<compile_context>
chip_gen: v7x
topology: tpu7x:2x2x1
jax: 0.10.0
libtpu: 0.0.40
codegen_flags: <defaults>
</compile_context>

<pallas_src>
import numpy as np
import jax
import jax.numpy as jnp
from jax.experimental import pallas as pl
from jax.experimental.pallas import tpu as pltpu

KH = KW = 7
PAD = 3
NCONV = 4


# ----------------------------- fused Pallas kernel --------------------------

def _make_fused_kernel(B, H, WC):
    """B: images per grid step; H: spatial rows; WC = W * C (multiple of 128)."""
    Hp = H + 2 * PAD

    def kernel(x1_ref, x2_ref, w_ref, b_ref, o_ref, xpa_ref, xpb_ref):
        # Zero only the PAD halo rows; interior rows are fully overwritten by
        # every conv.  Done every grid step (cheap) so it stays correct when
        # the parallel grid axis is split across TensorCores (each core owns
        # its own scratch).
        zhalo = jnp.zeros((B, PAD, WC), jnp.float32)
        xpa_ref[:, 0:PAD, :] = zhalo
        xpa_ref[:, PAD + H:Hp, :] = zhalo
        xpb_ref[:, 0:PAD, :] = zhalo
        xpb_ref[:, PAD + H:Hp, :] = zhalo

        def conv_pair(xa, xb, ia, ib):
            """Two independent convs (chain A, chain B) with interleaved kh
            iterations.  xa/xb: (B, H, WC) f32 values (never touch HBM)."""
            xpa_ref[:, PAD:PAD + H, :] = xa
            xpb_ref[:, PAD:PAD + H, :] = xb
            acc_a = None
            acc_b = None
            for kh in range(KH):
                # (B, H, WC) -> (B*H, WC): lane-dense, sublane-aligned merge.
                ra = xpa_ref[:, kh:kh + H, :].reshape(B * H, WC).astype(jnp.bfloat16)
                rb = xpb_ref[:, kh:kh + H, :].reshape(B * H, WC).astype(jnp.bfloat16)
                pa = jax.lax.dot_general(
                    ra, w_ref[ia, kh],
                    dimension_numbers=(((1,), (0,)), ((), ())),
                    preferred_element_type=jnp.float32)
                pb = jax.lax.dot_general(
                    rb, w_ref[ib, kh],
                    dimension_numbers=(((1,), (0,)), ((), ())),
                    preferred_element_type=jnp.float32)
                acc_a = pa if acc_a is None else acc_a + pa
                acc_b = pb if acc_b is None else acc_b + pb
            # Bias added at the end (not as the accumulator seed).
            ya = (acc_a + b_ref[ia]).reshape(B, H, WC)
            yb = (acc_b + b_ref[ib]).reshape(B, H, WC)
            return ya, yb

        v1, v2 = conv_pair(x1_ref[...], x2_ref[...], 0, 1)   # conv1 / conv2
        v3, v4 = conv_pair(v1, v2, 2, 3)                     # conv3 / conv4
        o_ref[...] = jnp.maximum(v3 + v4, 0.0)               # relu(v3 + v4)

    return kernel


# ------------------------------ JAX wrappers ---------------------------------

def _pick_batch_block(N, target=8):
    b = min(N, target)
    while N % b:
        b -= 1
    return b


def fused_forward_packed(x1p, x2p, w_rows, b_rows, *, batch_block=None):
    """x1p, x2p: (N, H, W*C) packed float32.  w_rows: (4, KH, WC, WC) bf16.
    b_rows: (4, 1, WC) f32.  Returns (N, H, W*C) f32."""
    N, H, WC = x1p.shape
    B = batch_block if batch_block is not None else _pick_batch_block(N)
    assert N % B == 0
    Hp = H + 2 * PAD
    kernel = _make_fused_kernel(B, H, WC)

    x_spec = pl.BlockSpec((B, H, WC), lambda n: (n, 0, 0))
    w_spec = pl.BlockSpec(tuple(w_rows.shape), lambda n: (0, 0, 0, 0))
    b_spec = pl.BlockSpec(tuple(b_rows.shape), lambda n: (0, 0, 0))

    return pl.pallas_call(
        kernel,
        out_shape=jax.ShapeDtypeStruct((N, H, WC), jnp.float32),
        grid=(N // B,),
        in_specs=[x_spec, x_spec, w_spec, b_spec],
        out_specs=pl.BlockSpec((B, H, WC), lambda n: (n, 0, 0)),
        scratch_shapes=[pltpu.VMEM((B, Hp, WC), jnp.float32),
                        pltpu.VMEM((B, Hp, WC), jnp.float32)],
        compiler_params=pltpu.CompilerParams(
            dimension_semantics=("parallel",),
            vmem_limit_bytes=32 * 1024 * 1024),
    )(x1p, x2p, w_rows, b_rows)


def model_forward(x1, x2, x3, x4, params):
    # x3 is unused by the PyTorch forward; x4 only feeds dead code (v6/v8).
    N, C, H, W = x1.shape

    def pack(x):  # NCHW -> lane-packed (N, H, W*C)
        return jnp.transpose(x, (0, 2, 3, 1)).reshape(N, H, W * C).astype(jnp.float32)

    outp = fused_forward_packed(pack(x1), pack(x2),
                                params["w_rows"], params["b_rows"])
    return outp.reshape(N, H, W, C).transpose(0, 3, 1, 2)


# --------------------------- parameter construction --------------------------

def make_dense_weight(key, cin, cout, groups):
    """Dense (KH, KW, Cin, Cout) weight equivalent to PyTorch
    Conv2d(cin, cout, 7, groups=groups); grouped convs -> block-diagonal."""
    cin_g = cin // groups
    cout_g = cout // groups
    fan_in = cin_g * KH * KW
    bound = 1.0 / float(np.sqrt(fan_in))
    w_torch = jax.random.uniform(key, (cout, cin_g, KH, KW),
                                 minval=-bound, maxval=bound, dtype=jnp.float32)
    w_np = np.asarray(w_torch)
    dense = np.zeros((KH, KW, cin, cout), np.float32)
    for g in range(groups):
        blk = np.transpose(w_np[g * cout_g:(g + 1) * cout_g],
                           (2, 3, 1, 0))          # (KH, KW, cin_g, cout_g)
        dense[:, :, g * cin_g:(g + 1) * cin_g,
              g * cout_g:(g + 1) * cout_g] = blk
    return jnp.asarray(dense), bound


def make_bias(key, cout, bound):
    return jax.random.uniform(key, (cout,), minval=-bound, maxval=bound,
                              dtype=jnp.float32)


def make_row_toeplitz(dense, W):
    """Fold kw taps + channel contraction + width zero-padding into a
    (KH, W*Cin, W*Cout) matrix:  out[h, w*Co+co] = sum_kh XP[h+kh] @ WR[kh]."""
    KH_, KW_, Cin, Cout = dense.shape
    d = np.asarray(dense)
    WR = np.zeros((KH_, W * Cin, W * Cout), np.float32)
    for kh in range(KH_):
        for w in range(W):
            for kw in range(KW_):
                u = w + kw - PAD
                if 0 <= u < W:
                    WR[kh, u * Cin:(u + 1) * Cin,
                       w * Cout:(w + 1) * Cout] = d[kh, kw]
    return jnp.asarray(WR)


def make_bias_row(bias, W):
    return jnp.tile(bias, W).reshape(1, W * bias.shape[0]).astype(jnp.float32)


# --------------------------------- reference ---------------------------------

def ref_conv(x_nchw, w_dense, bias):
    w_oihw = jnp.transpose(w_dense, (3, 2, 0, 1))
    y = jax.lax.conv_general_dilated(
        x_nchw, w_oihw, window_strides=(1, 1),
        padding=((PAD, PAD), (PAD, PAD)),
        dimension_numbers=("NCHW", "OIHW", "NCHW"))
    return y + bias.reshape(1, -1, 1, 1)


def ref_forward(x1, x2, x3, x4, p):
    v1 = ref_conv(x1, p["w1"], p["b1"])
    v2 = ref_conv(x2, p["w2"], p["b2"])
    v3 = ref_conv(v1, p["w3"], p["b3"])
    v4 = ref_conv(v2, p["w4"], p["b4"])
    return jnp.maximum(v3 + v4, 0.0)


# ----------------------------------- main -------------------------------------

if __name__ == "__main__":
    key = jax.random.PRNGKey(0)
    (kx1, kx2, kx3, kx4,
     k1, k2, k3, k4, kb1, kb2, kb3, kb4) = jax.random.split(key, 12)

    # Small shapes consistent with the module: 16 channels, 16x16 spatial.
    # Batch 16 lets the kernel block 8 images into the matmul M dimension
    # (M = 128) and still expose 2 parallel grid steps for v7x's two TCs.
    N, C, H, W = 16, 16, 16, 16
    x1 = jax.random.normal(kx1, (N, C, H, W), jnp.float32)
    x2 = jax.random.normal(kx2, (N, C, H, W), jnp.float32)
    x3 = jax.random.normal(kx3, (N, C, H, W), jnp.float32)
    x4 = jax.random.normal(kx4, (N, C, H, W), jnp.float32)

    w1d, bd1 = make_dense_weight(k1, C, C, groups=1)
    w2d, bd2 = make_dense_weight(k2, C, C, groups=8)
    w3d, bd3 = make_dense_weight(k3, C, C, groups=1)
    w4d, bd4 = make_dense_weight(k4, C, C, groups=8)
    b1 = make_bias(kb1, C, bd1)
    b2 = make_bias(kb2, C, bd2)
    b3 = make_bias(kb3, C, bd3)
    b4 = make_bias(kb4, C, bd4)

    # Kernel-layout parameters: bf16 row-Toeplitz weights, f32 bias rows.
    w_rows = jnp.stack([make_row_toeplitz(w1d, W), make_row_toeplitz(w2d, W),
                        make_row_toeplitz(w3d, W), make_row_toeplitz(w4d, W)]
                       ).astype(jnp.bfloat16)               # (4, KH, WC, WC)
    b_rows = jnp.stack([make_bias_row(b1, W), make_bias_row(b2, W),
                        make_bias_row(b3, W), make_bias_row(b4, W)])  # (4, 1, WC)

    params = {"w_rows": w_rows, "b_rows": b_rows}

    out = jax.block_until_ready(jax.jit(model_forward)(x1, x2, x3, x4, params))

    ref = jax.block_until_ready(
        ref_forward(x1, x2, x3, x4,
                    dict(w1=w1d, b1=b1, w2=w2d, b2=b2,
                         w3=w3d, b3=b3, w4=w4d, b4=b4)))

    assert out.shape == (N, C, H, W)
    err = float(jnp.max(jnp.abs(out - ref)))
    # bf16 weights/activations on the MXU with f32 accumulation is the
    # intentional numeric contract (per perf review); ~1e-2 abs error on O(1)
    # outputs is expected through two stacked 7x7 convs.
    assert err < 5e-2, f"mismatch vs f32 reference conv: {err}"
    print("KERNEL_OK")
</pallas_src>

<mosaic_0001>
module attributes {stable_mosaic.version = 11 : i64} {
  func.func @kernel(%arg0: i32, %arg1: memref<8x16x256xf32, #tpu.memory_space<vmem>>, %arg2: memref<8x16x256xf32, #tpu.memory_space<vmem>>, %arg3: memref<4x7x256x256xbf16, #tpu.memory_space<vmem>>, %arg4: memref<4x1x256xf32, #tpu.memory_space<vmem>>, %arg5: memref<8x16x256xf32, #tpu.memory_space<vmem>>, %arg6: memref<8x22x256xf32, #tpu.memory_space<vmem>>, %arg7: memref<8x22x256xf32, #tpu.memory_space<vmem>>) attributes {dimension_semantics = [#tpu.dimension_semantics<parallel>], iteration_bounds = array<i64: 2>, scalar_prefetch = 0 : i64, scratch_operands = 2 : i64, tpu.core_type = #tpu.core_type<tc>, window_params = [{transform_indices = @transform_0, window_bounds = array<i64: 8, 16, 256>}, {transform_indices = @transform_1, window_bounds = array<i64: 8, 16, 256>}, {pipeline_mode = #tpu.pipeline_mode<synchronous>, transform_indices = @transform_2, window_bounds = array<i64: 4, 7, 256, 256>}, {pipeline_mode = #tpu.pipeline_mode<synchronous>, transform_indices = @transform_3, window_bounds = array<i64: 4, 1, 256>}, {transform_indices = @transform_4, window_bounds = array<i64: 8, 16, 256>}]} {
    %cst = arith.constant 0.000000e+00 : f32
    %0 = vector.broadcast %cst : f32 to vector<8x3x256xf32>
    %c0 = arith.constant 0 : index
    %c0_0 = arith.constant 0 : index
    %c0_1 = arith.constant 0 : index
    %1 = vector.load %arg6[%c0, %c0_0, %c0_1] : memref<8x22x256xf32, #tpu.memory_space<vmem>>, vector<8x3x256xf32>
    tpu.vector_store %arg6[%c0, %c0_0, %c0_1], %0 {strides = array<i32>} : memref<8x22x256xf32, #tpu.memory_space<vmem>>, vector<8x3x256xf32>,
    %c0_2 = arith.constant 0 : index
    %c19 = arith.constant 19 : index
    %c0_3 = arith.constant 0 : index
    %2 = vector.load %arg6[%c0_2, %c19, %c0_3] : memref<8x22x256xf32, #tpu.memory_space<vmem>>, vector<8x3x256xf32>
    tpu.vector_store %arg6[%c0_2, %c19, %c0_3], %0 {strides = array<i32>} : memref<8x22x256xf32, #tpu.memory_space<vmem>>, vector<8x3x256xf32>,
    %c0_4 = arith.constant 0 : index
    %c0_5 = arith.constant 0 : index
    %c0_6 = arith.constant 0 : index
    %3 = vector.load %arg7[%c0_4, %c0_5, %c0_6] : memref<8x22x256xf32, #tpu.memory_space<vmem>>, vector<8x3x256xf32>
    tpu.vector_store %arg7[%c0_4, %c0_5, %c0_6], %0 {strides = array<i32>} : memref<8x22x256xf32, #tpu.memory_space<vmem>>, vector<8x3x256xf32>,
    %c0_7 = arith.constant 0 : index
    %c19_8 = arith.constant 19 : index
    %c0_9 = arith.constant 0 : index
    %4 = vector.load %arg7[%c0_7, %c19_8, %c0_9] : memref<8x22x256xf32, #tpu.memory_space<vmem>>, vector<8x3x256xf32>
    tpu.vector_store %arg7[%c0_7, %c19_8, %c0_9], %0 {strides = array<i32>} : memref<8x22x256xf32, #tpu.memory_space<vmem>>, vector<8x3x256xf32>,
    %c0_10 = arith.constant 0 : index
    %c0_11 = arith.constant 0 : index
    %c0_12 = arith.constant 0 : index
    %5 = vector.load %arg1[%c0_10, %c0_11, %c0_12] : memref<8x16x256xf32, #tpu.memory_space<vmem>>, vector<8x16x256xf32>
    %c0_13 = arith.constant 0 : index
    %c0_14 = arith.constant 0 : index
    %c0_15 = arith.constant 0 : index
    %6 = vector.load %arg2[%c0_13, %c0_14, %c0_15] : memref<8x16x256xf32, #tpu.memory_space<vmem>>, vector<8x16x256xf32>
    %c0_16 = arith.constant 0 : index
    %c3 = arith.constant 3 : index
    %c0_17 = arith.constant 0 : index
    %7 = vector.load %arg6[%c0_16, %c3, %c0_17] : memref<8x22x256xf32, #tpu.memory_space<vmem>>, vector<8x16x256xf32>
    tpu.vector_store %arg6[%c0_16, %c3, %c0_17], %5 {strides = array<i32>} : memref<8x22x256xf32, #tpu.memory_space<vmem>>, vector<8x16x256xf32>,
    %c0_18 = arith.constant 0 : index
    %c3_19 = arith.constant 3 : index
    %c0_20 = arith.constant 0 : index
    %8 = vector.load %arg7[%c0_18, %c3_19, %c0_20] : memref<8x22x256xf32, #tpu.memory_space<vmem>>, vector<8x16x256xf32>
    tpu.vector_store %arg7[%c0_18, %c3_19, %c0_20], %6 {strides = array<i32>} : memref<8x22x256xf32, #tpu.memory_space<vmem>>, vector<8x16x256xf32>,
    %c0_21 = arith.constant 0 : index
    %c0_22 = arith.constant 0 : index
    %c0_23 = arith.constant 0 : index
    %9 = vector.load %arg6[%c0_21, %c0_22, %c0_23] : memref<8x22x256xf32, #tpu.memory_space<vmem>>, vector<8x16x256xf32>
    %10 = vector.shape_cast %9 : vector<8x16x256xf32> to vector<128x256xf32>
    %11 = arith.truncf %10 : vector<128x256xf32> to vector<128x256xbf16>
    %c0_24 = arith.constant 0 : index
    %c0_25 = arith.constant 0 : index
    %c0_26 = arith.constant 0 : index
    %12 = vector.load %arg7[%c0_24, %c0_25, %c0_26] : memref<8x22x256xf32, #tpu.memory_space<vmem>>, vector<8x16x256xf32>
    %13 = vector.shape_cast %12 : vector<8x16x256xf32> to vector<128x256xf32>
    %14 = arith.truncf %13 : vector<128x256xf32> to vector<128x256xbf16>
    %c0_27 = arith.constant 0 : index
    %c0_28 = arith.constant 0 : index
    %c0_29 = arith.constant 0 : index
    %c0_30 = arith.constant 0 : index
    %15 = vector.load %arg3[%c0_27, %c0_28, %c0_29, %c0_30] : memref<4x7x256x256xbf16, #tpu.memory_space<vmem>>, vector<1x1x256x256xbf16>
    %16 = vector.shape_cast %15 : vector<1x1x256x256xbf16> to vector<256x256xbf16>
    %cst_31 = arith.constant dense<0.000000e+00> : vector<128x256xf32>
    %17 = tpu.matmul %11, %16, %cst_31 {dimension_numbers = #tpu.dot_dimension_numbers<[1], [0], [0], [1], [0, 0, 1, 1], [], []>} : vector<128x256xbf16>, vector<256x256xbf16>, vector<128x256xf32> -> vector<128x256xf32>
    %c1 = arith.constant 1 : index
    %c0_32 = arith.constant 0 : index
    %c0_33 = arith.constant 0 : index
    %c0_34 = arith.constant 0 : index
    %18 = vector.load %arg3[%c1, %c0_32, %c0_33, %c0_34] : memref<4x7x256x256xbf16, #tpu.memory_space<vmem>>, vector<1x1x256x256xbf16>
    %19 = vector.shape_cast %18 : vector<1x1x256x256xbf16> to vector<256x256xbf16>
    %cst_35 = arith.constant dense<0.000000e+00> : vector<128x256xf32>
    %20 = tpu.matmul %14, %19, %cst_35 {dimension_numbers = #tpu.dot_dimension_numbers<[1], [0], [0], [1], [0, 0, 1, 1], [], []>} : vector<128x256xbf16>, vector<256x256xbf16>, vector<128x256xf32> -> vector<128x256xf32>
    %c0_36 = arith.constant 0 : index
    %c1_37 = arith.constant 1 : index
    %c0_38 = arith.constant 0 : index
    %21 = vector.load %arg6[%c0_36, %c1_37, %c0_38] : memref<8x22x256xf32, #tpu.memory_space<vmem>>, vector<8x16x256xf32>
    %22 = vector.shape_cast %21 : vector<8x16x256xf32> to vector<128x256xf32>
    %23 = arith.truncf %22 : vector<128x256xf32> to vector<128x256xbf16>
    %c0_39 = arith.constant 0 : index
    %c1_40 = arith.constant 1 : index
    %c0_41 = arith.constant 0 : index
    %24 = vector.load %arg7[%c0_39, %c1_40, %c0_41] : memref<8x22x256xf32, #tpu.memory_space<vmem>>, vector<8x16x256xf32>
    %25 = vector.shape_cast %24 : vector<8x16x256xf32> to vector<128x256xf32>
    %26 = arith.truncf %25 : vector<128x256xf32> to vector<128x256xbf16>
    %c0_42 = arith.constant 0 : index
    %c1_43 = arith.constant 1 : index
    %c0_44 = arith.constant 0 : index
    %c0_45 = arith.constant 0 : index
    %27 = vector.load %arg3[%c0_42, %c1_43, %c0_44, %c0_45] : memref<4x7x256x256xbf16, #tpu.memory_space<vmem>>, vector<1x1x256x256xbf16>
    %28 = vector.shape_cast %27 : vector<1x1x256x256xbf16> to vector<256x256xbf16>
    %cst_46 = arith.constant dense<0.000000e+00> : vector<128x256xf32>
    %29 = tpu.matmul %23, %28, %cst_46 {dimension_numbers = #tpu.dot_dimension_numbers<[1], [0], [0], [1], [0, 0, 1, 1], [], []>} : vector<128x256xbf16>, vector<256x256xbf16>, vector<128x256xf32> -> vector<128x256xf32>
    %c1_47 = arith.constant 1 : index
    %c1_48 = arith.constant 1 : index
    %c0_49 = arith.constant 0 : index
    %c0_50 = arith.constant 0 : index
    %30 = vector.load %arg3[%c1_47, %c1_48, %c0_49, %c0_50] : memref<4x7x256x256xbf16, #tpu.memory_space<vmem>>, vector<1x1x256x256xbf16>
    %31 = vector.shape_cast %30 : vector<1x1x256x256xbf16> to vector<256x256xbf16>
    %cst_51 = arith.constant dense<0.000000e+00> : vector<128x256xf32>
    %32 = tpu.matmul %26, %31, %cst_51 {dimension_numbers = #tpu.dot_dimension_numbers<[1], [0], [0], [1], [0, 0, 1, 1], [], []>} : vector<128x256xbf16>, vector<256x256xbf16>, vector<128x256xf32> -> vector<128x256xf32>
    %33 = arith.addf %17, %29 : vector<128x256xf32>
    %34 = arith.addf %20, %32 : vector<128x256xf32>
    %c0_52 = arith.constant 0 : index
    %c2 = arith.constant 2 : index
    %c0_53 = arith.constant 0 : index
    %35 = vector.load %arg6[%c0_52, %c2, %c0_53] : memref<8x22x256xf32, #tpu.memory_space<vmem>>, vector<8x16x256xf32>
    %36 = vector.shape_cast %35 : vector<8x16x256xf32> to vector<128x256xf32>
    %37 = arith.truncf %36 : vector<128x256xf32> to vector<128x256xbf16>
    %c0_54 = arith.constant 0 : index
    %c2_55 = arith.constant 2 : index
    %c0_56 = arith.constant 0 : index
    %38 = vector.load %arg7[%c0_54, %c2_55, %c0_56] : memref<8x22x256xf32, #tpu.memory_space<vmem>>, vector<8x16x256xf32>
    %39 = vector.shape_cast %38 : vector<8x16x256xf32> to vector<128x256xf32>
    %40 = arith.truncf %39 : vector<128x256xf32> to vector<128x256xbf16>
    %c0_57 = arith.constant 0 : index
    %c2_58 = arith.constant 2 : index
    %c0_59 = arith.constant 0 : index
    %c0_60 = arith.constant 0 : index
    %41 = vector.load %arg3[%c0_57, %c2_58, %c0_59, %c0_60] : memref<4x7x256x256xbf16, #tpu.memory_space<vmem>>, vector<1x1x256x256xbf16>
    %42 = vector.shape_cast %41 : vector<1x1x256x256xbf16> to vector<256x256xbf16>
    %cst_61 = arith.constant dense<0.000000e+00> : vector<128x256xf32>
    %43 = tpu.matmul %37, %42, %cst_61 {dimension_numbers = #tpu.dot_dimension_numbers<[1], [0], [0], [1], [0, 0, 1, 1], [], []>} : vector<128x256xbf16>, vector<256x256xbf16>, vector<128x256xf32> -> vector<128x256xf32>
    %c1_62 = arith.constant 1 : index
    %c2_63 = arith.constant 2 : index
    %c0_64 = arith.constant 0 : index
    %c0_65 = arith.constant 0 : index
    %44 = vector.load %arg3[%c1_62, %c2_63, %c0_64, %c0_65] : memref<4x7x256x256xbf16, #tpu.memory_space<vmem>>, vector<1x1x256x256xbf16>
    %45 = vector.shape_cast %44 : vector<1x1x256x256xbf16> to vector<256x256xbf16>
    %cst_66 = arith.constant dense<0.000000e+00> : vector<128x256xf32>
    %46 = tpu.matmul %40, %45, %cst_66 {dimension_numbers = #tpu.dot_dimension_numbers<[1], [0], [0], [1], [0, 0, 1, 1], [], []>} : vector<128x256xbf16>, vector<256x256xbf16>, vector<128x256xf32> -> vector<128x256xf32>
    %47 = arith.addf %33, %43 : vector<128x256xf32>
    %48 = arith.addf %34, %46 : vector<128x256xf32>
    %c0_67 = arith.constant 0 : index
    %c3_68 = arith.constant 3 : index
    %c0_69 = arith.constant 0 : index
    %49 = vector.load %arg6[%c0_67, %c3_68, %c0_69] : memref<8x22x256xf32, #tpu.memory_space<vmem>>, vector<8x16x256xf32>
    %50 = vector.shape_cast %49 : vector<8x16x256xf32> to vector<128x256xf32>
    %51 = arith.truncf %50 : vector<128x256xf32> to vector<128x256xbf16>
    %c0_70 = arith.constant 0 : index
    %c3_71 = arith.constant 3 : index
    %c0_72 = arith.constant 0 : index
    %52 = vector.load %arg7[%c0_70, %c3_71, %c0_72] : memref<8x22x256xf32, #tpu.memory_space<vmem>>, vector<8x16x256xf32>
    %53 = vector.shape_cast %52 : vector<8x16x256xf32> to vector<128x256xf32>
    %54 = arith.truncf %53 : vector<128x256xf32> to vector<128x256xbf16>
    %c0_73 = arith.constant 0 : index
    %c3_74 = arith.constant 3 : index
    %c0_75 = arith.constant 0 : index
    %c0_76 = arith.constant 0 : index
    %55 = vector.load %arg3[%c0_73, %c3_74, %c0_75, %c0_76] : memref<4x7x256x256xbf16, #tpu.memory_space<vmem>>, vector<1x1x256x256xbf16>
    %56 = vector.shape_cast %55 : vector<1x1x256x256xbf16> to vector<256x256xbf16>
    %cst_77 = arith.constant dense<0.000000e+00> : vector<128x256xf32>
    %57 = tpu.matmul %51, %56, %cst_77 {dimension_numbers = #tpu.dot_dimension_numbers<[1], [0], [0], [1], [0, 0, 1, 1], [], []>} : vector<128x256xbf16>, vector<256x256xbf16>, vector<128x256xf32> -> vector<128x256xf32>
    %c1_78 = arith.constant 1 : index
    %c3_79 = arith.constant 3 : index
    %c0_80 = arith.constant 0 : index
    %c0_81 = arith.constant 0 : index
    %58 = vector.load %arg3[%c1_78, %c3_79, %c0_80, %c0_81] : memref<4x7x256x256xbf16, #tpu.memory_space<vmem>>, vector<1x1x256x256xbf16>
    %59 = vector.shape_cast %58 : vector<1x1x256x256xbf16> to vector<256x256xbf16>
    %cst_82 = arith.constant dense<0.000000e+00> : vector<128x256xf32>
    %60 = tpu.matmul %54, %59, %cst_82 {dimension_numbers = #tpu.dot_dimension_numbers<[1], [0], [0], [1], [0, 0, 1, 1], [], []>} : vector<128x256xbf16>, vector<256x256xbf16>, vector<128x256xf32> -> vector<128x256xf32>
    %61 = arith.addf %47, %57 : vector<128x256xf32>
    %62 = arith.addf %48, %60 : vector<128x256xf32>
    %c0_83 = arith.constant 0 : index
    %c4 = arith.constant 4 : index
    %c0_84 = arith.constant 0 : index
    %63 = vector.load %arg6[%c0_83, %c4, %c0_84] : memref<8x22x256xf32, #tpu.memory_space<vmem>>, vector<8x16x256xf32>
    %64 = vector.shape_cast %63 : vector<8x16x256xf32> to vector<128x256xf32>
    %65 = arith.truncf %64 : vector<128x256xf32> to vector<128x256xbf16>
    %c0_85 = arith.constant 0 : index
    %c4_86 = arith.constant 4 : index
    %c0_87 = arith.constant 0 : index
    %66 = vector.load %arg7[%c0_85, %c4_86, %c0_87] : memref<8x22x256xf32, #tpu.memory_space<vmem>>, vector<8x16x256xf32>
    %67 = vector.shape_cast %66 : vector<8x16x256xf32> to vector<128x256xf32>
    %68 = arith.truncf %67 : vector<128x256xf32> to vector<128x256xbf16>
    %c0_88 = arith.constant 0 : index
    %c4_89 = arith.constant 4 : index
    %c0_90 = arith.constant 0 : index
    %c0_91 = arith.constant 0 : index
    %69 = vector.load %arg3[%c0_88, %c4_89, %c0_90, %c0_91] : memref<4x7x256x256xbf16, #tpu.memory_space<vmem>>, vector<1x1x256x256xbf16>
    %70 = vector.shape_cast %69 : vector<1x1x256x256xbf16> to vector<256x256xbf16>
    %cst_92 = arith.constant dense<0.000000e+00> : vector<128x256xf32>
    %71 = tpu.matmul %65, %70, %cst_92 {dimension_numbers = #tpu.dot_dimension_numbers<[1], [0], [0], [1], [0, 0, 1, 1], [], []>} : vector<128x256xbf16>, vector<256x256xbf16>, vector<128x256xf32> -> vector<128x256xf32>
    %c1_93 = arith.constant 1 : index
    %c4_94 = arith.constant 4 : index
    %c0_95 = arith.constant 0 : index
    %c0_96 = arith.constant 0 : index
    %72 = vector.load %arg3[%c1_93, %c4_94, %c0_95, %c0_96] : memref<4x7x256x256xbf16, #tpu.memory_space<vmem>>, vector<1x1x256x256xbf16>
    %73 = vector.shape_cast %72 : vector<1x1x256x256xbf16> to vector<256x256xbf16>
    %cst_97 = arith.constant dense<0.000000e+00> : vector<128x256xf32>
    %74 = tpu.matmul %68, %73, %cst_97 {dimension_numbers = #tpu.dot_dimension_numbers<[1], [0], [0], [1], [0, 0, 1, 1], [], []>} : vector<128x256xbf16>, vector<256x256xbf16>, vector<128x256xf32> -> vector<128x256xf32>
    %75 = arith.addf %61, %71 : vector<128x256xf32>
    %76 = arith.addf %62, %74 : vector<128x256xf32>
    %c0_98 = arith.constant 0 : index
    %c5 = arith.constant 5 : index
    %c0_99 = arith.constant 0 : index
    %77 = vector.load %arg6[%c0_98, %c5, %c0_99] : memref<8x22x256xf32, #tpu.memory_space<vmem>>, vector<8x16x256xf32>
    %78 = vector.shape_cast %77 : vector<8x16x256xf32> to vector<128x256xf32>
    %79 = arith.truncf %78 : vector<128x256xf32> to vector<128x256xbf16>
    %c0_100 = arith.constant 0 : index
    %c5_101 = arith.constant 5 : index
    %c0_102 = arith.constant 0 : index
    %80 = vector.load %arg7[%c0_100, %c5_101, %c0_102] : memref<8x22x256xf32, #tpu.memory_space<vmem>>, vector<8x16x256xf32>
    %81 = vector.shape_cast %80 : vector<8x16x256xf32> to vector<128x256xf32>
    %82 = arith.truncf %81 : vector<128x256xf32> to vector<128x256xbf16>
    %c0_103 = arith.constant 0 : index
    %c5_104 = arith.constant 5 : index
    %c0_105 = arith.constant 0 : index
    %c0_106 = arith.constant 0 : index
    %83 = vector.load %arg3[%c0_103, %c5_104, %c0_105, %c0_106] : memref<4x7x256x256xbf16, #tpu.memory_space<vmem>>, vector<1x1x256x256xbf16>
    %84 = vector.shape_cast %83 : vector<1x1x256x256xbf16> to vector<256x256xbf16>
    %cst_107 = arith.constant dense<0.000000e+00> : vector<128x256xf32>
    %85 = tpu.matmul %79, %84, %cst_107 {dimension_numbers = #tpu.dot_dimension_numbers<[1], [0], [0], [1], [0, 0, 1, 1], [], []>} : vector<128x256xbf16>, vector<256x256xbf16>, vector<128x256xf32> -> vector<128x256xf32>
    %c1_108 = arith.constant 1 : index
    %c5_109 = arith.constant 5 : index
    %c0_110 = arith.constant 0 : index
    %c0_111 = arith.constant 0 : index
    %86 = vector.load %arg3[%c1_108, %c5_109, %c0_110, %c0_111] : memref<4x7x256x256xbf16, #tpu.memory_space<vmem>>, vector<1x1x256x256xbf16>
    %87 = vector.shape_cast %86 : vector<1x1x256x256xbf16> to vector<256x256xbf16>
    %cst_112 = arith.constant dense<0.000000e+00> : vector<128x256xf32>
    %88 = tpu.matmul %82, %87, %cst_112 {dimension_numbers = #tpu.dot_dimension_numbers<[1], [0], [0], [1], [0, 0, 1, 1], [], []>} : vector<128x256xbf16>, vector<256x256xbf16>, vector<128x256xf32> -> vector<128x256xf32>
    %89 = arith.addf %75, %85 : vector<128x256xf32>
    %90 = arith.addf %76, %88 : vector<128x256xf32>
    %c0_113 = arith.constant 0 : index
    %c6 = arith.constant 6 : index
    %c0_114 = arith.constant 0 : index
    %91 = vector.load %arg6[%c0_113, %c6, %c0_114] : memref<8x22x256xf32, #tpu.memory_space<vmem>>, vector<8x16x256xf32>
    %92 = vector.shape_cast %91 : vector<8x16x256xf32> to vector<128x256xf32>
    %93 = arith.truncf %92 : vector<128x256xf32> to vector<128x256xbf16>
    %c0_115 = arith.constant 0 : index
    %c6_116 = arith.constant 6 : index
    %c0_117 = arith.constant 0 : index
    %94 = vector.load %arg7[%c0_115, %c6_116, %c0_117] : memref<8x22x256xf32, #tpu.memory_space<vmem>>, vector<8x16x256xf32>
    %95 = vector.shape_cast %94 : vector<8x16x256xf32> to vector<128x256xf32>
    %96 = arith.truncf %95 : vector<128x256xf32> to vector<128x256xbf16>
    %c0_118 = arith.constant 0 : index
    %c6_119 = arith.constant 6 : index
    %c0_120 = arith.constant 0 : index
    %c0_121 = arith.constant 0 : index
    %97 = vector.load %arg3[%c0_118, %c6_119, %c0_120, %c0_121] : memref<4x7x256x256xbf16, #tpu.memory_space<vmem>>, vector<1x1x256x256xbf16>
    %98 = vector.shape_cast %97 : vector<1x1x256x256xbf16> to vector<256x256xbf16>
    %cst_122 = arith.constant dense<0.000000e+00> : vector<128x256xf32>
    %99 = tpu.matmul %93, %98, %cst_122 {dimension_numbers = #tpu.dot_dimension_numbers<[1], [0], [0], [1], [0, 0, 1, 1], [], []>} : vector<128x256xbf16>, vector<256x256xbf16>, vector<128x256xf32> -> vector<128x256xf32>
    %c1_123 = arith.constant 1 : index
    %c6_124 = arith.constant 6 : index
    %c0_125 = arith.constant 0 : index
    %c0_126 = arith.constant 0 : index
    %100 = vector.load %arg3[%c1_123, %c6_124, %c0_125, %c0_126] : memref<4x7x256x256xbf16, #tpu.memory_space<vmem>>, vector<1x1x256x256xbf16>
    %101 = vector.shape_cast %100 : vector<1x1x256x256xbf16> to vector<256x256xbf16>
    %cst_127 = arith.constant dense<0.000000e+00> : vector<128x256xf32>
    %102 = tpu.matmul %96, %101, %cst_127 {dimension_numbers = #tpu.dot_dimension_numbers<[1], [0], [0], [1], [0, 0, 1, 1], [], []>} : vector<128x256xbf16>, vector<256x256xbf16>, vector<128x256xf32> -> vector<128x256xf32>
    %103 = arith.addf %89, %99 : vector<128x256xf32>
    %104 = arith.addf %90, %102 : vector<128x256xf32>
    %c0_128 = arith.constant 0 : index
    %c0_129 = arith.constant 0 : index
    %c0_130 = arith.constant 0 : index
    %105 = vector.load %arg4[%c0_128, %c0_129, %c0_130] : memref<4x1x256xf32, #tpu.memory_space<vmem>>, vector<1x1x256xf32>
    %106 = vector.shape_cast %105 : vector<1x1x256xf32> to vector<1x256xf32>
    %107 = vector.broadcast %106 : vector<1x256xf32> to vector<128x256xf32>
    %108 = arith.addf %103, %107 : vector<128x256xf32>
    %109 = vector.shape_cast %108 : vector<128x256xf32> to vector<8x16x256xf32>
    %c1_131 = arith.constant 1 : index
    %c0_132 = arith.constant 0 : index
    %c0_133 = arith.constant 0 : index
    %110 = vector.load %arg4[%c1_131, %c0_132, %c0_133] : memref<4x1x256xf32, #tpu.memory_space<vmem>>, vector<1x1x256xf32>
    %111 = vector.shape_cast %110 : vector<1x1x256xf32> to vector<1x256xf32>
    %112 = vector.broadcast %111 : vector<1x256xf32> to vector<128x256xf32>
    %113 = arith.addf %104, %112 : vector<128x256xf32>
    %114 = vector.shape_cast %113 : vector<128x256xf32> to vector<8x16x256xf32>
    %c0_134 = arith.constant 0 : index
    %c3_135 = arith.constant 3 : index
    %c0_136 = arith.constant 0 : index
    %115 = vector.load %arg6[%c0_134, %c3_135, %c0_136] : memref<8x22x256xf32, #tpu.memory_space<vmem>>, vector<8x16x256xf32>
    tpu.vector_store %arg6[%c0_134, %c3_135, %c0_136], %109 {strides = array<i32>} : memref<8x22x256xf32, #tpu.memory_space<vmem>>, vector<8x16x256xf32>,
    %c0_137 = arith.constant 0 : index
    %c3_138 = arith.constant 3 : index
    %c0_139 = arith.constant 0 : index
    %116 = vector.load %arg7[%c0_137, %c3_138, %c0_139] : memref<8x22x256xf32, #tpu.memory_space<vmem>>, vector<8x16x256xf32>
    tpu.vector_store %arg7[%c0_137, %c3_138, %c0_139], %114 {strides = array<i32>} : memref<8x22x256xf32, #tpu.memory_space<vmem>>, vector<8x16x256xf32>,
    %c0_140 = arith.constant 0 : index
    %c0_141 = arith.constant 0 : index
    %c0_142 = arith.constant 0 : index
    %117 = vector.load %arg6[%c0_140, %c0_141, %c0_142] : memref<8x22x256xf32, #tpu.memory_space<vmem>>, vector<8x16x256xf32>
    %118 = vector.shape_cast %117 : vector<8x16x256xf32> to vector<128x256xf32>
    %119 = arith.truncf %118 : vector<128x256xf32> to vector<128x256xbf16>
    %c0_143 = arith.constant 0 : index
    %c0_144 = arith.constant 0 : index
    %c0_145 = arith.constant 0 : index
    %120 = vector.load %arg7[%c0_143, %c0_144, %c0_145] : memref<8x22x256xf32, #tpu.memory_space<vmem>>, vector<8x16x256xf32>
    %121 = vector.shape_cast %120 : vector<8x16x256xf32> to vector<128x256xf32>
    %122 = arith.truncf %121 : vector<128x256xf32> to vector<128x256xbf16>
    %c2_146 = arith.constant 2 : index
    %c0_147 = arith.constant 0 : index
    %c0_148 = arith.constant 0 : index
    %c0_149 = arith.constant 0 : index
    %123 = vector.load %arg3[%c2_146, %c0_147, %c0_148, %c0_149] : memref<4x7x256x256xbf16, #tpu.memory_space<vmem>>, vector<1x1x256x256xbf16>
    %124 = vector.shape_cast %123 : vector<1x1x256x256xbf16> to vector<256x256xbf16>
    %cst_150 = arith.constant dense<0.000000e+00> : vector<128x256xf32>
    %125 = tpu.matmul %119, %124, %cst_150 {dimension_numbers = #tpu.dot_dimension_numbers<[1], [0], [0], [1], [0, 0, 1, 1], [], []>} : vector<128x256xbf16>, vector<256x256xbf16>, vector<128x256xf32> -> vector<128x256xf32>
    %c3_151 = arith.constant 3 : index
    %c0_152 = arith.constant 0 : index
    %c0_153 = arith.constant 0 : index
    %c0_154 = arith.constant 0 : index
    %126 = vector.load %arg3[%c3_151, %c0_152, %c0_153, %c0_154] : memref<4x7x256x256xbf16, #tpu.memory_space<vmem>>, vector<1x1x256x256xbf16>
    %127 = vector.shape_cast %126 : vector<1x1x256x256xbf16> to vector<256x256xbf16>
    %cst_155 = arith.constant dense<0.000000e+00> : vector<128x256xf32>
    %128 = tpu.matmul %122, %127, %cst_155 {dimension_numbers = #tpu.dot_dimension_numbers<[1], [0], [0], [1], [0, 0, 1, 1], [], []>} : vector<128x256xbf16>, vector<256x256xbf16>, vector<128x256xf32> -> vector<128x256xf32>
    %c0_156 = arith.constant 0 : index
    %c1_157 = arith.constant 1 : index
    %c0_158 = arith.constant 0 : index
    %129 = vector.load %arg6[%c0_156, %c1_157, %c0_158] : memref<8x22x256xf32, #tpu.memory_space<vmem>>, vector<8x16x256xf32>
    %130 = vector.shape_cast %129 : vector<8x16x256xf32> to vector<128x256xf32>
    %131 = arith.truncf %130 : vector<128x256xf32> to vector<128x256xbf16>
    %c0_159 = arith.constant 0 : index
    %c1_160 = arith.constant 1 : index
    %c0_161 = arith.constant 0 : index
    %132 = vector.load %arg7[%c0_159, %c1_160, %c0_161] : memref<8x22x256xf32, #tpu.memory_space<vmem>>, vector<8x16x256xf32>
    %133 = vector.shape_cast %132 : vector<8x16x256xf32> to vector<128x256xf32>
    %134 = arith.truncf %133 : vector<128x256xf32> to vector<128x256xbf16>
    %c2_162 = arith.constant 2 : index
    %c1_163 = arith.constant 1 : index
    %c0_164 = arith.constant 0 : index
    %c0_165 = arith.constant 0 : index
    %135 = vector.load %arg3[%c2_162, %c1_163, %c0_164, %c0_165] : memref<4x7x256x256xbf16, #tpu.memory_space<vmem>>, vector<1x1x256x256xbf16>
    %136 = vector.shape_cast %135 : vector<1x1x256x256xbf16> to vector<256x256xbf16>
    %cst_166 = arith.constant dense<0.000000e+00> : vector<128x256xf32>
    %137 = tpu.matmul %131, %136, %cst_166 {dimension_numbers = #tpu.dot_dimension_numbers<[1], [0], [0], [1], [0, 0, 1, 1], [], []>} : vector<128x256xbf16>, vector<256x256xbf16>, vector<128x256xf32> -> vector<128x256xf32>
    %c3_167 = arith.constant 3 : index
    %c1_168 = arith.constant 1 : index
    %c0_169 = arith.constant 0 : index
    %c0_170 = arith.constant 0 : index
    %138 = vector.load %arg3[%c3_167, %c1_168, %c0_169, %c0_170] : memref<4x7x256x256xbf16, #tpu.memory_space<vmem>>, vector<1x1x256x256xbf16>
    %139 = vector.shape_cast %138 : vector<1x1x256x256xbf16> to vector<256x256xbf16>
    %cst_171 = arith.constant dense<0.000000e+00> : vector<128x256xf32>
    %140 = tpu.matmul %134, %139, %cst_171 {dimension_numbers = #tpu.dot_dimension_numbers<[1], [0], [0], [1], [0, 0, 1, 1], [], []>} : vector<128x256xbf16>, vector<256x256xbf16>, vector<128x256xf32> -> vector<128x256xf32>
    %141 = arith.addf %125, %137 : vector<128x256xf32>
    %142 = arith.addf %128, %140 : vector<128x256xf32>
    %c0_172 = arith.constant 0 : index
    %c2_173 = arith.constant 2 : index
    %c0_174 = arith.constant 0 : index
    %143 = vector.load %arg6[%c0_172, %c2_173, %c0_174] : memref<8x22x256xf32, #tpu.memory_space<vmem>>, vector<8x16x256xf32>
    %144 = vector.shape_cast %143 : vector<8x16x256xf32> to vector<128x256xf32>
    %145 = arith.truncf %144 : vector<128x256xf32> to vector<128x256xbf16>
    %c0_175 = arith.constant 0 : index
    %c2_176 = arith.constant 2 : index
    %c0_177 = arith.constant 0 : index
    %146 = vector.load %arg7[%c0_175, %c2_176, %c0_177] : memref<8x22x256xf32, #tpu.memory_space<vmem>>, vector<8x16x256xf32>
    %147 = vector.shape_cast %146 : vector<8x16x256xf32> to vector<128x256xf32>
    %148 = arith.truncf %147 : vector<128x256xf32> to vector<128x256xbf16>
    %c2_178 = arith.constant 2 : index
    %c2_179 = arith.constant 2 : index
    %c0_180 = arith.constant 0 : index
    %c0_181 = arith.constant 0 : index
    %149 = vector.load %arg3[%c2_178, %c2_179, %c0_180, %c0_181] : memref<4x7x256x256xbf16, #tpu.memory_space<vmem>>, vector<1x1x256x256xbf16>
    %150 = vector.shape_cast %149 : vector<1x1x256x256xbf16> to vector<256x256xbf16>
    %cst_182 = arith.constant dense<0.000000e+00> : vector<128x256xf32>
    %151 = tpu.matmul %145, %150, %cst_182 {dimension_numbers = #tpu.dot_dimension_numbers<[1], [0], [0], [1], [0, 0, 1, 1], [], []>} : vector<128x256xbf16>, vector<256x256xbf16>, vector<128x256xf32> -> vector<128x256xf32>
    %c3_183 = arith.constant 3 : index
    %c2_184 = arith.constant 2 : index
    %c0_185 = arith.constant 0 : index
    %c0_186 = arith.constant 0 : index
    %152 = vector.load %arg3[%c3_183, %c2_184, %c0_185, %c0_186] : memref<4x7x256x256xbf16, #tpu.memory_space<vmem>>, vector<1x1x256x256xbf16>
    %153 = vector.shape_cast %152 : vector<1x1x256x256xbf16> to vector<256x256xbf16>
    %cst_187 = arith.constant dense<0.000000e+00> : vector<128x256xf32>
    %154 = tpu.matmul %148, %153, %cst_187 {dimension_numbers = #tpu.dot_dimension_numbers<[1], [0], [0], [1], [0, 0, 1, 1], [], []>} : vector<128x256xbf16>, vector<256x256xbf16>, vector<128x256xf32> -> vector<128x256xf32>
    %155 = arith.addf %141, %151 : vector<128x256xf32>
    %156 = arith.addf %142, %154 : vector<128x256xf32>
    %c0_188 = arith.constant 0 : index
    %c3_189 = arith.constant 3 : index
    %c0_190 = arith.constant 0 : index
    %157 = vector.load %arg6[%c0_188, %c3_189, %c0_190] : memref<8x22x256xf32, #tpu.memory_space<vmem>>, vector<8x16x256xf32>
    %158 = vector.shape_cast %157 : vector<8x16x256xf32> to vector<128x256xf32>
    %159 = arith.truncf %158 : vector<128x256xf32> to vector<128x256xbf16>
    %c0_191 = arith.constant 0 : index
    %c3_192 = arith.constant 3 : index
    %c0_193 = arith.constant 0 : index
    %160 = vector.load %arg7[%c0_191, %c3_192, %c0_193] : memref<8x22x256xf32, #tpu.memory_space<vmem>>, vector<8x16x256xf32>
    %161 = vector.shape_cast %160 : vector<8x16x256xf32> to vector<128x256xf32>
    %162 = arith.truncf %161 : vector<128x256xf32> to vector<128x256xbf16>
    %c2_194 = arith.constant 2 : index
    %c3_195 = arith.constant 3 : index
    %c0_196 = arith.constant 0 : index
    %c0_197 = arith.constant 0 : index
    %163 = vector.load %arg3[%c2_194, %c3_195, %c0_196, %c0_197] : memref<4x7x256x256xbf16, #tpu.memory_space<vmem>>, vector<1x1x256x256xbf16>
    %164 = vector.shape_cast %163 : vector<1x1x256x256xbf16> to vector<256x256xbf16>
    %cst_198 = arith.constant dense<0.000000e+00> : vector<128x256xf32>
    %165 = tpu.matmul %159, %164, %cst_198 {dimension_numbers = #tpu.dot_dimension_numbers<[1], [0], [0], [1], [0, 0, 1, 1], [], []>} : vector<128x256xbf16>, vector<256x256xbf16>, vector<128x256xf32> -> vector<128x256xf32>
    %c3_199 = arith.constant 3 : index
    %c3_200 = arith.constant 3 : index
    %c0_201 = arith.constant 0 : index
    %c0_202 = arith.constant 0 : index
    %166 = vector.load %arg3[%c3_199, %c3_200, %c0_201, %c0_202] : memref<4x7x256x256xbf16, #tpu.memory_space<vmem>>, vector<1x1x256x256xbf16>
    %167 = vector.shape_cast %166 : vector<1x1x256x256xbf16> to vector<256x256xbf16>
    %cst_203 = arith.constant dense<0.000000e+00> : vector<128x256xf32>
    %168 = tpu.matmul %162, %167, %cst_203 {dimension_numbers = #tpu.dot_dimension_numbers<[1], [0], [0], [1], [0, 0, 1, 1], [], []>} : vector<128x256xbf16>, vector<256x256xbf16>, vector<128x256xf32> -> vector<128x256xf32>
    %169 = arith.addf %155, %165 : vector<128x256xf32>
    %170 = arith.addf %156, %168 : vector<128x256xf32>
    %c0_204 = arith.constant 0 : index
    %c4_205 = arith.constant 4 : index
    %c0_206 = arith.constant 0 : index
    %171 = vector.load %arg6[%c0_204, %c4_205, %c0_206] : memref<8x22x256xf32, #tpu.memory_space<vmem>>, vector<8x16x256xf32>
    %172 = vector.shape_cast %171 : vector<8x16x256xf32> to vector<128x256xf32>
    %173 = arith.truncf %172 : vector<128x256xf32> to vector<128x256xbf16>
    %c0_207 = arith.constant 0 : index
    %c4_208 = arith.constant 4 : index
    %c0_209 = arith.constant 0 : index
    %174 = vector.load %arg7[%c0_207, %c4_208, %c0_209] : memref<8x22x256xf32, #tpu.memory_space<vmem>>, vector<8x16x256xf32>
    %175 = vector.shape_cast %174 : vector<8x16x256xf32> to vector<128x256xf32>
    %176 = arith.truncf %175 : vector<128x256xf32> to vector<128x256xbf16>
    %c2_210 = arith.constant 2 : index
    %c4_211 = arith.constant 4 : index
    %c0_212 = arith.constant 0 : index
    %c0_213 = arith.constant 0 : index
    %177 = vector.load %arg3[%c2_210, %c4_211, %c0_212, %c0_213] : memref<4x7x256x256xbf16, #tpu.memory_space<vmem>>, vector<1x1x256x256xbf16>
    %178 = vector.shape_cast %177 : vector<1x1x256x256xbf16> to vector<256x256xbf16>
    %cst_214 = arith.constant dense<0.000000e+00> : vector<128x256xf32>
    %179 = tpu.matmul %173, %178, %cst_214 {dimension_numbers = #tpu.dot_dimension_numbers<[1], [0], [0], [1], [0, 0, 1, 1], [], []>} : vector<128x256xbf16>, vector<256x256xbf16>, vector<128x256xf32> -> vector<128x256xf32>
    %c3_215 = arith.constant 3 : index
    %c4_216 = arith.constant 4 : index
    %c0_217 = arith.constant 0 : index
    %c0_218 = arith.constant 0 : index
    %180 = vector.load %arg3[%c3_215, %c4_216, %c0_217, %c0_218] : memref<4x7x256x256xbf16, #tpu.memory_space<vmem>>, vector<1x1x256x256xbf16>
    %181 = vector.shape_cast %180 : vector<1x1x256x256xbf16> to vector<256x256xbf16>
    %cst_219 = arith.constant dense<0.000000e+00> : vector<128x256xf32>
    %182 = tpu.matmul %176, %181, %cst_219 {dimension_numbers = #tpu.dot_dimension_numbers<[1], [0], [0], [1], [0, 0, 1, 1], [], []>} : vector<128x256xbf16>, vector<256x256xbf16>, vector<128x256xf32> -> vector<128x256xf32>
    %183 = arith.addf %169, %179 : vector<128x256xf32>
    %184 = arith.addf %170, %182 : vector<128x256xf32>
    %c0_220 = arith.constant 0 : index
    %c5_221 = arith.constant 5 : index
    %c0_222 = arith.constant 0 : index
    %185 = vector.load %arg6[%c0_220, %c5_221, %c0_222] : memref<8x22x256xf32, #tpu.memory_space<vmem>>, vector<8x16x256xf32>
    %186 = vector.shape_cast %185 : vector<8x16x256xf32> to vector<128x256xf32>
    %187 = arith.truncf %186 : vector<128x256xf32> to vector<128x256xbf16>
    %c0_223 = arith.constant 0 : index
    %c5_224 = arith.constant 5 : index
    %c0_225 = arith.constant 0 : index
    %188 = vector.load %arg7[%c0_223, %c5_224, %c0_225] : memref<8x22x256xf32, #tpu.memory_space<vmem>>, vector<8x16x256xf32>
    %189 = vector.shape_cast %188 : vector<8x16x256xf32> to vector<128x256xf32>
    %190 = arith.truncf %189 : vector<128x256xf32> to vector<128x256xbf16>
    %c2_226 = arith.constant 2 : index
    %c5_227 = arith.constant 5 : index
    %c0_228 = arith.constant 0 : index
    %c0_229 = arith.constant 0 : index
    %191 = vector.load %arg3[%c2_226, %c5_227, %c0_228, %c0_229] : memref<4x7x256x256xbf16, #tpu.memory_space<vmem>>, vector<1x1x256x256xbf16>
    %192 = vector.shape_cast %191 : vector<1x1x256x256xbf16> to vector<256x256xbf16>
    %cst_230 = arith.constant dense<0.000000e+00> : vector<128x256xf32>
    %193 = tpu.matmul %187, %192, %cst_230 {dimension_numbers = #tpu.dot_dimension_numbers<[1], [0], [0], [1], [0, 0, 1, 1], [], []>} : vector<128x256xbf16>, vector<256x256xbf16>, vector<128x256xf32> -> vector<128x256xf32>
    %c3_231 = arith.constant 3 : index
    %c5_232 = arith.constant 5 : index
    %c0_233 = arith.constant 0 : index
    %c0_234 = arith.constant 0 : index
    %194 = vector.load %arg3[%c3_231, %c5_232, %c0_233, %c0_234] : memref<4x7x256x256xbf16, #tpu.memory_space<vmem>>, vector<1x1x256x256xbf16>
    %195 = vector.shape_cast %194 : vector<1x1x256x256xbf16> to vector<256x256xbf16>
    %cst_235 = arith.constant dense<0.000000e+00> : vector<128x256xf32>
    %196 = tpu.matmul %190, %195, %cst_235 {dimension_numbers = #tpu.dot_dimension_numbers<[1], [0], [0], [1], [0, 0, 1, 1], [], []>} : vector<128x256xbf16>, vector<256x256xbf16>, vector<128x256xf32> -> vector<128x256xf32>
    %197 = arith.addf %183, %193 : vector<128x256xf32>
    %198 = arith.addf %184, %196 : vector<128x256xf32>
    %c0_236 = arith.constant 0 : index
    %c6_237 = arith.constant 6 : index
    %c0_238 = arith.constant 0 : index
    %199 = vector.load %arg6[%c0_236, %c6_237, %c0_238] : memref<8x22x256xf32, #tpu.memory_space<vmem>>, vector<8x16x256xf32>
    %200 = vector.shape_cast %199 : vector<8x16x256xf32> to vector<128x256xf32>
    %201 = arith.truncf %200 : vector<128x256xf32> to vector<128x256xbf16>
    %c0_239 = arith.constant 0 : index
    %c6_240 = arith.constant 6 : index
    %c0_241 = arith.constant 0 : index
    %202 = vector.load %arg7[%c0_239, %c6_240, %c0_241] : memref<8x22x256xf32, #tpu.memory_space<vmem>>, vector<8x16x256xf32>
    %203 = vector.shape_cast %202 : vector<8x16x256xf32> to vector<128x256xf32>
    %204 = arith.truncf %203 : vector<128x256xf32> to vector<128x256xbf16>
    %c2_242 = arith.constant 2 : index
    %c6_243 = arith.constant 6 : index
    %c0_244 = arith.constant 0 : index
    %c0_245 = arith.constant 0 : index
    %205 = vector.load %arg3[%c2_242, %c6_243, %c0_244, %c0_245] : memref<4x7x256x256xbf16, #tpu.memory_space<vmem>>, vector<1x1x256x256xbf16>
    %206 = vector.shape_cast %205 : vector<1x1x256x256xbf16> to vector<256x256xbf16>
    %cst_246 = arith.constant dense<0.000000e+00> : vector<128x256xf32>
    %207 = tpu.matmul %201, %206, %cst_246 {dimension_numbers = #tpu.dot_dimension_numbers<[1], [0], [0], [1], [0, 0, 1, 1], [], []>} : vector<128x256xbf16>, vector<256x256xbf16>, vector<128x256xf32> -> vector<128x256xf32>
    %c3_247 = arith.constant 3 : index
    %c6_248 = arith.constant 6 : index
    %c0_249 = arith.constant 0 : index
    %c0_250 = arith.constant 0 : index
    %208 = vector.load %arg3[%c3_247, %c6_248, %c0_249, %c0_250] : memref<4x7x256x256xbf16, #tpu.memory_space<vmem>>, vector<1x1x256x256xbf16>
    %209 = vector.shape_cast %208 : vector<1x1x256x256xbf16> to vector<256x256xbf16>
    %cst_251 = arith.constant dense<0.000000e+00> : vector<128x256xf32>
    %210 = tpu.matmul %204, %209, %cst_251 {dimension_numbers = #tpu.dot_dimension_numbers<[1], [0], [0], [1], [0, 0, 1, 1], [], []>} : vector<128x256xbf16>, vector<256x256xbf16>, vector<128x256xf32> -> vector<128x256xf32>
    %211 = arith.addf %197, %207 : vector<128x256xf32>
    %212 = arith.addf %198, %210 : vector<128x256xf32>
    %c2_252 = arith.constant 2 : index
    %c0_253 = arith.constant 0 : index
    %c0_254 = arith.constant 0 : index
    %213 = vector.load %arg4[%c2_252, %c0_253, %c0_254] : memref<4x1x256xf32, #tpu.memory_space<vmem>>, vector<1x1x256xf32>
    %214 = vector.shape_cast %213 : vector<1x1x256xf32> to vector<1x256xf32>
    %215 = vector.broadcast %214 : vector<1x256xf32> to vector<128x256xf32>
    %216 = arith.addf %211, %215 : vector<128x256xf32>
    %217 = vector.shape_cast %216 : vector<128x256xf32> to vector<8x16x256xf32>
    %c3_255 = arith.constant 3 : index
    %c0_256 = arith.constant 0 : index
    %c0_257 = arith.constant 0 : index
    %218 = vector.load %arg4[%c3_255, %c0_256, %c0_257] : memref<4x1x256xf32, #tpu.memory_space<vmem>>, vector<1x1x256xf32>
    %219 = vector.shape_cast %218 : vector<1x1x256xf32> to vector<1x256xf32>
    %220 = vector.broadcast %219 : vector<1x256xf32> to vector<128x256xf32>
    %221 = arith.addf %212, %220 : vector<128x256xf32>
    %222 = vector.shape_cast %221 : vector<128x256xf32> to vector<8x16x256xf32>
    %223 = arith.addf %217, %222 : vector<8x16x256xf32>
    %cst_258 = arith.constant 0.000000e+00 : f32
    %224 = vector.broadcast %cst_258 : f32 to vector<8x16x256xf32>
    %225 = arith.maximumf %223, %224 : vector<8x16x256xf32>
    %c0_259 = arith.constant 0 : index
    %c0_260 = arith.constant 0 : index
    %c0_261 = arith.constant 0 : index
    %226 = vector.load %arg5[%c0_259, %c0_260, %c0_261] : memref<8x16x256xf32, #tpu.memory_space<vmem>>, vector<8x16x256xf32>
    tpu.vector_store %arg5[%c0_259, %c0_260, %c0_261], %225 {strides = array<i32>} : memref<8x16x256xf32, #tpu.memory_space<vmem>>, vector<8x16x256xf32>,
    return
  }
  func.func @transform_0(%arg0: i32) -> (i32, i32, i32) {
    %c0_i32 = arith.constant 0 : i32
    %c0_i32_0 = arith.constant 0 : i32
    %c0_i32_1 = arith.constant 0 : i32
    return %arg0, %c0_i32, %c0_i32_0 : i32, i32, i32
  }
  func.func @transform_1(%arg0: i32) -> (i32, i32, i32) {
    %c0_i32 = arith.constant 0 : i32
    %c0_i32_0 = arith.constant 0 : i32
    %c0_i32_1 = arith.constant 0 : i32
    return %arg0, %c0_i32, %c0_i32_0 : i32, i32, i32
  }
  func.func @transform_2(%arg0: i32) -> (i32, i32, i32, i32) {
    %c0_i32 = arith.constant 0 : i32
    %c0_i32_0 = arith.constant 0 : i32
    %c0_i32_1 = arith.constant 0 : i32
    %c0_i32_2 = arith.constant 0 : i32
    %c0_i32_3 = arith.constant 0 : i32
    return %c0_i32, %c0_i32_0, %c0_i32_1, %c0_i32_2 : i32, i32, i32, i32
  }
  func.func @transform_3(%arg0: i32) -> (i32, i32, i32) {
    %c0_i32 = arith.constant 0 : i32
    %c0_i32_0 = arith.constant 0 : i32
    %c0_i32_1 = arith.constant 0 : i32
    %c0_i32_2 = arith.constant 0 : i32
    return %c0_i32, %c0_i32_0, %c0_i32_1 : i32, i32, i32
  }
  func.func @transform_4(%arg0: i32) -> (i32, i32, i32) {
    %c0_i32 = arith.constant 0 : i32
    %c0_i32_0 = arith.constant 0 : i32
    %c0_i32_1 = arith.constant 0 : i32
    return %arg0, %c0_i32, %c0_i32_0 : i32, i32, i32
  }
}

</mosaic_0001>

<bundles_post_ra>
// kernel: model_forward.1
= control target key start
LH: loop header
LB: loop body
LE: loop exit
PB: predicated region body
PF: predicated region fallthrough
CT: control target
= control target key end

     0   :  { %s19614_s15 = smov 0   ;;  %s24628_s0 = inlined_call_operand.vmem [shape: f32[16,16,256], index: 0, kind: input, shape index: {}]   ;;  %s24629_s1 = inlined_call_operand.vmem [shape: f32[16,16,256], index: 1, kind: input, shape index: {}]   ;;  %s24630_s2 = inlined_call_operand.vmem [shape: bf16[4,7,256,256], index: 2, kind: input, shape index: {}]   ;;  %s24631_s3 = inlined_call_operand.vmem [shape: f32[4,1,256], index: 3, kind: input, shape index: {}]   ;;  %s24632_s4 = inlined_call_operand.vmem [shape: f32[16,16,256], index: 4, kind: output, shape index: {}]  }
   0x1 LB: > { %s15485_s16 = sadd.s32 4294967295, %s19586_s15   ;;  %p15489_p0 = scmp.ge.s32.totalorder %s19586_s15, 1  ;;  %s19586_s15 = sphi %s19614_s15, %s14_s15  }
   0x2   : > { %p176_p1 = scmp.lt.s32.totalorder %s19586_s15, 3 }
   0x4   : > { %p177_p2 = pnand %p15489_p0, %p176_p1 }
   0x6   : > { %180 = sbr.rel (%p177_p2) target bundleno = 2189 (0x88d), region = 36 }
   0xd   : > { %v19625_v0 = vld [vmem:[%s24630_s2 + $0x104] ss:$8 sps:$4 sm:$0xff]   ;;  %v19630_v1 = vld [vmem:[%s24630_s2 + $0x100] ss:$8 sps:$4 sm:$0xff]   ;;  %v19588_v2 = vmov 0.0   ;;  %s15490_s27 = sshll.u32 %s15485_s16, 3 }
   0xe   : > { %232 = vst [vmem:[#allocation2 + $0x8] sm:$0x7] %v19588_v2  ;;  %231 = vst [vmem:[#allocation2] sm:$0x7] %v19588_v2  ;;  %1483 = vmatprep.subr.bf16.mxu1 %v19625_v0  ;;  %v18143_v3 = vld [vmem:[%s24630_s2 + $0x114] ss:$8 sps:$4 sm:$0xff]  }
   0xf   : > { %233 = vst [vmem:[#allocation2 + $0x30] sm:$0x7] %v19588_v2  ;;  %234 = vst [vmem:[#allocation2 + $0x38] sm:$0x7] %v19588_v2  ;;  %1484 = vmatpush1.bf16.msra.mxu1 %v19630_v1  ;;  %v18145_v4 = vld [vmem:[%s24630_s2 + $0x110] ss:$8 sps:$4 sm:$0xff]  }
  0x10   : > { %235 = vst [vmem:[#allocation2 + $0x60] sm:$0x7] %v19588_v2  ;;  %236 = vst [vmem:[#allocation2 + $0x68] sm:$0x7] %v19588_v2  ;;  %1485 = vmatprep.subr.bf16.mxu1 %v18143_v3  ;;  %v18146_v5 = vld [vmem:[%s24630_s2 + $0x124] ss:$8 sps:$4 sm:$0xff]  }
  0x11   : > { %237 = vst [vmem:[#allocation2 + $0x90] sm:$0x7] %v19588_v2  ;;  %238 = vst [vmem:[#allocation2 + $0x98] sm:$0x7] %v19588_v2  ;;  %v18148_v6 = vld [vmem:[%s24630_s2 + $0x120] ss:$8 sps:$4 sm:$0xff]  }
  0x12   : > { %239 = vst [vmem:[#allocation2 + $0xc0] sm:$0x7] %v19588_v2  ;;  %240 = vst [vmem:[#allocation2 + $0xc8] sm:$0x7] %v19588_v2  ;;  %p211_p3 = scmp.lt.s32.totalorder %s15490_s27, 15  ;;  %vm391_vm0 = vcmask 1042432  }
  0x13   : > { %241 = vst [vmem:[#allocation2 + $0xf0] sm:$0x7] %v19588_v2  ;;  %242 = vst [vmem:[#allocation2 + $0xf8] sm:$0x7] %v19588_v2  ;;  %1486 = vmatpush1.bf16.msra.mxu1 %v18145_v4  ;;  %v18149_v7 = vld [vmem:[%s24630_s2 + $0x134] ss:$8 sps:$4 sm:$0xff]  }
  0x14   : > { %243 = vst [vmem:[#allocation2 + $0x120] sm:$0x7] %v19588_v2  ;;  %244 = vst [vmem:[#allocation2 + $0x128] sm:$0x7] %v19588_v2  ;;  %1487 = vmatprep.subr.bf16.mxu1 %v18146_v5  ;;  %v18151_v8 = vld [vmem:[%s24630_s2 + $0x130] ss:$8 sps:$4 sm:$0xff]  }
  0x15   : > { %245 = vst [vmem:[#allocation2 + $0x150] sm:$0x7] %v19588_v2  ;;  %246 = vst [vmem:[#allocation2 + $0x158] sm:$0x7] %v19588_v2  ;;  %s24708_s27 = smov (!%p211_p3, %s15490_s27), 15  ;;  %vm953_vm1 = vcmask 1046528  }
  0x16   : > { %247 = vst [vmem:[#allocation2 + $0x20] sm:$0x38] %v19588_v2  ;;  %248 = vst [vmem:[#allocation2 + $0x28] sm:$0x38] %v19588_v2  ;;  %v18152_v9 = vld [vmem:[%s24630_s2 + $0x144] ss:$8 sps:$4 sm:$0xff]  }
  0x17   : > { %249 = vst [vmem:[#allocation2 + $0x50] sm:$0x38] %v19588_v2  ;;  %250 = vst [vmem:[#allocation2 + $0x58] sm:$0x38] %v19588_v2  ;;  %1488 = vmatpush1.bf16.msra.mxu1 %v18148_v6  ;;  %v18154_v10 = vld [vmem:[%s24630_s2 + $0x140] ss:$8 sps:$4 sm:$0xff]  }
  0x18   : > { %251 = vst [vmem:[#allocation2 + $0x80] sm:$0x38] %v19588_v2  ;;  %252 = vst [vmem:[#allocation2 + $0x88] sm:$0x38] %v19588_v2  ;;  %1489 = vmatprep.subr.bf16.mxu1 %v18149_v7  ;;  %s19724_s12 = sshll.u32 %s24708_s27, 5  ;;  %vm2512_vm2 = vcmask 1045504  }
  0x19   : > { %253 = vst [vmem:[#allocation2 + $0xb0] sm:$0x38] %v19588_v2  ;;  %254 = vst [vmem:[#allocation2 + $0xb8] sm:$0x38] %v19588_v2  ;;  %v18155_v11 = vld [vmem:[%s24630_s2 + $0x154] ss:$8 sps:$4 sm:$0xff]   ;;  %s19733_s18 = scalar_lea.vmem %s24628_s0, %s19724_s12  ;;  %s20021_s21 = scalar_lea.vmem %s24629_s1, %s19724_s12 }
  0x1a   : > { %255 = vst [vmem:[#allocation2 + $0xe0] sm:$0x38] %v19588_v2  ;;  %256 = vst [vmem:[#allocation2 + $0xe8] sm:$0x38] %v19588_v2  ;;  %v18157_v12 = vld [vmem:[%s24630_s2 + $0x150] ss:$8 sps:$4 sm:$0xff]   ;;  %s24531_s28 = scalar_lea.vmem %s24632_s4, %s19724_s12 }
  0x1b   : > { %257 = vst [vmem:[#allocation2 + $0x110] sm:$0x38] %v19588_v2  ;;  %258 = vst [vmem:[#allocation2 + $0x118] sm:$0x38] %v19588_v2  ;;  %1490 = vmatpush1.bf16.msra.mxu1 %v18151_v8  ;;  %v18158_v13 = vld [vmem:[%s24630_s2 + $0x164] ss:$8 sps:$4 sm:$0xff]  }
  0x1c   : > { %259 = vst [vmem:[#allocation2 + $0x140] sm:$0x38] %v19588_v2  ;;  %260 = vst [vmem:[#allocation2 + $0x148] sm:$0x38] %v19588_v2  ;;  %1491 = vmatprep.subr.bf16.mxu1 %v18152_v9  ;;  %v296_v14 = vld [vmem:[%s19733_s18 + $0x8] sm:$0xff]  ;;  %v298_v15 = vld [vmem:[%s19733_s18 + $0x18] sm:$0xff] }
  0x1d   : > { %261 = vst [vmem:[#allocation2 + $0x170] sm:$0x38] %v19588_v2  ;;  %262 = vst [vmem:[#allocation2 + $0x178] sm:$0x38] %v19588_v2  ;;  %v393_v16 = vrot.slane %v296_v14, 5  ;;  %v396_v17 = vrot.slane %v298_v15, 5 }
  0x1e   : > { %263 = vst [vmem:[#allocation3] sm:$0x7] %v19588_v2  ;;  %264 = vst [vmem:[#allocation3 + $0x8] sm:$0x7] %v19588_v2  ;;  %v19744_v18 = vld [vmem:[%s19733_s18] sm:$0xff]  ;;  %v19747_v19 = vld [vmem:[%s19733_s18 + $0x10] sm:$0xff] }
  0x1f   : > { %265 = vst [vmem:[#allocation3 + $0x30] sm:$0x7] %v19588_v2  ;;  %266 = vst [vmem:[#allocation3 + $0x38] sm:$0x7] %v19588_v2  ;;  %1492 = vmatpush1.bf16.msra.mxu1 %v18154_v10  ;;  %v18160_v20 = vld [vmem:[%s24630_s2 + $0x160] ss:$8 sps:$4 sm:$0xff]   ;;  %v19779_v31 = vsel %vm391_vm0, %v393_v16, %v396_v17 }
  0x20   : > { %267 = vst [vmem:[#allocation3 + $0x60] sm:$0x7] %v19588_v2  ;;  %268 = vst [vmem:[#allocation3 + $0x68] sm:$0x7] %v19588_v2  ;;  %1493 = vmatprep.subr.bf16.mxu1 %v18155_v11  ;;  %v392_v21 = vrot.slane %v19744_v18, 5  ;;  %v394_v22 = vrot.slane %v19747_v19, 5 }
  0x21   : > { %269 = vst [vmem:[#allocation3 + $0x90] sm:$0x7] %v19588_v2  ;;  %270 = vst [vmem:[#allocation3 + $0x98] sm:$0x7] %v19588_v2  ;;  %v18161_v23 = vld [vmem:[%s24630_s2 + $0x174] ss:$8 sps:$4 sm:$0xff]  }
  0x22   : > { %271 = vst [vmem:[#allocation3 + $0xc0] sm:$0x7] %v19588_v2  ;;  %272 = vst [vmem:[#allocation3 + $0xc8] sm:$0x7] %v19588_v2  ;;  %v19762_v24 = vld [vmem:[%s19733_s18 + $0x28] sm:$0xff]  ;;  %v19765_v25 = vld [vmem:[%s19733_s18 + $0x38] sm:$0xff] }
  0x23   : > { %273 = vst [vmem:[#allocation3 + $0xf0] sm:$0x7] %v19588_v2  ;;  %274 = vst [vmem:[#allocation3 + $0xf8] sm:$0x7] %v19588_v2  ;;  %1494 = vmatpush1.bf16.msra.mxu1 %v18157_v12  ;;  %v399_v26 = vrot.slane %v19762_v24, 5  ;;  %v402_v27 = vrot.slane %v19765_v25, 5 }
  0x24   : > { %275 = vst [vmem:[#allocation3 + $0x120] sm:$0x7] %v19588_v2  ;;  %276 = vst [vmem:[#allocation3 + $0x128] sm:$0x7] %v19588_v2  ;;  %1495 = vmatprep.subr.bf16.mxu1 %v18158_v13  ;;  %v19770_v28 = vld [vmem:[%s19733_s18 + $0x20] sm:$0xff]  ;;  %v19773_v29 = vld [vmem:[%s19733_s18 + $0x30] sm:$0xff] }
  0x25   : > { %277 = vst [vmem:[#allocation3 + $0x150] sm:$0x7] %v19588_v2  ;;  %278 = vst [vmem:[#allocation3 + $0x158] sm:$0x7] %v19588_v2  ;;  %v18163_v30 = vld [vmem:[%s24630_s2 + $0x170] ss:$8 sps:$4 sm:$0xff]   ;;  %v19937_v19 = vsel %vm391_vm0, %v399_v26, %v402_v27 }
  0x26   : > { %279 = vst [vmem:[#allocation3 + $0x20] sm:$0x38] %v19588_v2  ;;  %280 = vst [vmem:[#allocation3 + $0x28] sm:$0x38] %v19588_v2  ;;  %v398_v32 = vrot.slane %v19770_v28, 5  ;;  %v400_v33 = vrot.slane %v19773_v29, 5 }
  0x27   : > { %281 = vst [vmem:[#allocation3 + $0x50] sm:$0x38] %v19588_v2  ;;  %282 = vst [vmem:[#allocation3 + $0x58] sm:$0x38] %v19588_v2  ;;  %1496 = vmatpush1.bf16.msra.mxu1 %v18160_v20  ;;  %v18164_v34 = vld [vmem:[%s24630_s2 + $0x184] ss:$8 sps:$4 sm:$0xff]  }
  0x28   : > { %283 = vst [vmem:[#allocation3 + $0x80] sm:$0x38] %v19588_v2  ;;  %284 = vst [vmem:[#allocation3 + $0x88] sm:$0x38] %v19588_v2  ;;  %1497 = vmatprep.subr.bf16.mxu1 %v18161_v23  ;;  %v18166_v35 = vld [vmem:[%s24630_s2 + $0x180] ss:$8 sps:$4 sm:$0xff]  }
  0x29   : > { %285 = vst [vmem:[#allocation3 + $0xb0] sm:$0x38] %v19588_v2  ;;  %286 = vst [vmem:[#allocation3 + $0xb8] sm:$0x38] %v19588_v2  ;;  %v19798_v36 = vld [vmem:[%s19733_s18 + $0x48] sm:$0xff]  ;;  %v19801_v37 = vld [vmem:[%s19733_s18 + $0x58] sm:$0xff] }
  0x2a   : > { %287 = vst [vmem:[#allocation3 + $0xe0] sm:$0x38] %v19588_v2  ;;  %288 = vst [vmem:[#allocation3 + $0xe8] sm:$0x38] %v19588_v2  ;;  %v958_v38 = vrot.slane %v19779_v31, 1  ;;  %v405_v39 = vrot.slane %v19798_v36, 5 }
  0x2b   : > { %289 = vst [vmem:[#allocation3 + $0x110] sm:$0x38] %v19588_v2  ;;  %290 = vst [vmem:[#allocation3 + $0x118] sm:$0x38] %v19588_v2  ;;  %v408_v40 = vrot.slane %v19801_v37, 5  ;;  %v19807_v41 = vld [vmem:[%s19733_s18 + $0x40] sm:$0xff]  ;;  %1498 = vmatpush1.bf16.msra.mxu1 %v18163_v30 }
  0x2c   : > { %291 = vst [vmem:[#allocation3 + $0x140] sm:$0x38] %v19588_v2  ;;  %292 = vst [vmem:[#allocation3 + $0x148] sm:$0x38] %v19588_v2  ;;  %v19810_v42 = vld [vmem:[%s19733_s18 + $0x50] sm:$0xff]  ;;  %v404_v45 = vrot.slane %v19807_v41, 5  ;;  %1499 = vmatprep.subr.bf16.mxu1 %v18164_v34 }
  0x2d   : > { %293 = vst [vmem:[#allocation3 + $0x170] sm:$0x38] %v19588_v2  ;;  %294 = vst [vmem:[#allocation3 + $0x178] sm:$0x38] %v19588_v2  ;;  %v406_v46 = vrot.slane %v19810_v42, 5  ;;  %v19834_v55 = vld [vmem:[%s19733_s18 + $0x68] sm:$0xff] }
  0x2e   : > { %489 = vst [vmem:[#allocation2 + $0x8] sm:$0xf8] %v393_v16  ;;  %493 = vst [vmem:[#allocation2 + $0x28] sm:$0x7] %v396_v17  ;;  %v18167_v47 = vld [vmem:[%s24630_s2 + $0x194] ss:$8 sps:$4 sm:$0xff]  }
  0x2f   : > { %488 = vst [vmem:[#allocation2] sm:$0xf8] %v392_v21  ;;  %492 = vst [vmem:[#allocation2 + $0x20] sm:$0x7] %v394_v22  ;;  %1500 = vmatpush1.bf16.msra.mxu1 %v18166_v35  ;;  %v18169_v52 = vld [vmem:[%s24630_s2 + $0x190] ss:$8 sps:$4 sm:$0xff]  }
  0x30   : > { %495 = vst [vmem:[#allocation2 + $0x38] sm:$0xf8] %v399_v26  ;;  %499 = vst [vmem:[#allocation2 + $0x58] sm:$0x7] %v402_v27  ;;  %1501 = vmatprep.subr.bf16.mxu1 %v18167_v47  ;;  %v18170_v54 = vld [vmem:[%s24630_s2 + $0x1a4] ss:$8 sps:$4 sm:$0xff]  }
  0x31   : > { %494 = vst [vmem:[#allocation2 + $0x30] sm:$0xf8] %v398_v32  ;;  %498 = vst [vmem:[#allocation2 + $0x50] sm:$0x7] %v400_v33  ;;  %v19837_v56 = vld [vmem:[%s19733_s18 + $0x78] sm:$0xff]  ;;  %v411_v57 = vrot.slane %v19834_v55, 5 }
  0x32   : > { %501 = vst [vmem:[#allocation2 + $0x68] sm:$0xf8] %v405_v39  ;;  %505 = vst [vmem:[#allocation2 + $0x88] sm:$0x7] %v408_v40  ;;  %v414_v58 = vrot.slane %v19837_v56, 5  ;;  %v19842_v59 = vld [vmem:[%s19733_s18 + $0x60] sm:$0xff] }
  0x33   : > { %500 = vst [vmem:[#allocation2 + $0x60] sm:$0xf8] %v404_v45  ;;  %504 = vst [vmem:[#allocation2 + $0x80] sm:$0x7] %v406_v46  ;;  %v19845_v60 = vld [vmem:[%s19733_s18 + $0x70] sm:$0xff]  ;;  %1502 = vmatpush1.bf16.msra.mxu1 %v18169_v52  ;;  %v410_v62 = vrot.slane %v19842_v59, 5 }
  0x34   : > { %v18172_v61 = vld [vmem:[%s24630_s2 + $0x1a0] ss:$8 sps:$4 sm:$0xff]   ;;  %1503 = vmatprep.subr.bf16.mxu1 %v18170_v54  ;;  %v18173_v63 = vld [vmem:[%s24630_s2 + $0x1b4] ss:$8 sps:$4 sm:$0xff]   ;;  %507 = vst [vmem:[#allocation2 + $0x98] sm:$0xf8] %v411_v57 }
  0x35   : > { %v874_v43 = vld [vmem:[#allocation2 + $0x8] sm:$0xfe]  ;;  %v876_v44 = vld [vmem:[#allocation2 + $0x28] sm:$0x1]  ;;  %511 = vst [vmem:[#allocation2 + $0xb8] sm:$0x7] %v414_v58 }
  0x36   : > { %v957_v48 = vrot.slane %v874_v43, 1  ;;  %v962_v49 = vrot.slane %v876_v44, 1  ;;  %v412_v0 = vrot.slane %v19845_v60, 5  ;;  %506 = vst [vmem:[#allocation2 + $0x90] sm:$0xf8] %v410_v62  ;;  %v19870_v3 = vld [vmem:[%s19733_s18 + $0x88] sm:$0xff] }
  0x37   : > { %1504 = vmatpush1.bf16.msra.mxu1 %v18172_v61  ;;  %v18175_v1 = vld [vmem:[%s24630_s2 + $0x1b0] ss:$8 sps:$4 sm:$0xff]   ;;  %v18176_v2 = vld [vmem:[%s24630_s2 + $0x1c4] ss:$8 sps:$4 sm:$0xff]   ;;  %v417_v5 = vrot.slane %v19870_v3, 5  ;;  %vm3573_vm3 = vcmask 1044480  }
  0x38   : > { %v959_v50 = vsel %vm953_vm1, %v957_v48, %v958_v38  ;;  %v963_v51 = vsel %vm953_vm1, %v958_v38, %v962_v49  ;;  %510 = vst [vmem:[#allocation2 + $0xb0] sm:$0x7] %v412_v0  ;;  %1505 = vmatprep.subr.bf16.mxu1 %v18173_v63  ;;  %v19873_v4 = vld [vmem:[%s19733_s18 + $0x98] sm:$0xff]  ;;  %v19877_v6 = vld [vmem:[%s19733_s18 + $0x80] sm:$0xff]  ;;  %v19880_v7 = vld [vmem:[%s19733_s18 + $0x90] sm:$0xff]  ;;  %v19925_v38 = vsel %vm391_vm0, %v392_v21, %v394_v22  ;;  %vm4634_vm4 = vcmask 1043456  }
  0x39   : > { %v1067_v53 = vpack.c.bf16 %v963_v51, %v959_v50  ;;  %v420_v8 = vrot.slane %v19873_v4, 5  ;;  %v416_v9 = vrot.slane %v19877_v6, 5  ;;  %v418_v10 = vrot.slane %v19880_v7, 5  ;;  %513 = vst [vmem:[#allocation2 + $0xc8] sm:$0xf8] %v417_v5  ;;  %v19903_v14 = vld [vmem:[%s19733_s18 + $0xa8] sm:$0xff] }
  0x3a   : > { %v18178_v11 = vld [vmem:[%s24630_s2 + $0x1c0] ss:$8 sps:$4 sm:$0xff]   ;;  %v18179_v12 = vld [vmem:[%s24630_s2 + $0x1d4] ss:$8 sps:$4 sm:$0xff]   ;;  %v18181_v13 = vld [vmem:[%s24630_s2 + $0x1d0] ss:$8 sps:$4 sm:$0xff]  }
  0x3b   : > { %1515 = vmatprep.mubr.bf16.mxu1 %v1067_v53  ;;  %1506 = vmatpush1.bf16.msra.mxu1 %v18175_v1  ;;  %517 = vst [vmem:[#allocation2 + $0xe8] sm:$0x7] %v420_v8  ;;  %512 = vst [vmem:[#allocation2 + $0xc0] sm:$0xf8] %v416_v9  ;;  %v19906_v15 = vld [vmem:[%s19733_s18 + $0xb8] sm:$0xff]  ;;  %v423_v17 = vrot.slane %v19903_v14, 5 }
  0x3c   : > { %516 = vst [vmem:[#allocation2 + $0xe0] sm:$0x7] %v418_v10  ;;  %1507 = vmatprep.subr.bf16.mxu1 %v18176_v2  ;;  %v18182_v16 = vld [vmem:[%s24630_s2 + $0x1e4] ss:$8 sps:$4 sm:$0xff]   ;;  %v426_v20 = vrot.slane %v19906_v15, 5  ;;  %v19917_v30 = vld [vmem:[%s19733_s18 + $0xb0] sm:$0xff] }
  0x3d   : > { %v19914_v23 = vld [vmem:[%s19733_s18 + $0xa0] sm:$0xff]  ;;  %519 = vst [vmem:[#allocation2 + $0xf8] sm:$0xf8] %v423_v17  ;;  %v424_v44 = vrot.slane %v19917_v30, 5  ;;  %v878_v18 = vld [vmem:[#allocation2 + $0x38] sm:$0xfe] }
  0x3e   : > { %v873_v34 = vld [vmem:[#allocation2] sm:$0xfe]  ;;  %v422_v35 = vrot.slane %v19914_v23, 5  ;;  %v875_v43 = vld [vmem:[#allocation2 + $0x20] sm:$0x1]  ;;  %v19942_v21 = vld [vmem:[%s19733_s18 + $0xc8] sm:$0xff] }
  0x3f   : > { %1508 = vmatpush1.bf16.msra.mxu1 %v18178_v11  ;;  %523 = vst [vmem:[#allocation2 + $0x118] sm:$0x7] %v426_v20  ;;  %v880_v47 = vld [vmem:[#allocation2 + $0x58] sm:$0x1]  ;;  %v18184_v22 = vld [vmem:[%s24630_s2 + $0x1e0] ss:$8 sps:$4 sm:$0xff]  }
  0x40   : > { %1509 = vmatprep.subr.bf16.mxu1 %v18179_v12  ;;  %518 = vst [vmem:[#allocation2 + $0xf0] sm:$0xf8] %v422_v35  ;;  %522 = vst [vmem:[#allocation2 + $0x110] sm:$0x7] %v424_v44  ;;  %v19950_v24 = vld [vmem:[%s19733_s18 + $0xd8] sm:$0xff]  ;;  %v954_v26 = vrot.slane %v873_v34, 1 }
  0x41   : > { %v18185_v25 = vld [vmem:[%s24630_s2 + $0x1f4] ss:$8 sps:$4 sm:$0xff]   ;;  %v955_v27 = vrot.slane %v19925_v38, 1  ;;  %v960_v48 = vrot.slane %v875_v43, 1  ;;  %v429_v49 = vrot.slane %v19942_v21, 5  ;;  %v967_v50 = vrot.slane %v878_v18, 1 }
  0x42   : > { %v968_v51 = vrot.slane %v19937_v19, 1  ;;  %v972_v52 = vrot.slane %v880_v47, 1  ;;  %v432_v53 = vrot.slane %v19950_v24, 5  ;;  %v19960_v54 = vld [vmem:[%s19733_s18 + $0xc0] sm:$0xff]  ;;  %v19963_v61 = vld [vmem:[%s19733_s18 + $0xd0] sm:$0xff]  ;;  %v19988_v34 = vld [vmem:[%s19733_s18 + $0xe8] sm:$0xff]  ;;  %v20006_v47 = vsel %vm391_vm0, %v405_v39, %v408_v40 }
  0x43   : > { %1510 = vmatpush1.bf16.msra.mxu1 %v18181_v13  ;;  %525 = vst [vmem:[#allocation2 + $0x128] sm:$0xf8] %v429_v49  ;;  %v24633_v63 = vrot.slane %v19960_v54, 5  ;;  %v24634_v1 = vrot.slane %v19963_v61, 5  ;;  %v18187_v2 = vld [vmem:[%s24630_s2 + $0x1f0] ss:$8 sps:$4 sm:$0xff]   ;;  %v956_v11 = vsel %vm953_vm1, %v954_v26, %v955_v27  ;;  %v961_v12 = vsel %vm953_vm1, %v955_v27, %v960_v48 }
  0x44   : > { %1511 = vmatprep.subr.bf16.mxu1 %v18182_v16  ;;  %529 = vst [vmem:[#allocation2 + $0x148] sm:$0x7] %v432_v53  ;;  %v19981_v13 = vsel %vm391_vm0, %v398_v32, %v400_v33  ;;  %v877_v16 = vld [vmem:[#allocation2 + $0x30] sm:$0xfe]  ;;  %v18190_v29 = vld [vmem:[%s24630_s2 + $0x804] ss:$8 sps:$4 sm:$0xff]   ;;  %v969_v28 = vsel %vm953_vm1, %v967_v50, %v968_v51  ;;  %v973_v32 = vsel %vm953_vm1, %v968_v51, %v972_v52 }
  0x45   : > { %524 = vst [vmem:[#allocation2 + $0x120] sm:$0xf8] %v24633_v63  ;;  %528 = vst [vmem:[#allocation2 + $0x140] sm:$0x7] %v24634_v1  ;;  %v879_v33 = vld [vmem:[#allocation2 + $0x50] sm:$0x1]  ;;  %v1066_v27 = vpack.c.bf16 %v961_v12, %v956_v11  ;;  %v1069_v36 = vpack.c.bf16 %v973_v32, %v969_v28 }
  0x46   : > { %v19996_v43 = vld [vmem:[%s19733_s18 + $0xf8] sm:$0xff]  ;;  %v18188_v18 = vld [vmem:[%s24630_s2 + $0x800] ss:$8 sps:$4 sm:$0xff]   ;;  %v24637_v26 = vrot.slane %v19988_v34, 5  ;;  %v964_v48 = vrot.slane %v877_v16, 1  ;;  %v965_v50 = vrot.slane %v19981_v13, 1 }
  0x47   : > { %1512 = vmatpush1.bf16.msra.mxu1 %v18184_v22  ;;  %v882_v22 = vld [vmem:[#allocation2 + $0x68] sm:$0xfe]  ;;  %v438_v51 = vrot.slane %v19996_v43, 5  ;;  %v20012_v52 = vld [vmem:[%s19733_s18 + $0xe0] sm:$0xff]  ;;  %v20015_v63 = vld [vmem:[%s19733_s18 + $0xf0] sm:$0xff]  ;;  %v970_v37 = vrot.slane %v879_v33, 1 }
  0x48   : > { %1513 = vmatprep.subr.bf16.mxu1 %v18185_v25  ;;  %v884_v25 = vld [vmem:[#allocation2 + $0x88] sm:$0x1]  ;;  %531 = vst [vmem:[#allocation2 + $0x158] sm:$0xf8] %v24637_v26  ;;  %v24635_v39 = vrot.slane %v20012_v52, 5  ;;  %v24636_v40 = vrot.slane %v20015_v63, 5  ;;  %v966_v32 = vsel %vm953_vm1, %v964_v48, %v965_v50  ;;  %v20055_v26 = vsel %vm391_vm0, %v404_v45, %v406_v46 }
  0x49   : > { %v18193_v11 = vld [vmem:[%s24630_s2 + $0x814] ss:$8 sps:$4 sm:$0xff]   ;;  %v977_v12 = vrot.slane %v882_v22, 1  ;;  %v978_v16 = vrot.slane %v20006_v47, 1  ;;  %v982_v1 = vrot.slane %v884_v25, 1  ;;  %v971_v33 = vsel %vm953_vm1, %v965_v50, %v970_v37  ;;  %v20062_v50 = vld [vmem:[%s20021_s21] sm:$0xff] }
  0x4a   : > { %535 = vst [vmem:[#allocation2 + $0x178] sm:$0x7] %v438_v51  ;;  %530 = vst [vmem:[#allocation2 + $0x150] sm:$0xf8] %v24635_v39  ;;  %v18196_v28 = vld [vmem:[%s24630_s2 + $0x824] ss:$8 sps:$4 sm:$0xff]   ;;  %v1068_v45 = vpack.c.bf16 %v971_v33, %v966_v32 }
  0x4b   : > { %1514 = vmatpush1.bf16.msra.mxu1 %v18187_v2  ;;  %534 = vst [vmem:[#allocation2 + $0x170] sm:$0x7] %v24636_v40  ;;  %v20038_v2 = vld [vmem:[%s20021_s21 + $0x8] sm:$0xff]  ;;  %v881_v22 = vld [vmem:[#allocation2 + $0x60] sm:$0xfe]  ;;  %v983_v40 = vsel %vm953_vm1, %v978_v16, %v982_v1  ;;  %v20072_v1 = vsel %vm391_vm0, %v411_v57, %v414_v58  ;;  %v24638_v37 = vrot.slane %v20062_v50, 5 }
  0x4c   : > { %1789 = vmatprep.subr.bf16.mxu1 %v18190_v29  ;;  %v18191_v29 = vld [vmem:[%s24630_s2 + $0x810] ss:$8 sps:$4 sm:$0xff]   ;;  %v883_v25 = vld [vmem:[#allocation2 + $0x80] sm:$0x1]  ;;  %v24640_v48 = vrot.slane %v20038_v2, 5  ;;  %v974_v57 = vrot.slane %v881_v22, 1 }
  0x4d   : > { %v886_v39 = vld [vmem:[#allocation2 + $0x98] sm:$0xfe]  ;;  %v888_v42 = vld [vmem:[#allocation2 + $0xb8] sm:$0x1]  ;;  %v18194_v46 = vld [vmem:[%s24630_s2 + $0x820] ss:$8 sps:$4 sm:$0xff]  }
  0x4e   : > { %1516 = vmatmul.mubr.bf16.vlgmr.msra.gmra.mrb[0].mxu1 %v1066_v27  ;;  %v979_v27 = vsel %vm953_vm1, %v977_v12, %v978_v16  ;;  %665 = vst [vmem:[#allocation3 + $0x8] sm:$0xf8] %v24640_v48  ;;  %v975_v58 = vrot.slane %v20055_v26, 1  ;;  %v18199_v12 = vld [vmem:[%s24630_s2 + $0x834] ss:$8 sps:$4 sm:$0xff]   ;;  %v987_v16 = vrot.slane %v886_v39, 1 }
  0x4f   : > { %1790 = vmatpush1.bf16.msra.mxu1 %v18188_v18  ;;  %1525 = vmatprep.mubr.bf16.mxu1 %v1069_v36  ;;  %v20058_v18 = vld [vmem:[%s20021_s21 + $0x18] sm:$0xff]  ;;  %v20065_v36 = vld [vmem:[%s20021_s21 + $0x10] sm:$0xff]  ;;  %v1071_v55 = vpack.c.bf16 %v983_v40, %v979_v27  ;;  %v988_v32 = vrot.slane %v20072_v1, 1  ;;  %v992_v33 = vrot.slane %v888_v42, 1  ;;  %664 = vst [vmem:[#allocation3] sm:$0xf8] %v24638_v37 }
  0x50   : > { %1791 = vmatprep.subr.bf16.mxu1 %v18193_v11  ;;  %v24641_v41 = vrot.slane %v20058_v18, 5  ;;  %v24639_v56 = vrot.slane %v20065_v36, 5  ;;  %v980_v11 = vrot.slane %v883_v25, 1  ;;  %v18197_v40 = vld [vmem:[%s24630_s2 + $0x830] ss:$8 sps:$4 sm:$0xff]   ;;  %v20107_v27 = vld [vmem:[%s20021_s21 + $0x20] sm:$0xff]  ;;  %v976_v42 = vsel %vm953_vm1, %v974_v57, %v975_v58 }
  0x51   : > { %v18202_v39 = vld [vmem:[%s24630_s2 + $0x844] ss:$8 sps:$4 sm:$0xff]   ;;  %v20103_v22 = vld [vmem:[%s20021_s21 + $0x38] sm:$0xff]  ;;  %v20120_v48 = vld [vmem:[%s20021_s21 + $0x30] sm:$0xff]  ;;  %v24642_v60 = vrot.slane %v20107_v27, 5  ;;  %vm6755_vm5 = vcmask 1041408  }
  0x52   : > { %669 = vst [vmem:[#allocation3 + $0x28] sm:$0x7] %v24641_v41  ;;  %668 = vst [vmem:[#allocation3 + $0x20] sm:$0x7] %v24639_v56  ;;  %v981_v37 = vsel %vm953_vm1, %v975_v58, %v980_v11  ;;  %v24661_v56 = vrot.slane %v20103_v22, 5  ;;  %v989_v41 = vsel %vm953_vm1, %v987_v16, %v988_v32  ;;  %v24643_v59 = vrot.slane %v20120_v48, 5 }
  0x53   : > { %1792 = vmatpush1.bf16.msra.mxu1 %v18191_v29  ;;  %v20097_v29 = vld [vmem:[%s20021_s21 + $0x28] sm:$0xff]  ;;  %v1070_v58 = vpack.c.bf16 %v981_v37, %v976_v42  ;;  %670 = vst [vmem:[#allocation3 + $0x30] sm:$0xf8] %v24642_v60  ;;  %v18205_v3 = vld [vmem:[%s24630_s2 + $0x854] ss:$8 sps:$4 sm:$0xff]  }
  0x54   : > { %1793 = vmatprep.subr.bf16.mxu1 %v18196_v28  ;;  %v885_v28 = vld [vmem:[#allocation2 + $0x90] sm:$0xfe]  ;;  %v24656_v25 = vrot.slane %v20097_v29, 5  ;;  %v890_v57 = vld [vmem:[#allocation2 + $0xc8] sm:$0xfe]  ;;  %v20153_v42 = vld [vmem:[%s20021_s21 + $0x58] sm:$0xff] }
  0x55   : > { %675 = vst [vmem:[#allocation3 + $0x58] sm:$0x7] %v24661_v56  ;;  %v18200_v11 = vld [vmem:[%s24630_s2 + $0x840] ss:$8 sps:$4 sm:$0xff]   ;;  %674 = vst [vmem:[#allocation3 + $0x50] sm:$0x7] %v24643_v59 }
  0x56   : > { %1526 = vmatmul.mubr.bf16.gmra.mrb[4].mxu1 %v1068_v45  ;;  %v20116_v45 = vsel %vm391_vm0, %v410_v62, %v412_v0  ;;  %671 = vst [vmem:[#allocation3 + $0x38] sm:$0xf8] %v24656_v25  ;;  %v20133_v62 = vsel %vm391_vm0, %v417_v5, %v420_v8  ;;  %v892_v0 = vld [vmem:[#allocation2 + $0xe8] sm:$0x1]  ;;  %v984_v5 = vrot.slane %v885_v28, 1  ;;  %v24647_v60 = vrot.slane %v20153_v42, 5 }
  0x57   : > { %1794 = vmatpush1.bf16.msra.mxu1 %v18194_v46  ;;  %1535 = vmatprep.mubr.bf16.mxu1 %v1071_v55  ;;  %v993_v46 = vsel %vm953_vm1, %v988_v32, %v992_v33  ;;  %v887_v55 = vld [vmem:[#allocation2 + $0xb0] sm:$0x1]  ;;  %v985_v8 = vrot.slane %v20116_v45, 1  ;;  %v998_v16 = vrot.slane %v20133_v62, 1  ;;  %v1002_v32 = vrot.slane %v892_v0, 1  ;;  %v20150_v33 = vld [vmem:[%s20021_s21 + $0x48] sm:$0xff] }
  0x58   : > { %1795 = vmatprep.subr.bf16.mxu1 %v18199_v12  ;;  %v1073_v4 = vpack.c.bf16 %v993_v46, %v989_v41  ;;  %v990_v37 = vrot.slane %v887_v55, 1  ;;  %v997_v12 = vrot.slane %v890_v57, 1  ;;  %v20158_v59 = vld [vmem:[%s20021_s21 + $0x40] sm:$0xff]  ;;  %v20161_v41 = vld [vmem:[%s20021_s21 + $0x50] sm:$0xff]  ;;  %v20174_v57 = vsel %vm391_vm0, %v416_v9, %v418_v10  ;;  %681 = vst [vmem:[#allocation3 + $0x88] sm:$0x7] %v24647_v60 }
  0x59   : > { %v24644_v28 = vrot.slane %v20158_v59, 5  ;;  %v986_v46 = vsel %vm953_vm1, %v984_v5, %v985_v8  ;;  %v889_v0 = vld [vmem:[#allocation2 + $0xc0] sm:$0xfe]  ;;  %v1003_v9 = vsel %vm953_vm1, %v998_v16, %v1002_v32  ;;  %v891_v10 = vld [vmem:[#allocation2 + $0xe0] sm:$0x1]  ;;  %v995_v14 = vrot.slane %v20174_v57, 1 }
  0x5a   : > { %v991_v55 = vsel %vm953_vm1, %v985_v8, %v990_v37  ;;  %v18208_v7 = vld [vmem:[%s24630_s2 + $0x864] ss:$8 sps:$4 sm:$0xff]   ;;  %v999_v6 = vsel %vm953_vm1, %v997_v12, %v998_v16  ;;  %v896_v5 = vld [vmem:[#allocation2 + $0x118] sm:$0x1]  ;;  %v18211_v12 = vld [vmem:[%s24630_s2 + $0x874] ss:$8 sps:$4 sm:$0xff]  }
  0x5b   : > { %1796 = vmatpush1.bf16.msra.mxu1 %v18197_v40  ;;  %v24646_v40 = vrot.slane %v20150_v33, 5  ;;  %676 = vst [vmem:[#allocation3 + $0x60] sm:$0xf8] %v24644_v28  ;;  %v20201_v8 = vld [vmem:[%s20021_s21 + $0x68] sm:$0xff]  ;;  %v1072_v37 = vpack.c.bf16 %v991_v55, %v986_v46  ;;  %v994_v15 = vrot.slane %v889_v0, 1  ;;  %v20208_v16 = vld [vmem:[%s20021_s21 + $0x78] sm:$0xff] }
  0x5c   : > { %1797 = vmatprep.subr.bf16.mxu1 %v18202_v39  ;;  %v18203_v39 = vld [vmem:[%s24630_s2 + $0x850] ss:$8 sps:$4 sm:$0xff]   ;;  %v24649_v32 = vrot.slane %v20201_v8, 5  ;;  %v24655_v28 = vrot.slane %v20208_v16, 5  ;;  %v18212_v21 = vld [vmem:[%s24630_s2 + $0x880] ss:$8 sps:$4 sm:$0xff]  }
  0x5d   : > { %677 = vst [vmem:[#allocation3 + $0x68] sm:$0xf8] %v24646_v40  ;;  %v20216_v46 = vld [vmem:[%s20021_s21 + $0x70] sm:$0xff]  ;;  %v1012_v40 = vrot.slane %v896_v5, 1 }
  0x5e   : > { %1536 = vmatmul.mubr.bf16.gmra.mrb[8].mxu1 %v1070_v58  ;;  %v24645_v58 = vrot.slane %v20161_v41, 5  ;;  %683 = vst [vmem:[#allocation3 + $0x98] sm:$0xf8] %v24649_v32  ;;  %687 = vst [vmem:[#allocation3 + $0xb8] sm:$0x7] %v24655_v28  ;;  %v20265_v23 = vld [vmem:[%s20021_s21 + $0x90] sm:$0xff] }
  0x5f   : > { %1798 = vmatpush1.bf16.msra.mxu1 %v18200_v11  ;;  %1545 = vmatprep.mubr.bf16.mxu1 %v1073_v4  ;;  %v18206_v11 = vld [vmem:[%s24630_s2 + $0x860] ss:$8 sps:$4 sm:$0xff]   ;;  %v894_v4 = vld [vmem:[#allocation2 + $0xf8] sm:$0xfe]  ;;  %v893_v5 = vld [vmem:[#allocation2 + $0xf0] sm:$0xfe] }
  0x60   : > { %1799 = vmatprep.subr.bf16.mxu1 %v18205_v3  ;;  %v20196_v3 = vsel %vm391_vm0, %v423_v17, %v426_v20  ;;  %680 = vst [vmem:[#allocation3 + $0x80] sm:$0x7] %v24645_v58  ;;  %v1075_v17 = vpack.c.bf16 %v1003_v9, %v999_v6  ;;  %v1000_v20 = vrot.slane %v891_v10, 1  ;;  %v20213_v58 = vld [vmem:[%s20021_s21 + $0x60] sm:$0xff]  ;;  %v1007_v55 = vrot.slane %v894_v4, 1  ;;  %v20312_v25 = vld [vmem:[%s20021_s21 + $0xb0] sm:$0xff] }
  0x61   : > { %v1008_v0 = vrot.slane %v20196_v3, 1  ;;  %v24648_v60 = vrot.slane %v20213_v58, 5  ;;  %v18209_v6 = vld [vmem:[%s24630_s2 + $0x870] ss:$8 sps:$4 sm:$0xff]   ;;  %v996_v9 = vsel %vm953_vm1, %v994_v15, %v995_v14  ;;  %v18214_v4 = vld [vmem:[%s24630_s2 + $0x884] ss:$8 sps:$4 sm:$0xff]   ;;  %v20247_v15 = vsel %vm391_vm0, %v422_v35, %v424_v44 }
  0x62   : > { %v1001_v10 = vsel %vm953_vm1, %v995_v14, %v1000_v20  ;;  %v898_v14 = vld [vmem:[#allocation2 + $0x128] sm:$0xfe]  ;;  %v20250_v20 = vld [vmem:[%s20021_s21 + $0x98] sm:$0xff]  ;;  %v24652_v24 = vrot.slane %v20265_v23, 5  ;;  %v20309_v28 = vld [vmem:[%s20021_s21 + $0xa0] sm:$0xff] }
  0x63   : > { %1800 = vmatpush1.bf16.msra.mxu1 %v18203_v39  ;;  %v24654_v39 = vrot.slane %v20216_v46, 5  ;;  %682 = vst [vmem:[#allocation3 + $0x90] sm:$0xf8] %v24648_v60  ;;  %v1009_v60 = vsel %vm953_vm1, %v1007_v55, %v1008_v0  ;;  %v24653_v30 = vrot.slane %v20250_v20, 5  ;;  %v1074_v35 = vpack.c.bf16 %v1001_v10, %v996_v9  ;;  %v18217_v9 = vld [vmem:[%s24630_s2 + $0x894] ss:$8 sps:$4 sm:$0xff]  }
  0x64   : > { %1801 = vmatprep.subr.bf16.mxu1 %v18208_v7  ;;  %v20231_v7 = vld [vmem:[%s20021_s21 + $0x88] sm:$0xff]  ;;  %v1005_v55 = vrot.slane %v20247_v15, 1  ;;  %v1017_v10 = vrot.slane %v898_v14, 1  ;;  %692 = vst [vmem:[#allocation3 + $0xe0] sm:$0x7] %v24652_v24  ;;  %v24670_v24 = vrot.slane %v19963_v61, 5 }
  0x65   : > { %686 = vst [vmem:[#allocation3 + $0xb0] sm:$0x7] %v24654_v39  ;;  %v24650_v32 = vrot.slane %v20231_v7, 5  ;;  %693 = vst [vmem:[#allocation3 + $0xe8] sm:$0x7] %v24653_v30  ;;  %v24671_v30 = vrot.slane %v19960_v54, 5 }
  0x66   : > { %1546 = vmatmul.mubr.bf16.gmra.mrb[12].mxu1 %v1072_v37  ;;  %v895_v37 = vld [vmem:[#allocation2 + $0x110] sm:$0x1]  ;;  %v24657_v54 = vrot.slane %v20309_v28, 5  ;;  %v24659_v61 = vrot.slane %v20312_v25, 5 }
  0x67   : > { %1802 = vmatpush1.bf16.msra.mxu1 %v18206_v11  ;;  %1555 = vmatprep.mubr.bf16.mxu1 %v1075_v17  ;;  %v1013_v11 = vsel %vm953_vm1, %v1008_v0, %v1012_v40  ;;  %v900_v17 = vld [vmem:[#allocation2 + $0x148] sm:$0x1]  ;;  %v20262_v40 = vld [vmem:[%s20021_s21 + $0x80] sm:$0xff]  ;;  %689 = vst [vmem:[#allocation3 + $0xc8] sm:$0xf8] %v24650_v32  ;;  %v1010_v0 = vrot.slane %v895_v37, 1  ;;  %v20305_v39 = vsel %vm391_vm0, %v24671_v30, %v24670_v24 }
  0x68   : > { %1803 = vmatprep.subr.bf16.mxu1 %v18211_v12  ;;  %v20258_v12 = vsel %vm391_vm0, %v429_v49, %v432_v53  ;;  %v24651_v44 = vrot.slane %v20262_v40, 5  ;;  %v1077_v49 = vpack.c.bf16 %v1013_v11, %v1009_v60  ;;  %v1004_v53 = vrot.slane %v893_v5, 1  ;;  %v20286_v60 = vld [vmem:[%s20021_s21 + $0xa8] sm:$0xff]  ;;  %v20292_v5 = vld [vmem:[%s20021_s21 + $0xb8] sm:$0xff]  ;;  %v897_v11 = vld [vmem:[#allocation2 + $0x120] sm:$0xfe] }
  0x69   : > { %24669 = vst [vmem:[#allocation4_spill] sm:$0xff] %v20258_v12  ;;  %v1022_v32 = vrot.slane %v900_v17, 1  ;;  %v18220_v37 = vld [vmem:[%s24630_s2 + $0x8a4] ss:$8 sps:$4 sm:$0xff]   ;;  %v24658_v14 = vrot.slane %v20286_v60, 5  ;;  %24672 = vst [vmem:[#allocation5_spill] sm:$0xff] %v20305_v39 }
  0x6a   : > { %688 = vst [vmem:[#allocation3 + $0xc0] sm:$0xf8] %v24651_v44  ;;  %v1006_v17 = vsel %vm953_vm1, %v1004_v53, %v1005_v55  ;;  %v1011_v44 = vsel %vm953_vm1, %v1005_v55, %v1010_v0  ;;  %v899_v53 = vld [vmem:[#allocation2 + $0x140] sm:$0x1]  ;;  %v24673_v30 = vrot.slane %v19988_v34, 5  ;;  %v353_v56 = vld [vmem:[%s20021_s21 + $0xd0] sm:$0xff] }
  0x6b   : > { %1804 = vmatpush1.bf16.msra.mxu1 %v18209_v6  ;;  %v1018_v6 = vrot.slane %v20258_v12, 1  ;;  %695 = vst [vmem:[#allocation3 + $0xf8] sm:$0xf8] %v24658_v14  ;;  %v902_v55 = vld [vmem:[#allocation2 + $0x158] sm:$0xfe] }
  0x6c   : > { %1805 = vmatprep.subr.bf16.mxu1 %v18214_v4  ;;  %v18215_v4 = vld [vmem:[%s24630_s2 + $0x890] ss:$8 sps:$4 sm:$0xff]   ;;  %v20325_v24 = vsel %vm391_vm0, %v24673_v30, %v438_v51  ;;  %694 = vst [vmem:[#allocation3 + $0xf0] sm:$0xf8] %v24657_v54  ;;  %698 = vst [vmem:[#allocation3 + $0x110] sm:$0x7] %v24659_v61 }
  0x6d   : > { %24674 = vst [vmem:[#allocation6_spill] sm:$0xff] %v20325_v24  ;;  %v904_v0 = vld [vmem:[#allocation2 + $0x178] sm:$0x1]  ;;  %v18223_v34 = vld [vmem:[%s24630_s2 + $0x8b4] ss:$8 sps:$4 sm:$0xff]   ;;  %v1014_v51 = vrot.slane %v897_v11, 1 }
  0x6e   : > { %1556 = vmatmul.mubr.bf16.gmra.mrb[16].mxu1 %v1074_v35  ;;  %v24660_v35 = vrot.slane %v20292_v5, 5  ;;  %v1032_v30 = vrot.slane %v904_v0, 1  ;;  %v20342_v54 = vld [vmem:[%s20021_s21 + $0xc8] sm:$0xff]  ;;  %v20345_v14 = vld [vmem:[%s20021_s21 + $0xd8] sm:$0xff]  ;;  %v901_v61 = vld [vmem:[#allocation2 + $0x150] sm:$0xfe] }
  0x6f   : > { %1806 = vmatpush1.bf16.msra.mxu1 %v18212_v21  ;;  %1565 = vmatprep.mubr.bf16.mxu1 %v1077_v49  ;;  %v1019_v21 = vsel %vm953_vm1, %v1017_v10, %v1018_v6  ;;  %v1023_v49 = vsel %vm953_vm1, %v1018_v6, %v1022_v32  ;;  %v1076_v32 = vpack.c.bf16 %v1011_v44, %v1006_v17  ;;  %v1015_v44 = vrot.slane %v20305_v39, 1  ;;  %v18221_v11 = vld [vmem:[%s24630_s2 + $0x8b0] ss:$8 sps:$4 sm:$0xff]  }
  0x70   : > { %1807 = vmatprep.subr.bf16.mxu1 %v18217_v9  ;;  %699 = vst [vmem:[#allocation3 + $0x118] sm:$0x7] %v24660_v35  ;;  %v18218_v9 = vld [vmem:[%s24630_s2 + $0x8a0] ss:$8 sps:$4 sm:$0xff]   ;;  %v1079_v43 = vpack.c.bf16 %v1023_v49, %v1019_v21  ;;  %v1020_v10 = vrot.slane %v899_v53, 1  ;;  %v1027_v6 = vrot.slane %v902_v55, 1 }
  0x71   : > { %v1028_v17 = vrot.slane %v20325_v24, 1  ;;  %v351_v35 = vld [vmem:[%s20021_s21 + $0xc0] sm:$0xff]  ;;  %v1016_v21 = vsel %vm953_vm1, %v1014_v51, %v1015_v44  ;;  %v24675_v53 = vrot.slane %v20015_v63, 5  ;;  %v24676_v55 = vrot.slane %v20012_v52, 5  ;;  %v357_v24 = vld [vmem:[%s20021_s21 + $0xf0] sm:$0xff] }
  0x72   : > { %v1021_v49 = vsel %vm953_vm1, %v1015_v44, %v1020_v10  ;;  %v18224_v51 = vld [vmem:[%s24630_s2 + $0x8c0] ss:$8 sps:$4 sm:$0xff]   ;;  %v24678_v44 = vrot.slane %v20058_v18, 5  ;;  %v18229_v18 = vld [vmem:[%s24630_s2 + $0x8d4] ss:$8 sps:$4 sm:$0xff]  }
  0x73   : > { %1808 = vmatpush1.bf16.msra.mxu1 %v18215_v4  ;;  %v24662_v4 = vrot.slane %v20342_v54, 5  ;;  %v20361_v0 = vsel %vm391_vm0, %v24676_v55, %v24675_v53  ;;  %v1029_v63 = vsel %vm953_vm1, %v1027_v6, %v1028_v17  ;;  %v1033_v52 = vsel %vm953_vm1, %v1028_v17, %v1032_v30  ;;  %v1083_v10 = vld [vmem:[#allocation3 + $0x8] sm:$0xfe]  ;;  %v1085_v53 = vld [vmem:[#allocation3 + $0x28] sm:$0x1] }
  0x74   : > { %1809 = vmatprep.subr.bf16.mxu1 %v18220_v37  ;;  %v604_v37 = vrot.slane %v351_v35, 5  ;;  %v24677_v35 = vrot.slane %v20345_v14, 5  ;;  %v20386_v17 = vld [vmem:[%s20021_s21 + $0xe8] sm:$0xff]  ;;  %v1078_v30 = vpack.c.bf16 %v1021_v49, %v1016_v21  ;;  %v1024_v55 = vrot.slane %v901_v61, 1 }
  0x75   : > { %701 = vst [vmem:[#allocation3 + $0x128] sm:$0xf8] %v24662_v4  ;;  %v611_v4 = vrot.slane %v20386_v17, 5  ;;  %v1165_v21 = vrot.slane %v1083_v10, 1  ;;  %v1170_v39 = vrot.slane %v1085_v53, 1  ;;  %v612_v61 = vrot.slane %v357_v24, 5 }
  0x76   : > { %1566 = vmatmul.mubr.bf16.gmra.mrb[20].mxu1 %v1076_v32  ;;  %705 = vst [vmem:[#allocation3 + $0x148] sm:$0x7] %v24677_v35  ;;  %v606_v32 = vrot.slane %v353_v56, 5  ;;  %700 = vst [vmem:[#allocation3 + $0x120] sm:$0xf8] %v604_v37  ;;  %v24679_v56 = vrot.slane %v20038_v2, 5 }
  0x77   : > { %1810 = vmatpush1.bf16.msra.mxu1 %v18218_v9  ;;  %1575 = vmatprep.mubr.bf16.mxu1 %v1079_v43  ;;  %v18226_v9 = vld [vmem:[%s24630_s2 + $0x8c4] ss:$8 sps:$4 sm:$0xff]   ;;  %v903_v43 = vld [vmem:[#allocation2 + $0x170] sm:$0x1]  ;;  %v1025_v2 = vrot.slane %v20361_v0, 1  ;;  %v20393_v35 = vld [vmem:[%s20021_s21 + $0xf8] sm:$0xff] }
  0x78   : > { %1811 = vmatprep.subr.bf16.mxu1 %v18223_v34  ;;  %v20380_v34 = vsel %vm391_vm0, %v24679_v56, %v24678_v44  ;;  %v20383_v6 = vsel %vm391_vm0, %v604_v37, %v606_v32  ;;  %704 = vst [vmem:[#allocation3 + $0x140] sm:$0x7] %v606_v32  ;;  %v1081_v44 = vpack.c.bf16 %v1033_v52, %v1029_v63  ;;  %v1030_v56 = vrot.slane %v903_v43, 1  ;;  %v355_v32 = vld [vmem:[%s20021_s21 + $0xe0] sm:$0xff] }
  0x79   : > { %v614_v37 = vrot.slane %v20393_v35, 5  ;;  %v1166_v49 = vrot.slane %v20380_v34, 1  ;;  %v610_v12 = vrot.slane %v355_v32, 5  ;;  %707 = vst [vmem:[#allocation3 + $0x158] sm:$0xf8] %v611_v4  ;;  %v24680_v10 = vrot.slane %v20065_v36, 5 }
  0x7a   : > { %v1031_v63 = vsel %vm953_vm1, %v1025_v2, %v1030_v56  ;;  %v18232_v52 = vld [vmem:[%s24630_s2 + $0x8e4] ss:$8 sps:$4 sm:$0xff]   ;;  %710 = vst [vmem:[#allocation3 + $0x170] sm:$0x7] %v612_v61  ;;  %v24681_v53 = vrot.slane %v20062_v50, 5 }
  0x7b   : > { %1812 = vmatpush1.bf16.msra.mxu1 %v18221_v11  ;;  %711 = vst [vmem:[#allocation3 + $0x178] sm:$0x7] %v614_v37  ;;  %706 = vst [vmem:[#allocation3 + $0x150] sm:$0xf8] %v610_v12  ;;  %v18227_v11 = vld [vmem:[%s24630_s2 + $0x8d0] ss:$8 sps:$4 sm:$0xff]   ;;  %v20413_v43 = vsel %vm391_vm0, %v610_v12, %v612_v61  ;;  %v1167_v24 = vsel %vm953_vm1, %v1165_v21, %v1166_v49 }
  0x7c   : > { %1813 = vmatprep.subr.bf16.mxu1 %v18226_v9  ;;  %v1026_v9 = vsel %vm953_vm1, %v1024_v55, %v1025_v2  ;;  %v1082_v55 = vld [vmem:[#allocation3] sm:$0xfe]  ;;  %v1084_v2 = vld [vmem:[#allocation3 + $0x20] sm:$0x1]  ;;  %v24683_v12 = vrot.slane %v20097_v29, 5 }
  0x7d   : > { %v1089_v32 = vld [vmem:[#allocation3 + $0x58] sm:$0x1]  ;;  %v1080_v21 = vpack.c.bf16 %v1031_v63, %v1026_v9  ;;  %v18230_v50 = vld [vmem:[%s24630_s2 + $0x8e0] ss:$8 sps:$4 sm:$0xff]   ;;  %v1168_v61 = vrot.slane %v1084_v2, 1  ;;  %v24685_v2 = vrot.slane %v20107_v27, 5 }
  0x7e   : > { %1576 = vmatmul.mubr.bf16.gmra.mrb[24].mxu1 %v1078_v30  ;;  %v20422_v30 = vsel %vm391_vm0, %v24681_v53, %v24680_v10  ;;  %v18235_v29 = vld [vmem:[%s24630_s2 + $0x8f4] ss:$8 sps:$4 sm:$0xff]   ;;  %v1180_v53 = vrot.slane %v1089_v32, 1  ;;  %v24686_v32 = vrot.slane %v20153_v42, 5  ;;  %v18274_v17 = vld [vmem:[%s24630_s2 + $0xc4] ss:$8 sps:$4 sm:$0xff]  }
  0x7f   : > { %1814 = vmatpush1.bf16.msra.mxu1 %v18224_v51  ;;  %1585 = vmatprep.mubr.bf16.mxu1 %v1081_v44  ;;  %v1171_v51 = vsel %vm953_vm1, %v1166_v49, %v1170_v39  ;;  %v24682_v44 = vrot.slane %v20103_v22, 5  ;;  %v1162_v39 = vrot.slane %v1082_v55, 1  ;;  %v1163_v49 = vrot.slane %v20422_v30, 1  ;;  %v18241_v27 = vld [vmem:[%s24630_s2 + $0x14] ss:$8 sps:$4 sm:$0xff]  }
  0x80   : > { %1815 = vmatprep.subr.bf16.mxu1 %v18229_v18  ;;  %v1087_v18 = vld [vmem:[#allocation3 + $0x38] sm:$0xfe]  ;;  %v1275_v36 = vpack.c.bf16 %v1171_v51, %v1167_v24  ;;  %v24684_v55 = vrot.slane %v20120_v48, 5  ;;  %v18236_v48 = vld [vmem:[%s24630_s2] ss:$8 sps:$4 sm:$0xff]  }
  0x81   : > { %v20429_v56 = vsel %vm391_vm0, %v24683_v12, %v24682_v44  ;;  %v1175_v22 = vrot.slane %v1087_v18, 1  ;;  %v1164_v9 = vsel %vm953_vm1, %v1162_v39, %v1163_v49  ;;  %v1169_v63 = vsel %vm953_vm1, %v1163_v49, %v1168_v61  ;;  %v1086_v12 = vld [vmem:[#allocation3 + $0x30] sm:$0xfe]  ;;  %v1088_v18 = vld [vmem:[#allocation3 + $0x50] sm:$0x1] }
  0x82   : > { %v1176_v10 = vrot.slane %v20429_v56, 1  ;;  %v20454_v44 = vsel %vm391_vm0, %v24685_v2, %v24684_v55  ;;  %v1093_v39 = vld [vmem:[#allocation3 + $0x88] sm:$0x1]  ;;  %v1274_v49 = vpack.c.bf16 %v1169_v63, %v1164_v9  ;;  %v18239_v9 = vld [vmem:[%s24630_s2 + $0x10] ss:$8 sps:$4 sm:$0xff]   ;;  %v24688_v55 = vrot.slane %v20161_v41, 5 }
  0x83   : > { %1816 = vmatpush1.bf16.msra.mxu1 %v18227_v11  ;;  %v18233_v11 = vld [vmem:[%s24630_s2 + $0x8f0] ss:$8 sps:$4 sm:$0xff]   ;;  %v1173_v42 = vrot.slane %v20454_v44, 1  ;;  %v24689_v2 = vrot.slane %v20158_v59, 5  ;;  %v18242_v41 = vld [vmem:[%s24630_s2 + $0x20] ss:$8 sps:$4 sm:$0xff]  }
  0x84   : > { %1817 = vmatprep.subr.bf16.mxu1 %v18232_v52  ;;  %v18238_v52 = vld [vmem:[%s24630_s2 + $0x4] ss:$8 sps:$4 sm:$0xff]   ;;  %v1177_v24 = vsel %vm953_vm1, %v1175_v22, %v1176_v10  ;;  %v1181_v51 = vsel %vm953_vm1, %v1176_v10, %v1180_v53  ;;  %v1190_v53 = vrot.slane %v1093_v39, 1  ;;  %v18247_v59 = vld [vmem:[%s24630_s2 + $0x34] ss:$8 sps:$4 sm:$0xff]  }
  0x85   : > { %v1277_v61 = vpack.c.bf16 %v1181_v51, %v1177_v24  ;;  %v18244_v24 = vld [vmem:[%s24630_s2 + $0x24] ss:$8 sps:$4 sm:$0xff]  }
  0x86   : > { %1586 = vmatmul.mubr.bf16.gmra.mrb[28].mxu1 %v1080_v21  ;;  %v24687_v21 = vrot.slane %v20150_v33, 5  ;;  %v1178_v33 = vrot.slane %v1088_v18, 1  ;;  %v1090_v18 = vld [vmem:[#allocation3 + $0x60] sm:$0xfe] }
  0x87   : > { %1818 = vmatpush1.bf16.msra.mxu1 %v18230_v50  ;;  %1821 = vmatprep.mubr.bf16.mxu1 %v1275_v36  ;;  %v1091_v36 = vld [vmem:[#allocation3 + $0x68] sm:$0xfe] }
  0x88   : > { %1819 = vmatprep.subr.bf16.mxu1 %v18235_v29  ;;  %v20461_v50 = vsel %vm391_vm0, %v24687_v21, %v24686_v32  ;;  %v1172_v29 = vrot.slane %v1086_v12, 1  ;;  %v1185_v22 = vrot.slane %v1091_v36, 1  ;;  %v1179_v63 = vsel %vm953_vm1, %v1173_v42, %v1178_v33  ;;  %v1092_v32 = vld [vmem:[#allocation3 + $0x80] sm:$0x1] }
  0x89   : > { %v1186_v10 = vrot.slane %v20461_v50, 1  ;;  %v20486_v12 = vsel %vm391_vm0, %v24689_v2, %v24688_v55  ;;  %v24690_v21 = vrot.slane %v20208_v16, 5  ;;  %v24691_v36 = vrot.slane %v20201_v8, 5  ;;  %v1094_v2 = vld [vmem:[#allocation3 + $0x90] sm:$0xfe] }
  0x8a   : > { %v1183_v16 = vrot.slane %v20486_v12, 1  ;;  %v1188_v8 = vrot.slane %v1092_v32, 1  ;;  %v1099_v32 = vld [vmem:[#allocation3 + $0xc8] sm:$0xfe] }
  0x8b   : > { %1820 = vmatpush1.bf16.msra.mxu1 %v18233_v11  ;;  %v1174_v11 = vsel %vm953_vm1, %v1172_v29, %v1173_v42  ;;  %v1191_v51 = vsel %vm953_vm1, %v1186_v10, %v1190_v53  ;;  %v20493_v39 = vsel %vm391_vm0, %v24691_v36, %v24690_v21  ;;  %v1182_v29 = vrot.slane %v1090_v18, 1  ;;  %v1096_v18 = vld [vmem:[#allocation3 + $0xb0] sm:$0x1] }
  0x8c   : > { %2062 = vmatprep.subr.bf16.mxu1 %v18238_v52  ;;  %v1187_v52 = vsel %vm953_vm1, %v1185_v22, %v1186_v10  ;;  %v1196_v33 = vrot.slane %v20493_v39, 1  ;;  %v18245_v10 = vld [vmem:[%s24630_s2 + $0x30] ss:$8 sps:$4 sm:$0xff]   ;;  %v24694_v21 = vrot.slane %v20250_v20, 5  ;;  %v24695_v36 = vrot.slane %v20231_v7, 5 }
  0x8d   : > { %v1184_v53 = vsel %vm953_vm1, %v1182_v29, %v1183_v16  ;;  %v18253_v7 = vld [vmem:[%s24630_s2 + $0x54] ss:$8 sps:$4 sm:$0xff]   ;;  %v1205_v20 = vrot.slane %v1099_v32, 1 }
  0x8e   : > { %1822 = vmatmul.mubr.bf16.vlgmr.msra.gmra.mrb[32].mxu1 %v1274_v49  ;;  %v1095_v49 = vld [vmem:[#allocation3 + $0x98] sm:$0xfe] }
  0x8f   : > { %2063 = vmatpush1.bf16.msra.mxu1 %v18236_v48  ;;  %1831 = vmatprep.mubr.bf16.mxu1 %v1277_v61  ;;  %v1097_v48 = vld [vmem:[#allocation3 + $0xb8] sm:$0x1]  ;;  %v1279_v61 = vpack.c.bf16 %v1191_v51, %v1187_v52  ;;  %v1195_v42 = vrot.slane %v1095_v49, 1  ;;  %v24692_v52 = vrot.slane %v20216_v46, 5  ;;  %v24693_v51 = vrot.slane %v20213_v58, 5 }
  0x90   : > { %2064 = vmatprep.subr.bf16.mxu1 %v18241_v27  ;;  %v1276_v27 = vpack.c.bf16 %v1179_v63, %v1174_v11  ;;  %v1200_v22 = vrot.slane %v1097_v48, 1  ;;  %v18250_v11 = vld [vmem:[%s24630_s2 + $0x44] ss:$8 sps:$4 sm:$0xff]   ;;  %v20525_v49 = vsel %vm391_vm0, %v24695_v36, %v24694_v21  ;;  %v1101_v48 = vld [vmem:[#allocation3 + $0xe8] sm:$0x1] }
  0x91   : > { %v1197_v63 = vsel %vm953_vm1, %v1195_v42, %v1196_v33  ;;  %v20518_v55 = vsel %vm391_vm0, %v24693_v51, %v24692_v52  ;;  %v18248_v58 = vld [vmem:[%s24630_s2 + $0x40] ss:$8 sps:$4 sm:$0xff]   ;;  %v1206_v29 = vrot.slane %v20525_v49, 1  ;;  %v1103_v51 = vld [vmem:[#allocation3 + $0xf8] sm:$0xfe] }
  0x92   : > { %v1105_v21 = vld [vmem:[#allocation3 + $0x118] sm:$0x1] }
  0x93   : > { %2065 = vmatpush1.bf16.msra.mxu1 %v18239_v9  ;;  %v1189_v9 = vsel %vm953_vm1, %v1183_v16, %v1188_v8  ;;  %v1210_v16 = vrot.slane %v1101_v48, 1  ;;  %v18251_v8 = vld [vmem:[%s24630_s2 + $0x50] ss:$8 sps:$4 sm:$0xff]   ;;  %v18254_v48 = vld [vmem:[%s24630_s2 + $0x60] ss:$8 sps:$4 sm:$0xff]  }
  0x94   : > { %2066 = vmatprep.subr.bf16.mxu1 %v18244_v24  ;;  %v1201_v24 = vsel %vm953_vm1, %v1196_v33, %v1200_v22  ;;  %v18256_v22 = vld [vmem:[%s24630_s2 + $0x64] ss:$8 sps:$4 sm:$0xff]  }
  0x95   : > { %v1281_v46 = vpack.c.bf16 %v1201_v24, %v1197_v63  ;;  %v24696_v63 = vrot.slane %v20265_v23, 5  ;;  %v24697_v24 = vrot.slane %v20262_v40, 5 }
  0x96   : > { %1832 = vmatmul.mubr.bf16.gmra.mrb[36].mxu1 %v1276_v27  ;;  %v1278_v27 = vpack.c.bf16 %v1189_v9, %v1184_v53  ;;  %v1100_v53 = vld [vmem:[#allocation3 + $0xe0] sm:$0x1]  ;;  %v1207_v9 = vsel %vm953_vm1, %v1205_v20, %v1206_v29 }
  0x97   : > { %2067 = vmatpush1.bf16.msra.mxu1 %v18242_v41  ;;  %1841 = vmatprep.mubr.bf16.mxu1 %v1279_v61  ;;  %v1192_v41 = vrot.slane %v1094_v2, 1  ;;  %v1198_v61 = vrot.slane %v1096_v18, 1  ;;  %v20550_v52 = vsel %vm391_vm0, %v24697_v24, %v24696_v63  ;;  %v24698_v2 = vrot.slane %v20292_v5, 5 }
  0x98   : > { %2068 = vmatprep.subr.bf16.mxu1 %v18247_v59  ;;  %v1193_v59 = vrot.slane %v20518_v55, 1  ;;  %v24699_v18 = vrot.slane %v20286_v60, 5  ;;  %v18259_v60 = vld [vmem:[%s24630_s2 + $0x74] ss:$8 sps:$4 sm:$0xff]   ;;  %v1215_v5 = vrot.slane %v1103_v51, 1  ;;  %v24703_v63 = vrot.slane %v20342_v54, 5 }
  0x99   : > { %v1109_v51 = vld [vmem:[#allocation3 + $0x148] sm:$0x1] }
  0x9a   : > { %v1194_v42 = vsel %vm953_vm1, %v1192_v41, %v1193_v59  ;;  %v1199_v33 = vsel %vm953_vm1, %v1193_v59, %v1198_v61  ;;  %v20557_v32 = vsel %vm391_vm0, %v24699_v18, %v24698_v2  ;;  %v1220_v41 = vrot.slane %v1105_v21, 1  ;;  %v18257_v59 = vld [vmem:[%s24630_s2 + $0x70] ss:$8 sps:$4 sm:$0xff]   ;;  %v18262_v61 = vld [vmem:[%s24630_s2 + $0x84] ss:$8 sps:$4 sm:$0xff]  }
  0x9b   : > { %2069 = vmatpush1.bf16.msra.mxu1 %v18245_v10  ;;  %v1098_v10 = vld [vmem:[#allocation3 + $0xc0] sm:$0xfe]  ;;  %v1280_v36 = vpack.c.bf16 %v1199_v33, %v1194_v42  ;;  %v24700_v33 = vrot.slane %v20312_v25, 5  ;;  %v18265_v25 = vld [vmem:[%s24630_s2 + $0x94] ss:$8 sps:$4 sm:$0xff]   ;;  %v1230_v54 = vrot.slane %v1109_v51, 1 }
  0x9c   : > { %2070 = vmatprep.subr.bf16.mxu1 %v18250_v11  ;;  %v1211_v11 = vsel %vm953_vm1, %v1206_v29, %v1210_v16  ;;  %v1202_v40 = vrot.slane %v1098_v10, 1  ;;  %v1102_v29 = vld [vmem:[#allocation3 + $0xf0] sm:$0xfe]  ;;  %v1104_v16 = vld [vmem:[#allocation3 + $0x110] sm:$0x1] }
  0x9d   : > { %v1283_v23 = vpack.c.bf16 %v1211_v11, %v1207_v9  ;;  %v18260_v9 = vld [vmem:[%s24630_s2 + $0x80] ss:$8 sps:$4 sm:$0xff]   ;;  %v24702_v11 = vrot.slane %v20345_v14, 5  ;;  %v1212_v18 = vrot.slane %v1102_v29, 1  ;;  %v1112_v51 = vld [vmem:[#allocation3 + $0x170] sm:$0x1] }
  0x9e   : > { %1842 = vmatmul.mubr.bf16.gmra.mrb[40].mxu1 %v1278_v27  ;;  %v1203_v27 = vrot.slane %v20550_v52, 1 }
  0x9f   : > { %2071 = vmatpush1.bf16.msra.mxu1 %v18248_v58  ;;  %1851 = vmatprep.mubr.bf16.mxu1 %v1281_v46  ;;  %v1208_v58 = vrot.slane %v1100_v53, 1  ;;  %v1216_v46 = vrot.slane %v20557_v32, 1  ;;  %v1107_v53 = vld [vmem:[#allocation3 + $0x128] sm:$0xfe]  ;;  %v20592_v24 = vsel %vm391_vm0, %v24703_v63, %v24702_v11  ;;  %v1110_v63 = vld [vmem:[#allocation3 + $0x150] sm:$0xfe] }
  0xa0   : > { %2072 = vmatprep.subr.bf16.mxu1 %v18253_v7  ;;  %v1204_v7 = vsel %vm953_vm1, %v1202_v40, %v1203_v27  ;;  %v1226_v14 = vrot.slane %v20592_v24, 1  ;;  %v18268_v40 = vld [vmem:[%s24630_s2 + $0xa4] ss:$8 sps:$4 sm:$0xff]  }
  0xa1   : > { %v1209_v20 = vsel %vm953_vm1, %v1203_v27, %v1208_v58  ;;  %v1221_v42 = vsel %vm953_vm1, %v1216_v46, %v1220_v41  ;;  %v1106_v27 = vld [vmem:[#allocation3 + $0x120] sm:$0xfe]  ;;  %v1108_v58 = vld [vmem:[#allocation3 + $0x140] sm:$0x1]  ;;  %v1113_v41 = vld [vmem:[#allocation3 + $0x178] sm:$0x1] }
  0xa2   : > { %v1282_v2 = vpack.c.bf16 %v1209_v20, %v1204_v7  ;;  %v18266_v7 = vld [vmem:[%s24630_s2 + $0xa0] ss:$8 sps:$4 sm:$0xff]   ;;  %v20617_v20 = vsel %vm391_vm0, %v611_v4, %v614_v37  ;;  %v18269_v4 = vld [vmem:[%s24630_s2 + $0xb0] ss:$8 sps:$4 sm:$0xff]  }
  0xa3   : > { %2073 = vmatpush1.bf16.msra.mxu1 %v18251_v8  ;;  %v1217_v8 = vsel %vm953_vm1, %v1215_v5, %v1216_v46  ;;  %v1111_v46 = vld [vmem:[#allocation3 + $0x158] sm:$0xfe]  ;;  %v1236_v35 = vrot.slane %v20617_v20, 1 }
  0xa4   : > { %2074 = vmatprep.subr.bf16.mxu1 %v18256_v22  ;;  %v24701_v22 = vrot.slane %v20309_v28, 5  ;;  %v1285_v28 = vpack.c.bf16 %v1221_v42, %v1217_v8  ;;  %v1222_v42 = vrot.slane %v1106_v27, 1 }
  0xa6   : > { %1852 = vmatmul.mubr.bf16.gmra.mrb[44].mxu1 %v1280_v36  ;;  %v20582_v10 = vsel %vm391_vm0, %v24701_v22, %v24700_v33  ;;  %v1218_v36 = vrot.slane %v1104_v16, 1  ;;  %v18271_v16 = vld [vmem:[%s24630_s2 + $0xb4] ss:$8 sps:$4 sm:$0xff]   ;;  %v1223_v33 = vrot.slane %v20383_v6, 1  ;;  %v1228_v22 = vrot.slane %v1108_v58, 1 }
  0xa7   : > { %2075 = vmatpush1.bf16.msra.mxu1 %v18254_v48  ;;  %1861 = vmatprep.mubr.bf16.mxu1 %v1283_v23  ;;  %v1213_v21 = vrot.slane %v20582_v10, 1  ;;  %v1225_v48 = vrot.slane %v1107_v53, 1  ;;  %v18263_v23 = vld [vmem:[%s24630_s2 + $0x90] ss:$8 sps:$4 sm:$0xff]   ;;  %v1235_v53 = vrot.slane %v1111_v46, 1 }
  0xa8   : > { %2076 = vmatprep.subr.bf16.mxu1 %v18259_v60  ;;  %v1224_v37 = vsel %vm953_vm1, %v1222_v42, %v1223_v33  ;;  %v1229_v11 = vsel %vm953_vm1, %v1223_v33, %v1228_v22  ;;  %v18280_v58 = vld [vmem:[%s24630_s2 + $0xe4] ss:$8 sps:$4 sm:$0xff]   ;;  %v18278_v46 = vld [vmem:[%s24630_s2 + $0xe0] ss:$8 sps:$4 sm:$0xff]   ;;  %v18289_v22 = vld [vmem:[%s24630_s2 + $0x714] ss:$8 sps:$4 sm:$0xff]  }
  0xa9   : > { %v1214_v60 = vsel %vm953_vm1, %v1212_v18, %v1213_v21  ;;  %v1219_v5 = vsel %vm953_vm1, %v1213_v21, %v1218_v36  ;;  %v18272_v18 = vld [vmem:[%s24630_s2 + $0xc0] ss:$8 sps:$4 sm:$0xff]   ;;  %v1232_v36 = vrot.slane %v1110_v63, 1  ;;  %v18295_v63 = vld [vmem:[%s24630_s2 + $0x734] ss:$8 sps:$4 sm:$0xff]  }
  0xaa   : > { %v1284_v29 = vpack.c.bf16 %v1219_v5, %v1214_v60  ;;  %v713_v60 = vld [vmem:[#allocation2 + $0x8] sm:$0xff] }
  0xab   : > { %2077 = vmatpush1.bf16.msra.mxu1 %v18257_v59  ;;  %v1227_v59 = vsel %vm953_vm1, %v1225_v48, %v1226_v14  ;;  %v1233_v48 = vrot.slane %v20413_v43, 1 }
  0xac   : > { %2078 = vmatprep.subr.bf16.mxu1 %v18262_v61  ;;  %v1231_v61 = vsel %vm953_vm1, %v1226_v14, %v1230_v54  ;;  %v1238_v14 = vrot.slane %v1112_v51, 1  ;;  %v18277_v54 = vld [vmem:[%s24630_s2 + $0xd4] ss:$8 sps:$4 sm:$0xff]   ;;  %v18293_v51 = vld [vmem:[%s24630_s2 + $0x730] ss:$8 sps:$4 sm:$0xff]  }
  0xad   : > { %v1287_v8 = vpack.c.bf16 %v1231_v61, %v1227_v59  ;;  %v18283_v59 = vld [vmem:[%s24630_s2 + $0xf4] ss:$8 sps:$4 sm:$0xff]   ;;  %v18281_v61 = vld [vmem:[%s24630_s2 + $0xf0] ss:$8 sps:$4 sm:$0xff]  }
  0xae   : > { %1862 = vmatmul.mubr.bf16.gmra.mrb[48].mxu1 %v1282_v2  ;;  %v1237_v2 = vsel %vm953_vm1, %v1235_v53, %v1236_v35  ;;  %v1239_v27 = vsel %vm953_vm1, %v1233_v48, %v1238_v14  ;;  %v18287_v53 = vld [vmem:[%s24630_s2 + $0x710] ss:$8 sps:$4 sm:$0xff]  }
  0xaf   : > { %2079 = vmatpush1.bf16.msra.mxu1 %v18260_v9  ;;  %1871 = vmatprep.mubr.bf16.mxu1 %v1285_v28  ;;  %v1240_v9 = vrot.slane %v1113_v41, 1  ;;  %v1286_v28 = vpack.c.bf16 %v1229_v11, %v1224_v37  ;;  %v745_v41 = vpack.c.bf16 %v19779_v31, %v713_v60  ;;  %v18299_v14 = vld [vmem:[%s24630_s2 + $0x750] ss:$8 sps:$4 sm:$0xff]  }
  0xb0   : > { %2080 = vmatprep.subr.bf16.mxu1 %v18265_v25 }
  0xb1   : > { %v1241_v25 = vsel %vm953_vm1, %v1236_v35, %v1240_v9  ;;  %v716_v35 = vld [vmem:[#allocation2 + $0x30] sm:$0xff]  ;;  %v18292_v9 = vld [vmem:[%s24630_s2 + $0x724] ss:$8 sps:$4 sm:$0xff]  }
  0xb2   : > { %v1289_v21 = vpack.c.bf16 %v1241_v25, %v1237_v2  ;;  %v746_v37 = vpack.c.bf16 %v19981_v13, %v716_v35  ;;  %v720_v2 = vld [vmem:[#allocation2 + $0x60] sm:$0xff] }
  0xb3   : > { %2081 = vmatpush1.bf16.msra.mxu1 %v18263_v23  ;;  %v18275_v23 = vld [vmem:[%s24630_s2 + $0xd0] ss:$8 sps:$4 sm:$0xff]   ;;  %v18298_v25 = vld [vmem:[%s24630_s2 + $0x744] ss:$8 sps:$4 sm:$0xff]   ;;  %v18314_v35 = vld [vmem:[%s24630_s2 + $0x7a0] ss:$8 sps:$4 sm:$0xff]  }
  0xb4   : > { %2082 = vmatprep.subr.bf16.mxu1 %v18268_v40  ;;  %v1234_v40 = vsel %vm953_vm1, %v1232_v36, %v1233_v48  ;;  %v18301_v48 = vld [vmem:[%s24630_s2 + $0x754] ss:$8 sps:$4 sm:$0xff]  }
  0xb5   : > { %v1288_v5 = vpack.c.bf16 %v1239_v27, %v1234_v40  ;;  %v729_v40 = vld [vmem:[#allocation2 + $0xc8] sm:$0xff] }
  0xb6   : > { %1872 = vmatmul.mubr.bf16.gmra.mrb[52].mxu1 %v1284_v29  ;;  %v18286_v29 = vld [vmem:[%s24630_s2 + $0x704] ss:$8 sps:$4 sm:$0xff]   ;;  %v18302_v27 = vld [vmem:[%s24630_s2 + $0x760] ss:$8 sps:$4 sm:$0xff]   ;;  %v753_v60 = vpack.c.bf16 %v20133_v62, %v729_v40 }
  0xb7   : > { %2083 = vmatpush1.bf16.msra.mxu1 %v18266_v7  ;;  %1881 = vmatprep.mubr.bf16.mxu1 %v1287_v8  ;;  %v712_v7 = vld [vmem:[#allocation2] sm:$0xff]  ;;  %v761_v40 = vld [vmem:[#allocation3 + $0x8] sm:$0xff] }
  0xb8   : > { %2084 = vmatprep.subr.bf16.mxu1 %v18271_v16  ;;  %v717_v16 = vld [vmem:[#allocation2 + $0x38] sm:$0xff]  ;;  %v18284_v8 = vld [vmem:[%s24630_s2 + $0x700] ss:$8 sps:$4 sm:$0xff]   ;;  %v744_v42 = vpack.c.bf16 %v19925_v38, %v712_v7 }
  0xb9   : > { %v747_v33 = vpack.c.bf16 %v19937_v19, %v717_v16  ;;  %v18308_v7 = vld [vmem:[%s24630_s2 + $0x780] ss:$8 sps:$4 sm:$0xff]  }
  0xbb   : > { %2085 = vmatpush1.bf16.msra.mxu1 %v18269_v4  ;;  %v721_v4 = vld [vmem:[#allocation2 + $0x68] sm:$0xff] }
  0xbc   : > { %2086 = vmatprep.subr.bf16.mxu1 %v18274_v17  ;;  %v18290_v17 = vld [vmem:[%s24630_s2 + $0x720] ss:$8 sps:$4 sm:$0xff]   ;;  %v749_v11 = vpack.c.bf16 %v20006_v47, %v721_v4 }
  0xbd   : > { %v24704_v4 = vld [vmem:[#allocation4_spill] sm:$0xff] }
  0xbe   : > { %1882 = vmatmul.mubr.bf16.gmra.mrb[56].mxu1 %v1286_v28  ;;  %v725_v28 = vld [vmem:[#allocation2 + $0x98] sm:$0xff] }
  0xbf   : > { %2087 = vmatpush1.bf16.msra.mxu1 %v18272_v18  ;;  %1891 = vmatprep.mubr.bf16.mxu1 %v1289_v21  ;;  %v18296_v18 = vld [vmem:[%s24630_s2 + $0x740] ss:$8 sps:$4 sm:$0xff]   ;;  %v748_v21 = vpack.c.bf16 %v20055_v26, %v720_v2  ;;  %v751_v36 = vpack.c.bf16 %v20072_v1, %v725_v28  ;;  %v741_v2 = vld [vmem:[#allocation2 + $0x158] sm:$0xff] }
  0xc0   : > { %2088 = vmatprep.subr.bf16.mxu1 %v18277_v54  ;;  %v724_v54 = vld [vmem:[#allocation2 + $0x90] sm:$0xff]  ;;  %v24705_v28 = vld [vmem:[#allocation5_spill] sm:$0xff] }
  0xc3   : > { %2089 = vmatpush1.bf16.msra.mxu1 %v18275_v23  ;;  %v18304_v23 = vld [vmem:[%s24630_s2 + $0x764] ss:$8 sps:$4 sm:$0xff]  }
  0xc4   : > { %2090 = vmatprep.subr.bf16.mxu1 %v18280_v58  ;;  %v750_v58 = vpack.c.bf16 %v20116_v45, %v724_v54  ;;  %v740_v54 = vld [vmem:[#allocation2 + $0x150] sm:$0xff] }
  0xc6   : > { %1892 = vmatmul.mubr.bf16.gmra.mrb[60].mxu1 %v1288_v5  ;;  %v18307_v5 = vld [vmem:[%s24630_s2 + $0x774] ss:$8 sps:$4 sm:$0xff]  }
  0xc7   : > { %2091 = vmatpush1.bf16.msra.mxu1 %v18278_v46  ;;  %2094 = vmatprep.mubr.bf16.mxu1 %v745_v41  ;;  %v18305_v46 = vld [vmem:[%s24630_s2 + $0x770] ss:$8 sps:$4 sm:$0xff]   ;;  %v728_v41 = vld [vmem:[#allocation2 + $0xc0] sm:$0xff] }
  0xc8   : > { %2092 = vmatprep.subr.bf16.mxu1 %v18283_v59  ;;  %v18310_v59 = vld [vmem:[%s24630_s2 + $0x784] ss:$8 sps:$4 sm:$0xff]  }
  0xcb   : > { %2093 = vmatpush1.bf16.msra.mxu1 %v18281_v61  ;;  %v733_v61 = vld [vmem:[#allocation2 + $0xf8] sm:$0xff] }
  0xcc   : > { %2335 = vmatprep.subr.bf16.mxu1 %v18286_v29  ;;  %v752_v29 = vpack.c.bf16 %v20174_v57, %v728_v41  ;;  %v755_v16 = vpack.c.bf16 %v20196_v3, %v733_v61  ;;  %v760_v41 = vld [vmem:[#allocation3] sm:$0xff]  ;;  %v765_v61 = vld [vmem:[#allocation3 + $0x38] sm:$0xff] }
  0xce   : > { %2095 = vmatmul.mubr.bf16.vlgmr.msra.gmra.mrb[0].mxu1 %v744_v42  ;;  %v18311_v42 = vld [vmem:[%s24630_s2 + $0x790] ss:$8 sps:$4 sm:$0xff]  }
  0xcf   : > { %2336 = vmatpush1.bf16.msra.mxu1 %v18284_v8  ;;  %2104 = vmatprep.mubr.bf16.mxu1 %v747_v33  ;;  %v18313_v8 = vld [vmem:[%s24630_s2 + $0x794] ss:$8 sps:$4 sm:$0xff]  }
  0xd0   : > { %2337 = vmatprep.subr.bf16.mxu1 %v18289_v22  ;;  %v732_v33 = vld [vmem:[#allocation2 + $0xf0] sm:$0xff]  ;;  %v18316_v22 = vld [vmem:[%s24630_s2 + $0x7a4] ss:$8 sps:$4 sm:$0xff]  }
  0xd3   : > { %2338 = vmatpush1.bf16.msra.mxu1 %v18287_v53  ;;  %v737_v53 = vld [vmem:[#allocation2 + $0x128] sm:$0xff] }
  0xd4   : > { %2339 = vmatprep.subr.bf16.mxu1 %v18292_v9  ;;  %v754_v9 = vpack.c.bf16 %v20247_v15, %v732_v33  ;;  %v764_v33 = vld [vmem:[#allocation3 + $0x30] sm:$0xff] }
  0xd6   : > { %2105 = vmatmul.mubr.bf16.gmra.mrb[4].mxu1 %v746_v37  ;;  %v18319_v37 = vld [vmem:[%s24630_s2 + $0x7b4] ss:$8 sps:$4 sm:$0xff]  }
  0xd7   : > { %2340 = vmatpush1.bf16.msra.mxu1 %v18290_v17  ;;  %2114 = vmatprep.mubr.bf16.mxu1 %v749_v11  ;;  %v757_v17 = vpack.c.bf16 %v24704_v4, %v737_v53  ;;  %v18317_v11 = vld [vmem:[%s24630_s2 + $0x7b0] ss:$8 sps:$4 sm:$0xff]   ;;  %v769_v53 = vld [vmem:[#allocation3 + $0x68] sm:$0xff] }
  0xd8   : > { %2341 = vmatprep.subr.bf16.mxu1 %v18295_v63  ;;  %v736_v63 = vld [vmem:[#allocation2 + $0x120] sm:$0xff] }
  0xdb   : > { %2342 = vmatpush1.bf16.msra.mxu1 %v18293_v51  ;;  %v18322_v51 = vld [vmem:[%s24630_s2 + $0x7c4] ss:$8 sps:$4 sm:$0xff]  }
  0xdc   : > { %2343 = vmatprep.subr.bf16.mxu1 %v18298_v25  ;;  %v18320_v25 = vld [vmem:[%s24630_s2 + $0x7c0] ss:$8 sps:$4 sm:$0xff]  }
  0xde   : > { %2115 = vmatmul.mubr.bf16.gmra.mrb[8].mxu1 %v748_v21  ;;  %v24706_v21 = vld [vmem:[#allocation6_spill] sm:$0xff] }
  0xdf   : > { %2344 = vmatpush1.bf16.msra.mxu1 %v18296_v18  ;;  %2124 = vmatprep.mubr.bf16.mxu1 %v751_v36  ;;  %v756_v18 = vpack.c.bf16 %v24705_v28, %v736_v63  ;;  %v759_v36 = vpack.c.bf16 %v24706_v21, %v741_v2  ;;  %v768_v63 = vld [vmem:[#allocation3 + $0x60] sm:$0xff]  ;;  %v773_v2 = vld [vmem:[#allocation3 + $0x98] sm:$0xff] }
  0xe0   : > { %2345 = vmatprep.subr.bf16.mxu1 %v18301_v48  ;;  %v18325_v48 = vld [vmem:[%s24630_s2 + $0x7d4] ss:$8 sps:$4 sm:$0xff]  }
  0xe3   : > { %2346 = vmatpush1.bf16.msra.mxu1 %v18299_v14  ;;  %v18323_v14 = vld [vmem:[%s24630_s2 + $0x7d0] ss:$8 sps:$4 sm:$0xff]  }
  0xe4   : > { %2347 = vmatprep.subr.bf16.mxu1 %v18304_v23  ;;  %v18328_v23 = vld [vmem:[%s24630_s2 + $0x7e4] ss:$8 sps:$4 sm:$0xff]  }
  0xe6   : > { %2125 = vmatmul.mubr.bf16.gmra.mrb[12].mxu1 %v750_v58  ;;  %v758_v58 = vpack.c.bf16 %v20361_v0, %v740_v54  ;;  %v772_v54 = vld [vmem:[#allocation3 + $0x90] sm:$0xff] }
  0xe7   : > { %2348 = vmatpush1.bf16.msra.mxu1 %v18302_v27  ;;  %2134 = vmatprep.mubr.bf16.mxu1 %v753_v60  ;;  %v18326_v27 = vld [vmem:[%s24630_s2 + $0x7e0] ss:$8 sps:$4 sm:$0xff]   ;;  %v793_v60 = vpack.c.bf16 %v20380_v34, %v761_v40 }
  0xe8   : > { %2349 = vmatprep.subr.bf16.mxu1 %v18307_v5  ;;  %v18331_v5 = vld [vmem:[%s24630_s2 + $0x7f4] ss:$8 sps:$4 sm:$0xff]   ;;  %v777_v40 = vld [vmem:[#allocation3 + $0xc8] sm:$0xff] }
  0xeb   : > { %2350 = vmatpush1.bf16.msra.mxu1 %v18305_v46  ;;  %v18329_v46 = vld [vmem:[%s24630_s2 + $0x7f0] ss:$8 sps:$4 sm:$0xff]  }
  0xec   : > { %2351 = vmatprep.subr.bf16.mxu1 %v18310_v59  ;;  %v18334_v59 = vld [vmem:[%s24630_s2 + $0x204] ss:$8 sps:$4 sm:$0xff]  }
  0xee   : > { %2135 = vmatmul.mubr.bf16.gmra.mrb[16].mxu1 %v752_v29  ;;  %v792_v29 = vpack.c.bf16 %v20422_v30, %v760_v41  ;;  %v776_v41 = vld [vmem:[#allocation3 + $0xc0] sm:$0xff] }
  0xef   : > { %2352 = vmatpush1.bf16.msra.mxu1 %v18308_v7  ;;  %2144 = vmatprep.mubr.bf16.mxu1 %v755_v16  ;;  %v18332_v7 = vld [vmem:[%s24630_s2 + $0x200] ss:$8 sps:$4 sm:$0xff]   ;;  %v795_v16 = vpack.c.bf16 %v20429_v56, %v765_v61  ;;  %v781_v61 = vld [vmem:[#allocation3 + $0xf8] sm:$0xff] }
  0xf0   : > { %2353 = vmatprep.subr.bf16.mxu1 %v18313_v8  ;;  %v18337_v8 = vld [vmem:[%s24630_s2 + $0x214] ss:$8 sps:$4 sm:$0xff]  }
  0xf3   : > { %2354 = vmatpush1.bf16.msra.mxu1 %v18311_v42  ;;  %v18335_v42 = vld [vmem:[%s24630_s2 + $0x210] ss:$8 sps:$4 sm:$0xff]  }
  0xf4   : > { %2355 = vmatprep.subr.bf16.mxu1 %v18316_v22  ;;  %v18340_v22 = vld [vmem:[%s24630_s2 + $0x224] ss:$8 sps:$4 sm:$0xff]  }
  0xf6   : > { %2145 = vmatmul.mubr.bf16.gmra.mrb[20].mxu1 %v754_v9  ;;  %v794_v9 = vpack.c.bf16 %v20454_v44, %v764_v33  ;;  %v780_v33 = vld [vmem:[#allocation3 + $0xf0] sm:$0xff] }
  0xf7   : > { %2356 = vmatpush1.bf16.msra.mxu1 %v18314_v35  ;;  %2154 = vmatprep.mubr.bf16.mxu1 %v757_v17  ;;  %v18338_v35 = vld [vmem:[%s24630_s2 + $0x220] ss:$8 sps:$4 sm:$0xff]   ;;  %v797_v17 = vpack.c.bf16 %v20461_v50, %v769_v53 }
  0xf8   : > { %2357 = vmatprep.subr.bf16.mxu1 %v18319_v37  ;;  %v18343_v37 = vld [vmem:[%s24630_s2 + $0x234] ss:$8 sps:$4 sm:$0xff]   ;;  %v785_v53 = vld [vmem:[#allocation3 + $0x128] sm:$0xff] }
  0xfb   : > { %2358 = vmatpush1.bf16.msra.mxu1 %v18317_v11  ;;  %v18341_v11 = vld [vmem:[%s24630_s2 + $0x230] ss:$8 sps:$4 sm:$0xff]  }
  0xfc   : > { %2359 = vmatprep.subr.bf16.mxu1 %v18322_v51  ;;  %v18346_v51 = vld [vmem:[%s24630_s2 + $0x244] ss:$8 sps:$4 sm:$0xff]  }
  0xfe   : > { %2155 = vmatmul.mubr.bf16.gmra.mrb[24].mxu1 %v756_v18  ;;  %v796_v18 = vpack.c.bf16 %v20486_v12, %v768_v63  ;;  %v784_v63 = vld [vmem:[#allocation3 + $0x120] sm:$0xff] }
  0xff   : > { %2360 = vmatpush1.bf16.msra.mxu1 %v18320_v25  ;;  %2164 = vmatprep.mubr.bf16.mxu1 %v759_v36  ;;  %v18344_v25 = vld [vmem:[%s24630_s2 + $0x240] ss:$8 sps:$4 sm:$0xff]   ;;  %v799_v36 = vpack.c.bf16 %v20493_v39, %v773_v2  ;;  %v789_v2 = vld [vmem:[#allocation3 + $0x158] sm:$0xff] }
 0x100   : > { %2361 = vmatprep.subr.bf16.mxu1 %v18325_v48  ;;  %v18349_v48 = vld [vmem:[%s24630_s2 + $0x254] ss:$8 sps:$4 sm:$0xff]  }
 0x103   : > { %2362 = vmatpush1.bf16.msra.mxu1 %v18323_v14  ;;  %v18347_v14 = vld [vmem:[%s24630_s2 + $0x250] ss:$8 sps:$4 sm:$0xff]  }
 0x104   : > { %2363 = vmatprep.subr.bf16.mxu1 %v18328_v23  ;;  %v18352_v23 = vld [vmem:[%s24630_s2 + $0x264] ss:$8 sps:$4 sm:$0xff]  }
 0x106   : > { %2165 = vmatmul.mubr.bf16.gmra.mrb[28].mxu1 %v758_v58  ;;  %v798_v58 = vpack.c.bf16 %v20518_v55, %v772_v54  ;;  %v807_v54 = vpack.c.bf16 %v20617_v20, %v789_v2  ;;  %v18382_v2 = vld [vmem:[%s24630_s2 + $0x904] ss:$8 sps:$4 sm:$0xff]  }
 0x107   : > { %2364 = vmatpush1.bf16.msra.mxu1 %v18326_v27  ;;  %2367 = vmatprep.mubr.bf16.mxu1 %v793_v60  ;;  %v18350_v27 = vld [vmem:[%s24630_s2 + $0x260] ss:$8 sps:$4 sm:$0xff]   ;;  %v801_v60 = vpack.c.bf16 %v20525_v49, %v777_v40  ;;  %v2517_v40 = vrot.slane %v19779_v31, 2 }
 0x108   : > { %2365 = vmatprep.subr.bf16.mxu1 %v18331_v5  ;;  %v18355_v5 = vld [vmem:[%s24630_s2 + $0x274] ss:$8 sps:$4 sm:$0xff]  }
 0x10b   : > { %2366 = vmatpush1.bf16.msra.mxu1 %v18329_v46  ;;  %v18353_v46 = vld [vmem:[%s24630_s2 + $0x270] ss:$8 sps:$4 sm:$0xff]  }
 0x10c   : > { %3026 = vmatprep.subr.bf16.mxu1 %v18334_v59  ;;  %v18358_v59 = vld [vmem:[%s24630_s2 + $0x284] ss:$8 sps:$4 sm:$0xff]  }
 0x10e   : > { %2368 = vmatmul.mubr.bf16.vlgmr.msra.gmra.mrb[32].mxu1 %v792_v29  ;;  %v800_v29 = vpack.c.bf16 %v20550_v52, %v776_v41 }
 0x10f   : > { %3027 = vmatpush1.bf16.msra.mxu1 %v18332_v7  ;;  %2377 = vmatprep.mubr.bf16.mxu1 %v795_v16  ;;  %v18356_v7 = vld [vmem:[%s24630_s2 + $0x280] ss:$8 sps:$4 sm:$0xff]   ;;  %v803_v16 = vpack.c.bf16 %v20557_v32, %v781_v61 }
 0x110   : > { %3028 = vmatprep.subr.bf16.mxu1 %v18337_v8  ;;  %v18361_v8 = vld [vmem:[%s24630_s2 + $0x294] ss:$8 sps:$4 sm:$0xff]   ;;  %v2450_v61 = vld [vmem:[#allocation2 + $0x20] sm:$0x3] }
 0x113   : > { %3029 = vmatpush1.bf16.msra.mxu1 %v18335_v42  ;;  %v18359_v42 = vld [vmem:[%s24630_s2 + $0x290] ss:$8 sps:$4 sm:$0xff]  }
 0x114   : > { %3030 = vmatprep.subr.bf16.mxu1 %v18340_v22  ;;  %v18364_v22 = vld [vmem:[%s24630_s2 + $0x2a4] ss:$8 sps:$4 sm:$0xff]  }
 0x116   : > { %2378 = vmatmul.mubr.bf16.gmra.mrb[36].mxu1 %v794_v9  ;;  %v802_v9 = vpack.c.bf16 %v20582_v10, %v780_v33 }
 0x117   : > { %3031 = vmatpush1.bf16.msra.mxu1 %v18338_v35  ;;  %2387 = vmatprep.mubr.bf16.mxu1 %v797_v17  ;;  %v18362_v35 = vld [vmem:[%s24630_s2 + $0x2a0] ss:$8 sps:$4 sm:$0xff]   ;;  %v805_v17 = vpack.c.bf16 %v20592_v24, %v785_v53  ;;  %v2514_v53 = vrot.slane %v19925_v38, 2 }
 0x118   : > { %3032 = vmatprep.subr.bf16.mxu1 %v18343_v37  ;;  %v18367_v37 = vld [vmem:[%s24630_s2 + $0x2b4] ss:$8 sps:$4 sm:$0xff]  }
 0x11b   : > { %3033 = vmatpush1.bf16.msra.mxu1 %v18341_v11  ;;  %v18365_v11 = vld [vmem:[%s24630_s2 + $0x2b0] ss:$8 sps:$4 sm:$0xff]  }
 0x11c   : > { %3034 = vmatprep.subr.bf16.mxu1 %v18346_v51  ;;  %v18370_v51 = vld [vmem:[%s24630_s2 + $0x2c4] ss:$8 sps:$4 sm:$0xff]  }
 0x11e   : > { %2388 = vmatmul.mubr.bf16.gmra.mrb[40].mxu1 %v796_v18  ;;  %v2449_v18 = vld [vmem:[#allocation2 + $0x8] sm:$0xfc] }
 0x11f   : > { %3035 = vmatpush1.bf16.msra.mxu1 %v18344_v25  ;;  %2397 = vmatprep.mubr.bf16.mxu1 %v799_v36  ;;  %v18368_v25 = vld [vmem:[%s24630_s2 + $0x2c0] ss:$8 sps:$4 sm:$0xff]  }
 0x120   : > { %3036 = vmatprep.subr.bf16.mxu1 %v18349_v48  ;;  %v2451_v36 = vld [vmem:[#allocation2 + $0x28] sm:$0x3]  ;;  %v804_v48 = vpack.c.bf16 %v20383_v6, %v784_v63 }
 0x123   : > { %3037 = vmatpush1.bf16.msra.mxu1 %v18347_v14  ;;  %v18373_v14 = vld [vmem:[%s24630_s2 + $0x2d4] ss:$8 sps:$4 sm:$0xff]  }
 0x124   : > { %3038 = vmatprep.subr.bf16.mxu1 %v18352_v23  ;;  %v2516_v23 = vrot.slane %v2449_v18, 2 }
 0x126   : > { %2398 = vmatmul.mubr.bf16.gmra.mrb[44].mxu1 %v798_v58  ;;  %v18371_v58 = vld [vmem:[%s24630_s2 + $0x2d0] ss:$8 sps:$4 sm:$0xff]  }
 0x127   : > { %3039 = vmatpush1.bf16.msra.mxu1 %v18350_v27  ;;  %2407 = vmatprep.mubr.bf16.mxu1 %v801_v60  ;;  %v2521_v27 = vrot.slane %v2451_v36, 2  ;;  %v788_v60 = vld [vmem:[#allocation3 + $0x150] sm:$0xff] }
 0x128   : > { %3040 = vmatprep.subr.bf16.mxu1 %v18355_v5  ;;  %v18376_v5 = vld [vmem:[%s24630_s2 + $0x2e4] ss:$8 sps:$4 sm:$0xff]   ;;  %v2452_v36 = vld [vmem:[#allocation2 + $0x30] sm:$0xfc] }
 0x129   : > { %v2522_v41 = vsel %vm2512_vm2, %v2517_v40, %v2521_v27  ;;  %v18385_v27 = vld [vmem:[%s24630_s2 + $0x914] ss:$8 sps:$4 sm:$0xff]  }
 0x12b   : > { %3041 = vmatpush1.bf16.msra.mxu1 %v18353_v46  ;;  %v2518_v46 = vsel %vm2512_vm2, %v2516_v23, %v2517_v40  ;;  %v2459_v23 = vld [vmem:[#allocation2 + $0x88] sm:$0x3] }
 0x12c   : > { %3042 = vmatprep.subr.bf16.mxu1 %v18358_v59  ;;  %v2448_v59 = vld [vmem:[#allocation2] sm:$0xfc]  ;;  %v2626_v33 = vpack.c.bf16 %v2522_v41, %v2518_v46 }
 0x12e   : > { %2408 = vmatmul.mubr.bf16.gmra.mrb[48].mxu1 %v800_v29  ;;  %v2453_v29 = vld [vmem:[#allocation2 + $0x38] sm:$0xfc] }
 0x12f   : > { %3043 = vmatpush1.bf16.msra.mxu1 %v18356_v7  ;;  %2417 = vmatprep.mubr.bf16.mxu1 %v803_v16  ;;  %v18374_v7 = vld [vmem:[%s24630_s2 + $0x2e0] ss:$8 sps:$4 sm:$0xff]   ;;  %v2455_v16 = vld [vmem:[#allocation2 + $0x58] sm:$0x3] }
 0x130   : > { %3044 = vmatprep.subr.bf16.mxu1 %v18361_v8  ;;  %v806_v8 = vpack.c.bf16 %v20413_v43, %v788_v60  ;;  %v2523_v60 = vrot.slane %v2452_v36, 2  ;;  %v2547_v36 = vrot.slane %v20072_v1, 2 }
 0x133   : > { %3045 = vmatpush1.bf16.msra.mxu1 %v18359_v42  ;;  %v18379_v42 = vld [vmem:[%s24630_s2 + $0x2f4] ss:$8 sps:$4 sm:$0xff]  }
 0x134   : > { %3046 = vmatprep.subr.bf16.mxu1 %v18364_v22  ;;  %v2513_v22 = vrot.slane %v2448_v59, 2  ;;  %v2537_v59 = vrot.slane %v20006_v47, 2 }
 0x136   : > { %2418 = vmatmul.mubr.bf16.gmra.mrb[52].mxu1 %v802_v9  ;;  %v2526_v9 = vrot.slane %v2453_v29, 2  ;;  %v2515_v63 = vsel %vm2512_vm2, %v2513_v22, %v2514_v53  ;;  %v2456_v22 = vld [vmem:[#allocation2 + $0x60] sm:$0xfc] }
 0x137   : > { %3047 = vmatpush1.bf16.msra.mxu1 %v18362_v35  ;;  %2427 = vmatprep.mubr.bf16.mxu1 %v805_v17  ;;  %v2519_v35 = vrot.slane %v2450_v61, 2  ;;  %v2527_v17 = vrot.slane %v19937_v19, 2  ;;  %v2541_v61 = vrot.slane %v2459_v23, 2 }
 0x138   : > { %3048 = vmatprep.subr.bf16.mxu1 %v18367_v37  ;;  %v2531_v37 = vrot.slane %v2455_v16, 2 }
 0x13a   : > { %v2532_v18 = vsel %vm2512_vm2, %v2527_v17, %v2531_v37 }
 0x13b   : > { %3049 = vmatpush1.bf16.msra.mxu1 %v18365_v11  ;;  %v18377_v11 = vld [vmem:[%s24630_s2 + $0x2f0] ss:$8 sps:$4 sm:$0xff]  }
 0x13c   : > { %3050 = vmatprep.subr.bf16.mxu1 %v18370_v51  ;;  %v2520_v51 = vsel %vm2512_vm2, %v2514_v53, %v2519_v35  ;;  %v2458_v53 = vld [vmem:[#allocation2 + $0x80] sm:$0x3] }
 0x13d   : > { %v2625_v40 = vpack.c.bf16 %v2520_v51, %v2515_v63  ;;  %v18386_v35 = vld [vmem:[%s24630_s2 + $0x920] ss:$8 sps:$4 sm:$0xff]   ;;  %v2533_v51 = vrot.slane %v2456_v22, 2  ;;  %v2557_v22 = vrot.slane %v20133_v62, 2 }
 0x13e   : > { %2428 = vmatmul.mubr.bf16.gmra.mrb[56].mxu1 %v804_v48  ;;  %v2454_v48 = vld [vmem:[#allocation2 + $0x50] sm:$0x3] }
 0x13f   : > { %3051 = vmatpush1.bf16.msra.mxu1 %v18368_v25  ;;  %2437 = vmatprep.mubr.bf16.mxu1 %v807_v54  ;;  %v2528_v25 = vsel %vm2512_vm2, %v2526_v9, %v2527_v17  ;;  %v2457_v54 = vld [vmem:[#allocation2 + $0x68] sm:$0xfc]  ;;  %v2529_v46 = vrot.slane %v2454_v48, 2  ;;  %v2461_v9 = vld [vmem:[#allocation2 + $0x98] sm:$0xfc] }
 0x140   : > { %3052 = vmatprep.subr.bf16.mxu1 %v18373_v14  ;;  %v18380_v14 = vld [vmem:[%s24630_s2 + $0x900] ss:$8 sps:$4 sm:$0xff]   ;;  %v2536_v41 = vrot.slane %v2457_v54, 2  ;;  %v2463_v17 = vld [vmem:[#allocation2 + $0xb8] sm:$0x3] }
 0x141   : > { %v2551_v48 = vrot.slane %v2463_v17, 2 }
 0x143   : > { %3053 = vmatpush1.bf16.msra.mxu1 %v18371_v58  ;;  %v2628_v58 = vpack.c.bf16 %v2532_v18, %v2528_v25  ;;  %v2539_v25 = vrot.slane %v2458_v53, 2  ;;  %v2546_v18 = vrot.slane %v2461_v9, 2 }
 0x144   : > { %3054 = vmatprep.subr.bf16.mxu1 %v18376_v5  ;;  %v2524_v5 = vrot.slane %v19981_v13, 2 }
 0x146   : > { %2438 = vmatmul.mubr.bf16.gmra.mrb[60].mxu1 %v806_v8  ;;  %v2525_v29 = vsel %vm2512_vm2, %v2523_v60, %v2524_v5  ;;  %v2530_v16 = vsel %vm2512_vm2, %v2524_v5, %v2529_v46  ;;  %v18388_v8 = vld [vmem:[%s24630_s2 + $0x924] ss:$8 sps:$4 sm:$0xff]   ;;  %v2460_v60 = vld [vmem:[#allocation2 + $0x90] sm:$0xfc]  ;;  %v2462_v5 = vld [vmem:[#allocation2 + $0xb0] sm:$0x3] }
 0x147   : > { %3055 = vmatpush1.bf16.msra.mxu1 %v18374_v7  ;;  %3058 = vmatprep.mubr.bf16.mxu1 %v2626_v33  ;;  %v18383_v7 = vld [vmem:[%s24630_s2 + $0x910] ss:$8 sps:$4 sm:$0xff]   ;;  %v2542_v33 = vsel %vm2512_vm2, %v2537_v59, %v2541_v61  ;;  %v2627_v37 = vpack.c.bf16 %v2530_v16, %v2525_v29  ;;  %v18392_v46 = vld [vmem:[%s24630_s2 + $0x940] ss:$8 sps:$4 sm:$0xff]   ;;  %v2543_v16 = vrot.slane %v2460_v60, 2  ;;  %v2567_v60 = vrot.slane %v20196_v3, 2 }
 0x148   : > { %3056 = vmatprep.subr.bf16.mxu1 %v18379_v42  ;;  %v2538_v42 = vsel %vm2512_vm2, %v2536_v41, %v2537_v59  ;;  %v2465_v41 = vld [vmem:[#allocation2 + $0xc8] sm:$0xfc]  ;;  %v2467_v59 = vld [vmem:[#allocation2 + $0xe8] sm:$0x3] }
 0x149   : > { %v2630_v63 = vpack.c.bf16 %v2542_v33, %v2538_v42  ;;  %v2549_v42 = vrot.slane %v2462_v5, 2  ;;  %v2556_v33 = vrot.slane %v2465_v41, 2  ;;  %v2561_v53 = vrot.slane %v2467_v59, 2 }
 0x14b   : > { %3057 = vmatpush1.bf16.msra.mxu1 %v18377_v11  ;;  %v18391_v11 = vld [vmem:[%s24630_s2 + $0x934] ss:$8 sps:$4 sm:$0xff]  }
 0x14c   : > { %3332 = vmatprep.subr.bf16.mxu1 %v18382_v2  ;;  %v2534_v2 = vrot.slane %v20055_v26, 2 }
 0x14e   : > { %3059 = vmatmul.mubr.bf16.vlgmr.msra.gmra.mrb[0].mxu1 %v2625_v40  ;;  %v2535_v54 = vsel %vm2512_vm2, %v2533_v51, %v2534_v2  ;;  %v2540_v23 = vsel %vm2512_vm2, %v2534_v2, %v2539_v25  ;;  %v18394_v40 = vld [vmem:[%s24630_s2 + $0x944] ss:$8 sps:$4 sm:$0xff]   ;;  %v2466_v2 = vld [vmem:[#allocation2 + $0xe0] sm:$0x3] }
 0x14f   : > { %3333 = vmatpush1.bf16.msra.mxu1 %v18380_v14  ;;  %3068 = vmatprep.mubr.bf16.mxu1 %v2628_v58  ;;  %v18389_v14 = vld [vmem:[%s24630_s2 + $0x930] ss:$8 sps:$4 sm:$0xff]   ;;  %v2552_v58 = vsel %vm2512_vm2, %v2547_v36, %v2551_v48  ;;  %v2629_v61 = vpack.c.bf16 %v2540_v23, %v2535_v54  ;;  %v2464_v51 = vld [vmem:[#allocation2 + $0xc0] sm:$0xfc] }
 0x150   : > { %3334 = vmatprep.subr.bf16.mxu1 %v18385_v27  ;;  %v2548_v27 = vsel %vm2512_vm2, %v2546_v18, %v2547_v36  ;;  %v18398_v25 = vld [vmem:[%s24630_s2 + $0x960] ss:$8 sps:$4 sm:$0xff]   ;;  %v2469_v18 = vld [vmem:[#allocation2 + $0xf8] sm:$0xfc]  ;;  %v2471_v36 = vld [vmem:[#allocation2 + $0x118] sm:$0x3] }
 0x151   : > { %v2632_v29 = vpack.c.bf16 %v2552_v58, %v2548_v27  ;;  %v2553_v23 = vrot.slane %v2464_v51, 2  ;;  %v2559_v27 = vrot.slane %v2466_v2, 2  ;;  %v2566_v58 = vrot.slane %v2469_v18, 2 }
 0x152   : > { %v2571_v5 = vrot.slane %v2471_v36, 2  ;;  %v2577_v51 = vrot.slane %v24704_v4, 2 }
 0x153   : > { %3335 = vmatpush1.bf16.msra.mxu1 %v18383_v7  ;;  %v18397_v7 = vld [vmem:[%s24630_s2 + $0x954] ss:$8 sps:$4 sm:$0xff]  }
 0x154   : > { %3336 = vmatprep.subr.bf16.mxu1 %v18388_v8  ;;  %v2544_v8 = vrot.slane %v20116_v45, 2 }
 0x156   : > { %3069 = vmatmul.mubr.bf16.gmra.mrb[4].mxu1 %v2627_v37  ;;  %v2545_v9 = vsel %vm2512_vm2, %v2543_v16, %v2544_v8  ;;  %v2550_v17 = vsel %vm2512_vm2, %v2544_v8, %v2549_v42  ;;  %v18400_v37 = vld [vmem:[%s24630_s2 + $0x964] ss:$8 sps:$4 sm:$0xff]   ;;  %v2468_v16 = vld [vmem:[#allocation2 + $0xf0] sm:$0xfc]  ;;  %v2470_v8 = vld [vmem:[#allocation2 + $0x110] sm:$0x3] }
 0x157   : > { %3337 = vmatpush1.bf16.msra.mxu1 %v18386_v35  ;;  %3078 = vmatprep.mubr.bf16.mxu1 %v2630_v63  ;;  %v18395_v35 = vld [vmem:[%s24630_s2 + $0x950] ss:$8 sps:$4 sm:$0xff]   ;;  %v2562_v63 = vsel %vm2512_vm2, %v2557_v22, %v2561_v53  ;;  %v2631_v48 = vpack.c.bf16 %v2550_v17, %v2545_v9  ;;  %v18404_v42 = vld [vmem:[%s24630_s2 + $0x980] ss:$8 sps:$4 sm:$0xff]   ;;  %v2563_v17 = vrot.slane %v2468_v16, 2  ;;  %v2587_v16 = vrot.slane %v24706_v21, 2 }
 0x158   : > { %3338 = vmatprep.subr.bf16.mxu1 %v18391_v11  ;;  %v2558_v11 = vsel %vm2512_vm2, %v2556_v33, %v2557_v22  ;;  %v2473_v33 = vld [vmem:[#allocation2 + $0x128] sm:$0xfc]  ;;  %v2475_v22 = vld [vmem:[#allocation2 + $0x148] sm:$0x3] }
 0x159   : > { %v2634_v54 = vpack.c.bf16 %v2562_v63, %v2558_v11  ;;  %v2569_v11 = vrot.slane %v2470_v8, 2  ;;  %v2576_v63 = vrot.slane %v2473_v33, 2  ;;  %v2581_v2 = vrot.slane %v2475_v22, 2 }
 0x15b   : > { %3339 = vmatpush1.bf16.msra.mxu1 %v18389_v14  ;;  %v18403_v14 = vld [vmem:[%s24630_s2 + $0x974] ss:$8 sps:$4 sm:$0xff]  }
 0x15c   : > { %3340 = vmatprep.subr.bf16.mxu1 %v18394_v40  ;;  %v2554_v40 = vrot.slane %v20174_v57, 2 }
 0x15e   : > { %3079 = vmatmul.mubr.bf16.gmra.mrb[8].mxu1 %v2629_v61  ;;  %v2555_v41 = vsel %vm2512_vm2, %v2553_v23, %v2554_v40  ;;  %v2560_v59 = vsel %vm2512_vm2, %v2554_v40, %v2559_v27  ;;  %v18406_v61 = vld [vmem:[%s24630_s2 + $0x984] ss:$8 sps:$4 sm:$0xff]   ;;  %v2474_v40 = vld [vmem:[#allocation2 + $0x140] sm:$0x3] }
 0x15f   : > { %3341 = vmatpush1.bf16.msra.mxu1 %v18392_v46  ;;  %3088 = vmatprep.mubr.bf16.mxu1 %v2632_v29  ;;  %v18401_v46 = vld [vmem:[%s24630_s2 + $0x970] ss:$8 sps:$4 sm:$0xff]   ;;  %v2572_v29 = vsel %vm2512_vm2, %v2567_v60, %v2571_v5  ;;  %v2633_v53 = vpack.c.bf16 %v2560_v59, %v2555_v41  ;;  %v2472_v23 = vld [vmem:[#allocation2 + $0x120] sm:$0xfc] }
 0x160   : > { %3342 = vmatprep.subr.bf16.mxu1 %v18397_v7  ;;  %v2568_v7 = vsel %vm2512_vm2, %v2566_v58, %v2567_v60  ;;  %v18410_v27 = vld [vmem:[%s24630_s2 + $0x9a0] ss:$8 sps:$4 sm:$0xff]   ;;  %v2477_v58 = vld [vmem:[#allocation2 + $0x158] sm:$0xfc]  ;;  %v2479_v60 = vld [vmem:[#allocation2 + $0x178] sm:$0x3] }
 0x161   : > { %v2636_v9 = vpack.c.bf16 %v2572_v29, %v2568_v7  ;;  %v2573_v59 = vrot.slane %v2472_v23, 2  ;;  %v2579_v7 = vrot.slane %v2474_v40, 2  ;;  %v2586_v29 = vrot.slane %v2477_v58, 2 }
 0x162   : > { %v2591_v8 = vrot.slane %v2479_v60, 2  ;;  %v2709_v23 = vrot.slane %v20380_v34, 2 }
 0x163   : > { %3343 = vmatpush1.bf16.msra.mxu1 %v18395_v35  ;;  %v18409_v35 = vld [vmem:[%s24630_s2 + $0x994] ss:$8 sps:$4 sm:$0xff]  }
 0x164   : > { %3344 = vmatprep.subr.bf16.mxu1 %v18400_v37  ;;  %v2564_v37 = vrot.slane %v20247_v15, 2 }
 0x166   : > { %3089 = vmatmul.mubr.bf16.gmra.mrb[12].mxu1 %v2631_v48  ;;  %v2565_v18 = vsel %vm2512_vm2, %v2563_v17, %v2564_v37  ;;  %v2570_v36 = vsel %vm2512_vm2, %v2564_v37, %v2569_v11  ;;  %v18412_v48 = vld [vmem:[%s24630_s2 + $0x9a4] ss:$8 sps:$4 sm:$0xff]   ;;  %v2476_v17 = vld [vmem:[#allocation2 + $0x150] sm:$0xfc]  ;;  %v2478_v37 = vld [vmem:[#allocation2 + $0x170] sm:$0x3] }
 0x167   : > { %3345 = vmatpush1.bf16.msra.mxu1 %v18398_v25  ;;  %3098 = vmatprep.mubr.bf16.mxu1 %v2634_v54  ;;  %v18407_v25 = vld [vmem:[%s24630_s2 + $0x990] ss:$8 sps:$4 sm:$0xff]   ;;  %v2582_v54 = vsel %vm2512_vm2, %v2577_v51, %v2581_v2  ;;  %v2635_v5 = vpack.c.bf16 %v2570_v36, %v2565_v18  ;;  %v18416_v11 = vld [vmem:[%s24630_s2 + $0x9c0] ss:$8 sps:$4 sm:$0xff]   ;;  %v2583_v36 = vrot.slane %v2476_v17, 2  ;;  %v2719_v17 = vrot.slane %v20429_v56, 2 }
 0x168   : > { %3346 = vmatprep.subr.bf16.mxu1 %v18403_v14  ;;  %v2578_v14 = vsel %vm2512_vm2, %v2576_v63, %v2577_v51  ;;  %v2642_v63 = vld [vmem:[#allocation3 + $0x8] sm:$0xfc]  ;;  %v2644_v51 = vld [vmem:[#allocation3 + $0x28] sm:$0x3] }
 0x169   : > { %v2638_v41 = vpack.c.bf16 %v2582_v54, %v2578_v14  ;;  %v2589_v14 = vrot.slane %v2478_v37, 2  ;;  %v2708_v54 = vrot.slane %v2642_v63, 2  ;;  %v2713_v40 = vrot.slane %v2644_v51, 2 }
 0x16b   : > { %3347 = vmatpush1.bf16.msra.mxu1 %v18401_v46  ;;  %v18415_v46 = vld [vmem:[%s24630_s2 + $0x9b4] ss:$8 sps:$4 sm:$0xff]  }
 0x16c   : > { %3348 = vmatprep.subr.bf16.mxu1 %v18406_v61  ;;  %v2574_v61 = vrot.slane %v24705_v28, 2 }
 0x16e   : > { %3099 = vmatmul.mubr.bf16.gmra.mrb[16].mxu1 %v2633_v53  ;;  %v2575_v33 = vsel %vm2512_vm2, %v2573_v59, %v2574_v61  ;;  %v2580_v22 = vsel %vm2512_vm2, %v2574_v61, %v2579_v7  ;;  %v18418_v53 = vld [vmem:[%s24630_s2 + $0x9c4] ss:$8 sps:$4 sm:$0xff]   ;;  %v2643_v61 = vld [vmem:[#allocation3 + $0x20] sm:$0x3] }
 0x16f   : > { %3349 = vmatpush1.bf16.msra.mxu1 %v18404_v42  ;;  %3108 = vmatprep.mubr.bf16.mxu1 %v2636_v9  ;;  %v18413_v42 = vld [vmem:[%s24630_s2 + $0x9b0] ss:$8 sps:$4 sm:$0xff]   ;;  %v2592_v9 = vsel %vm2512_vm2, %v2587_v16, %v2591_v8  ;;  %v2637_v2 = vpack.c.bf16 %v2580_v22, %v2575_v33  ;;  %v2641_v59 = vld [vmem:[#allocation3] sm:$0xfc] }
 0x170   : > { %3350 = vmatprep.subr.bf16.mxu1 %v18409_v35  ;;  %v2588_v35 = vsel %vm2512_vm2, %v2586_v29, %v2587_v16  ;;  %v18422_v7 = vld [vmem:[%s24630_s2 + $0x9e0] ss:$8 sps:$4 sm:$0xff]   ;;  %v2646_v29 = vld [vmem:[#allocation3 + $0x38] sm:$0xfc]  ;;  %v2648_v16 = vld [vmem:[#allocation3 + $0x58] sm:$0x3] }
 0x171   : > { %v2640_v18 = vpack.c.bf16 %v2592_v9, %v2588_v35  ;;  %v2705_v22 = vrot.slane %v2641_v59, 2  ;;  %v2711_v35 = vrot.slane %v2643_v61, 2  ;;  %v2718_v9 = vrot.slane %v2646_v29, 2 }
 0x172   : > { %v2723_v37 = vrot.slane %v2648_v16, 2  ;;  %v2729_v59 = vrot.slane %v20461_v50, 2 }
 0x173   : > { %3351 = vmatpush1.bf16.msra.mxu1 %v18407_v25  ;;  %v18421_v25 = vld [vmem:[%s24630_s2 + $0x9d4] ss:$8 sps:$4 sm:$0xff]  }
 0x174   : > { %3352 = vmatprep.subr.bf16.mxu1 %v18412_v48  ;;  %v2584_v48 = vrot.slane %v20361_v0, 2 }
 0x176   : > { %3109 = vmatmul.mubr.bf16.gmra.mrb[20].mxu1 %v2635_v5  ;;  %v2585_v58 = vsel %vm2512_vm2, %v2583_v36, %v2584_v48  ;;  %v2590_v60 = vsel %vm2512_vm2, %v2584_v48, %v2589_v14  ;;  %v18424_v5 = vld [vmem:[%s24630_s2 + $0x9e4] ss:$8 sps:$4 sm:$0xff]   ;;  %v2645_v36 = vld [vmem:[#allocation3 + $0x30] sm:$0xfc]  ;;  %v2647_v48 = vld [vmem:[#allocation3 + $0x50] sm:$0x3] }
 0x177   : > { %3353 = vmatpush1.bf16.msra.mxu1 %v18410_v27  ;;  %3118 = vmatprep.mubr.bf16.mxu1 %v2638_v41  ;;  %v18419_v27 = vld [vmem:[%s24630_s2 + $0x9d0] ss:$8 sps:$4 sm:$0xff]   ;;  %v2714_v41 = vsel %vm2512_vm2, %v2709_v23, %v2713_v40  ;;  %v2639_v8 = vpack.c.bf16 %v2590_v60, %v2585_v58  ;;  %v18428_v14 = vld [vmem:[%s24630_s2 + $0x300] ss:$8 sps:$4 sm:$0xff]   ;;  %v2715_v60 = vrot.slane %v2645_v36, 2  ;;  %v2739_v36 = vrot.slane %v20493_v39, 2 }
 0x178   : > { %3354 = vmatprep.subr.bf16.mxu1 %v18415_v46  ;;  %v2710_v46 = vsel %vm2512_vm2, %v2708_v54, %v2709_v23  ;;  %v2650_v54 = vld [vmem:[#allocation3 + $0x68] sm:$0xfc]  ;;  %v2652_v23 = vld [vmem:[#allocation3 + $0x88] sm:$0x3] }
 0x179   : > { %v2818_v33 = vpack.c.bf16 %v2714_v41, %v2710_v46  ;;  %v2721_v46 = vrot.slane %v2647_v48, 2  ;;  %v2728_v41 = vrot.slane %v2650_v54, 2  ;;  %v2733_v61 = vrot.slane %v2652_v23, 2 }
 0x17b   : > { %3355 = vmatpush1.bf16.msra.mxu1 %v18413_v42  ;;  %v18427_v42 = vld [vmem:[%s24630_s2 + $0x9f4] ss:$8 sps:$4 sm:$0xff]  }
 0x17c   : > { %3356 = vmatprep.subr.bf16.mxu1 %v18418_v53  ;;  %v2706_v53 = vrot.slane %v20422_v30, 2 }
 0x17e   : > { %3119 = vmatmul.mubr.bf16.gmra.mrb[24].mxu1 %v2637_v2  ;;  %v2707_v63 = vsel %vm2512_vm2, %v2705_v22, %v2706_v53  ;;  %v2712_v51 = vsel %vm2512_vm2, %v2706_v53, %v2711_v35  ;;  %v18430_v2 = vld [vmem:[%s24630_s2 + $0x304] ss:$8 sps:$4 sm:$0xff]   ;;  %v2651_v53 = vld [vmem:[#allocation3 + $0x80] sm:$0x3] }
 0x17f   : > { %3357 = vmatpush1.bf16.msra.mxu1 %v18416_v11  ;;  %3128 = vmatprep.mubr.bf16.mxu1 %v2640_v18  ;;  %v18425_v11 = vld [vmem:[%s24630_s2 + $0x9f0] ss:$8 sps:$4 sm:$0xff]   ;;  %v2724_v18 = vsel %vm2512_vm2, %v2719_v17, %v2723_v37  ;;  %v2817_v40 = vpack.c.bf16 %v2712_v51, %v2707_v63  ;;  %v2649_v22 = vld [vmem:[#allocation3 + $0x60] sm:$0xfc] }
 0x180   : > { %3358 = vmatprep.subr.bf16.mxu1 %v18421_v25  ;;  %v2720_v25 = vsel %vm2512_vm2, %v2718_v9, %v2719_v17  ;;  %v18434_v35 = vld [vmem:[%s24630_s2 + $0x320] ss:$8 sps:$4 sm:$0xff]   ;;  %v2654_v9 = vld [vmem:[#allocation3 + $0x98] sm:$0xfc]  ;;  %v2656_v17 = vld [vmem:[#allocation3 + $0xb8] sm:$0x3] }
 0x181   : > { %v2820_v58 = vpack.c.bf16 %v2724_v18, %v2720_v25  ;;  %v2725_v51 = vrot.slane %v2649_v22, 2  ;;  %v2731_v25 = vrot.slane %v2651_v53, 2  ;;  %v2738_v18 = vrot.slane %v2654_v9, 2 }
 0x182   : > { %v2743_v48 = vrot.slane %v2656_v17, 2  ;;  %v2749_v22 = vrot.slane %v20525_v49, 2 }
 0x183   : > { %3359 = vmatpush1.bf16.msra.mxu1 %v18419_v27  ;;  %v18433_v27 = vld [vmem:[%s24630_s2 + $0x314] ss:$8 sps:$4 sm:$0xff]  }
 0x184   : > { %3360 = vmatprep.subr.bf16.mxu1 %v18424_v5  ;;  %v2716_v5 = vrot.slane %v20454_v44, 2 }
 0x186   : > { %3129 = vmatmul.mubr.bf16.gmra.mrb[28].mxu1 %v2639_v8  ;;  %v2717_v29 = vsel %vm2512_vm2, %v2715_v60, %v2716_v5  ;;  %v2722_v16 = vsel %vm2512_vm2, %v2716_v5, %v2721_v46  ;;  %v18436_v8 = vld [vmem:[%s24630_s2 + $0x324] ss:$8 sps:$4 sm:$0xff]   ;;  %v2653_v60 = vld [vmem:[#allocation3 + $0x90] sm:$0xfc]  ;;  %v2655_v5 = vld [vmem:[#allocation3 + $0xb0] sm:$0x3] }
 0x187   : > { %3361 = vmatpush1.bf16.msra.mxu1 %v18422_v7  ;;  %3364 = vmatprep.mubr.bf16.mxu1 %v2818_v33  ;;  %v18431_v7 = vld [vmem:[%s24630_s2 + $0x310] ss:$8 sps:$4 sm:$0xff]   ;;  %v2734_v33 = vsel %vm2512_vm2, %v2729_v59, %v2733_v61  ;;  %v2819_v37 = vpack.c.bf16 %v2722_v16, %v2717_v29  ;;  %v18440_v46 = vld [vmem:[%s24630_s2 + $0x340] ss:$8 sps:$4 sm:$0xff]   ;;  %v2735_v16 = vrot.slane %v2653_v60, 2  ;;  %v2759_v60 = vrot.slane %v20557_v32, 2 }
 0x188   : > { %3362 = vmatprep.subr.bf16.mxu1 %v18427_v42  ;;  %v2730_v42 = vsel %vm2512_vm2, %v2728_v41, %v2729_v59  ;;  %v2658_v41 = vld [vmem:[#allocation3 + $0xc8] sm:$0xfc]  ;;  %v2660_v59 = vld [vmem:[#allocation3 + $0xe8] sm:$0x3] }
 0x189   : > { %v2822_v63 = vpack.c.bf16 %v2734_v33, %v2730_v42  ;;  %v2741_v42 = vrot.slane %v2655_v5, 2  ;;  %v2748_v33 = vrot.slane %v2658_v41, 2  ;;  %v2753_v53 = vrot.slane %v2660_v59, 2 }
 0x18b   : > { %3363 = vmatpush1.bf16.msra.mxu1 %v18425_v11  ;;  %v18439_v11 = vld [vmem:[%s24630_s2 + $0x334] ss:$8 sps:$4 sm:$0xff]  }
 0x18c   : > { %4087 = vmatprep.subr.bf16.mxu1 %v18430_v2  ;;  %v2726_v2 = vrot.slane %v20486_v12, 2 }
 0x18e   : > { %3365 = vmatmul.mubr.bf16.vlgmr.msra.gmra.mrb[32].mxu1 %v2817_v40  ;;  %v2727_v54 = vsel %vm2512_vm2, %v2725_v51, %v2726_v2  ;;  %v2732_v23 = vsel %vm2512_vm2, %v2726_v2, %v2731_v25  ;;  %v18442_v40 = vld [vmem:[%s24630_s2 + $0x344] ss:$8 sps:$4 sm:$0xff]   ;;  %v2659_v2 = vld [vmem:[#allocation3 + $0xe0] sm:$0x3] }
 0x18f   : > { %4088 = vmatpush1.bf16.msra.mxu1 %v18428_v14  ;;  %3374 = vmatprep.mubr.bf16.mxu1 %v2820_v58  ;;  %v18437_v14 = vld [vmem:[%s24630_s2 + $0x330] ss:$8 sps:$4 sm:$0xff]   ;;  %v2744_v58 = vsel %vm2512_vm2, %v2739_v36, %v2743_v48  ;;  %v2821_v61 = vpack.c.bf16 %v2732_v23, %v2727_v54  ;;  %v2657_v51 = vld [vmem:[#allocation3 + $0xc0] sm:$0xfc] }
 0x190   : > { %4089 = vmatprep.subr.bf16.mxu1 %v18433_v27  ;;  %v2740_v27 = vsel %vm2512_vm2, %v2738_v18, %v2739_v36  ;;  %v18446_v25 = vld [vmem:[%s24630_s2 + $0x360] ss:$8 sps:$4 sm:$0xff]   ;;  %v2662_v18 = vld [vmem:[#allocation3 + $0xf8] sm:$0xfc]  ;;  %v2664_v36 = vld [vmem:[#allocation3 + $0x118] sm:$0x3] }
 0x191   : > { %v2824_v29 = vpack.c.bf16 %v2744_v58, %v2740_v27  ;;  %v2745_v23 = vrot.slane %v2657_v51, 2  ;;  %v2751_v27 = vrot.slane %v2659_v2, 2  ;;  %v2758_v58 = vrot.slane %v2662_v18, 2 }
 0x192   : > { %v2763_v5 = vrot.slane %v2664_v36, 2  ;;  %v2769_v51 = vrot.slane %v20592_v24, 2 }
 0x193   : > { %4090 = vmatpush1.bf16.msra.mxu1 %v18431_v7  ;;  %v18445_v7 = vld [vmem:[%s24630_s2 + $0x354] ss:$8 sps:$4 sm:$0xff]  }
 0x194   : > { %4091 = vmatprep.subr.bf16.mxu1 %v18436_v8  ;;  %v2736_v8 = vrot.slane %v20518_v55, 2 }
 0x196   : > { %3375 = vmatmul.mubr.bf16.gmra.mrb[36].mxu1 %v2819_v37  ;;  %v2737_v9 = vsel %vm2512_vm2, %v2735_v16, %v2736_v8  ;;  %v2742_v17 = vsel %vm2512_vm2, %v2736_v8, %v2741_v42  ;;  %v18448_v37 = vld [vmem:[%s24630_s2 + $0x364] ss:$8 sps:$4 sm:$0xff]   ;;  %v2661_v16 = vld [vmem:[#allocation3 + $0xf0] sm:$0xfc]  ;;  %v2663_v8 = vld [vmem:[#allocation3 + $0x110] sm:$0x3] }
 0x197   : > { %4092 = vmatpush1.bf16.msra.mxu1 %v18434_v35  ;;  %3384 = vmatprep.mubr.bf16.mxu1 %v2822_v63  ;;  %v18443_v35 = vld [vmem:[%s24630_s2 + $0x350] ss:$8 sps:$4 sm:$0xff]   ;;  %v2754_v63 = vsel %vm2512_vm2, %v2749_v22, %v2753_v53  ;;  %v2823_v48 = vpack.c.bf16 %v2742_v17, %v2737_v9  ;;  %v18452_v42 = vld [vmem:[%s24630_s2 + $0x380] ss:$8 sps:$4 sm:$0xff]   ;;  %v2755_v17 = vrot.slane %v2661_v16, 2  ;;  %v2779_v16 = vrot.slane %v20617_v20, 2 }
 0x198   : > { %4093 = vmatprep.subr.bf16.mxu1 %v18439_v11  ;;  %v2750_v11 = vsel %vm2512_vm2, %v2748_v33, %v2749_v22  ;;  %v2666_v33 = vld [vmem:[#allocation3 + $0x128] sm:$0xfc]  ;;  %v2668_v22 = vld [vmem:[#allocation3 + $0x148] sm:$0x3] }
 0x199   : > { %v2826_v54 = vpack.c.bf16 %v2754_v63, %v2750_v11  ;;  %v2761_v11 = vrot.slane %v2663_v8, 2  ;;  %v2768_v63 = vrot.slane %v2666_v33, 2  ;;  %v2773_v2 = vrot.slane %v2668_v22, 2 }
 0x19b   : > { %4094 = vmatpush1.bf16.msra.mxu1 %v18437_v14  ;;  %v18451_v14 = vld [vmem:[%s24630_s2 + $0x374] ss:$8 sps:$4 sm:$0xff]  }
 0x19c   : > { %4095 = vmatprep.subr.bf16.mxu1 %v18442_v40  ;;  %v2746_v40 = vrot.slane %v20550_v52, 2 }
 0x19e   : > { %3385 = vmatmul.mubr.bf16.gmra.mrb[40].mxu1 %v2821_v61  ;;  %v2747_v41 = vsel %vm2512_vm2, %v2745_v23, %v2746_v40  ;;  %v2752_v59 = vsel %vm2512_vm2, %v2746_v40, %v2751_v27  ;;  %v18454_v61 = vld [vmem:[%s24630_s2 + $0x384] ss:$8 sps:$4 sm:$0xff]   ;;  %v2667_v40 = vld [vmem:[#allocation3 + $0x140] sm:$0x3] }
 0x19f   : > { %4096 = vmatpush1.bf16.msra.mxu1 %v18440_v46  ;;  %3394 = vmatprep.mubr.bf16.mxu1 %v2824_v29  ;;  %v18449_v46 = vld [vmem:[%s24630_s2 + $0x370] ss:$8 sps:$4 sm:$0xff]   ;;  %v2764_v29 = vsel %vm2512_vm2, %v2759_v60, %v2763_v5  ;;  %v2825_v53 = vpack.c.bf16 %v2752_v59, %v2747_v41  ;;  %v2665_v23 = vld [vmem:[#allocation3 + $0x120] sm:$0xfc] }
 0x1a0   : > { %4097 = vmatprep.subr.bf16.mxu1 %v18445_v7  ;;  %v2760_v7 = vsel %vm2512_vm2, %v2758_v58, %v2759_v60  ;;  %v18458_v27 = vld [vmem:[%s24630_s2 + $0x3a0] ss:$8 sps:$4 sm:$0xff]   ;;  %v2670_v58 = vld [vmem:[#allocation3 + $0x158] sm:$0xfc]  ;;  %v2672_v60 = vld [vmem:[#allocation3 + $0x178] sm:$0x3] }
 0x1a1   : > { %v2828_v9 = vpack.c.bf16 %v2764_v29, %v2760_v7  ;;  %v2765_v59 = vrot.slane %v2665_v23, 2  ;;  %v2771_v7 = vrot.slane %v2667_v40, 2  ;;  %v2778_v29 = vrot.slane %v2670_v58, 2 }
 0x1a2   : > { %v2783_v8 = vrot.slane %v2672_v60, 2  ;;  %v3578_v23 = vrot.slane %v19779_v31, 3 }
 0x1a3   : > { %4098 = vmatpush1.bf16.msra.mxu1 %v18443_v35  ;;  %v18457_v35 = vld [vmem:[%s24630_s2 + $0x394] ss:$8 sps:$4 sm:$0xff]  }
 0x1a4   : > { %4099 = vmatprep.subr.bf16.mxu1 %v18448_v37  ;;  %v2756_v37 = vrot.slane %v20582_v10, 2 }
 0x1a6   : > { %3395 = vmatmul.mubr.bf16.gmra.mrb[44].mxu1 %v2823_v48  ;;  %v2757_v18 = vsel %vm2512_vm2, %v2755_v17, %v2756_v37  ;;  %v2762_v36 = vsel %vm2512_vm2, %v2756_v37, %v2761_v11  ;;  %v18460_v48 = vld [vmem:[%s24630_s2 + $0x3a4] ss:$8 sps:$4 sm:$0xff]   ;;  %v2669_v17 = vld [vmem:[#allocation3 + $0x150] sm:$0xfc]  ;;  %v2671_v37 = vld [vmem:[#allocation3 + $0x170] sm:$0x3] }
 0x1a7   : > { %4100 = vmatpush1.bf16.msra.mxu1 %v18446_v25  ;;  %3404 = vmatprep.mubr.bf16.mxu1 %v2826_v54  ;;  %v18455_v25 = vld [vmem:[%s24630_s2 + $0x390] ss:$8 sps:$4 sm:$0xff]   ;;  %v2774_v54 = vsel %vm2512_vm2, %v2769_v51, %v2773_v2  ;;  %v2827_v5 = vpack.c.bf16 %v2762_v36, %v2757_v18  ;;  %v18464_v11 = vld [vmem:[%s24630_s2 + $0x3c0] ss:$8 sps:$4 sm:$0xff]   ;;  %v2775_v36 = vrot.slane %v2669_v17, 2  ;;  %v3588_v17 = vrot.slane %v19937_v19, 3 }
 0x1a8   : > { %4101 = vmatprep.subr.bf16.mxu1 %v18451_v14  ;;  %v2770_v14 = vsel %vm2512_vm2, %v2768_v63, %v2769_v51  ;;  %v3510_v63 = vld [vmem:[#allocation2 + $0x8] sm:$0xf8]  ;;  %v3512_v51 = vld [vmem:[#allocation2 + $0x28] sm:$0x7] }
 0x1a9   : > { %v2830_v41 = vpack.c.bf16 %v2774_v54, %v2770_v14  ;;  %v2781_v14 = vrot.slane %v2671_v37, 2  ;;  %v3577_v54 = vrot.slane %v3510_v63, 3  ;;  %v3582_v40 = vrot.slane %v3512_v51, 3 }
 0x1ab   : > { %4102 = vmatpush1.bf16.msra.mxu1 %v18449_v46  ;;  %v18463_v46 = vld [vmem:[%s24630_s2 + $0x3b4] ss:$8 sps:$4 sm:$0xff]  }
 0x1ac   : > { %4103 = vmatprep.subr.bf16.mxu1 %v18454_v61  ;;  %v2766_v61 = vrot.slane %v20383_v6, 2 }
 0x1ae   : > { %3405 = vmatmul.mubr.bf16.gmra.mrb[48].mxu1 %v2825_v53  ;;  %v2767_v33 = vsel %vm2512_vm2, %v2765_v59, %v2766_v61  ;;  %v2772_v22 = vsel %vm2512_vm2, %v2766_v61, %v2771_v7  ;;  %v18466_v53 = vld [vmem:[%s24630_s2 + $0x3c4] ss:$8 sps:$4 sm:$0xff]   ;;  %v3511_v61 = vld [vmem:[#allocation2 + $0x20] sm:$0x7] }
 0x1af   : > { %4104 = vmatpush1.bf16.msra.mxu1 %v18452_v42  ;;  %3414 = vmatprep.mubr.bf16.mxu1 %v2828_v9  ;;  %v18461_v42 = vld [vmem:[%s24630_s2 + $0x3b0] ss:$8 sps:$4 sm:$0xff]   ;;  %v2784_v9 = vsel %vm2512_vm2, %v2779_v16, %v2783_v8  ;;  %v2829_v2 = vpack.c.bf16 %v2772_v22, %v2767_v33  ;;  %v3509_v59 = vld [vmem:[#allocation2] sm:$0xf8] }
 0x1b0   : > { %4105 = vmatprep.subr.bf16.mxu1 %v18457_v35  ;;  %v2780_v35 = vsel %vm2512_vm2, %v2778_v29, %v2779_v16  ;;  %v18470_v7 = vld [vmem:[%s24630_s2 + $0x3e0] ss:$8 sps:$4 sm:$0xff]   ;;  %v3514_v29 = vld [vmem:[#allocation2 + $0x38] sm:$0xf8]  ;;  %v3516_v16 = vld [vmem:[#allocation2 + $0x58] sm:$0x7] }
 0x1b1   : > { %v2832_v18 = vpack.c.bf16 %v2784_v9, %v2780_v35  ;;  %v3574_v22 = vrot.slane %v3509_v59, 3  ;;  %v3580_v35 = vrot.slane %v3511_v61, 3  ;;  %v3587_v9 = vrot.slane %v3514_v29, 3 }
 0x1b2   : > { %v3592_v37 = vrot.slane %v3516_v16, 3  ;;  %v3598_v59 = vrot.slane %v20006_v47, 3 }
 0x1b3   : > { %4106 = vmatpush1.bf16.msra.mxu1 %v18455_v25  ;;  %v18469_v25 = vld [vmem:[%s24630_s2 + $0x3d4] ss:$8 sps:$4 sm:$0xff]  }
 0x1b4   : > { %4107 = vmatprep.subr.bf16.mxu1 %v18460_v48  ;;  %v2776_v48 = vrot.slane %v20413_v43, 2 }
 0x1b6   : > { %3415 = vmatmul.mubr.bf16.gmra.mrb[52].mxu1 %v2827_v5  ;;  %v2777_v58 = vsel %vm2512_vm2, %v2775_v36, %v2776_v48  ;;  %v2782_v60 = vsel %vm2512_vm2, %v2776_v48, %v2781_v14  ;;  %v18472_v5 = vld [vmem:[%s24630_s2 + $0x3e4] ss:$8 sps:$4 sm:$0xff]   ;;  %v3513_v36 = vld [vmem:[#allocation2 + $0x30] sm:$0xf8]  ;;  %v3515_v48 = vld [vmem:[#allocation2 + $0x50] sm:$0x7] }
 0x1b7   : > { %4108 = vmatpush1.bf16.msra.mxu1 %v18458_v27  ;;  %3424 = vmatprep.mubr.bf16.mxu1 %v2830_v41  ;;  %v18467_v27 = vld [vmem:[%s24630_s2 + $0x3d0] ss:$8 sps:$4 sm:$0xff]   ;;  %v3583_v41 = vsel %vm3573_vm3, %v3578_v23, %v3582_v40  ;;  %v2831_v8 = vpack.c.bf16 %v2782_v60, %v2777_v58  ;;  %v18476_v14 = vld [vmem:[%s24630_s2 + $0xa00] ss:$8 sps:$4 sm:$0xff]   ;;  %v3584_v60 = vrot.slane %v3513_v36, 3  ;;  %v3608_v36 = vrot.slane %v20072_v1, 3 }
 0x1b8   : > { %4109 = vmatprep.subr.bf16.mxu1 %v18463_v46  ;;  %v3579_v46 = vsel %vm3573_vm3, %v3577_v54, %v3578_v23  ;;  %v3518_v54 = vld [vmem:[#allocation2 + $0x68] sm:$0xf8]  ;;  %v3520_v23 = vld [vmem:[#allocation2 + $0x88] sm:$0x7] }
 0x1b9   : > { %v3687_v33 = vpack.c.bf16 %v3583_v41, %v3579_v46  ;;  %v3590_v46 = vrot.slane %v3515_v48, 3  ;;  %v3597_v41 = vrot.slane %v3518_v54, 3  ;;  %v3602_v61 = vrot.slane %v3520_v23, 3 }
 0x1bb   : > { %4110 = vmatpush1.bf16.msra.mxu1 %v18461_v42  ;;  %v18475_v42 = vld [vmem:[%s24630_s2 + $0x3f4] ss:$8 sps:$4 sm:$0xff]  }
 0x1bc   : > { %4111 = vmatprep.subr.bf16.mxu1 %v18466_v53  ;;  %v3575_v53 = vrot.slane %v19925_v38, 3 }
 0x1be   : > { %3425 = vmatmul.mubr.bf16.gmra.mrb[56].mxu1 %v2829_v2  ;;  %v3576_v63 = vsel %vm3573_vm3, %v3574_v22, %v3575_v53  ;;  %v3581_v51 = vsel %vm3573_vm3, %v3575_v53, %v3580_v35  ;;  %v18478_v2 = vld [vmem:[%s24630_s2 + $0xa04] ss:$8 sps:$4 sm:$0xff]   ;;  %v3519_v53 = vld [vmem:[#allocation2 + $0x80] sm:$0x7] }
 0x1bf   : > { %4112 = vmatpush1.bf16.msra.mxu1 %v18464_v11  ;;  %3434 = vmatprep.mubr.bf16.mxu1 %v2832_v18  ;;  %v18473_v11 = vld [vmem:[%s24630_s2 + $0x3f0] ss:$8 sps:$4 sm:$0xff]   ;;  %v3593_v18 = vsel %vm3573_vm3, %v3588_v17, %v3592_v37  ;;  %v3686_v40 = vpack.c.bf16 %v3581_v51, %v3576_v63  ;;  %v3517_v22 = vld [vmem:[#allocation2 + $0x60] sm:$0xf8] }
 0x1c0   : > { %4113 = vmatprep.subr.bf16.mxu1 %v18469_v25  ;;  %v3589_v25 = vsel %vm3573_vm3, %v3587_v9, %v3588_v17  ;;  %v18482_v35 = vld [vmem:[%s24630_s2 + $0xa20] ss:$8 sps:$4 sm:$0xff]   ;;  %v3522_v9 = vld [vmem:[#allocation2 + $0x98] sm:$0xf8]  ;;  %v3524_v17 = vld [vmem:[#allocation2 + $0xb8] sm:$0x7] }
 0x1c1   : > { %v3689_v58 = vpack.c.bf16 %v3593_v18, %v3589_v25  ;;  %v3594_v51 = vrot.slane %v3517_v22, 3  ;;  %v3600_v25 = vrot.slane %v3519_v53, 3  ;;  %v3607_v18 = vrot.slane %v3522_v9, 3 }
 0x1c2   : > { %v3612_v48 = vrot.slane %v3524_v17, 3  ;;  %v3618_v22 = vrot.slane %v20133_v62, 3 }
 0x1c3   : > { %4114 = vmatpush1.bf16.msra.mxu1 %v18467_v27  ;;  %v18481_v27 = vld [vmem:[%s24630_s2 + $0xa14] ss:$8 sps:$4 sm:$0xff]  }
 0x1c4   : > { %4115 = vmatprep.subr.bf16.mxu1 %v18472_v5  ;;  %v3585_v5 = vrot.slane %v19981_v13, 3 }
 0x1c6   : > { %3435 = vmatmul.mubr.bf16.gmra.mrb[60].mxu1 %v2831_v8  ;;  %v3586_v29 = vsel %vm3573_vm3, %v3584_v60, %v3585_v5  ;;  %v3591_v16 = vsel %vm3573_vm3, %v3585_v5, %v3590_v46  ;;  %v18484_v8 = vld [vmem:[%s24630_s2 + $0xa24] ss:$8 sps:$4 sm:$0xff]   ;;  %v3521_v60 = vld [vmem:[#allocation2 + $0x90] sm:$0xf8]  ;;  %v3523_v5 = vld [vmem:[#allocation2 + $0xb0] sm:$0x7] }
 0x1c7   : > { %4116 = vmatpush1.bf16.msra.mxu1 %v18470_v7  ;;  %4119 = vmatprep.mubr.bf16.mxu1 %v3687_v33  ;;  %v18479_v7 = vld [vmem:[%s24630_s2 + $0xa10] ss:$8 sps:$4 sm:$0xff]   ;;  %v3603_v33 = vsel %vm3573_vm3, %v3598_v59, %v3602_v61  ;;  %v3688_v37 = vpack.c.bf16 %v3591_v16, %v3586_v29  ;;  %v18488_v46 = vld [vmem:[%s24630_s2 + $0xa40] ss:$8 sps:$4 sm:$0xff]   ;;  %v3604_v16 = vrot.slane %v3521_v60, 3  ;;  %v3628_v60 = vrot.slane %v20196_v3, 3 }
 0x1c8   : > { %4117 = vmatprep.subr.bf16.mxu1 %v18475_v42  ;;  %v3599_v42 = vsel %vm3573_vm3, %v3597_v41, %v3598_v59  ;;  %v3526_v41 = vld [vmem:[#allocation2 + $0xc8] sm:$0xf8]  ;;  %v3528_v59 = vld [vmem:[#allocation2 + $0xe8] sm:$0x7] }
 0x1c9   : > { %v3691_v63 = vpack.c.bf16 %v3603_v33, %v3599_v42  ;;  %v3610_v42 = vrot.slane %v3523_v5, 3  ;;  %v3617_v33 = vrot.slane %v3526_v41, 3  ;;  %v3622_v53 = vrot.slane %v3528_v59, 3 }
 0x1cb   : > { %4118 = vmatpush1.bf16.msra.mxu1 %v18473_v11  ;;  %v18487_v11 = vld [vmem:[%s24630_s2 + $0xa34] ss:$8 sps:$4 sm:$0xff]  }
 0x1cc   : > { %4393 = vmatprep.subr.bf16.mxu1 %v18478_v2  ;;  %v3595_v2 = vrot.slane %v20055_v26, 3 }
 0x1ce   : > { %4120 = vmatmul.mubr.bf16.vlgmr.msra.gmra.mrb[0].mxu1 %v3686_v40  ;;  %v3596_v54 = vsel %vm3573_vm3, %v3594_v51, %v3595_v2  ;;  %v3601_v23 = vsel %vm3573_vm3, %v3595_v2, %v3600_v25  ;;  %v18490_v40 = vld [vmem:[%s24630_s2 + $0xa44] ss:$8 sps:$4 sm:$0xff]   ;;  %v3527_v2 = vld [vmem:[#allocation2 + $0xe0] sm:$0x7] }
 0x1cf   : > { %4394 = vmatpush1.bf16.msra.mxu1 %v18476_v14  ;;  %4129 = vmatprep.mubr.bf16.mxu1 %v3689_v58  ;;  %v18485_v14 = vld [vmem:[%s24630_s2 + $0xa30] ss:$8 sps:$4 sm:$0xff]   ;;  %v3613_v58 = vsel %vm3573_vm3, %v3608_v36, %v3612_v48  ;;  %v3690_v61 = vpack.c.bf16 %v3601_v23, %v3596_v54  ;;  %v3525_v51 = vld [vmem:[#allocation2 + $0xc0] sm:$0xf8] }
 0x1d0   : > { %4395 = vmatprep.subr.bf16.mxu1 %v18481_v27  ;;  %v3609_v27 = vsel %vm3573_vm3, %v3607_v18, %v3608_v36  ;;  %v18494_v25 = vld [vmem:[%s24630_s2 + $0xa60] ss:$8 sps:$4 sm:$0xff]   ;;  %v3530_v18 = vld [vmem:[#allocation2 + $0xf8] sm:$0xf8]  ;;  %v3532_v36 = vld [vmem:[#allocation2 + $0x118] sm:$0x7] }
 0x1d1   : > { %v3693_v29 = vpack.c.bf16 %v3613_v58, %v3609_v27  ;;  %v3614_v23 = vrot.slane %v3525_v51, 3  ;;  %v3620_v27 = vrot.slane %v3527_v2, 3  ;;  %v3627_v58 = vrot.slane %v3530_v18, 3 }
 0x1d2   : > { %v3632_v5 = vrot.slane %v3532_v36, 3  ;;  %v3638_v51 = vrot.slane %v24704_v4, 3 }
 0x1d3   : > { %4396 = vmatpush1.bf16.msra.mxu1 %v18479_v7  ;;  %v18493_v7 = vld [vmem:[%s24630_s2 + $0xa54] ss:$8 sps:$4 sm:$0xff]  }
 0x1d4   : > { %4397 = vmatprep.subr.bf16.mxu1 %v18484_v8  ;;  %v3605_v8 = vrot.slane %v20116_v45, 3 }
 0x1d6   : > { %4130 = vmatmul.mubr.bf16.gmra.mrb[4].mxu1 %v3688_v37  ;;  %v3606_v9 = vsel %vm3573_vm3, %v3604_v16, %v3605_v8  ;;  %v3611_v17 = vsel %vm3573_vm3, %v3605_v8, %v3610_v42  ;;  %v18496_v37 = vld [vmem:[%s24630_s2 + $0xa64] ss:$8 sps:$4 sm:$0xff]   ;;  %v3529_v16 = vld [vmem:[#allocation2 + $0xf0] sm:$0xf8]  ;;  %v3531_v8 = vld [vmem:[#allocation2 + $0x110] sm:$0x7] }
 0x1d7   : > { %4398 = vmatpush1.bf16.msra.mxu1 %v18482_v35  ;;  %4139 = vmatprep.mubr.bf16.mxu1 %v3691_v63  ;;  %v18491_v35 = vld [vmem:[%s24630_s2 + $0xa50] ss:$8 sps:$4 sm:$0xff]   ;;  %v3623_v63 = vsel %vm3573_vm3, %v3618_v22, %v3622_v53  ;;  %v3692_v48 = vpack.c.bf16 %v3611_v17, %v3606_v9  ;;  %v18500_v42 = vld [vmem:[%s24630_s2 + $0xa80] ss:$8 sps:$4 sm:$0xff]   ;;  %v3624_v17 = vrot.slane %v3529_v16, 3  ;;  %v3648_v16 = vrot.slane %v24706_v21, 3 }
 0x1d8   : > { %4399 = vmatprep.subr.bf16.mxu1 %v18487_v11  ;;  %v3619_v11 = vsel %vm3573_vm3, %v3617_v33, %v3618_v22  ;;  %v3534_v33 = vld [vmem:[#allocation2 + $0x128] sm:$0xf8]  ;;  %v3536_v22 = vld [vmem:[#allocation2 + $0x148] sm:$0x7] }
 0x1d9   : > { %v3695_v54 = vpack.c.bf16 %v3623_v63, %v3619_v11  ;;  %v3630_v11 = vrot.slane %v3531_v8, 3  ;;  %v3637_v63 = vrot.slane %v3534_v33, 3  ;;  %v3642_v2 = vrot.slane %v3536_v22, 3 }
 0x1db   : > { %4400 = vmatpush1.bf16.msra.mxu1 %v18485_v14  ;;  %v18499_v14 = vld [vmem:[%s24630_s2 + $0xa74] ss:$8 sps:$4 sm:$0xff]  }
 0x1dc   : > { %4401 = vmatprep.subr.bf16.mxu1 %v18490_v40  ;;  %v3615_v40 = vrot.slane %v20174_v57, 3 }
 0x1de   : > { %4140 = vmatmul.mubr.bf16.gmra.mrb[8].mxu1 %v3690_v61  ;;  %v3616_v41 = vsel %vm3573_vm3, %v3614_v23, %v3615_v40  ;;  %v3621_v59 = vsel %vm3573_vm3, %v3615_v40, %v3620_v27  ;;  %v18502_v61 = vld [vmem:[%s24630_s2 + $0xa84] ss:$8 sps:$4 sm:$0xff]   ;;  %v3535_v40 = vld [vmem:[#allocation2 + $0x140] sm:$0x7] }
 0x1df   : > { %4402 = vmatpush1.bf16.msra.mxu1 %v18488_v46  ;;  %4149 = vmatprep.mubr.bf16.mxu1 %v3693_v29  ;;  %v18497_v46 = vld [vmem:[%s24630_s2 + $0xa70] ss:$8 sps:$4 sm:$0xff]   ;;  %v3633_v29 = vsel %vm3573_vm3, %v3628_v60, %v3632_v5  ;;  %v3694_v53 = vpack.c.bf16 %v3621_v59, %v3616_v41  ;;  %v3533_v23 = vld [vmem:[#allocation2 + $0x120] sm:$0xf8] }
 0x1e0   : > { %4403 = vmatprep.subr.bf16.mxu1 %v18493_v7  ;;  %v3629_v7 = vsel %vm3573_vm3, %v3627_v58, %v3628_v60  ;;  %v18506_v27 = vld [vmem:[%s24630_s2 + $0xaa0] ss:$8 sps:$4 sm:$0xff]   ;;  %v3538_v58 = vld [vmem:[#allocation2 + $0x158] sm:$0xf8]  ;;  %v3540_v60 = vld [vmem:[#allocation2 + $0x178] sm:$0x7] }
 0x1e1   : > { %v3697_v9 = vpack.c.bf16 %v3633_v29, %v3629_v7  ;;  %v3634_v59 = vrot.slane %v3533_v23, 3  ;;  %v3640_v7 = vrot.slane %v3535_v40, 3  ;;  %v3647_v29 = vrot.slane %v3538_v58, 3 }
 0x1e2   : > { %v3652_v8 = vrot.slane %v3540_v60, 3  ;;  %v3770_v23 = vrot.slane %v20380_v34, 3 }
 0x1e3   : > { %4404 = vmatpush1.bf16.msra.mxu1 %v18491_v35  ;;  %v18505_v35 = vld [vmem:[%s24630_s2 + $0xa94] ss:$8 sps:$4 sm:$0xff]  }
 0x1e4   : > { %4405 = vmatprep.subr.bf16.mxu1 %v18496_v37  ;;  %v3625_v37 = vrot.slane %v20247_v15, 3 }
 0x1e6   : > { %4150 = vmatmul.mubr.bf16.gmra.mrb[12].mxu1 %v3692_v48  ;;  %v3626_v18 = vsel %vm3573_vm3, %v3624_v17, %v3625_v37  ;;  %v3631_v36 = vsel %vm3573_vm3, %v3625_v37, %v3630_v11  ;;  %v18508_v48 = vld [vmem:[%s24630_s2 + $0xaa4] ss:$8 sps:$4 sm:$0xff]   ;;  %v3537_v17 = vld [vmem:[#allocation2 + $0x150] sm:$0xf8]  ;;  %v3539_v37 = vld [vmem:[#allocation2 + $0x170] sm:$0x7] }
 0x1e7   : > { %4406 = vmatpush1.bf16.msra.mxu1 %v18494_v25  ;;  %4159 = vmatprep.mubr.bf16.mxu1 %v3695_v54  ;;  %v18503_v25 = vld [vmem:[%s24630_s2 + $0xa90] ss:$8 sps:$4 sm:$0xff]   ;;  %v3643_v54 = vsel %vm3573_vm3, %v3638_v51, %v3642_v2  ;;  %v3696_v5 = vpack.c.bf16 %v3631_v36, %v3626_v18  ;;  %v18512_v11 = vld [vmem:[%s24630_s2 + $0xac0] ss:$8 sps:$4 sm:$0xff]   ;;  %v3644_v36 = vrot.slane %v3537_v17, 3  ;;  %v3780_v17 = vrot.slane %v20429_v56, 3 }
 0x1e8   : > { %4407 = vmatprep.subr.bf16.mxu1 %v18499_v14  ;;  %v3639_v14 = vsel %vm3573_vm3, %v3637_v63, %v3638_v51  ;;  %v3703_v63 = vld [vmem:[#allocation3 + $0x8] sm:$0xf8]  ;;  %v3705_v51 = vld [vmem:[#allocation3 + $0x28] sm:$0x7] }
 0x1e9   : > { %v3699_v41 = vpack.c.bf16 %v3643_v54, %v3639_v14  ;;  %v3650_v14 = vrot.slane %v3539_v37, 3  ;;  %v3769_v54 = vrot.slane %v3703_v63, 3  ;;  %v3774_v40 = vrot.slane %v3705_v51, 3 }
 0x1eb   : > { %4408 = vmatpush1.bf16.msra.mxu1 %v18497_v46  ;;  %v18511_v46 = vld [vmem:[%s24630_s2 + $0xab4] ss:$8 sps:$4 sm:$0xff]  }
 0x1ec   : > { %4409 = vmatprep.subr.bf16.mxu1 %v18502_v61  ;;  %v3635_v61 = vrot.slane %v24705_v28, 3 }
 0x1ee   : > { %4160 = vmatmul.mubr.bf16.gmra.mrb[16].mxu1 %v3694_v53  ;;  %v3636_v33 = vsel %vm3573_vm3, %v3634_v59, %v3635_v61  ;;  %v3641_v22 = vsel %vm3573_vm3, %v3635_v61, %v3640_v7  ;;  %v18514_v53 = vld [vmem:[%s24630_s2 + $0xac4] ss:$8 sps:$4 sm:$0xff]   ;;  %v3704_v61 = vld [vmem:[#allocation3 + $0x20] sm:$0x7] }
 0x1ef   : > { %4410 = vmatpush1.bf16.msra.mxu1 %v18500_v42  ;;  %4169 = vmatprep.mubr.bf16.mxu1 %v3697_v9  ;;  %v18509_v42 = vld [vmem:[%s24630_s2 + $0xab0] ss:$8 sps:$4 sm:$0xff]   ;;  %v3653_v9 = vsel %vm3573_vm3, %v3648_v16, %v3652_v8  ;;  %v3698_v2 = vpack.c.bf16 %v3641_v22, %v3636_v33  ;;  %v3702_v59 = vld [vmem:[#allocation3] sm:$0xf8] }
 0x1f0   : > { %4411 = vmatprep.subr.bf16.mxu1 %v18505_v35  ;;  %v3649_v35 = vsel %vm3573_vm3, %v3647_v29, %v3648_v16  ;;  %v18518_v7 = vld [vmem:[%s24630_s2 + $0xae0] ss:$8 sps:$4 sm:$0xff]   ;;  %v3707_v29 = vld [vmem:[#allocation3 + $0x38] sm:$0xf8]  ;;  %v3709_v16 = vld [vmem:[#allocation3 + $0x58] sm:$0x7] }
 0x1f1   : > { %v3701_v18 = vpack.c.bf16 %v3653_v9, %v3649_v35  ;;  %v3766_v22 = vrot.slane %v3702_v59, 3  ;;  %v3772_v35 = vrot.slane %v3704_v61, 3  ;;  %v3779_v9 = vrot.slane %v3707_v29, 3 }
 0x1f2   : > { %v3784_v37 = vrot.slane %v3709_v16, 3  ;;  %v3790_v59 = vrot.slane %v20461_v50, 3 }
 0x1f3   : > { %4412 = vmatpush1.bf16.msra.mxu1 %v18503_v25  ;;  %v18517_v25 = vld [vmem:[%s24630_s2 + $0xad4] ss:$8 sps:$4 sm:$0xff]  }
 0x1f4   : > { %4413 = vmatprep.subr.bf16.mxu1 %v18508_v48  ;;  %v3645_v48 = vrot.slane %v20361_v0, 3 }
 0x1f6   : > { %4170 = vmatmul.mubr.bf16.gmra.mrb[20].mxu1 %v3696_v5  ;;  %v3646_v58 = vsel %vm3573_vm3, %v3644_v36, %v3645_v48  ;;  %v3651_v60 = vsel %vm3573_vm3, %v3645_v48, %v3650_v14  ;;  %v18520_v5 = vld [vmem:[%s24630_s2 + $0xae4] ss:$8 sps:$4 sm:$0xff]   ;;  %v3706_v36 = vld [vmem:[#allocation3 + $0x30] sm:$0xf8]  ;;  %v3708_v48 = vld [vmem:[#allocation3 + $0x50] sm:$0x7] }
 0x1f7   : > { %4414 = vmatpush1.bf16.msra.mxu1 %v18506_v27  ;;  %4179 = vmatprep.mubr.bf16.mxu1 %v3699_v41  ;;  %v18515_v27 = vld [vmem:[%s24630_s2 + $0xad0] ss:$8 sps:$4 sm:$0xff]   ;;  %v3775_v41 = vsel %vm3573_vm3, %v3770_v23, %v3774_v40  ;;  %v3700_v8 = vpack.c.bf16 %v3651_v60, %v3646_v58  ;;  %v18524_v14 = vld [vmem:[%s24630_s2 + $0x400] ss:$8 sps:$4 sm:$0xff]   ;;  %v3776_v60 = vrot.slane %v3706_v36, 3  ;;  %v3800_v36 = vrot.slane %v20493_v39, 3 }
 0x1f8   : > { %4415 = vmatprep.subr.bf16.mxu1 %v18511_v46  ;;  %v3771_v46 = vsel %vm3573_vm3, %v3769_v54, %v3770_v23  ;;  %v3711_v54 = vld [vmem:[#allocation3 + $0x68] sm:$0xf8]  ;;  %v3713_v23 = vld [vmem:[#allocation3 + $0x88] sm:$0x7] }
 0x1f9   : > { %v3879_v33 = vpack.c.bf16 %v3775_v41, %v3771_v46  ;;  %v3782_v46 = vrot.slane %v3708_v48, 3  ;;  %v3789_v41 = vrot.slane %v3711_v54, 3  ;;  %v3794_v61 = vrot.slane %v3713_v23, 3 }
 0x1fb   : > { %4416 = vmatpush1.bf16.msra.mxu1 %v18509_v42  ;;  %v18523_v42 = vld [vmem:[%s24630_s2 + $0xaf4] ss:$8 sps:$4 sm:$0xff]  }
 0x1fc   : > { %4417 = vmatprep.subr.bf16.mxu1 %v18514_v53  ;;  %v3767_v53 = vrot.slane %v20422_v30, 3 }
 0x1fe   : > { %4180 = vmatmul.mubr.bf16.gmra.mrb[24].mxu1 %v3698_v2  ;;  %v3768_v63 = vsel %vm3573_vm3, %v3766_v22, %v3767_v53  ;;  %v3773_v51 = vsel %vm3573_vm3, %v3767_v53, %v3772_v35  ;;  %v18526_v2 = vld [vmem:[%s24630_s2 + $0x404] ss:$8 sps:$4 sm:$0xff]   ;;  %v3712_v53 = vld [vmem:[#allocation3 + $0x80] sm:$0x7] }
 0x1ff   : > { %4418 = vmatpush1.bf16.msra.mxu1 %v18512_v11  ;;  %4189 = vmatprep.mubr.bf16.mxu1 %v3701_v18  ;;  %v18521_v11 = vld [vmem:[%s24630_s2 + $0xaf0] ss:$8 sps:$4 sm:$0xff]   ;;  %v3785_v18 = vsel %vm3573_vm3, %v3780_v17, %v3784_v37  ;;  %v3878_v40 = vpack.c.bf16 %v3773_v51, %v3768_v63  ;;  %v3710_v22 = vld [vmem:[#allocation3 + $0x60] sm:$0xf8] }
 0x200   : > { %4419 = vmatprep.subr.bf16.mxu1 %v18517_v25  ;;  %v3781_v25 = vsel %vm3573_vm3, %v3779_v9, %v3780_v17  ;;  %v18530_v35 = vld [vmem:[%s24630_s2 + $0x420] ss:$8 sps:$4 sm:$0xff]   ;;  %v3715_v9 = vld [vmem:[#allocation3 + $0x98] sm:$0xf8]  ;;  %v3717_v17 = vld [vmem:[#allocation3 + $0xb8] sm:$0x7] }
 0x201   : > { %v3881_v58 = vpack.c.bf16 %v3785_v18, %v3781_v25  ;;  %v3786_v51 = vrot.slane %v3710_v22, 3  ;;  %v3792_v25 = vrot.slane %v3712_v53, 3  ;;  %v3799_v18 = vrot.slane %v3715_v9, 3 }
 0x202   : > { %v3804_v48 = vrot.slane %v3717_v17, 3  ;;  %v3810_v22 = vrot.slane %v20525_v49, 3 }
 0x203   : > { %4420 = vmatpush1.bf16.msra.mxu1 %v18515_v27  ;;  %v18529_v27 = vld [vmem:[%s24630_s2 + $0x414] ss:$8 sps:$4 sm:$0xff]  }
 0x204   : > { %4421 = vmatprep.subr.bf16.mxu1 %v18520_v5  ;;  %v3777_v5 = vrot.slane %v20454_v44, 3 }
 0x206   : > { %4190 = vmatmul.mubr.bf16.gmra.mrb[28].mxu1 %v3700_v8  ;;  %v3778_v29 = vsel %vm3573_vm3, %v3776_v60, %v3777_v5  ;;  %v3783_v16 = vsel %vm3573_vm3, %v3777_v5, %v3782_v46  ;;  %v18532_v8 = vld [vmem:[%s24630_s2 + $0x424] ss:$8 sps:$4 sm:$0xff]   ;;  %v3714_v60 = vld [vmem:[#allocation3 + $0x90] sm:$0xf8]  ;;  %v3716_v5 = vld [vmem:[#allocation3 + $0xb0] sm:$0x7] }
 0x207   : > { %4422 = vmatpush1.bf16.msra.mxu1 %v18518_v7  ;;  %4425 = vmatprep.mubr.bf16.mxu1 %v3879_v33  ;;  %v18527_v7 = vld [vmem:[%s24630_s2 + $0x410] ss:$8 sps:$4 sm:$0xff]   ;;  %v3795_v33 = vsel %vm3573_vm3, %v3790_v59, %v3794_v61  ;;  %v3880_v37 = vpack.c.bf16 %v3783_v16, %v3778_v29  ;;  %v18536_v46 = vld [vmem:[%s24630_s2 + $0x440] ss:$8 sps:$4 sm:$0xff]   ;;  %v3796_v16 = vrot.slane %v3714_v60, 3  ;;  %v3820_v60 = vrot.slane %v20557_v32, 3 }
 0x208   : > { %4423 = vmatprep.subr.bf16.mxu1 %v18523_v42  ;;  %v3791_v42 = vsel %vm3573_vm3, %v3789_v41, %v3790_v59  ;;  %v3719_v41 = vld [vmem:[#allocation3 + $0xc8] sm:$0xf8]  ;;  %v3721_v59 = vld [vmem:[#allocation3 + $0xe8] sm:$0x7] }
 0x209   : > { %v3883_v63 = vpack.c.bf16 %v3795_v33, %v3791_v42  ;;  %v3802_v42 = vrot.slane %v3716_v5, 3  ;;  %v3809_v33 = vrot.slane %v3719_v41, 3  ;;  %v3814_v53 = vrot.slane %v3721_v59, 3 }
 0x20b   : > { %4424 = vmatpush1.bf16.msra.mxu1 %v18521_v11  ;;  %v18535_v11 = vld [vmem:[%s24630_s2 + $0x434] ss:$8 sps:$4 sm:$0xff]  }
 0x20c   : > { %5148 = vmatprep.subr.bf16.mxu1 %v18526_v2  ;;  %v3787_v2 = vrot.slane %v20486_v12, 3 }
 0x20e   : > { %4426 = vmatmul.mubr.bf16.vlgmr.msra.gmra.mrb[32].mxu1 %v3878_v40  ;;  %v3788_v54 = vsel %vm3573_vm3, %v3786_v51, %v3787_v2  ;;  %v3793_v23 = vsel %vm3573_vm3, %v3787_v2, %v3792_v25  ;;  %v18538_v40 = vld [vmem:[%s24630_s2 + $0x444] ss:$8 sps:$4 sm:$0xff]   ;;  %v3720_v2 = vld [vmem:[#allocation3 + $0xe0] sm:$0x7] }
 0x20f   : > { %5149 = vmatpush1.bf16.msra.mxu1 %v18524_v14  ;;  %4435 = vmatprep.mubr.bf16.mxu1 %v3881_v58  ;;  %v18533_v14 = vld [vmem:[%s24630_s2 + $0x430] ss:$8 sps:$4 sm:$0xff]   ;;  %v3805_v58 = vsel %vm3573_vm3, %v3800_v36, %v3804_v48  ;;  %v3882_v61 = vpack.c.bf16 %v3793_v23, %v3788_v54  ;;  %v3718_v51 = vld [vmem:[#allocation3 + $0xc0] sm:$0xf8] }
 0x210   : > { %5150 = vmatprep.subr.bf16.mxu1 %v18529_v27  ;;  %v3801_v27 = vsel %vm3573_vm3, %v3799_v18, %v3800_v36  ;;  %v18542_v25 = vld [vmem:[%s24630_s2 + $0x460] ss:$8 sps:$4 sm:$0xff]   ;;  %v3723_v18 = vld [vmem:[#allocation3 + $0xf8] sm:$0xf8]  ;;  %v3725_v36 = vld [vmem:[#allocation3 + $0x118] sm:$0x7] }
 0x211   : > { %v3885_v29 = vpack.c.bf16 %v3805_v58, %v3801_v27  ;;  %v3806_v23 = vrot.slane %v3718_v51, 3  ;;  %v3812_v27 = vrot.slane %v3720_v2, 3  ;;  %v3819_v58 = vrot.slane %v3723_v18, 3 }
 0x212   : > { %v3824_v5 = vrot.slane %v3725_v36, 3  ;;  %v3830_v51 = vrot.slane %v20592_v24, 3 }
 0x213   : > { %5151 = vmatpush1.bf16.msra.mxu1 %v18527_v7  ;;  %v18541_v7 = vld [vmem:[%s24630_s2 + $0x454] ss:$8 sps:$4 sm:$0xff]  }
 0x214   : > { %5152 = vmatprep.subr.bf16.mxu1 %v18532_v8  ;;  %v3797_v8 = vrot.slane %v20518_v55, 3 }
 0x216   : > { %4436 = vmatmul.mubr.bf16.gmra.mrb[36].mxu1 %v3880_v37  ;;  %v3798_v9 = vsel %vm3573_vm3, %v3796_v16, %v3797_v8  ;;  %v3803_v17 = vsel %vm3573_vm3, %v3797_v8, %v3802_v42  ;;  %v18544_v37 = vld [vmem:[%s24630_s2 + $0x464] ss:$8 sps:$4 sm:$0xff]   ;;  %v3722_v16 = vld [vmem:[#allocation3 + $0xf0] sm:$0xf8]  ;;  %v3724_v8 = vld [vmem:[#allocation3 + $0x110] sm:$0x7] }
 0x217   : > { %5153 = vmatpush1.bf16.msra.mxu1 %v18530_v35  ;;  %4445 = vmatprep.mubr.bf16.mxu1 %v3883_v63  ;;  %v18539_v35 = vld [vmem:[%s24630_s2 + $0x450] ss:$8 sps:$4 sm:$0xff]   ;;  %v3815_v63 = vsel %vm3573_vm3, %v3810_v22, %v3814_v53  ;;  %v3884_v48 = vpack.c.bf16 %v3803_v17, %v3798_v9  ;;  %v18548_v42 = vld [vmem:[%s24630_s2 + $0x480] ss:$8 sps:$4 sm:$0xff]   ;;  %v3816_v17 = vrot.slane %v3722_v16, 3  ;;  %v3840_v16 = vrot.slane %v20617_v20, 3 }
 0x218   : > { %5154 = vmatprep.subr.bf16.mxu1 %v18535_v11  ;;  %v3811_v11 = vsel %vm3573_vm3, %v3809_v33, %v3810_v22  ;;  %v3727_v33 = vld [vmem:[#allocation3 + $0x128] sm:$0xf8]  ;;  %v3729_v22 = vld [vmem:[#allocation3 + $0x148] sm:$0x7] }
 0x219   : > { %v3887_v54 = vpack.c.bf16 %v3815_v63, %v3811_v11  ;;  %v3822_v11 = vrot.slane %v3724_v8, 3  ;;  %v3829_v63 = vrot.slane %v3727_v33, 3  ;;  %v3834_v2 = vrot.slane %v3729_v22, 3 }
 0x21b   : > { %5155 = vmatpush1.bf16.msra.mxu1 %v18533_v14  ;;  %v18547_v14 = vld [vmem:[%s24630_s2 + $0x474] ss:$8 sps:$4 sm:$0xff]  }
 0x21c   : > { %5156 = vmatprep.subr.bf16.mxu1 %v18538_v40  ;;  %v3807_v40 = vrot.slane %v20550_v52, 3 }
 0x21e   : > { %4446 = vmatmul.mubr.bf16.gmra.mrb[40].mxu1 %v3882_v61  ;;  %v3808_v41 = vsel %vm3573_vm3, %v3806_v23, %v3807_v40  ;;  %v3813_v59 = vsel %vm3573_vm3, %v3807_v40, %v3812_v27  ;;  %v18550_v61 = vld [vmem:[%s24630_s2 + $0x484] ss:$8 sps:$4 sm:$0xff]   ;;  %v3728_v40 = vld [vmem:[#allocation3 + $0x140] sm:$0x7] }
 0x21f   : > { %5157 = vmatpush1.bf16.msra.mxu1 %v18536_v46  ;;  %4455 = vmatprep.mubr.bf16.mxu1 %v3885_v29  ;;  %v18545_v46 = vld [vmem:[%s24630_s2 + $0x470] ss:$8 sps:$4 sm:$0xff]   ;;  %v3825_v29 = vsel %vm3573_vm3, %v3820_v60, %v3824_v5  ;;  %v3886_v53 = vpack.c.bf16 %v3813_v59, %v3808_v41  ;;  %v3726_v23 = vld [vmem:[#allocation3 + $0x120] sm:$0xf8] }
 0x220   : > { %5158 = vmatprep.subr.bf16.mxu1 %v18541_v7  ;;  %v3821_v7 = vsel %vm3573_vm3, %v3819_v58, %v3820_v60  ;;  %v18554_v27 = vld [vmem:[%s24630_s2 + $0x4a0] ss:$8 sps:$4 sm:$0xff]   ;;  %v3731_v58 = vld [vmem:[#allocation3 + $0x158] sm:$0xf8]  ;;  %v3733_v60 = vld [vmem:[#allocation3 + $0x178] sm:$0x7] }
 0x221   : > { %v3889_v9 = vpack.c.bf16 %v3825_v29, %v3821_v7  ;;  %v3826_v59 = vrot.slane %v3726_v23, 3  ;;  %v3832_v7 = vrot.slane %v3728_v40, 3  ;;  %v3839_v29 = vrot.slane %v3731_v58, 3 }
 0x222   : > { %v3844_v8 = vrot.slane %v3733_v60, 3  ;;  %v4639_v23 = vrot.slane %v19779_v31, 4 }
 0x223   : > { %5159 = vmatpush1.bf16.msra.mxu1 %v18539_v35  ;;  %v18553_v35 = vld [vmem:[%s24630_s2 + $0x494] ss:$8 sps:$4 sm:$0xff]  }
 0x224   : > { %5160 = vmatprep.subr.bf16.mxu1 %v18544_v37  ;;  %v3817_v37 = vrot.slane %v20582_v10, 3 }
 0x226   : > { %4456 = vmatmul.mubr.bf16.gmra.mrb[44].mxu1 %v3884_v48  ;;  %v3818_v18 = vsel %vm3573_vm3, %v3816_v17, %v3817_v37  ;;  %v3823_v36 = vsel %vm3573_vm3, %v3817_v37, %v3822_v11  ;;  %v18556_v48 = vld [vmem:[%s24630_s2 + $0x4a4] ss:$8 sps:$4 sm:$0xff]   ;;  %v3730_v17 = vld [vmem:[#allocation3 + $0x150] sm:$0xf8]  ;;  %v3732_v37 = vld [vmem:[#allocation3 + $0x170] sm:$0x7] }
 0x227   : > { %5161 = vmatpush1.bf16.msra.mxu1 %v18542_v25  ;;  %4465 = vmatprep.mubr.bf16.mxu1 %v3887_v54  ;;  %v18551_v25 = vld [vmem:[%s24630_s2 + $0x490] ss:$8 sps:$4 sm:$0xff]   ;;  %v3835_v54 = vsel %vm3573_vm3, %v3830_v51, %v3834_v2  ;;  %v3888_v5 = vpack.c.bf16 %v3823_v36, %v3818_v18  ;;  %v18560_v11 = vld [vmem:[%s24630_s2 + $0x4c0] ss:$8 sps:$4 sm:$0xff]   ;;  %v3836_v36 = vrot.slane %v3730_v17, 3  ;;  %v4649_v17 = vrot.slane %v19937_v19, 4 }
 0x228   : > { %5162 = vmatprep.subr.bf16.mxu1 %v18547_v14  ;;  %v3831_v14 = vsel %vm3573_vm3, %v3829_v63, %v3830_v51  ;;  %v4571_v63 = vld [vmem:[#allocation2 + $0x8] sm:$0xf0]  ;;  %v4573_v51 = vld [vmem:[#allocation2 + $0x28] sm:$0xf] }
 0x229   : > { %v3891_v41 = vpack.c.bf16 %v3835_v54, %v3831_v14  ;;  %v3842_v14 = vrot.slane %v3732_v37, 3  ;;  %v4638_v54 = vrot.slane %v4571_v63, 4  ;;  %v4643_v40 = vrot.slane %v4573_v51, 4 }
 0x22b   : > { %5163 = vmatpush1.bf16.msra.mxu1 %v18545_v46  ;;  %v18559_v46 = vld [vmem:[%s24630_s2 + $0x4b4] ss:$8 sps:$4 sm:$0xff]  }
 0x22c   : > { %5164 = vmatprep.subr.bf16.mxu1 %v18550_v61  ;;  %v3827_v61 = vrot.slane %v20383_v6, 3 }
 0x22e   : > { %4466 = vmatmul.mubr.bf16.gmra.mrb[48].mxu1 %v3886_v53  ;;  %v3828_v33 = vsel %vm3573_vm3, %v3826_v59, %v3827_v61  ;;  %v3833_v22 = vsel %vm3573_vm3, %v3827_v61, %v3832_v7  ;;  %v18562_v53 = vld [vmem:[%s24630_s2 + $0x4c4] ss:$8 sps:$4 sm:$0xff]   ;;  %v4572_v61 = vld [vmem:[#allocation2 + $0x20] sm:$0xf] }
 0x22f   : > { %5165 = vmatpush1.bf16.msra.mxu1 %v18548_v42  ;;  %4475 = vmatprep.mubr.bf16.mxu1 %v3889_v9  ;;  %v18557_v42 = vld [vmem:[%s24630_s2 + $0x4b0] ss:$8 sps:$4 sm:$0xff]   ;;  %v3845_v9 = vsel %vm3573_vm3, %v3840_v16, %v3844_v8  ;;  %v3890_v2 = vpack.c.bf16 %v3833_v22, %v3828_v33  ;;  %v4570_v59 = vld [vmem:[#allocation2] sm:$0xf0]  ;;  %v18566_v7 = vld [vmem:[%s24630_s2 + $0x4e0] ss:$8 sps:$4 sm:$0xff]  }
 0x230   : > { %5166 = vmatprep.subr.bf16.mxu1 %v18553_v35  ;;  %v3841_v35 = vsel %vm3573_vm3, %v3839_v29, %v3840_v16  ;;  %v4575_v29 = vld [vmem:[#allocation2 + $0x38] sm:$0xf0]  ;;  %v4577_v16 = vld [vmem:[#allocation2 + $0x58] sm:$0xf]  ;;  %v4635_v22 = vrot.slane %v4570_v59, 4  ;;  %v4659_v59 = vrot.slane %v20006_v47, 4 }
 0x231   : > { %v3893_v18 = vpack.c.bf16 %v3845_v9, %v3841_v35  ;;  %v4641_v35 = vrot.slane %v4572_v61, 4  ;;  %v4648_v9 = vrot.slane %v4575_v29, 4  ;;  %v4653_v37 = vrot.slane %v4577_v16, 4 }
 0x233   : > { %5167 = vmatpush1.bf16.msra.mxu1 %v18551_v25  ;;  %v18565_v25 = vld [vmem:[%s24630_s2 + $0x4d4] ss:$8 sps:$4 sm:$0xff]  }
 0x234   : > { %5168 = vmatprep.subr.bf16.mxu1 %v18556_v48  ;;  %v3837_v48 = vrot.slane %v20413_v43, 3 }
 0x236   : > { %4476 = vmatmul.mubr.bf16.gmra.mrb[52].mxu1 %v3888_v5  ;;  %v3838_v58 = vsel %vm3573_vm3, %v3836_v36, %v3837_v48  ;;  %v3843_v60 = vsel %vm3573_vm3, %v3837_v48, %v3842_v14  ;;  %v18568_v5 = vld [vmem:[%s24630_s2 + $0x4e4] ss:$8 sps:$4 sm:$0xff]   ;;  %v4574_v36 = vld [vmem:[#allocation2 + $0x30] sm:$0xf0]  ;;  %v4576_v48 = vld [vmem:[#allocation2 + $0x50] sm:$0xf] }
 0x237   : > { %5169 = vmatpush1.bf16.msra.mxu1 %v18554_v27  ;;  %4485 = vmatprep.mubr.bf16.mxu1 %v3891_v41  ;;  %v18563_v27 = vld [vmem:[%s24630_s2 + $0x4d0] ss:$8 sps:$4 sm:$0xff]   ;;  %v4644_v41 = vsel %vm4634_vm4, %v4639_v23, %v4643_v40  ;;  %v3892_v8 = vpack.c.bf16 %v3843_v60, %v3838_v58  ;;  %v18572_v14 = vld [vmem:[%s24630_s2 + $0xb00] ss:$8 sps:$4 sm:$0xff]   ;;  %v4645_v60 = vrot.slane %v4574_v36, 4  ;;  %v4669_v36 = vrot.slane %v20072_v1, 4 }
 0x238   : > { %5170 = vmatprep.subr.bf16.mxu1 %v18559_v46  ;;  %v4640_v46 = vsel %vm4634_vm4, %v4638_v54, %v4639_v23  ;;  %v4579_v54 = vld [vmem:[#allocation2 + $0x68] sm:$0xf0]  ;;  %v4581_v23 = vld [vmem:[#allocation2 + $0x88] sm:$0xf] }
 0x239   : > { %v4748_v33 = vpack.c.bf16 %v4644_v41, %v4640_v46  ;;  %v4651_v46 = vrot.slane %v4576_v48, 4  ;;  %v4658_v41 = vrot.slane %v4579_v54, 4  ;;  %v4663_v61 = vrot.slane %v4581_v23, 4 }
 0x23b   : > { %5171 = vmatpush1.bf16.msra.mxu1 %v18557_v42  ;;  %v18571_v42 = vld [vmem:[%s24630_s2 + $0x4f4] ss:$8 sps:$4 sm:$0xff]  }
 0x23c   : > { %5172 = vmatprep.subr.bf16.mxu1 %v18562_v53  ;;  %v4636_v53 = vrot.slane %v19925_v38, 4 }
 0x23e   : > { %4486 = vmatmul.mubr.bf16.gmra.mrb[56].mxu1 %v3890_v2  ;;  %v4637_v63 = vsel %vm4634_vm4, %v4635_v22, %v4636_v53  ;;  %v4642_v51 = vsel %vm4634_vm4, %v4636_v53, %v4641_v35  ;;  %v18574_v2 = vld [vmem:[%s24630_s2 + $0xb04] ss:$8 sps:$4 sm:$0xff]   ;;  %v4580_v53 = vld [vmem:[#allocation2 + $0x80] sm:$0xf]  ;;  %v4583_v35 = vld [vmem:[#allocation2 + $0x98] sm:$0xf0] }
 0x23f   : > { %5173 = vmatpush1.bf16.msra.mxu1 %v18560_v11  ;;  %4495 = vmatprep.mubr.bf16.mxu1 %v3893_v18  ;;  %v18569_v11 = vld [vmem:[%s24630_s2 + $0x4f0] ss:$8 sps:$4 sm:$0xff]   ;;  %v4654_v18 = vsel %vm4634_vm4, %v4649_v17, %v4653_v37  ;;  %v4747_v40 = vpack.c.bf16 %v4642_v51, %v4637_v63  ;;  %v4578_v22 = vld [vmem:[#allocation2 + $0x60] sm:$0xf0]  ;;  %v18578_v37 = vld [vmem:[%s24630_s2 + $0xb20] ss:$8 sps:$4 sm:$0xff]  }
 0x240   : > { %5174 = vmatprep.subr.bf16.mxu1 %v18565_v25  ;;  %v4650_v25 = vsel %vm4634_vm4, %v4648_v9, %v4649_v17  ;;  %v4585_v9 = vld [vmem:[#allocation2 + $0xb8] sm:$0xf]  ;;  %v4655_v63 = vrot.slane %v4578_v22, 4  ;;  %v4656_v51 = vrot.slane %v20055_v26, 4  ;;  %v4679_v22 = vrot.slane %v20133_v62, 4 }
 0x241   : > { %v4750_v58 = vpack.c.bf16 %v4654_v18, %v4650_v25  ;;  %v18583_v25 = vld [vmem:[%s24630_s2 + $0xb34] ss:$8 sps:$4 sm:$0xff]   ;;  %v4668_v18 = vrot.slane %v4583_v35, 4  ;;  %v4673_v48 = vrot.slane %v4585_v9, 4  ;;  %v18587_v35 = vld [vmem:[%s24630_s2 + $0xb50] ss:$8 sps:$4 sm:$0xff]  }
 0x242   : > { %v4657_v54 = vsel %vm4634_vm4, %v4655_v63, %v4656_v51 }
 0x243   : > { %5175 = vmatpush1.bf16.msra.mxu1 %v18563_v27  ;;  %v18577_v27 = vld [vmem:[%s24630_s2 + $0xb14] ss:$8 sps:$4 sm:$0xff]  }
 0x244   : > { %5176 = vmatprep.subr.bf16.mxu1 %v18568_v5  ;;  %v4646_v5 = vrot.slane %v19981_v13, 4 }
 0x246   : > { %4496 = vmatmul.mubr.bf16.gmra.mrb[60].mxu1 %v3892_v8  ;;  %v4647_v29 = vsel %vm4634_vm4, %v4645_v60, %v4646_v5  ;;  %v4652_v16 = vsel %vm4634_vm4, %v4646_v5, %v4651_v46  ;;  %v18580_v8 = vld [vmem:[%s24630_s2 + $0xb24] ss:$8 sps:$4 sm:$0xff]   ;;  %v4582_v60 = vld [vmem:[#allocation2 + $0x90] sm:$0xf0]  ;;  %v4584_v5 = vld [vmem:[#allocation2 + $0xb0] sm:$0xf] }
 0x247   : > { %5177 = vmatpush1.bf16.msra.mxu1 %v18566_v7  ;;  %5180 = vmatprep.mubr.bf16.mxu1 %v4748_v33  ;;  %v18575_v7 = vld [vmem:[%s24630_s2 + $0xb10] ss:$8 sps:$4 sm:$0xff]   ;;  %v4664_v33 = vsel %vm4634_vm4, %v4659_v59, %v4663_v61  ;;  %v4749_v17 = vpack.c.bf16 %v4652_v16, %v4647_v29  ;;  %v4587_v46 = vld [vmem:[#allocation2 + $0xc8] sm:$0xf0]  ;;  %v18584_v61 = vld [vmem:[%s24630_s2 + $0xb40] ss:$8 sps:$4 sm:$0xff]  }
 0x248   : > { %5178 = vmatprep.subr.bf16.mxu1 %v18571_v42  ;;  %v4660_v42 = vsel %vm4634_vm4, %v4658_v41, %v4659_v59  ;;  %v4589_v41 = vld [vmem:[#allocation2 + $0xe8] sm:$0xf]  ;;  %v4665_v29 = vrot.slane %v4582_v60, 4  ;;  %v4666_v16 = vrot.slane %v20116_v45, 4  ;;  %v4689_v60 = vrot.slane %v20196_v3, 4 }
 0x24a   : > { %v4667_v9 = vsel %vm4634_vm4, %v4665_v29, %v4666_v16 }
 0x24b   : > { %5179 = vmatpush1.bf16.msra.mxu1 %v18569_v11  ;;  %v4752_v11 = vpack.c.bf16 %v4664_v33, %v4660_v42  ;;  %v18589_v42 = vld [vmem:[%s24630_s2 + $0xb54] ss:$8 sps:$4 sm:$0xff]   ;;  %v4678_v33 = vrot.slane %v4587_v46, 4  ;;  %v18593_v46 = vld [vmem:[%s24630_s2 + $0xb70] ss:$8 sps:$4 sm:$0xff]  }
 0x24c   : > { %5454 = vmatprep.subr.bf16.mxu1 %v18574_v2  ;;  %v4661_v2 = vrot.slane %v4580_v53, 4  ;;  %v4683_v53 = vrot.slane %v4589_v41, 4 }
 0x24e   : > { %5181 = vmatmul.mubr.bf16.vlgmr.msra.gmra.mrb[0].mxu1 %v4747_v40  ;;  %v4662_v23 = vsel %vm4634_vm4, %v4656_v51, %v4661_v2  ;;  %v18586_v40 = vld [vmem:[%s24630_s2 + $0xb44] ss:$8 sps:$4 sm:$0xff]   ;;  %v4684_v63 = vsel %vm4634_vm4, %v4679_v22, %v4683_v53  ;;  %v4588_v2 = vld [vmem:[#allocation2 + $0xe0] sm:$0xf] }
 0x24f   : > { %5455 = vmatpush1.bf16.msra.mxu1 %v18572_v14  ;;  %5190 = vmatprep.mubr.bf16.mxu1 %v4750_v58  ;;  %v18581_v14 = vld [vmem:[%s24630_s2 + $0xb30] ss:$8 sps:$4 sm:$0xff]   ;;  %v4674_v58 = vsel %vm4634_vm4, %v4669_v36, %v4673_v48  ;;  %v4751_v59 = vpack.c.bf16 %v4662_v23, %v4657_v54  ;;  %v4586_v51 = vld [vmem:[#allocation2 + $0xc0] sm:$0xf0]  ;;  %v18590_v48 = vld [vmem:[%s24630_s2 + $0xb60] ss:$8 sps:$4 sm:$0xff]  }
 0x250   : > { %5456 = vmatprep.subr.bf16.mxu1 %v18577_v27  ;;  %v4670_v27 = vsel %vm4634_vm4, %v4668_v18, %v4669_v36  ;;  %v4593_v18 = vld [vmem:[#allocation2 + $0x118] sm:$0xf]  ;;  %v4675_v54 = vrot.slane %v4586_v51, 4  ;;  %v4676_v23 = vrot.slane %v20174_v57, 4  ;;  %v18596_v53 = vld [vmem:[%s24630_s2 + $0xb80] ss:$8 sps:$4 sm:$0xff]  }
 0x251   : > { %v4699_v51 = vrot.slane %v24704_v4, 4 }
 0x252   : > { %v4677_v41 = vsel %vm4634_vm4, %v4675_v54, %v4676_v23 }
 0x253   : > { %5457 = vmatpush1.bf16.msra.mxu1 %v18575_v7  ;;  %v4754_v7 = vpack.c.bf16 %v4674_v58, %v4670_v27  ;;  %v18595_v27 = vld [vmem:[%s24630_s2 + $0xb74] ss:$8 sps:$4 sm:$0xff]  }
 0x254   : > { %5458 = vmatprep.subr.bf16.mxu1 %v18580_v8  ;;  %v4671_v8 = vrot.slane %v4584_v5, 4  ;;  %v4693_v5 = vrot.slane %v4593_v18, 4 }
 0x256   : > { %5191 = vmatmul.mubr.bf16.gmra.mrb[4].mxu1 %v4749_v17  ;;  %v4672_v17 = vsel %vm4634_vm4, %v4666_v16, %v4671_v8  ;;  %v4694_v29 = vsel %vm4634_vm4, %v4689_v60, %v4693_v5  ;;  %v4590_v16 = vld [vmem:[#allocation2 + $0xf0] sm:$0xf0]  ;;  %v4592_v8 = vld [vmem:[#allocation2 + $0x110] sm:$0xf]  ;;  %v18602_v5 = vld [vmem:[%s24630_s2 + $0xba0] ss:$8 sps:$4 sm:$0xff]  }
 0x257   : > { %5459 = vmatpush1.bf16.msra.mxu1 %v18578_v37  ;;  %5200 = vmatprep.mubr.bf16.mxu1 %v4752_v11  ;;  %v18592_v37 = vld [vmem:[%s24630_s2 + $0xb64] ss:$8 sps:$4 sm:$0xff]   ;;  %v4680_v11 = vsel %vm4634_vm4, %v4678_v33, %v4679_v22  ;;  %v4753_v36 = vpack.c.bf16 %v4672_v17, %v4667_v9  ;;  %v4597_v33 = vld [vmem:[#allocation2 + $0x148] sm:$0xf]  ;;  %v4685_v9 = vrot.slane %v4590_v16, 4  ;;  %v4686_v17 = vrot.slane %v20247_v15, 4 }
 0x258   : > { %5460 = vmatprep.subr.bf16.mxu1 %v18583_v25  ;;  %v4591_v25 = vld [vmem:[#allocation2 + $0xf8] sm:$0xf0]  ;;  %v4709_v16 = vrot.slane %v24706_v21, 4 }
 0x259   : > { %v4688_v58 = vrot.slane %v4591_v25, 4  ;;  %v18599_v25 = vld [vmem:[%s24630_s2 + $0xb90] ss:$8 sps:$4 sm:$0xff]   ;;  %v4687_v18 = vsel %vm4634_vm4, %v4685_v9, %v4686_v17 }
 0x25b   : > { %5461 = vmatpush1.bf16.msra.mxu1 %v18581_v14  ;;  %v4756_v14 = vpack.c.bf16 %v4684_v63, %v4680_v11  ;;  %v18601_v11 = vld [vmem:[%s24630_s2 + $0xb94] ss:$8 sps:$4 sm:$0xff]  }
 0x25c   : > { %5462 = vmatprep.subr.bf16.mxu1 %v18586_v40  ;;  %v4681_v40 = vrot.slane %v4588_v2, 4  ;;  %v4703_v2 = vrot.slane %v4597_v33, 4 }
 0x25e   : > { %5201 = vmatmul.mubr.bf16.gmra.mrb[8].mxu1 %v4751_v59  ;;  %v4682_v59 = vsel %vm4634_vm4, %v4676_v23, %v4681_v40  ;;  %v4704_v54 = vsel %vm4634_vm4, %v4699_v51, %v4703_v2  ;;  %v4594_v23 = vld [vmem:[#allocation2 + $0x120] sm:$0xf0]  ;;  %v4596_v40 = vld [vmem:[#allocation2 + $0x140] sm:$0xf] }
 0x25f   : > { %5463 = vmatpush1.bf16.msra.mxu1 %v18584_v61  ;;  %5210 = vmatprep.mubr.bf16.mxu1 %v4754_v7  ;;  %v18598_v61 = vld [vmem:[%s24630_s2 + $0xb84] ss:$8 sps:$4 sm:$0xff]   ;;  %v4690_v7 = vsel %vm4634_vm4, %v4688_v58, %v4689_v60  ;;  %v4755_v22 = vpack.c.bf16 %v4682_v59, %v4677_v41  ;;  %v4601_v58 = vld [vmem:[#allocation2 + $0x178] sm:$0xf]  ;;  %v4695_v41 = vrot.slane %v4594_v23, 4  ;;  %v4696_v59 = vrot.slane %v24705_v28, 4 }
 0x260   : > { %5464 = vmatprep.subr.bf16.mxu1 %v18589_v42  ;;  %v4595_v42 = vld [vmem:[#allocation2 + $0x128] sm:$0xf0]  ;;  %v18608_v2 = vld [vmem:[%s24630_s2 + $0xbc0] ss:$8 sps:$4 sm:$0xff]   ;;  %v4831_v23 = vrot.slane %v20380_v34, 4 }
 0x261   : > { %v4698_v63 = vrot.slane %v4595_v42, 4  ;;  %v18605_v42 = vld [vmem:[%s24630_s2 + $0xbb0] ss:$8 sps:$4 sm:$0xff]   ;;  %v4697_v33 = vsel %vm4634_vm4, %v4695_v41, %v4696_v59 }
 0x263   : > { %5465 = vmatpush1.bf16.msra.mxu1 %v18587_v35  ;;  %v4758_v35 = vpack.c.bf16 %v4694_v29, %v4690_v7  ;;  %v18607_v7 = vld [vmem:[%s24630_s2 + $0xbb4] ss:$8 sps:$4 sm:$0xff]  }
 0x264   : > { %5466 = vmatprep.subr.bf16.mxu1 %v18592_v37  ;;  %v4691_v37 = vrot.slane %v4592_v8, 4  ;;  %v4713_v8 = vrot.slane %v4601_v58, 4 }
 0x266   : > { %5211 = vmatmul.mubr.bf16.gmra.mrb[12].mxu1 %v4753_v36  ;;  %v4692_v36 = vsel %vm4634_vm4, %v4686_v17, %v4691_v37  ;;  %v4714_v9 = vsel %vm4634_vm4, %v4709_v16, %v4713_v8  ;;  %v4598_v17 = vld [vmem:[#allocation2 + $0x150] sm:$0xf0]  ;;  %v4600_v37 = vld [vmem:[#allocation2 + $0x170] sm:$0xf]  ;;  %v18614_v8 = vld [vmem:[%s24630_s2 + $0xbe0] ss:$8 sps:$4 sm:$0xff]  }
 0x267   : > { %5467 = vmatpush1.bf16.msra.mxu1 %v18590_v48  ;;  %5220 = vmatprep.mubr.bf16.mxu1 %v4756_v14  ;;  %v18604_v48 = vld [vmem:[%s24630_s2 + $0xba4] ss:$8 sps:$4 sm:$0xff]   ;;  %v4700_v14 = vsel %vm4634_vm4, %v4698_v63, %v4699_v51  ;;  %v4757_v60 = vpack.c.bf16 %v4692_v36, %v4687_v18  ;;  %v4766_v63 = vld [vmem:[#allocation3 + $0x28] sm:$0xf]  ;;  %v4705_v18 = vrot.slane %v4598_v17, 4  ;;  %v4706_v36 = vrot.slane %v20361_v0, 4 }
 0x268   : > { %5468 = vmatprep.subr.bf16.mxu1 %v18595_v27  ;;  %v4599_v27 = vld [vmem:[#allocation2 + $0x158] sm:$0xf0]  ;;  %v4841_v17 = vrot.slane %v20429_v56, 4 }
 0x269   : > { %v4708_v29 = vrot.slane %v4599_v27, 4  ;;  %v18611_v27 = vld [vmem:[%s24630_s2 + $0xbd0] ss:$8 sps:$4 sm:$0xff]   ;;  %v4707_v58 = vsel %vm4634_vm4, %v4705_v18, %v4706_v36 }
 0x26b   : > { %5469 = vmatpush1.bf16.msra.mxu1 %v18593_v46  ;;  %v4760_v46 = vpack.c.bf16 %v4704_v54, %v4700_v14  ;;  %v18613_v14 = vld [vmem:[%s24630_s2 + $0xbd4] ss:$8 sps:$4 sm:$0xff]  }
 0x26c   : > { %5470 = vmatprep.subr.bf16.mxu1 %v18598_v61  ;;  %v4701_v61 = vrot.slane %v4596_v40, 4  ;;  %v4835_v40 = vrot.slane %v4766_v63, 4 }
 0x26e   : > { %5221 = vmatmul.mubr.bf16.gmra.mrb[16].mxu1 %v4755_v22  ;;  %v4702_v22 = vsel %vm4634_vm4, %v4696_v59, %v4701_v61  ;;  %v4836_v41 = vsel %vm4634_vm4, %v4831_v23, %v4835_v40  ;;  %v4763_v59 = vld [vmem:[#allocation3] sm:$0xf0]  ;;  %v4765_v61 = vld [vmem:[#allocation3 + $0x20] sm:$0xf] }
 0x26f   : > { %5471 = vmatpush1.bf16.msra.mxu1 %v18596_v53  ;;  %5230 = vmatprep.mubr.bf16.mxu1 %v4758_v35  ;;  %v18610_v53 = vld [vmem:[%s24630_s2 + $0xbc4] ss:$8 sps:$4 sm:$0xff]   ;;  %v4710_v35 = vsel %vm4634_vm4, %v4708_v29, %v4709_v16  ;;  %v4759_v51 = vpack.c.bf16 %v4702_v22, %v4697_v33  ;;  %v4770_v29 = vld [vmem:[#allocation3 + $0x58] sm:$0xf]  ;;  %v4827_v33 = vrot.slane %v4763_v59, 4  ;;  %v4828_v22 = vrot.slane %v20422_v30, 4 }
 0x270   : > { %5472 = vmatprep.subr.bf16.mxu1 %v18601_v11  ;;  %v4764_v11 = vld [vmem:[#allocation3 + $0x8] sm:$0xf0]  ;;  %v18620_v40 = vld [vmem:[%s24630_s2 + $0x500] ss:$8 sps:$4 sm:$0xff]   ;;  %v4851_v59 = vrot.slane %v20461_v50, 4 }
 0x271   : > { %v4830_v54 = vrot.slane %v4764_v11, 4  ;;  %v18617_v11 = vld [vmem:[%s24630_s2 + $0xbf0] ss:$8 sps:$4 sm:$0xff]   ;;  %v4829_v63 = vsel %vm4634_vm4, %v4827_v33, %v4828_v22 }
 0x273   : > { %5473 = vmatpush1.bf16.msra.mxu1 %v18599_v25  ;;  %v4762_v25 = vpack.c.bf16 %v4714_v9, %v4710_v35  ;;  %v18619_v35 = vld [vmem:[%s24630_s2 + $0xbf4] ss:$8 sps:$4 sm:$0xff]  }
 0x274   : > { %5474 = vmatprep.subr.bf16.mxu1 %v18604_v48  ;;  %v4711_v48 = vrot.slane %v4600_v37, 4  ;;  %v4845_v37 = vrot.slane %v4770_v29, 4 }
 0x276   : > { %5231 = vmatmul.mubr.bf16.gmra.mrb[20].mxu1 %v4757_v60  ;;  %v4712_v60 = vsel %vm4634_vm4, %v4706_v36, %v4711_v48  ;;  %v4846_v18 = vsel %vm4634_vm4, %v4841_v17, %v4845_v37  ;;  %v4767_v36 = vld [vmem:[#allocation3 + $0x30] sm:$0xf0]  ;;  %v4769_v48 = vld [vmem:[#allocation3 + $0x50] sm:$0xf]  ;;  %v18626_v37 = vld [vmem:[%s24630_s2 + $0x520] ss:$8 sps:$4 sm:$0xff]  }
 0x277   : > { %5475 = vmatpush1.bf16.msra.mxu1 %v18602_v5  ;;  %5240 = vmatprep.mubr.bf16.mxu1 %v4760_v46  ;;  %v18616_v5 = vld [vmem:[%s24630_s2 + $0xbe4] ss:$8 sps:$4 sm:$0xff]   ;;  %v4832_v46 = vsel %vm4634_vm4, %v4830_v54, %v4831_v23  ;;  %v4761_v16 = vpack.c.bf16 %v4712_v60, %v4707_v58  ;;  %v4774_v54 = vld [vmem:[#allocation3 + $0x88] sm:$0xf]  ;;  %v4837_v58 = vrot.slane %v4767_v36, 4  ;;  %v4838_v60 = vrot.slane %v20454_v44, 4 }
 0x278   : > { %5476 = vmatprep.subr.bf16.mxu1 %v18607_v7  ;;  %v4768_v7 = vld [vmem:[#allocation3 + $0x38] sm:$0xf0]  ;;  %v4861_v36 = vrot.slane %v20493_v39, 4 }
 0x279   : > { %v4840_v9 = vrot.slane %v4768_v7, 4  ;;  %v18623_v7 = vld [vmem:[%s24630_s2 + $0x510] ss:$8 sps:$4 sm:$0xff]   ;;  %v4839_v29 = vsel %vm4634_vm4, %v4837_v58, %v4838_v60 }
 0x27b   : > { %5477 = vmatpush1.bf16.msra.mxu1 %v18605_v42  ;;  %v4940_v42 = vpack.c.bf16 %v4836_v41, %v4832_v46  ;;  %v18625_v46 = vld [vmem:[%s24630_s2 + $0x514] ss:$8 sps:$4 sm:$0xff]  }
 0x27c   : > { %5478 = vmatprep.subr.bf16.mxu1 %v18610_v53  ;;  %v4833_v53 = vrot.slane %v4765_v61, 4  ;;  %v4855_v61 = vrot.slane %v4774_v54, 4 }
 0x27e   : > { %5241 = vmatmul.mubr.bf16.gmra.mrb[24].mxu1 %v4759_v51  ;;  %v4834_v51 = vsel %vm4634_vm4, %v4828_v22, %v4833_v53  ;;  %v4856_v33 = vsel %vm4634_vm4, %v4851_v59, %v4855_v61  ;;  %v4771_v22 = vld [vmem:[#allocation3 + $0x60] sm:$0xf0]  ;;  %v4773_v53 = vld [vmem:[#allocation3 + $0x80] sm:$0xf] }
 0x27f   : > { %5479 = vmatpush1.bf16.msra.mxu1 %v18608_v2  ;;  %5250 = vmatprep.mubr.bf16.mxu1 %v4762_v25  ;;  %v18622_v2 = vld [vmem:[%s24630_s2 + $0x504] ss:$8 sps:$4 sm:$0xff]   ;;  %v4842_v25 = vsel %vm4634_vm4, %v4840_v9, %v4841_v17  ;;  %v4939_v23 = vpack.c.bf16 %v4834_v51, %v4829_v63  ;;  %v4778_v9 = vld [vmem:[#allocation3 + $0xb8] sm:$0xf]  ;;  %v4847_v63 = vrot.slane %v4771_v22, 4  ;;  %v4848_v51 = vrot.slane %v20486_v12, 4 }
 0x280   : > { %5480 = vmatprep.subr.bf16.mxu1 %v18613_v14  ;;  %v4772_v14 = vld [vmem:[#allocation3 + $0x68] sm:$0xf0]  ;;  %v18632_v61 = vld [vmem:[%s24630_s2 + $0x540] ss:$8 sps:$4 sm:$0xff]   ;;  %v4871_v22 = vrot.slane %v20525_v49, 4 }
 0x281   : > { %v4850_v41 = vrot.slane %v4772_v14, 4  ;;  %v18629_v14 = vld [vmem:[%s24630_s2 + $0x530] ss:$8 sps:$4 sm:$0xff]   ;;  %v4849_v54 = vsel %vm4634_vm4, %v4847_v63, %v4848_v51 }
 0x283   : > { %5481 = vmatpush1.bf16.msra.mxu1 %v18611_v27  ;;  %v4942_v27 = vpack.c.bf16 %v4846_v18, %v4842_v25  ;;  %v18631_v25 = vld [vmem:[%s24630_s2 + $0x534] ss:$8 sps:$4 sm:$0xff]  }
 0x284   : > { %5482 = vmatprep.subr.bf16.mxu1 %v18616_v5  ;;  %v4843_v5 = vrot.slane %v4769_v48, 4  ;;  %v4865_v48 = vrot.slane %v4778_v9, 4 }
 0x286   : > { %5251 = vmatmul.mubr.bf16.gmra.mrb[28].mxu1 %v4761_v16  ;;  %v4844_v16 = vsel %vm4634_vm4, %v4838_v60, %v4843_v5  ;;  %v4866_v58 = vsel %vm4634_vm4, %v4861_v36, %v4865_v48  ;;  %v4775_v60 = vld [vmem:[#allocation3 + $0x90] sm:$0xf0]  ;;  %v4777_v5 = vld [vmem:[#allocation3 + $0xb0] sm:$0xf]  ;;  %v18638_v48 = vld [vmem:[%s24630_s2 + $0x560] ss:$8 sps:$4 sm:$0xff]  }
 0x287   : > { %5483 = vmatpush1.bf16.msra.mxu1 %v18614_v8  ;;  %5486 = vmatprep.mubr.bf16.mxu1 %v4940_v42  ;;  %v18628_v8 = vld [vmem:[%s24630_s2 + $0x524] ss:$8 sps:$4 sm:$0xff]   ;;  %v4852_v42 = vsel %vm4634_vm4, %v4850_v41, %v4851_v59  ;;  %v4941_v17 = vpack.c.bf16 %v4844_v16, %v4839_v29  ;;  %v4782_v41 = vld [vmem:[#allocation3 + $0xe8] sm:$0xf]  ;;  %v4857_v29 = vrot.slane %v4775_v60, 4  ;;  %v4858_v16 = vrot.slane %v20518_v55, 4 }
 0x288   : > { %5484 = vmatprep.subr.bf16.mxu1 %v18619_v35  ;;  %v4776_v35 = vld [vmem:[#allocation3 + $0x98] sm:$0xf0]  ;;  %v4881_v60 = vrot.slane %v20557_v32, 4 }
 0x289   : > { %v4860_v18 = vrot.slane %v4776_v35, 4  ;;  %v18635_v35 = vld [vmem:[%s24630_s2 + $0x550] ss:$8 sps:$4 sm:$0xff]   ;;  %v4859_v9 = vsel %vm4634_vm4, %v4857_v29, %v4858_v16 }
 0x28b   : > { %5485 = vmatpush1.bf16.msra.mxu1 %v18617_v11  ;;  %v4944_v11 = vpack.c.bf16 %v4856_v33, %v4852_v42  ;;  %v18637_v42 = vld [vmem:[%s24630_s2 + $0x554] ss:$8 sps:$4 sm:$0xff]  }
 0x28c   : > { %6208 = vmatprep.subr.bf16.mxu1 %v18622_v2  ;;  %v4853_v2 = vrot.slane %v4773_v53, 4  ;;  %v4875_v53 = vrot.slane %v4782_v41, 4 }
 0x28e   : > { %5487 = vmatmul.mubr.bf16.vlgmr.msra.gmra.mrb[32].mxu1 %v4939_v23  ;;  %v4854_v23 = vsel %vm4634_vm4, %v4848_v51, %v4853_v2  ;;  %v4876_v63 = vsel %vm4634_vm4, %v4871_v22, %v4875_v53  ;;  %v4779_v51 = vld [vmem:[#allocation3 + $0xc0] sm:$0xf0]  ;;  %v4781_v2 = vld [vmem:[#allocation3 + $0xe0] sm:$0xf] }
 0x28f   : > { %6209 = vmatpush1.bf16.msra.mxu1 %v18620_v40  ;;  %5496 = vmatprep.mubr.bf16.mxu1 %v4942_v27  ;;  %v18634_v40 = vld [vmem:[%s24630_s2 + $0x544] ss:$8 sps:$4 sm:$0xff]   ;;  %v4862_v27 = vsel %vm4634_vm4, %v4860_v18, %v4861_v36  ;;  %v4943_v59 = vpack.c.bf16 %v4854_v23, %v4849_v54  ;;  %v4786_v18 = vld [vmem:[#allocation3 + $0x118] sm:$0xf]  ;;  %v4867_v54 = vrot.slane %v4779_v51, 4  ;;  %v4868_v23 = vrot.slane %v20550_v52, 4 }
 0x290   : > { %6210 = vmatprep.subr.bf16.mxu1 %v18625_v46  ;;  %v4780_v46 = vld [vmem:[#allocation3 + $0xc8] sm:$0xf0]  ;;  %v18644_v53 = vld [vmem:[%s24630_s2 + $0x580] ss:$8 sps:$4 sm:$0xff]   ;;  %v4891_v51 = vrot.slane %v20592_v24, 4 }
 0x291   : > { %v4870_v33 = vrot.slane %v4780_v46, 4  ;;  %v18641_v46 = vld [vmem:[%s24630_s2 + $0x570] ss:$8 sps:$4 sm:$0xff]   ;;  %v4869_v41 = vsel %vm4634_vm4, %v4867_v54, %v4868_v23 }
 0x293   : > { %6211 = vmatpush1.bf16.msra.mxu1 %v18623_v7  ;;  %v4946_v7 = vpack.c.bf16 %v4866_v58, %v4862_v27  ;;  %v18643_v27 = vld [vmem:[%s24630_s2 + $0x574] ss:$8 sps:$4 sm:$0xff]  }
 0x294   : > { %6212 = vmatprep.subr.bf16.mxu1 %v18628_v8  ;;  %v4863_v8 = vrot.slane %v4777_v5, 4  ;;  %v4885_v5 = vrot.slane %v4786_v18, 4 }
 0x296   : > { %5497 = vmatmul.mubr.bf16.gmra.mrb[36].mxu1 %v4941_v17  ;;  %v4864_v17 = vsel %vm4634_vm4, %v4858_v16, %v4863_v8  ;;  %v4886_v29 = vsel %vm4634_vm4, %v4881_v60, %v4885_v5  ;;  %v4783_v16 = vld [vmem:[#allocation3 + $0xf0] sm:$0xf0]  ;;  %v4785_v8 = vld [vmem:[#allocation3 + $0x110] sm:$0xf]  ;;  %v18650_v5 = vld [vmem:[%s24630_s2 + $0x5a0] ss:$8 sps:$4 sm:$0xff]  }
 0x297   : > { %6213 = vmatpush1.bf16.msra.mxu1 %v18626_v37  ;;  %5506 = vmatprep.mubr.bf16.mxu1 %v4944_v11  ;;  %v18640_v37 = vld [vmem:[%s24630_s2 + $0x564] ss:$8 sps:$4 sm:$0xff]   ;;  %v4872_v11 = vsel %vm4634_vm4, %v4870_v33, %v4871_v22  ;;  %v4945_v36 = vpack.c.bf16 %v4864_v17, %v4859_v9  ;;  %v4790_v33 = vld [vmem:[#allocation3 + $0x148] sm:$0xf]  ;;  %v4877_v9 = vrot.slane %v4783_v16, 4  ;;  %v4878_v17 = vrot.slane %v20582_v10, 4 }
 0x298   : > { %6214 = vmatprep.subr.bf16.mxu1 %v18631_v25  ;;  %v4784_v25 = vld [vmem:[#allocation3 + $0xf8] sm:$0xf0]  ;;  %v4901_v16 = vrot.slane %v20617_v20, 4 }
 0x299   : > { %v4880_v58 = vrot.slane %v4784_v25, 4  ;;  %v18647_v25 = vld [vmem:[%s24630_s2 + $0x590] ss:$8 sps:$4 sm:$0xff]   ;;  %v4879_v18 = vsel %vm4634_vm4, %v4877_v9, %v4878_v17 }
 0x29b   : > { %6215 = vmatpush1.bf16.msra.mxu1 %v18629_v14  ;;  %v4948_v14 = vpack.c.bf16 %v4876_v63, %v4872_v11  ;;  %v18649_v11 = vld [vmem:[%s24630_s2 + $0x594] ss:$8 sps:$4 sm:$0xff]  }
 0x29c   : > { %6216 = vmatprep.subr.bf16.mxu1 %v18634_v40  ;;  %v4873_v40 = vrot.slane %v4781_v2, 4  ;;  %v4895_v2 = vrot.slane %v4790_v33, 4 }
 0x29e   : > { %5507 = vmatmul.mubr.bf16.gmra.mrb[40].mxu1 %v4943_v59  ;;  %v4874_v59 = vsel %vm4634_vm4, %v4868_v23, %v4873_v40  ;;  %v4896_v54 = vsel %vm4634_vm4, %v4891_v51, %v4895_v2  ;;  %v4787_v23 = vld [vmem:[#allocation3 + $0x120] sm:$0xf0]  ;;  %v4789_v40 = vld [vmem:[#allocation3 + $0x140] sm:$0xf] }
 0x29f   : > { %6217 = vmatpush1.bf16.msra.mxu1 %v18632_v61  ;;  %5516 = vmatprep.mubr.bf16.mxu1 %v4946_v7  ;;  %v18646_v61 = vld [vmem:[%s24630_s2 + $0x584] ss:$8 sps:$4 sm:$0xff]   ;;  %v4882_v7 = vsel %vm4634_vm4, %v4880_v58, %v4881_v60  ;;  %v4947_v22 = vpack.c.bf16 %v4874_v59, %v4869_v41  ;;  %v4794_v58 = vld [vmem:[#allocation3 + $0x178] sm:$0xf]  ;;  %v4887_v41 = vrot.slane %v4787_v23, 4  ;;  %v4888_v59 = vrot.slane %v20383_v6, 4 }
 0x2a0   : > { %6218 = vmatprep.subr.bf16.mxu1 %v18637_v42  ;;  %v4788_v42 = vld [vmem:[#allocation3 + $0x128] sm:$0xf0]  ;;  %v18656_v2 = vld [vmem:[%s24630_s2 + $0x5c0] ss:$8 sps:$4 sm:$0xff]   ;;  %v5699_v23 = vrot.slane %v19779_v31, 5 }
 0x2a1   : > { %v4890_v63 = vrot.slane %v4788_v42, 4  ;;  %v18653_v42 = vld [vmem:[%s24630_s2 + $0x5b0] ss:$8 sps:$4 sm:$0xff]   ;;  %v4889_v33 = vsel %vm4634_vm4, %v4887_v41, %v4888_v59 }
 0x2a3   : > { %6219 = vmatpush1.bf16.msra.mxu1 %v18635_v35  ;;  %v4950_v35 = vpack.c.bf16 %v4886_v29, %v4882_v7  ;;  %v18655_v7 = vld [vmem:[%s24630_s2 + $0x5b4] ss:$8 sps:$4 sm:$0xff]  }
 0x2a4   : > { %6220 = vmatprep.subr.bf16.mxu1 %v18640_v37  ;;  %v4883_v37 = vrot.slane %v4785_v8, 4  ;;  %v4905_v8 = vrot.slane %v4794_v58, 4 }
 0x2a6   : > { %5517 = vmatmul.mubr.bf16.gmra.mrb[44].mxu1 %v4945_v36  ;;  %v4884_v36 = vsel %vm4634_vm4, %v4878_v17, %v4883_v37  ;;  %v4906_v9 = vsel %vm4634_vm4, %v4901_v16, %v4905_v8  ;;  %v4791_v17 = vld [vmem:[#allocation3 + $0x150] sm:$0xf0]  ;;  %v4793_v37 = vld [vmem:[#allocation3 + $0x170] sm:$0xf]  ;;  %v18662_v8 = vld [vmem:[%s24630_s2 + $0x5e0] ss:$8 sps:$4 sm:$0xff]  }
 0x2a7   : > { %6221 = vmatpush1.bf16.msra.mxu1 %v18638_v48  ;;  %5526 = vmatprep.mubr.bf16.mxu1 %v4948_v14  ;;  %v18652_v48 = vld [vmem:[%s24630_s2 + $0x5a4] ss:$8 sps:$4 sm:$0xff]   ;;  %v4892_v14 = vsel %vm4634_vm4, %v4890_v63, %v4891_v51  ;;  %v4949_v60 = vpack.c.bf16 %v4884_v36, %v4879_v18  ;;  %v4897_v18 = vrot.slane %v4791_v17, 4  ;;  %v4898_v36 = vrot.slane %v20413_v43, 4 }
 0x2a8   : > { %6222 = vmatprep.subr.bf16.mxu1 %v18643_v27  ;;  %v4792_v27 = vld [vmem:[#allocation3 + $0x158] sm:$0xf0]  ;;  %v5634_v63 = vld [vmem:[#allocation2 + $0x28] sm:$0x1f]  ;;  %v5709_v17 = vrot.slane %v19937_v19, 5 }
 0x2a9   : > { %v4900_v29 = vrot.slane %v4792_v27, 4  ;;  %v18659_v27 = vld [vmem:[%s24630_s2 + $0x5d0] ss:$8 sps:$4 sm:$0xff]   ;;  %v4899_v58 = vsel %vm4634_vm4, %v4897_v18, %v4898_v36 }
 0x2ab   : > { %6223 = vmatpush1.bf16.msra.mxu1 %v18641_v46  ;;  %v4952_v46 = vpack.c.bf16 %v4896_v54, %v4892_v14  ;;  %v18661_v14 = vld [vmem:[%s24630_s2 + $0x5d4] ss:$8 sps:$4 sm:$0xff]  }
 0x2ac   : > { %6224 = vmatprep.subr.bf16.mxu1 %v18646_v61  ;;  %v4893_v61 = vrot.slane %v4789_v40, 4  ;;  %v5703_v40 = vrot.slane %v5634_v63, 5 }
 0x2ae   : > { %5527 = vmatmul.mubr.bf16.gmra.mrb[48].mxu1 %v4947_v22  ;;  %v4894_v22 = vsel %vm4634_vm4, %v4888_v59, %v4893_v61  ;;  %v5704_v41 = vsel %vm391_vm0, %v5699_v23, %v5703_v40  ;;  %v5631_v59 = vld [vmem:[#allocation2] sm:$0xe0]  ;;  %v5633_v61 = vld [vmem:[#allocation2 + $0x20] sm:$0x1f] }
 0x2af   : > { %6225 = vmatpush1.bf16.msra.mxu1 %v18644_v53  ;;  %5536 = vmatprep.mubr.bf16.mxu1 %v4950_v35  ;;  %v18658_v53 = vld [vmem:[%s24630_s2 + $0x5c4] ss:$8 sps:$4 sm:$0xff]   ;;  %v4902_v35 = vsel %vm4634_vm4, %v4900_v29, %v4901_v16  ;;  %v4951_v51 = vpack.c.bf16 %v4894_v22, %v4889_v33  ;;  %v5638_v29 = vld [vmem:[#allocation2 + $0x58] sm:$0x1f]  ;;  %v5695_v33 = vrot.slane %v5631_v59, 5  ;;  %v5696_v22 = vrot.slane %v19925_v38, 5 }
 0x2b0   : > { %6226 = vmatprep.subr.bf16.mxu1 %v18649_v11  ;;  %v5632_v11 = vld [vmem:[#allocation2 + $0x8] sm:$0xe0]  ;;  %v18668_v40 = vld [vmem:[%s24630_s2 + $0xc00] ss:$8 sps:$4 sm:$0xff]   ;;  %v5719_v59 = vrot.slane %v20006_v47, 5 }
 0x2b1   : > { %v5698_v54 = vrot.slane %v5632_v11, 5  ;;  %v18665_v11 = vld [vmem:[%s24630_s2 + $0x5f0] ss:$8 sps:$4 sm:$0xff]   ;;  %v5697_v63 = vsel %vm391_vm0, %v5695_v33, %v5696_v22 }
 0x2b3   : > { %6227 = vmatpush1.bf16.msra.mxu1 %v18647_v25  ;;  %v4954_v25 = vpack.c.bf16 %v4906_v9, %v4902_v35  ;;  %v18667_v35 = vld [vmem:[%s24630_s2 + $0x5f4] ss:$8 sps:$4 sm:$0xff]  }
 0x2b4   : > { %6228 = vmatprep.subr.bf16.mxu1 %v18652_v48  ;;  %v4903_v48 = vrot.slane %v4793_v37, 4  ;;  %v5713_v37 = vrot.slane %v5638_v29, 5 }
 0x2b6   : > { %5537 = vmatmul.mubr.bf16.gmra.mrb[52].mxu1 %v4949_v60  ;;  %v4904_v60 = vsel %vm4634_vm4, %v4898_v36, %v4903_v48  ;;  %v5714_v18 = vsel %vm391_vm0, %v5709_v17, %v5713_v37  ;;  %v5635_v36 = vld [vmem:[#allocation2 + $0x30] sm:$0xe0]  ;;  %v5637_v48 = vld [vmem:[#allocation2 + $0x50] sm:$0x1f]  ;;  %v18674_v37 = vld [vmem:[%s24630_s2 + $0xc20] ss:$8 sps:$4 sm:$0xff]  }
 0x2b7   : > { %6229 = vmatpush1.bf16.msra.mxu1 %v18650_v5  ;;  %5546 = vmatprep.mubr.bf16.mxu1 %v4952_v46  ;;  %v18664_v5 = vld [vmem:[%s24630_s2 + $0x5e4] ss:$8 sps:$4 sm:$0xff]   ;;  %v5700_v46 = vsel %vm391_vm0, %v5698_v54, %v5699_v23  ;;  %v4953_v16 = vpack.c.bf16 %v4904_v60, %v4899_v58  ;;  %v5705_v58 = vrot.slane %v5635_v36, 5  ;;  %v5706_v60 = vrot.slane %v19981_v13, 5 }
 0x2b8   : > { %6230 = vmatprep.subr.bf16.mxu1 %v18655_v7  ;;  %v5636_v7 = vld [vmem:[#allocation2 + $0x38] sm:$0xe0]  ;;  %v5642_v54 = vld [vmem:[#allocation2 + $0x88] sm:$0x1f]  ;;  %v5729_v36 = vrot.slane %v20072_v1, 5 }
 0x2b9   : > { %v5708_v9 = vrot.slane %v5636_v7, 5  ;;  %v18671_v7 = vld [vmem:[%s24630_s2 + $0xc10] ss:$8 sps:$4 sm:$0xff]   ;;  %v5707_v29 = vsel %vm391_vm0, %v5705_v58, %v5706_v60 }
 0x2bb   : > { %6231 = vmatpush1.bf16.msra.mxu1 %v18653_v42  ;;  %v5808_v42 = vpack.c.bf16 %v5704_v41, %v5700_v46  ;;  %v18673_v46 = vld [vmem:[%s24630_s2 + $0xc14] ss:$8 sps:$4 sm:$0xff]  }
 0x2bc   : > { %6232 = vmatprep.subr.bf16.mxu1 %v18658_v53  ;;  %v5701_v53 = vrot.slane %v5633_v61, 5  ;;  %v5723_v61 = vrot.slane %v5642_v54, 5 }
 0x2be   : > { %5547 = vmatmul.mubr.bf16.gmra.mrb[56].mxu1 %v4951_v51  ;;  %v5702_v51 = vsel %vm391_vm0, %v5696_v22, %v5701_v53  ;;  %v5724_v33 = vsel %vm391_vm0, %v5719_v59, %v5723_v61  ;;  %v5639_v22 = vld [vmem:[#allocation2 + $0x60] sm:$0xe0]  ;;  %v5641_v53 = vld [vmem:[#allocation2 + $0x80] sm:$0x1f] }
 0x2bf   : > { %6233 = vmatpush1.bf16.msra.mxu1 %v18656_v2  ;;  %5556 = vmatprep.mubr.bf16.mxu1 %v4954_v25  ;;  %v18670_v2 = vld [vmem:[%s24630_s2 + $0xc04] ss:$8 sps:$4 sm:$0xff]   ;;  %v5710_v25 = vsel %vm391_vm0, %v5708_v9, %v5709_v17  ;;  %v5807_v23 = vpack.c.bf16 %v5702_v51, %v5697_v63  ;;  %v5646_v9 = vld [vmem:[#allocation2 + $0xb8] sm:$0x1f]  ;;  %v5715_v63 = vrot.slane %v5639_v22, 5  ;;  %v5716_v51 = vrot.slane %v20055_v26, 5 }
 0x2c0   : > { %6234 = vmatprep.subr.bf16.mxu1 %v18661_v14  ;;  %v5640_v14 = vld [vmem:[#allocation2 + $0x68] sm:$0xe0]  ;;  %v18680_v61 = vld [vmem:[%s24630_s2 + $0xc40] ss:$8 sps:$4 sm:$0xff]   ;;  %v5739_v22 = vrot.slane %v20133_v62, 5 }
 0x2c1   : > { %v5718_v41 = vrot.slane %v5640_v14, 5  ;;  %v18677_v14 = vld [vmem:[%s24630_s2 + $0xc30] ss:$8 sps:$4 sm:$0xff]   ;;  %v5717_v54 = vsel %vm391_vm0, %v5715_v63, %v5716_v51 }
 0x2c3   : > { %6235 = vmatpush1.bf16.msra.mxu1 %v18659_v27  ;;  %v5810_v27 = vpack.c.bf16 %v5714_v18, %v5710_v25  ;;  %v18679_v25 = vld [vmem:[%s24630_s2 + $0xc34] ss:$8 sps:$4 sm:$0xff]  }
 0x2c4   : > { %6236 = vmatprep.subr.bf16.mxu1 %v18664_v5  ;;  %v5711_v5 = vrot.slane %v5637_v48, 5  ;;  %v5733_v48 = vrot.slane %v5646_v9, 5 }
 0x2c6   : > { %5557 = vmatmul.mubr.bf16.gmra.mrb[60].mxu1 %v4953_v16  ;;  %v5712_v16 = vsel %vm391_vm0, %v5706_v60, %v5711_v5  ;;  %v5734_v58 = vsel %vm391_vm0, %v5729_v36, %v5733_v48  ;;  %v5643_v60 = vld [vmem:[#allocation2 + $0x90] sm:$0xe0]  ;;  %v5645_v5 = vld [vmem:[#allocation2 + $0xb0] sm:$0x1f]  ;;  %v18686_v48 = vld [vmem:[%s24630_s2 + $0xc60] ss:$8 sps:$4 sm:$0xff]  }
 0x2c7   : > { %6237 = vmatpush1.bf16.msra.mxu1 %v18662_v8  ;;  %6240 = vmatprep.mubr.bf16.mxu1 %v5808_v42  ;;  %v18676_v8 = vld [vmem:[%s24630_s2 + $0xc24] ss:$8 sps:$4 sm:$0xff]   ;;  %v5720_v42 = vsel %vm391_vm0, %v5718_v41, %v5719_v59  ;;  %v5809_v17 = vpack.c.bf16 %v5712_v16, %v5707_v29  ;;  %v5725_v29 = vrot.slane %v5643_v60, 5  ;;  %v5726_v16 = vrot.slane %v20116_v45, 5 }
 0x2c8   : > { %6238 = vmatprep.subr.bf16.mxu1 %v18667_v35  ;;  %v5644_v35 = vld [vmem:[#allocation2 + $0x98] sm:$0xe0]  ;;  %v5650_v41 = vld [vmem:[#allocation2 + $0xe8] sm:$0x1f]  ;;  %v5749_v60 = vrot.slane %v20196_v3, 5 }
 0x2c9   : > { %v5728_v18 = vrot.slane %v5644_v35, 5  ;;  %v18683_v35 = vld [vmem:[%s24630_s2 + $0xc50] ss:$8 sps:$4 sm:$0xff]   ;;  %v5727_v9 = vsel %vm391_vm0, %v5725_v29, %v5726_v16 }
 0x2cb   : > { %6239 = vmatpush1.bf16.msra.mxu1 %v18665_v11  ;;  %v5812_v11 = vpack.c.bf16 %v5724_v33, %v5720_v42  ;;  %v18685_v42 = vld [vmem:[%s24630_s2 + $0xc54] ss:$8 sps:$4 sm:$0xff]  }
 0x2cc   : > { %6514 = vmatprep.subr.bf16.mxu1 %v18670_v2  ;;  %v5721_v2 = vrot.slane %v5641_v53, 5  ;;  %v5743_v53 = vrot.slane %v5650_v41, 5 }
 0x2ce   : > { %6241 = vmatmul.mubr.bf16.vlgmr.msra.gmra.mrb[0].mxu1 %v5807_v23  ;;  %v5722_v23 = vsel %vm391_vm0, %v5716_v51, %v5721_v2  ;;  %v5744_v63 = vsel %vm391_vm0, %v5739_v22, %v5743_v53  ;;  %v5647_v51 = vld [vmem:[#allocation2 + $0xc0] sm:$0xe0]  ;;  %v5649_v2 = vld [vmem:[#allocation2 + $0xe0] sm:$0x1f] }
 0x2cf   : > { %6515 = vmatpush1.bf16.msra.mxu1 %v18668_v40  ;;  %6250 = vmatprep.mubr.bf16.mxu1 %v5810_v27  ;;  %v18682_v40 = vld [vmem:[%s24630_s2 + $0xc44] ss:$8 sps:$4 sm:$0xff]   ;;  %v5730_v27 = vsel %vm391_vm0, %v5728_v18, %v5729_v36  ;;  %v5811_v59 = vpack.c.bf16 %v5722_v23, %v5717_v54  ;;  %v5654_v18 = vld [vmem:[#allocation2 + $0x118] sm:$0x1f]  ;;  %v5735_v54 = vrot.slane %v5647_v51, 5  ;;  %v5736_v23 = vrot.slane %v20174_v57, 5 }
 0x2d0   : > { %6516 = vmatprep.subr.bf16.mxu1 %v18673_v46  ;;  %v5648_v46 = vld [vmem:[#allocation2 + $0xc8] sm:$0xe0]  ;;  %v18692_v53 = vld [vmem:[%s24630_s2 + $0xc80] ss:$8 sps:$4 sm:$0xff]   ;;  %v5759_v51 = vrot.slane %v24704_v4, 5 }
 0x2d1   : > { %v5738_v33 = vrot.slane %v5648_v46, 5  ;;  %v18689_v46 = vld [vmem:[%s24630_s2 + $0xc70] ss:$8 sps:$4 sm:$0xff]   ;;  %v5737_v41 = vsel %vm391_vm0, %v5735_v54, %v5736_v23 }
 0x2d3   : > { %6517 = vmatpush1.bf16.msra.mxu1 %v18671_v7  ;;  %v5814_v7 = vpack.c.bf16 %v5734_v58, %v5730_v27  ;;  %v18691_v27 = vld [vmem:[%s24630_s2 + $0xc74] ss:$8 sps:$4 sm:$0xff]  }
 0x2d4   : > { %6518 = vmatprep.subr.bf16.mxu1 %v18676_v8  ;;  %v5731_v8 = vrot.slane %v5645_v5, 5  ;;  %v5753_v5 = vrot.slane %v5654_v18, 5 }
 0x2d6   : > { %6251 = vmatmul.mubr.bf16.gmra.mrb[4].mxu1 %v5809_v17  ;;  %v5732_v17 = vsel %vm391_vm0, %v5726_v16, %v5731_v8  ;;  %v5754_v29 = vsel %vm391_vm0, %v5749_v60, %v5753_v5  ;;  %v5651_v16 = vld [vmem:[#allocation2 + $0xf0] sm:$0xe0]  ;;  %v5653_v8 = vld [vmem:[#allocation2 + $0x110] sm:$0x1f]  ;;  %v18698_v5 = vld [vmem:[%s24630_s2 + $0xca0] ss:$8 sps:$4 sm:$0xff]  }
 0x2d7   : > { %6519 = vmatpush1.bf16.msra.mxu1 %v18674_v37  ;;  %6260 = vmatprep.mubr.bf16.mxu1 %v5812_v11  ;;  %v18688_v37 = vld [vmem:[%s24630_s2 + $0xc64] ss:$8 sps:$4 sm:$0xff]   ;;  %v5740_v11 = vsel %vm391_vm0, %v5738_v33, %v5739_v22  ;;  %v5813_v36 = vpack.c.bf16 %v5732_v17, %v5727_v9  ;;  %v5745_v9 = vrot.slane %v5651_v16, 5  ;;  %v5746_v17 = vrot.slane %v20247_v15, 5 }
 0x2d8   : > { %6520 = vmatprep.subr.bf16.mxu1 %v18679_v25  ;;  %v5652_v25 = vld [vmem:[#allocation2 + $0xf8] sm:$0xe0]  ;;  %v5658_v33 = vld [vmem:[#allocation2 + $0x148] sm:$0x1f]  ;;  %v5769_v16 = vrot.slane %v24706_v21, 5 }
 0x2d9   : > { %v5748_v58 = vrot.slane %v5652_v25, 5  ;;  %v18695_v25 = vld [vmem:[%s24630_s2 + $0xc90] ss:$8 sps:$4 sm:$0xff]   ;;  %v5747_v18 = vsel %vm391_vm0, %v5745_v9, %v5746_v17 }
 0x2db   : > { %6521 = vmatpush1.bf16.msra.mxu1 %v18677_v14  ;;  %v5816_v14 = vpack.c.bf16 %v5744_v63, %v5740_v11  ;;  %v18697_v11 = vld [vmem:[%s24630_s2 + $0xc94] ss:$8 sps:$4 sm:$0xff]  }
 0x2dc   : > { %6522 = vmatprep.subr.bf16.mxu1 %v18682_v40  ;;  %v5741_v40 = vrot.slane %v5649_v2, 5  ;;  %v5763_v2 = vrot.slane %v5658_v33, 5 }
 0x2de   : > { %6261 = vmatmul.mubr.bf16.gmra.mrb[8].mxu1 %v5811_v59  ;;  %v5742_v59 = vsel %vm391_vm0, %v5736_v23, %v5741_v40  ;;  %v5764_v54 = vsel %vm391_vm0, %v5759_v51, %v5763_v2  ;;  %v5655_v23 = vld [vmem:[#allocation2 + $0x120] sm:$0xe0]  ;;  %v5657_v40 = vld [vmem:[#allocation2 + $0x140] sm:$0x1f] }
 0x2df   : > { %6523 = vmatpush1.bf16.msra.mxu1 %v18680_v61  ;;  %6270 = vmatprep.mubr.bf16.mxu1 %v5814_v7  ;;  %v18694_v61 = vld [vmem:[%s24630_s2 + $0xc84] ss:$8 sps:$4 sm:$0xff]   ;;  %v5750_v7 = vsel %vm391_vm0, %v5748_v58, %v5749_v60  ;;  %v5815_v22 = vpack.c.bf16 %v5742_v59, %v5737_v41  ;;  %v5662_v58 = vld [vmem:[#allocation2 + $0x178] sm:$0x1f]  ;;  %v5755_v41 = vrot.slane %v5655_v23, 5  ;;  %v5756_v59 = vrot.slane %v24705_v28, 5 }
 0x2e0   : > { %6524 = vmatprep.subr.bf16.mxu1 %v18685_v42  ;;  %v5656_v42 = vld [vmem:[#allocation2 + $0x128] sm:$0xe0]  ;;  %v18704_v2 = vld [vmem:[%s24630_s2 + $0xcc0] ss:$8 sps:$4 sm:$0xff]   ;;  %v5891_v23 = vrot.slane %v20380_v34, 5 }
 0x2e1   : > { %v5758_v63 = vrot.slane %v5656_v42, 5  ;;  %v18701_v42 = vld [vmem:[%s24630_s2 + $0xcb0] ss:$8 sps:$4 sm:$0xff]   ;;  %v5757_v33 = vsel %vm391_vm0, %v5755_v41, %v5756_v59 }
 0x2e3   : > { %6525 = vmatpush1.bf16.msra.mxu1 %v18683_v35  ;;  %v5818_v35 = vpack.c.bf16 %v5754_v29, %v5750_v7  ;;  %v18703_v7 = vld [vmem:[%s24630_s2 + $0xcb4] ss:$8 sps:$4 sm:$0xff]  }
 0x2e4   : > { %6526 = vmatprep.subr.bf16.mxu1 %v18688_v37  ;;  %v5751_v37 = vrot.slane %v5653_v8, 5  ;;  %v5773_v8 = vrot.slane %v5662_v58, 5 }
 0x2e6   : > { %6271 = vmatmul.mubr.bf16.gmra.mrb[12].mxu1 %v5813_v36  ;;  %v5752_v36 = vsel %vm391_vm0, %v5746_v17, %v5751_v37  ;;  %v5774_v9 = vsel %vm391_vm0, %v5769_v16, %v5773_v8  ;;  %v5659_v17 = vld [vmem:[#allocation2 + $0x150] sm:$0xe0]  ;;  %v5661_v37 = vld [vmem:[#allocation2 + $0x170] sm:$0x1f]  ;;  %v18710_v8 = vld [vmem:[%s24630_s2 + $0xce0] ss:$8 sps:$4 sm:$0xff]  }
 0x2e7   : > { %6527 = vmatpush1.bf16.msra.mxu1 %v18686_v48  ;;  %6280 = vmatprep.mubr.bf16.mxu1 %v5816_v14  ;;  %v18700_v48 = vld [vmem:[%s24630_s2 + $0xca4] ss:$8 sps:$4 sm:$0xff]   ;;  %v5760_v14 = vsel %vm391_vm0, %v5758_v63, %v5759_v51  ;;  %v5817_v60 = vpack.c.bf16 %v5752_v36, %v5747_v18  ;;  %v5765_v18 = vrot.slane %v5659_v17, 5  ;;  %v5766_v36 = vrot.slane %v20361_v0, 5 }
 0x2e8   : > { %6528 = vmatprep.subr.bf16.mxu1 %v18691_v27  ;;  %v5660_v27 = vld [vmem:[#allocation2 + $0x158] sm:$0xe0]  ;;  %v5826_v63 = vld [vmem:[#allocation3 + $0x28] sm:$0x1f]  ;;  %v5901_v17 = vrot.slane %v20429_v56, 5 }
 0x2e9   : > { %v5768_v29 = vrot.slane %v5660_v27, 5  ;;  %v18707_v27 = vld [vmem:[%s24630_s2 + $0xcd0] ss:$8 sps:$4 sm:$0xff]   ;;  %v5767_v58 = vsel %vm391_vm0, %v5765_v18, %v5766_v36 }
 0x2eb   : > { %6529 = vmatpush1.bf16.msra.mxu1 %v18689_v46  ;;  %v5820_v46 = vpack.c.bf16 %v5764_v54, %v5760_v14  ;;  %v18709_v14 = vld [vmem:[%s24630_s2 + $0xcd4] ss:$8 sps:$4 sm:$0xff]  }
 0x2ec   : > { %6530 = vmatprep.subr.bf16.mxu1 %v18694_v61  ;;  %v5761_v61 = vrot.slane %v5657_v40, 5  ;;  %v5895_v40 = vrot.slane %v5826_v63, 5 }
 0x2ee   : > { %6281 = vmatmul.mubr.bf16.gmra.mrb[16].mxu1 %v5815_v22  ;;  %v5762_v22 = vsel %vm391_vm0, %v5756_v59, %v5761_v61  ;;  %v5896_v41 = vsel %vm391_vm0, %v5891_v23, %v5895_v40  ;;  %v5823_v59 = vld [vmem:[#allocation3] sm:$0xe0]  ;;  %v5825_v61 = vld [vmem:[#allocation3 + $0x20] sm:$0x1f] }
 0x2ef   : > { %6531 = vmatpush1.bf16.msra.mxu1 %v18692_v53  ;;  %6290 = vmatprep.mubr.bf16.mxu1 %v5818_v35  ;;  %v18706_v53 = vld [vmem:[%s24630_s2 + $0xcc4] ss:$8 sps:$4 sm:$0xff]   ;;  %v5770_v35 = vsel %vm391_vm0, %v5768_v29, %v5769_v16  ;;  %v5819_v51 = vpack.c.bf16 %v5762_v22, %v5757_v33  ;;  %v5830_v29 = vld [vmem:[#allocation3 + $0x58] sm:$0x1f]  ;;  %v5887_v33 = vrot.slane %v5823_v59, 5  ;;  %v5888_v22 = vrot.slane %v20422_v30, 5 }
 0x2f0   : > { %6532 = vmatprep.subr.bf16.mxu1 %v18697_v11  ;;  %v5824_v11 = vld [vmem:[#allocation3 + $0x8] sm:$0xe0]  ;;  %v18716_v40 = vld [vmem:[%s24630_s2 + $0x600] ss:$8 sps:$4 sm:$0xff]   ;;  %v5911_v59 = vrot.slane %v20461_v50, 5 }
 0x2f1   : > { %v5890_v54 = vrot.slane %v5824_v11, 5  ;;  %v18713_v11 = vld [vmem:[%s24630_s2 + $0xcf0] ss:$8 sps:$4 sm:$0xff]   ;;  %v5889_v63 = vsel %vm391_vm0, %v5887_v33, %v5888_v22 }
 0x2f3   : > { %6533 = vmatpush1.bf16.msra.mxu1 %v18695_v25  ;;  %v5822_v25 = vpack.c.bf16 %v5774_v9, %v5770_v35  ;;  %v18715_v35 = vld [vmem:[%s24630_s2 + $0xcf4] ss:$8 sps:$4 sm:$0xff]  }
 0x2f4   : > { %6534 = vmatprep.subr.bf16.mxu1 %v18700_v48  ;;  %v5771_v48 = vrot.slane %v5661_v37, 5  ;;  %v5905_v37 = vrot.slane %v5830_v29, 5 }
 0x2f6   : > { %6291 = vmatmul.mubr.bf16.gmra.mrb[20].mxu1 %v5817_v60  ;;  %v5772_v60 = vsel %vm391_vm0, %v5766_v36, %v5771_v48  ;;  %v5906_v18 = vsel %vm391_vm0, %v5901_v17, %v5905_v37  ;;  %v5827_v36 = vld [vmem:[#allocation3 + $0x30] sm:$0xe0]  ;;  %v5829_v48 = vld [vmem:[#allocation3 + $0x50] sm:$0x1f]  ;;  %v18722_v37 = vld [vmem:[%s24630_s2 + $0x620] ss:$8 sps:$4 sm:$0xff]  }
 0x2f7   : > { %6535 = vmatpush1.bf16.msra.mxu1 %v18698_v5  ;;  %6300 = vmatprep.mubr.bf16.mxu1 %v5820_v46  ;;  %v18712_v5 = vld [vmem:[%s24630_s2 + $0xce4] ss:$8 sps:$4 sm:$0xff]   ;;  %v5892_v46 = vsel %vm391_vm0, %v5890_v54, %v5891_v23  ;;  %v5821_v16 = vpack.c.bf16 %v5772_v60, %v5767_v58  ;;  %v5897_v58 = vrot.slane %v5827_v36, 5  ;;  %v5898_v60 = vrot.slane %v20454_v44, 5 }
 0x2f8   : > { %6536 = vmatprep.subr.bf16.mxu1 %v18703_v7  ;;  %v5828_v7 = vld [vmem:[#allocation3 + $0x38] sm:$0xe0]  ;;  %v5834_v54 = vld [vmem:[#allocation3 + $0x88] sm:$0x1f]  ;;  %v5921_v36 = vrot.slane %v20493_v39, 5 }
 0x2f9   : > { %v5900_v9 = vrot.slane %v5828_v7, 5  ;;  %v18719_v7 = vld [vmem:[%s24630_s2 + $0x610] ss:$8 sps:$4 sm:$0xff]   ;;  %v5899_v29 = vsel %vm391_vm0, %v5897_v58, %v5898_v60 }
 0x2fb   : > { %6537 = vmatpush1.bf16.msra.mxu1 %v18701_v42  ;;  %v6000_v42 = vpack.c.bf16 %v5896_v41, %v5892_v46  ;;  %v18721_v46 = vld [vmem:[%s24630_s2 + $0x614] ss:$8 sps:$4 sm:$0xff]  }
 0x2fc   : > { %6538 = vmatprep.subr.bf16.mxu1 %v18706_v53  ;;  %v5893_v53 = vrot.slane %v5825_v61, 5  ;;  %v5915_v61 = vrot.slane %v5834_v54, 5 }
 0x2fe   : > { %6301 = vmatmul.mubr.bf16.gmra.mrb[24].mxu1 %v5819_v51  ;;  %v5894_v51 = vsel %vm391_vm0, %v5888_v22, %v5893_v53  ;;  %v5916_v33 = vsel %vm391_vm0, %v5911_v59, %v5915_v61  ;;  %v5831_v22 = vld [vmem:[#allocation3 + $0x60] sm:$0xe0]  ;;  %v5833_v53 = vld [vmem:[#allocation3 + $0x80] sm:$0x1f] }
 0x2ff   : > { %6539 = vmatpush1.bf16.msra.mxu1 %v18704_v2  ;;  %6310 = vmatprep.mubr.bf16.mxu1 %v5822_v25  ;;  %v18718_v2 = vld [vmem:[%s24630_s2 + $0x604] ss:$8 sps:$4 sm:$0xff]   ;;  %v5902_v25 = vsel %vm391_vm0, %v5900_v9, %v5901_v17  ;;  %v5999_v23 = vpack.c.bf16 %v5894_v51, %v5889_v63  ;;  %v5838_v9 = vld [vmem:[#allocation3 + $0xb8] sm:$0x1f]  ;;  %v5907_v63 = vrot.slane %v5831_v22, 5  ;;  %v5908_v51 = vrot.slane %v20486_v12, 5 }
 0x300   : > { %6540 = vmatprep.subr.bf16.mxu1 %v18709_v14  ;;  %v5832_v14 = vld [vmem:[#allocation3 + $0x68] sm:$0xe0]  ;;  %v18728_v61 = vld [vmem:[%s24630_s2 + $0x640] ss:$8 sps:$4 sm:$0xff]   ;;  %v5931_v22 = vrot.slane %v20525_v49, 5 }
 0x301   : > { %v5910_v41 = vrot.slane %v5832_v14, 5  ;;  %v18725_v14 = vld [vmem:[%s24630_s2 + $0x630] ss:$8 sps:$4 sm:$0xff]   ;;  %v5909_v54 = vsel %vm391_vm0, %v5907_v63, %v5908_v51 }
 0x303   : > { %6541 = vmatpush1.bf16.msra.mxu1 %v18707_v27  ;;  %v6002_v27 = vpack.c.bf16 %v5906_v18, %v5902_v25  ;;  %v18727_v25 = vld [vmem:[%s24630_s2 + $0x634] ss:$8 sps:$4 sm:$0xff]  }
 0x304   : > { %6542 = vmatprep.subr.bf16.mxu1 %v18712_v5  ;;  %v5903_v5 = vrot.slane %v5829_v48, 5  ;;  %v5925_v48 = vrot.slane %v5838_v9, 5 }
 0x306   : > { %6311 = vmatmul.mubr.bf16.gmra.mrb[28].mxu1 %v5821_v16  ;;  %v5904_v16 = vsel %vm391_vm0, %v5898_v60, %v5903_v5  ;;  %v5926_v58 = vsel %vm391_vm0, %v5921_v36, %v5925_v48  ;;  %v5835_v60 = vld [vmem:[#allocation3 + $0x90] sm:$0xe0]  ;;  %v5837_v5 = vld [vmem:[#allocation3 + $0xb0] sm:$0x1f]  ;;  %v18734_v48 = vld [vmem:[%s24630_s2 + $0x660] ss:$8 sps:$4 sm:$0xff]  }
 0x307   : > { %6543 = vmatpush1.bf16.msra.mxu1 %v18710_v8  ;;  %6546 = vmatprep.mubr.bf16.mxu1 %v6000_v42  ;;  %v18724_v8 = vld [vmem:[%s24630_s2 + $0x624] ss:$8 sps:$4 sm:$0xff]   ;;  %v5912_v42 = vsel %vm391_vm0, %v5910_v41, %v5911_v59  ;;  %v6001_v17 = vpack.c.bf16 %v5904_v16, %v5899_v29  ;;  %v5917_v29 = vrot.slane %v5835_v60, 5  ;;  %v5918_v16 = vrot.slane %v20518_v55, 5 }
 0x308   : > { %6544 = vmatprep.subr.bf16.mxu1 %v18715_v35  ;;  %v5836_v35 = vld [vmem:[#allocation3 + $0x98] sm:$0xe0]  ;;  %v5842_v41 = vld [vmem:[#allocation3 + $0xe8] sm:$0x1f]  ;;  %v5941_v60 = vrot.slane %v20557_v32, 5 }
 0x309   : > { %v5920_v18 = vrot.slane %v5836_v35, 5  ;;  %v18731_v35 = vld [vmem:[%s24630_s2 + $0x650] ss:$8 sps:$4 sm:$0xff]   ;;  %v5919_v9 = vsel %vm391_vm0, %v5917_v29, %v5918_v16 }
 0x30b   : > { %6545 = vmatpush1.bf16.msra.mxu1 %v18713_v11  ;;  %v6004_v11 = vpack.c.bf16 %v5916_v33, %v5912_v42  ;;  %v18733_v42 = vld [vmem:[%s24630_s2 + $0x654] ss:$8 sps:$4 sm:$0xff]  }
 0x30c   : > { %7269 = vmatprep.subr.bf16.mxu1 %v18718_v2  ;;  %v5913_v2 = vrot.slane %v5833_v53, 5  ;;  %v5935_v53 = vrot.slane %v5842_v41, 5 }
 0x30e   : > { %6547 = vmatmul.mubr.bf16.vlgmr.msra.gmra.mrb[32].mxu1 %v5999_v23  ;;  %v5914_v23 = vsel %vm391_vm0, %v5908_v51, %v5913_v2  ;;  %v5936_v63 = vsel %vm391_vm0, %v5931_v22, %v5935_v53  ;;  %v5839_v51 = vld [vmem:[#allocation3 + $0xc0] sm:$0xe0]  ;;  %v5841_v2 = vld [vmem:[#allocation3 + $0xe0] sm:$0x1f] }
 0x30f   : > { %7270 = vmatpush1.bf16.msra.mxu1 %v18716_v40  ;;  %6556 = vmatprep.mubr.bf16.mxu1 %v6002_v27  ;;  %v18730_v40 = vld [vmem:[%s24630_s2 + $0x644] ss:$8 sps:$4 sm:$0xff]   ;;  %v5922_v27 = vsel %vm391_vm0, %v5920_v18, %v5921_v36  ;;  %v6003_v59 = vpack.c.bf16 %v5914_v23, %v5909_v54  ;;  %v5846_v18 = vld [vmem:[#allocation3 + $0x118] sm:$0x1f]  ;;  %v5927_v54 = vrot.slane %v5839_v51, 5  ;;  %v5928_v23 = vrot.slane %v20550_v52, 5 }
 0x310   : > { %7271 = vmatprep.subr.bf16.mxu1 %v18721_v46  ;;  %v5840_v46 = vld [vmem:[#allocation3 + $0xc8] sm:$0xe0]  ;;  %v18740_v53 = vld [vmem:[%s24630_s2 + $0x680] ss:$8 sps:$4 sm:$0xff]   ;;  %v5951_v51 = vrot.slane %v20592_v24, 5 }
 0x311   : > { %v5930_v33 = vrot.slane %v5840_v46, 5  ;;  %v18737_v46 = vld [vmem:[%s24630_s2 + $0x670] ss:$8 sps:$4 sm:$0xff]   ;;  %v5929_v41 = vsel %vm391_vm0, %v5927_v54, %v5928_v23 }
 0x313   : > { %7272 = vmatpush1.bf16.msra.mxu1 %v18719_v7  ;;  %v6006_v7 = vpack.c.bf16 %v5926_v58, %v5922_v27  ;;  %v18739_v27 = vld [vmem:[%s24630_s2 + $0x674] ss:$8 sps:$4 sm:$0xff]  }
 0x314   : > { %7273 = vmatprep.subr.bf16.mxu1 %v18724_v8  ;;  %v5923_v8 = vrot.slane %v5837_v5, 5  ;;  %v5945_v5 = vrot.slane %v5846_v18, 5 }
 0x316   : > { %6557 = vmatmul.mubr.bf16.gmra.mrb[36].mxu1 %v6001_v17  ;;  %v5924_v17 = vsel %vm391_vm0, %v5918_v16, %v5923_v8  ;;  %v5946_v29 = vsel %vm391_vm0, %v5941_v60, %v5945_v5  ;;  %v5843_v16 = vld [vmem:[#allocation3 + $0xf0] sm:$0xe0]  ;;  %v5845_v8 = vld [vmem:[#allocation3 + $0x110] sm:$0x1f]  ;;  %v18746_v5 = vld [vmem:[%s24630_s2 + $0x6a0] ss:$8 sps:$4 sm:$0xff]  }
 0x317   : > { %7274 = vmatpush1.bf16.msra.mxu1 %v18722_v37  ;;  %6566 = vmatprep.mubr.bf16.mxu1 %v6004_v11  ;;  %v18736_v37 = vld [vmem:[%s24630_s2 + $0x664] ss:$8 sps:$4 sm:$0xff]   ;;  %v5932_v11 = vsel %vm391_vm0, %v5930_v33, %v5931_v22  ;;  %v6005_v36 = vpack.c.bf16 %v5924_v17, %v5919_v9  ;;  %v5937_v9 = vrot.slane %v5843_v16, 5  ;;  %v5938_v17 = vrot.slane %v20582_v10, 5 }
 0x318   : > { %7275 = vmatprep.subr.bf16.mxu1 %v18727_v25  ;;  %v5844_v25 = vld [vmem:[#allocation3 + $0xf8] sm:$0xe0]  ;;  %v5850_v33 = vld [vmem:[#allocation3 + $0x148] sm:$0x1f]  ;;  %v5961_v16 = vrot.slane %v20617_v20, 5 }
 0x319   : > { %v5940_v58 = vrot.slane %v5844_v25, 5  ;;  %v18743_v25 = vld [vmem:[%s24630_s2 + $0x690] ss:$8 sps:$4 sm:$0xff]   ;;  %v5939_v18 = vsel %vm391_vm0, %v5937_v9, %v5938_v17 }
 0x31b   : > { %7276 = vmatpush1.bf16.msra.mxu1 %v18725_v14  ;;  %v6008_v14 = vpack.c.bf16 %v5936_v63, %v5932_v11  ;;  %v18745_v11 = vld [vmem:[%s24630_s2 + $0x694] ss:$8 sps:$4 sm:$0xff]  }
 0x31c   : > { %7277 = vmatprep.subr.bf16.mxu1 %v18730_v40  ;;  %v5933_v40 = vrot.slane %v5841_v2, 5  ;;  %v5955_v2 = vrot.slane %v5850_v33, 5 }
 0x31e   : > { %6567 = vmatmul.mubr.bf16.gmra.mrb[40].mxu1 %v6003_v59  ;;  %v5934_v59 = vsel %vm391_vm0, %v5928_v23, %v5933_v40  ;;  %v5956_v54 = vsel %vm391_vm0, %v5951_v51, %v5955_v2  ;;  %v5847_v23 = vld [vmem:[#allocation3 + $0x120] sm:$0xe0]  ;;  %v5849_v40 = vld [vmem:[#allocation3 + $0x140] sm:$0x1f] }
 0x31f   : > { %7278 = vmatpush1.bf16.msra.mxu1 %v18728_v61  ;;  %6576 = vmatprep.mubr.bf16.mxu1 %v6006_v7  ;;  %v18742_v61 = vld [vmem:[%s24630_s2 + $0x684] ss:$8 sps:$4 sm:$0xff]   ;;  %v5942_v7 = vsel %vm391_vm0, %v5940_v58, %v5941_v60  ;;  %v6007_v22 = vpack.c.bf16 %v5934_v59, %v5929_v41  ;;  %v5854_v58 = vld [vmem:[#allocation3 + $0x178] sm:$0x1f]  ;;  %v5947_v41 = vrot.slane %v5847_v23, 5  ;;  %v5948_v59 = vrot.slane %v20383_v6, 5 }
 0x320   : > { %7279 = vmatprep.subr.bf16.mxu1 %v18733_v42  ;;  %v5848_v42 = vld [vmem:[#allocation3 + $0x128] sm:$0xe0]  ;;  %v18752_v2 = vld [vmem:[%s24630_s2 + $0x6c0] ss:$8 sps:$4 sm:$0xff]   ;;  %v6760_v23 = vrot.slane %v19779_v31, 6 }
 0x321   : > { %v5950_v63 = vrot.slane %v5848_v42, 5  ;;  %v18749_v42 = vld [vmem:[%s24630_s2 + $0x6b0] ss:$8 sps:$4 sm:$0xff]   ;;  %v5949_v33 = vsel %vm391_vm0, %v5947_v41, %v5948_v59  ;;  %v6691_v41 = vld [vmem:[#allocation2] sm:$0xc0] }
 0x323   : > { %7280 = vmatpush1.bf16.msra.mxu1 %v18731_v35  ;;  %v6010_v35 = vpack.c.bf16 %v5946_v29, %v5942_v7  ;;  %v18751_v7 = vld [vmem:[%s24630_s2 + $0x6b4] ss:$8 sps:$4 sm:$0xff]  }
 0x324   : > { %7281 = vmatprep.subr.bf16.mxu1 %v18736_v37  ;;  %v5943_v37 = vrot.slane %v5845_v8, 5  ;;  %v5965_v8 = vrot.slane %v5854_v58, 5 }
 0x326   : > { %6577 = vmatmul.mubr.bf16.gmra.mrb[44].mxu1 %v6005_v36  ;;  %v5944_v36 = vsel %vm391_vm0, %v5938_v17, %v5943_v37  ;;  %v5966_v9 = vsel %vm391_vm0, %v5961_v16, %v5965_v8  ;;  %v5851_v17 = vld [vmem:[#allocation3 + $0x150] sm:$0xe0]  ;;  %v5853_v37 = vld [vmem:[#allocation3 + $0x170] sm:$0x1f] }
 0x327   : > { %7282 = vmatpush1.bf16.msra.mxu1 %v18734_v48  ;;  %6586 = vmatprep.mubr.bf16.mxu1 %v6008_v14  ;;  %v18748_v48 = vld [vmem:[%s24630_s2 + $0x6a4] ss:$8 sps:$4 sm:$0xff]   ;;  %v5952_v14 = vsel %vm391_vm0, %v5950_v63, %v5951_v51  ;;  %v6009_v60 = vpack.c.bf16 %v5944_v36, %v5939_v18  ;;  %v5957_v18 = vrot.slane %v5851_v17, 5  ;;  %v5958_v36 = vrot.slane %v20413_v43, 5 }
 0x328   : > { %7283 = vmatprep.subr.bf16.mxu1 %v18739_v27  ;;  %v5852_v27 = vld [vmem:[#allocation3 + $0x158] sm:$0xe0]  ;;  %v6694_v63 = vld [vmem:[#allocation2 + $0x28] sm:$0x3f] }
 0x329   : > { %v5960_v29 = vrot.slane %v5852_v27, 5  ;;  %v18755_v27 = vld [vmem:[%s24630_s2 + $0x6d0] ss:$8 sps:$4 sm:$0xff]   ;;  %v5959_v58 = vsel %vm391_vm0, %v5957_v18, %v5958_v36 }
 0x32b   : > { %7284 = vmatpush1.bf16.msra.mxu1 %v18737_v46  ;;  %v6012_v46 = vpack.c.bf16 %v5956_v54, %v5952_v14  ;;  %v18757_v14 = vld [vmem:[%s24630_s2 + $0x6d4] ss:$8 sps:$4 sm:$0xff]  }
 0x32c   : > { %7285 = vmatprep.subr.bf16.mxu1 %v18742_v61  ;;  %v5953_v61 = vrot.slane %v5849_v40, 5  ;;  %v6764_v40 = vrot.slane %v6694_v63, 6  ;;  %v18761_v63 = vld [vmem:[%s24630_s2 + $0x6f0] ss:$8 sps:$4 sm:$0xff]  }
 0x32e   : > { %6587 = vmatmul.mubr.bf16.gmra.mrb[48].mxu1 %v6007_v22  ;;  %v5954_v22 = vsel %vm391_vm0, %v5948_v59, %v5953_v61  ;;  %v6693_v59 = vld [vmem:[#allocation2 + $0x20] sm:$0x3f]  ;;  %v6696_v61 = vld [vmem:[#allocation2 + $0x38] sm:$0xc0] }
 0x32f   : > { %7286 = vmatpush1.bf16.msra.mxu1 %v18740_v53  ;;  %6596 = vmatprep.mubr.bf16.mxu1 %v6010_v35  ;;  %v18754_v53 = vld [vmem:[%s24630_s2 + $0x6c4] ss:$8 sps:$4 sm:$0xff]   ;;  %v5962_v35 = vsel %vm391_vm0, %v5960_v29, %v5961_v16  ;;  %v6011_v51 = vpack.c.bf16 %v5954_v22, %v5949_v33  ;;  %v18758_v16 = vld [vmem:[%s24630_s2 + $0x6e0] ss:$8 sps:$4 sm:$0xff]   ;;  %v6757_v33 = vrot.slane %v19925_v38, 6  ;;  %v6762_v22 = vrot.slane %v6693_v59, 6 }
 0x330   : > { %7287 = vmatprep.subr.bf16.mxu1 %v18745_v11  ;;  %v6692_v11 = vld [vmem:[#allocation2 + $0x8] sm:$0xc0]  ;;  %v18815_v38 = vld [vmem:[%s24630_s2 + $0xf14] ss:$8 sps:$4 sm:$0xff]  }
 0x331   : > { %v6759_v54 = vrot.slane %v6692_v11, 6  ;;  %v18814_v11 = vld [vmem:[%s24630_s2 + $0xf00] ss:$8 sps:$4 sm:$0xff]  }
 0x333   : > { %7288 = vmatpush1.bf16.msra.mxu1 %v18743_v25  ;;  %v6014_v25 = vpack.c.bf16 %v5966_v9, %v5962_v35  ;;  %v6761_v31 = vsel %vm6755_vm5, %v6759_v54, %v6760_v23  ;;  %v6769_v35 = vrot.slane %v6696_v61, 6  ;;  %v6770_v9 = vrot.slane %v19937_v19, 6  ;;  %v6702_v54 = vld [vmem:[#allocation2 + $0x88] sm:$0x3f] }
 0x334   : > { %7289 = vmatprep.subr.bf16.mxu1 %v18748_v48  ;;  %v5963_v48 = vrot.slane %v5853_v37, 5  ;;  %v18812_v37 = vld [vmem:[%s24630_s2 + $0xf04] ss:$8 sps:$4 sm:$0xff]   ;;  %v6780_v61 = vrot.slane %v20006_v47, 6 }
 0x335   : > { %8964 = vmatprep.subr.bf16.mxu0 %v18812_v37  ;;  %v18823_v37 = vld [vmem:[%s24630_s2 + $0xf30] ss:$8 sps:$4 sm:$0xff]  }
 0x336   : > { %6597 = vmatmul.mubr.bf16.gmra.mrb[52].mxu1 %v6009_v60  ;;  %v5964_v60 = vsel %vm391_vm0, %v5958_v36, %v5963_v48  ;;  %v6695_v36 = vld [vmem:[#allocation2 + $0x30] sm:$0xc0]  ;;  %v6697_v48 = vld [vmem:[#allocation2 + $0x50] sm:$0x3f]  ;;  %8965 = vmatpush1.bf16.msra.mxu0 %v18814_v11 }
 0x337   : > { %7290 = vmatpush1.bf16.msra.mxu1 %v18746_v5  ;;  %6606 = vmatprep.mubr.bf16.mxu1 %v6012_v46  ;;  %v18760_v5 = vld [vmem:[%s24630_s2 + $0x6e4] ss:$8 sps:$4 sm:$0xff]   ;;  %v6765_v46 = vsel %vm6755_vm5, %v6760_v23, %v6764_v40  ;;  %v6013_v29 = vpack.c.bf16 %v5964_v60, %v5959_v58  ;;  %v18817_v23 = vld [vmem:[%s24630_s2 + $0xf10] ss:$8 sps:$4 sm:$0xff]   ;;  %v18764_v58 = vld [vmem:[%s24630_s2 + $0xd00] ss:$8 sps:$4 sm:$0xff]  }
 0x338   : > { %7291 = vmatprep.subr.bf16.mxu1 %v18751_v7  ;;  %v6698_v7 = vld [vmem:[#allocation2 + $0x58] sm:$0x3f]  ;;  %v6869_v8 = vpack.c.bf16 %v6765_v46, %v6761_v31  ;;  %8966 = vmatprep.subr.bf16.mxu0 %v18815_v38  ;;  %v6767_v31 = vrot.slane %v19981_v13, 6  ;;  %v6772_v46 = vrot.slane %v6697_v48, 6  ;;  %v18824_v38 = vld [vmem:[%s24630_s2 + $0xf44] ss:$8 sps:$4 sm:$0xff]  }
 0x339   : > { %v6774_v17 = vrot.slane %v6698_v7, 6  ;;  %v6784_v7 = vrot.slane %v6702_v54, 6  ;;  %v18821_v13 = vld [vmem:[%s24630_s2 + $0xf34] ss:$8 sps:$4 sm:$0xff]   ;;  %v6790_v48 = vrot.slane %v20072_v1, 6 }
 0x33a   : > { %8967 = vmatpush1.bf16.msra.mxu0 %v18817_v23  ;;  %v18826_v54 = vld [vmem:[%s24630_s2 + $0xf40] ss:$8 sps:$4 sm:$0xff]   ;;  %v18773_v23 = vld [vmem:[%s24630_s2 + $0xd30] ss:$8 sps:$4 sm:$0xff]  }
 0x33b   : > { %7292 = vmatpush1.bf16.msra.mxu1 %v18749_v42  ;;  %v6756_v42 = vrot.slane %v6691_v41, 6  ;;  %v6775_v18 = vsel %vm6755_vm5, %v6770_v9, %v6774_v17  ;;  %v18769_v41 = vld [vmem:[%s24630_s2 + $0xd14] ss:$8 sps:$4 sm:$0xff]  }
 0x33c   : > { %7293 = vmatprep.subr.bf16.mxu1 %v18754_v53  ;;  %v18763_v53 = vld [vmem:[%s24630_s2 + $0x6f4] ss:$8 sps:$4 sm:$0xff]  }
 0x33d   : > { %v6758_v19 = vsel %vm6755_vm5, %v6756_v42, %v6757_v33  ;;  %v18772_v42 = vld [vmem:[%s24630_s2 + $0xd24] ss:$8 sps:$4 sm:$0xff]   ;;  %v6706_v17 = vld [vmem:[#allocation2 + $0xb8] sm:$0x3f] }
 0x33e   : > { %6607 = vmatmul.mubr.bf16.gmra.mrb[56].mxu1 %v6011_v51  ;;  %v6763_v51 = vsel %vm6755_vm5, %v6757_v33, %v6762_v22  ;;  %v6785_v22 = vsel %vm6755_vm5, %v6780_v61, %v6784_v7  ;;  %v18830_v7 = vld [vmem:[%s24630_s2 + $0xf64] ss:$8 sps:$4 sm:$0xff]  }
 0x33f   : > { %7294 = vmatpush1.bf16.msra.mxu1 %v18752_v2  ;;  %6616 = vmatprep.mubr.bf16.mxu1 %v6014_v25  ;;  %v18766_v2 = vld [vmem:[%s24630_s2 + $0xd04] ss:$8 sps:$4 sm:$0xff]   ;;  %v6771_v25 = vsel %vm6755_vm5, %v6769_v35, %v6770_v9  ;;  %v6868_v40 = vpack.c.bf16 %v6763_v51, %v6758_v19  ;;  %v6704_v9 = vld [vmem:[#allocation2 + $0x98] sm:$0xc0] }
 0x340   : > { %7295 = vmatprep.subr.bf16.mxu1 %v18757_v14  ;;  %v6700_v14 = vld [vmem:[#allocation2 + $0x68] sm:$0xc0]  ;;  %v6871_v60 = vpack.c.bf16 %v6775_v18, %v6771_v25  ;;  %v6701_v35 = vld [vmem:[#allocation2 + $0x80] sm:$0x3f]  ;;  %v18775_v18 = vld [vmem:[%s24630_s2 + $0xd34] ss:$8 sps:$4 sm:$0xff]  }
 0x341   : > { %v6779_v59 = vrot.slane %v6700_v14, 6  ;;  %v6782_v25 = vrot.slane %v6701_v35, 6  ;;  %v6794_v14 = vrot.slane %v6706_v17, 6  ;;  %v18832_v35 = vld [vmem:[%s24630_s2 + $0xf60] ss:$8 sps:$4 sm:$0xff]  }
 0x343   : > { %7296 = vmatpush1.bf16.msra.mxu1 %v18755_v27  ;;  %v18818_v27 = vld [vmem:[%s24630_s2 + $0xf24] ss:$8 sps:$4 sm:$0xff]   ;;  %v6781_v33 = vsel %vm6755_vm5, %v6779_v59, %v6780_v61  ;;  %v18829_v59 = vld [vmem:[%s24630_s2 + $0xf50] ss:$8 sps:$4 sm:$0xff]  }
 0x344   : > { %7297 = vmatprep.subr.bf16.mxu1 %v18760_v5  ;;  %v6766_v5 = vrot.slane %v6695_v36, 6  ;;  %8968 = vmatprep.subr.bf16.mxu0 %v18818_v27  ;;  %v6873_v19 = vpack.c.bf16 %v6785_v22, %v6781_v33  ;;  %v6789_v36 = vrot.slane %v6704_v9, 6  ;;  %v18778_v27 = vld [vmem:[%s24630_s2 + $0xd44] ss:$8 sps:$4 sm:$0xff]   ;;  %v6800_v22 = vrot.slane %v20133_v62, 6 }
 0x345   : > { %v18779_v9 = vld [vmem:[%s24630_s2 + $0xd50] ss:$8 sps:$4 sm:$0xff]  }
 0x346   : > { %6617 = vmatmul.mubr.bf16.gmra.mrb[60].mxu1 %v6013_v29  ;;  %v18820_v29 = vld [vmem:[%s24630_s2 + $0xf20] ss:$8 sps:$4 sm:$0xff]   ;;  %v6768_v47 = vsel %vm6755_vm5, %v6766_v5, %v6767_v31  ;;  %v6703_v5 = vld [vmem:[#allocation2 + $0x90] sm:$0xc0] }
 0x347   : > { %7298 = vmatpush1.bf16.msra.mxu1 %v18758_v16  ;;  %7301 = vmatprep.mubr.bf16.mxu1 %v6869_v8  ;;  %v18767_v16 = vld [vmem:[%s24630_s2 + $0xd10] ss:$8 sps:$4 sm:$0xff]   ;;  %v6773_v8 = vsel %vm6755_vm5, %v6767_v31, %v6772_v46  ;;  %v6708_v46 = vld [vmem:[#allocation2 + $0xc8] sm:$0xc0] }
 0x348   : > { %7299 = vmatprep.subr.bf16.mxu1 %v18763_v53  ;;  %v6699_v53 = vld [vmem:[#allocation2 + $0x60] sm:$0xc0]  ;;  %8969 = vmatpush1.bf16.msra.mxu0 %v18820_v29  ;;  %v6870_v11 = vpack.c.bf16 %v6773_v8, %v6768_v47  ;;  %v6705_v31 = vld [vmem:[#allocation2 + $0xb0] sm:$0x3f]  ;;  %v18776_v29 = vld [vmem:[%s24630_s2 + $0xd40] ss:$8 sps:$4 sm:$0xff]  }
 0x349   : > { %8970 = vmatprep.subr.bf16.mxu0 %v18821_v13  ;;  %v6776_v51 = vrot.slane %v6699_v53, 6  ;;  %v6787_v47 = vrot.slane %v20116_v45, 6  ;;  %v6792_v8 = vrot.slane %v6705_v31, 6  ;;  %v6799_v33 = vrot.slane %v6708_v46, 6  ;;  %v18833_v45 = vld [vmem:[%s24630_s2 + $0xf74] ss:$8 sps:$4 sm:$0xff]  }
 0x34a   : > { %v18790_v46 = vld [vmem:[%s24630_s2 + $0xd84] ss:$8 sps:$4 sm:$0xff]  }
 0x34b   : > { %7300 = vmatpush1.bf16.msra.mxu1 %v18761_v63  ;;  %v18770_v63 = vld [vmem:[%s24630_s2 + $0xd20] ss:$8 sps:$4 sm:$0xff]   ;;  %v6793_v17 = vsel %vm6755_vm5, %v6787_v47, %v6792_v8  ;;  %v18842_v8 = vld [vmem:[%s24630_s2 + $0xfa4] ss:$8 sps:$4 sm:$0xff]  }
 0x34c   : > { %7575 = vmatprep.subr.bf16.mxu1 %v18766_v2  ;;  %v6777_v2 = vrot.slane %v20055_v26, 6  ;;  %8971 = vmatpush1.bf16.msra.mxu0 %v18823_v37  ;;  %v18827_v26 = vld [vmem:[%s24630_s2 + $0xf54] ss:$8 sps:$4 sm:$0xff]   ;;  %v18784_v37 = vld [vmem:[%s24630_s2 + $0xd64] ss:$8 sps:$4 sm:$0xff]  }
 0x34d   : > { %8972 = vmatprep.subr.bf16.mxu0 %v18824_v38 }
 0x34e   : > { %7302 = vmatmul.mubr.bf16.vlgmr.msra.gmra.mrb[0].mxu1 %v6868_v40  ;;  %v6778_v1 = vsel %vm6755_vm5, %v6776_v51, %v6777_v2  ;;  %v6783_v40 = vsel %vm6755_vm5, %v6777_v2, %v6782_v25  ;;  %v6712_v51 = vld [vmem:[#allocation2 + $0xf8] sm:$0xc0]  ;;  %v6714_v2 = vld [vmem:[#allocation2 + $0x118] sm:$0x3f] }
 0x34f   : > { %7576 = vmatpush1.bf16.msra.mxu1 %v18764_v58  ;;  %7311 = vmatprep.mubr.bf16.mxu1 %v6871_v60  ;;  %v6791_v58 = vsel %vm6755_vm5, %v6789_v36, %v6790_v48  ;;  %v6795_v60 = vsel %vm6755_vm5, %v6790_v48, %v6794_v14  ;;  %v6872_v61 = vpack.c.bf16 %v6783_v40, %v6778_v1  ;;  %v18835_v25 = vld [vmem:[%s24630_s2 + $0xf70] ss:$8 sps:$4 sm:$0xff]   ;;  %v18836_v36 = vld [vmem:[%s24630_s2 + $0xf84] ss:$8 sps:$4 sm:$0xff]   ;;  %v18782_v48 = vld [vmem:[%s24630_s2 + $0xd60] ss:$8 sps:$4 sm:$0xff]  }
 0x350   : > { %7577 = vmatprep.subr.bf16.mxu1 %v18769_v41  ;;  %v6710_v41 = vld [vmem:[#allocation2 + $0xe8] sm:$0x3f]  ;;  %8973 = vmatpush1.bf16.msra.mxu0 %v18826_v54  ;;  %v6875_v13 = vpack.c.bf16 %v6795_v60, %v6791_v58  ;;  %v18787_v1 = vld [vmem:[%s24630_s2 + $0xd74] ss:$8 sps:$4 sm:$0xff]   ;;  %v6809_v40 = vrot.slane %v6712_v51, 6  ;;  %v6814_v58 = vrot.slane %v6714_v2, 6 }
 0x351   : > { %8974 = vmatprep.subr.bf16.mxu0 %v18827_v26  ;;  %v6804_v53 = vrot.slane %v6710_v41, 6  ;;  %v6797_v26 = vrot.slane %v20174_v57, 6  ;;  %v18838_v60 = vld [vmem:[%s24630_s2 + $0xf80] ss:$8 sps:$4 sm:$0xff]   ;;  %v18839_v57 = vld [vmem:[%s24630_s2 + $0xf94] ss:$8 sps:$4 sm:$0xff]  }
 0x352   : > { %v6717_v51 = vld [vmem:[#allocation2 + $0x140] sm:$0x3f]  ;;  %v6720_v2 = vld [vmem:[#allocation2 + $0x158] sm:$0xc0] }
 0x353   : > { %7578 = vmatpush1.bf16.msra.mxu1 %v18767_v16  ;;  %v6786_v16 = vrot.slane %v6703_v5, 6  ;;  %v6805_v38 = vsel %vm6755_vm5, %v6800_v22, %v6804_v53  ;;  %v18785_v5 = vld [vmem:[%s24630_s2 + $0xd70] ss:$8 sps:$4 sm:$0xff]   ;;  %v6807_v53 = vrot.slane %v20247_v15, 6 }
 0x354   : > { %7579 = vmatprep.subr.bf16.mxu1 %v18772_v42  ;;  %v18781_v42 = vld [vmem:[%s24630_s2 + $0xd54] ss:$8 sps:$4 sm:$0xff]   ;;  %8975 = vmatpush1.bf16.msra.mxu0 %v18829_v59 }
 0x355   : > { %8976 = vmatprep.subr.bf16.mxu0 %v18830_v7  ;;  %v6788_v62 = vsel %vm6755_vm5, %v6786_v16, %v6787_v47  ;;  %v6713_v7 = vld [vmem:[#allocation2 + $0x110] sm:$0x3f] }
 0x356   : > { %7312 = vmatmul.mubr.bf16.gmra.mrb[4].mxu1 %v6870_v11  ;;  %v6801_v11 = vsel %vm6755_vm5, %v6799_v33, %v6800_v22  ;;  %v18841_v16 = vld [vmem:[%s24630_s2 + $0xf90] ss:$8 sps:$4 sm:$0xff]  }
 0x357   : > { %7580 = vmatpush1.bf16.msra.mxu1 %v18770_v63  ;;  %7321 = vmatprep.mubr.bf16.mxu1 %v6873_v19  ;;  %v6707_v63 = vld [vmem:[#allocation2 + $0xc0] sm:$0xc0]  ;;  %v6709_v19 = vld [vmem:[#allocation2 + $0xe0] sm:$0x3f]  ;;  %v6877_v14 = vpack.c.bf16 %v6805_v38, %v6801_v11 }
 0x358   : > { %7581 = vmatprep.subr.bf16.mxu1 %v18775_v18  ;;  %8977 = vmatpush1.bf16.msra.mxu0 %v18832_v35  ;;  %v6874_v18 = vpack.c.bf16 %v6793_v17, %v6788_v62  ;;  %v6796_v54 = vrot.slane %v6707_v63, 6  ;;  %v6812_v35 = vrot.slane %v6713_v7, 6  ;;  %v6820_v62 = vrot.slane %v24704_v4, 6  ;;  %v18796_v38 = vld [vmem:[%s24630_s2 + $0xda4] ss:$8 sps:$4 sm:$0xff]  }
 0x359   : > { %8978 = vmatprep.subr.bf16.mxu0 %v18833_v45  ;;  %v18793_v45 = vld [vmem:[%s24630_s2 + $0xd94] ss:$8 sps:$4 sm:$0xff]  }
 0x35a   : > { %v6813_v11 = vsel %vm6755_vm5, %v6807_v53, %v6812_v35  ;;  %v18808_v35 = vld [vmem:[%s24630_s2 + $0xde4] ss:$8 sps:$4 sm:$0xff]  }
 0x35b   : > { %7582 = vmatpush1.bf16.msra.mxu1 %v18773_v23  ;;  %v6802_v23 = vrot.slane %v6709_v19, 6  ;;  %v6715_v19 = vld [vmem:[#allocation2 + $0x120] sm:$0xc0] }
 0x35c   : > { %7583 = vmatprep.subr.bf16.mxu1 %v18778_v27  ;;  %v6810_v27 = vrot.slane %v20196_v3, 6  ;;  %8979 = vmatpush1.bf16.msra.mxu0 %v18835_v25  ;;  %v6798_v3 = vsel %vm6755_vm5, %v6796_v54, %v6797_v26  ;;  %v6722_v25 = vld [vmem:[#allocation2 + $0x178] sm:$0x3f]  ;;  %v6817_v54 = vrot.slane %v24705_v28, 6 }
 0x35d   : > { %8980 = vmatprep.subr.bf16.mxu0 %v18836_v36  ;;  %v6803_v31 = vsel %vm6755_vm5, %v6797_v26, %v6802_v23  ;;  %v18794_v36 = vld [vmem:[%s24630_s2 + $0xda0] ss:$8 sps:$4 sm:$0xff]   ;;  %v6822_v26 = vrot.slane %v6717_v51, 6  ;;  %v18799_v23 = vld [vmem:[%s24630_s2 + $0xdb4] ss:$8 sps:$4 sm:$0xff]  }
 0x35e   : > { %7322 = vmatmul.mubr.bf16.gmra.mrb[8].mxu1 %v6872_v61  ;;  %v6811_v41 = vsel %vm6755_vm5, %v6809_v40, %v6810_v27  ;;  %v6815_v59 = vsel %vm6755_vm5, %v6810_v27, %v6814_v58  ;;  %v6711_v61 = vld [vmem:[#allocation2 + $0xf0] sm:$0xc0]  ;;  %v6876_v47 = vpack.c.bf16 %v6803_v31, %v6798_v3  ;;  %v6830_v40 = vrot.slane %v24706_v21, 6  ;;  %v18797_v58 = vld [vmem:[%s24630_s2 + $0xdb0] ss:$8 sps:$4 sm:$0xff]  }
 0x35f   : > { %7584 = vmatpush1.bf16.msra.mxu1 %v18776_v29  ;;  %7331 = vmatprep.mubr.bf16.mxu1 %v6875_v13  ;;  %v6716_v29 = vld [vmem:[#allocation2 + $0x128] sm:$0xc0]  ;;  %v6718_v13 = vld [vmem:[#allocation2 + $0x148] sm:$0x3f]  ;;  %v6879_v33 = vpack.c.bf16 %v6815_v59, %v6811_v41  ;;  %v6806_v22 = vrot.slane %v6711_v61, 6  ;;  %v6834_v27 = vrot.slane %v6722_v25, 6  ;;  %v6823_v28 = vsel %vm6755_vm5, %v6817_v54, %v6822_v26 }
 0x360   : > { %7585 = vmatprep.subr.bf16.mxu1 %v18781_v42  ;;  %8981 = vmatpush1.bf16.msra.mxu0 %v18838_v60  ;;  %v18788_v42 = vld [vmem:[%s24630_s2 + $0xd80] ss:$8 sps:$4 sm:$0xff]   ;;  %v6824_v17 = vrot.slane %v6718_v13, 6  ;;  %v6719_v3 = vld [vmem:[#allocation2 + $0x150] sm:$0xc0]  ;;  %v6827_v13 = vrot.slane %v20361_v0, 6 }
 0x361   : > { %8982 = vmatprep.subr.bf16.mxu0 %v18839_v57  ;;  %v6808_v15 = vsel %vm6755_vm5, %v6806_v22, %v6807_v53  ;;  %v18802_v57 = vld [vmem:[%s24630_s2 + $0xdc4] ss:$8 sps:$4 sm:$0xff]   ;;  %v6835_v21 = vsel %vm6755_vm5, %v6830_v40, %v6834_v27  ;;  %v6721_v31 = vld [vmem:[#allocation2 + $0x170] sm:$0x3f]  ;;  %v18800_v61 = vld [vmem:[%s24630_s2 + $0xdc0] ss:$8 sps:$4 sm:$0xff]  }
 0x362   : > { %v6825_v63 = vsel %vm6755_vm5, %v6820_v62, %v6824_v17  ;;  %v6887_v41 = vld [vmem:[#allocation3 + $0x28] sm:$0x3f]  ;;  %v18803_v22 = vld [vmem:[%s24630_s2 + $0xdd0] ss:$8 sps:$4 sm:$0xff]   ;;  %v6889_v17 = vld [vmem:[#allocation3 + $0x38] sm:$0xc0] }
 0x363   : > { %7586 = vmatpush1.bf16.msra.mxu1 %v18779_v9  ;;  %v6819_v9 = vrot.slane %v6716_v29, 6  ;;  %v6826_v29 = vrot.slane %v6719_v3, 6  ;;  %v18811_v51 = vld [vmem:[%s24630_s2 + $0xdf4] ss:$8 sps:$4 sm:$0xff]   ;;  %v6962_v25 = vrot.slane %v20429_v56, 6 }
 0x364   : > { %7587 = vmatprep.subr.bf16.mxu1 %v18784_v37  ;;  %8983 = vmatpush1.bf16.msra.mxu0 %v18841_v16  ;;  %v18791_v37 = vld [vmem:[%s24630_s2 + $0xd90] ss:$8 sps:$4 sm:$0xff]   ;;  %v6832_v16 = vrot.slane %v6721_v31, 6  ;;  %v6888_v26 = vld [vmem:[#allocation3 + $0x30] sm:$0xc0] }
 0x365   : > { %8984 = vmatprep.subr.bf16.mxu0 %v18842_v8  ;;  %v6821_v4 = vsel %vm6755_vm5, %v6819_v9, %v6820_v62  ;;  %v6828_v53 = vsel %vm6755_vm5, %v6826_v29, %v6827_v13  ;;  %v6884_v9 = vld [vmem:[#allocation3] sm:$0xc0]  ;;  %v6886_v62 = vld [vmem:[#allocation3 + $0x20] sm:$0x3f]  ;;  %v6893_v56 = vld [vmem:[#allocation3 + $0x68] sm:$0xc0] }
 0x366   : > { %7332 = vmatmul.mubr.bf16.gmra.mrb[12].mxu1 %v6874_v18  ;;  %v6878_v18 = vpack.c.bf16 %v6813_v11, %v6808_v15  ;;  %v6833_v0 = vsel %vm6755_vm5, %v6827_v13, %v6832_v16  ;;  %v18806_v11 = vld [vmem:[%s24630_s2 + $0xde0] ss:$8 sps:$4 sm:$0xff]   ;;  %v6899_v29 = vld [vmem:[#allocation3 + $0xb8] sm:$0x3f] }
 0x367   : > { %7588 = vmatpush1.bf16.msra.mxu1 %v18782_v48  ;;  %7341 = vmatprep.mubr.bf16.mxu1 %v6877_v14  ;;  %v6881_v48 = vpack.c.bf16 %v6825_v63, %v6821_v4  ;;  %v6816_v14 = vrot.slane %v6715_v19, 6  ;;  %v6882_v15 = vpack.c.bf16 %v6833_v0, %v6828_v53  ;;  %v6948_v4 = vrot.slane %v6884_v9, 6  ;;  %v6901_v9 = vld [vmem:[#allocation3 + $0xc8] sm:$0xc0] }
 0x368   : > { %7589 = vmatprep.subr.bf16.mxu1 %v18787_v1  ;;  %v6829_v1 = vrot.slane %v6720_v2, 6  ;;  %v6949_v63 = vrot.slane %v20422_v30, 6  ;;  %v6954_v19 = vrot.slane %v6886_v62, 6  ;;  %v6961_v2 = vrot.slane %v6889_v17, 6  ;;  %v6903_v62 = vld [vmem:[#allocation3 + $0xe8] sm:$0x3f] }
 0x369   : > { %v6818_v60 = vsel %vm6755_vm5, %v6816_v14, %v6817_v54 }
 0x36a   : > { %v6880_v59 = vpack.c.bf16 %v6823_v28, %v6818_v60  ;;  %v6955_v30 = vsel %vm6755_vm5, %v6949_v63, %v6954_v19  ;;  %v6963_v14 = vsel %vm6755_vm5, %v6961_v2, %v6962_v25  ;;  %v6959_v60 = vrot.slane %v20454_v44, 6 }
 0x36b   : > { %7590 = vmatpush1.bf16.msra.mxu1 %v18785_v5  ;;  %v6831_v5 = vsel %vm6755_vm5, %v6829_v1, %v6830_v40  ;;  %v6895_v1 = vld [vmem:[#allocation3 + $0x88] sm:$0x3f] }
 0x36c   : > { %7591 = vmatprep.subr.bf16.mxu1 %v18790_v46  ;;  %v6885_v46 = vld [vmem:[#allocation3 + $0x8] sm:$0xc0]  ;;  %v6883_v7 = vpack.c.bf16 %v6835_v21, %v6831_v5  ;;  %v6972_v5 = vrot.slane %v20461_v50, 6  ;;  %v6976_v21 = vrot.slane %v6895_v1, 6  ;;  %v6969_v50 = vrot.slane %v20486_v12, 6 }
 0x36d   : > { %v6951_v8 = vrot.slane %v6885_v46, 6 }
 0x36e   : > { %7342 = vmatmul.mubr.bf16.gmra.mrb[16].mxu1 %v6876_v47  ;;  %v18805_v47 = vld [vmem:[%s24630_s2 + $0xdd4] ss:$8 sps:$4 sm:$0xff]  }
 0x36f   : > { %7592 = vmatpush1.bf16.msra.mxu1 %v18788_v42  ;;  %7351 = vmatprep.mubr.bf16.mxu1 %v6879_v33  ;;  %v6952_v42 = vrot.slane %v20380_v34, 6  ;;  %v6956_v33 = vrot.slane %v6887_v41, 6  ;;  %v6977_v41 = vsel %vm6755_vm5, %v6972_v5, %v6976_v21  ;;  %v6906_v21 = vld [vmem:[#allocation3 + $0x110] sm:$0x3f] }
 0x370   : > { %7593 = vmatprep.subr.bf16.mxu1 %v18793_v45 }
 0x371   : > { %v6953_v45 = vsel %vm6755_vm5, %v6951_v8, %v6952_v42  ;;  %v6957_v34 = vsel %vm6755_vm5, %v6952_v42, %v6956_v33  ;;  %v6982_v42 = vrot.slane %v20493_v39, 6  ;;  %v6986_v33 = vrot.slane %v6899_v29, 6 }
 0x372   : > { %v6979_v39 = vrot.slane %v20518_v55, 6  ;;  %v6900_v55 = vld [vmem:[#allocation3 + $0xc0] sm:$0xc0]  ;;  %v6999_v29 = vrot.slane %v20582_v10, 6 }
 0x373   : > { %7594 = vmatpush1.bf16.msra.mxu1 %v18791_v37  ;;  %v6891_v37 = vld [vmem:[#allocation3 + $0x58] sm:$0x3f] }
 0x374   : > { %7595 = vmatprep.subr.bf16.mxu1 %v18796_v38  ;;  %v7061_v38 = vpack.c.bf16 %v6957_v34, %v6953_v45  ;;  %v6896_v45 = vld [vmem:[#allocation3 + $0x90] sm:$0xc0]  ;;  %v6898_v34 = vld [vmem:[#allocation3 + $0xb0] sm:$0x3f] }
 0x376   : > { %7352 = vmatmul.mubr.bf16.gmra.mrb[20].mxu1 %v6878_v18  ;;  %v6966_v18 = vrot.slane %v6891_v37, 6  ;;  %v6978_v37 = vrot.slane %v6896_v45, 6  ;;  %v18857_v45 = vld [vmem:[%s24630_s2 + $0xff4] ss:$8 sps:$4 sm:$0xff]  }
 0x377   : > { %7596 = vmatpush1.bf16.msra.mxu1 %v18794_v36  ;;  %7361 = vmatprep.mubr.bf16.mxu1 %v6881_v48  ;;  %v18809_v36 = vld [vmem:[%s24630_s2 + $0xdf0] ss:$8 sps:$4 sm:$0xff]   ;;  %v6950_v48 = vsel %vm6755_vm5, %v6948_v4, %v6949_v63  ;;  %v6996_v4 = vrot.slane %v6903_v62, 6  ;;  %v18844_v63 = vld [vmem:[%s24630_s2 + $0xfa0] ss:$8 sps:$4 sm:$0xff]  }
 0x378   : > { %7597 = vmatprep.subr.bf16.mxu1 %v18799_v23  ;;  %v6967_v54 = vsel %vm6755_vm5, %v6962_v25, %v6966_v18  ;;  %v6890_v23 = vld [vmem:[#allocation3 + $0x50] sm:$0x3f]  ;;  %v7060_v40 = vpack.c.bf16 %v6955_v30, %v6950_v48  ;;  %v6980_v19 = vsel %vm6755_vm5, %v6978_v37, %v6979_v39  ;;  %v6902_v18 = vld [vmem:[#allocation3 + $0xe0] sm:$0x3f]  ;;  %8985 = vmatpush1.bf16.msra.mxu0 %v18844_v63 }
 0x379   : > { %v7063_v27 = vpack.c.bf16 %v6967_v54, %v6963_v14  ;;  %v6964_v28 = vrot.slane %v6890_v23, 6  ;;  %v18845_v48 = vld [vmem:[%s24630_s2 + $0xfb4] ss:$8 sps:$4 sm:$0xff]   ;;  %v18847_v14 = vld [vmem:[%s24630_s2 + $0xfb0] ss:$8 sps:$4 sm:$0xff]   ;;  %v6989_v23 = vrot.slane %v20550_v52, 6 }
 0x37a   : > { %8986 = vmatprep.subr.bf16.mxu0 %v18845_v48 }
 0x37b   : > { %7598 = vmatpush1.bf16.msra.mxu1 %v18797_v58  ;;  %v6958_v58 = vrot.slane %v6888_v26, 6  ;;  %v6965_v31 = vsel %vm6755_vm5, %v6959_v60, %v6964_v28  ;;  %v6988_v26 = vrot.slane %v6900_v55, 6 }
 0x37c   : > { %7599 = vmatprep.subr.bf16.mxu1 %v18802_v57  ;;  %v6971_v57 = vrot.slane %v6893_v56, 6  ;;  %v6994_v56 = vrot.slane %v6902_v18, 6  ;;  %8987 = vmatpush1.bf16.msra.mxu0 %v18847_v14  ;;  %v7019_v18 = vrot.slane %v20413_v43, 6  ;;  %v7754_v14 = vlaneseq }
 0x37d   : > { %v6960_v3 = vsel %vm6755_vm5, %v6958_v58, %v6959_v60  ;;  %v18848_v58 = vld [vmem:[%s24630_s2 + $0xfc4] ss:$8 sps:$4 sm:$0xff]   ;;  %v18850_v60 = vld [vmem:[%s24630_s2 + $0xfc0] ss:$8 sps:$4 sm:$0xff]   ;;  %v6990_v28 = vsel %vm6755_vm5, %v6988_v26, %v6989_v23 }
 0x37e   : > { %7362 = vmatmul.mubr.bf16.gmra.mrb[24].mxu1 %v6880_v59  ;;  %v6973_v46 = vsel %vm6755_vm5, %v6971_v57, %v6972_v5  ;;  %v6892_v59 = vld [vmem:[#allocation3 + $0x60] sm:$0xc0]  ;;  %v7062_v44 = vpack.c.bf16 %v6965_v31, %v6960_v3  ;;  %v6995_v52 = vsel %vm6755_vm5, %v6989_v23, %v6994_v56  ;;  %8988 = vmatprep.subr.bf16.mxu0 %v18848_v58  ;;  %v6904_v5 = vld [vmem:[#allocation3 + $0xf0] sm:$0xc0]  ;;  %v6909_v3 = vld [vmem:[#allocation3 + $0x128] sm:$0xc0] }
 0x37f   : > { %7600 = vmatpush1.bf16.msra.mxu1 %v18800_v61  ;;  %7371 = vmatprep.mubr.bf16.mxu1 %v6883_v7  ;;  %v6894_v61 = vld [vmem:[#allocation3 + $0x80] sm:$0x3f]  ;;  %v6897_v7 = vld [vmem:[#allocation3 + $0x98] sm:$0xc0]  ;;  %v7065_v13 = vpack.c.bf16 %v6977_v41, %v6973_v46  ;;  %v6968_v16 = vrot.slane %v6892_v59, 6  ;;  %v7068_v41 = vpack.c.bf16 %v6995_v52, %v6990_v28 }
 0x380   : > { %7601 = vmatprep.subr.bf16.mxu1 %v18805_v47  ;;  %v6974_v47 = vrot.slane %v6894_v61, 6  ;;  %v6981_v8 = vrot.slane %v6897_v7, 6  ;;  %8989 = vmatpush1.bf16.msra.mxu0 %v18850_v60  ;;  %v6911_v31 = vld [vmem:[#allocation3 + $0x148] sm:$0x3f]  ;;  %v18851_v46 = vld [vmem:[%s24630_s2 + $0xfd4] ss:$8 sps:$4 sm:$0xff]  }
 0x381   : > { %v18853_v59 = vld [vmem:[%s24630_s2 + $0xfd0] ss:$8 sps:$4 sm:$0xff]   ;;  %v6998_v7 = vrot.slane %v6904_v5, 6  ;;  %8990 = vmatprep.subr.bf16.mxu0 %v18851_v46  ;;  %v7752_v23 = vld [vmem:[%s24631_s3] sm:$0x3] }
 0x382   : > { %v6975_v53 = vsel %vm6755_vm5, %v6969_v50, %v6974_v47  ;;  %v6983_v0 = vsel %vm6755_vm5, %v6981_v8, %v6982_v42  ;;  %v18854_v47 = vld [vmem:[%s24630_s2 + $0xfe4] ss:$8 sps:$4 sm:$0xff]   ;;  %v18856_v8 = vld [vmem:[%s24630_s2 + $0xfe0] ss:$8 sps:$4 sm:$0xff]  }
 0x383   : > { %7602 = vmatpush1.bf16.msra.mxu1 %v18803_v22  ;;  %v6970_v22 = vsel %vm6755_vm5, %v6968_v16, %v6969_v50  ;;  %v7012_v16 = vrot.slane %v20592_v24, 6  ;;  %v7016_v50 = vrot.slane %v6911_v31, 6 }
 0x384   : > { %7603 = vmatprep.subr.bf16.mxu1 %v18808_v35  ;;  %v6987_v35 = vsel %vm6755_vm5, %v6982_v42, %v6986_v33  ;;  %v7064_v12 = vpack.c.bf16 %v6975_v53, %v6970_v22  ;;  %8991 = vmatpush1.bf16.msra.mxu0 %v18853_v59  ;;  %v7000_v42 = vsel %vm6755_vm5, %v6998_v7, %v6999_v29  ;;  %v6908_v22 = vld [vmem:[#allocation3 + $0x120] sm:$0xc0]  ;;  %v6910_v53 = vld [vmem:[#allocation3 + $0x140] sm:$0x3f] }
 0x385   : > { %v7067_v17 = vpack.c.bf16 %v6987_v35, %v6983_v0  ;;  %8992 = vmatprep.subr.bf16.mxu0 %v18854_v47  ;;  %v7017_v24 = vsel %vm6755_vm5, %v7012_v16, %v7016_v50  ;;  %v6913_v0 = vld [vmem:[#allocation3 + $0x158] sm:$0xc0]  ;;  %v6915_v35 = vld [vmem:[#allocation3 + $0x178] sm:$0x3f]  ;;  %v7014_v37 = vrot.slane %v6910_v53, 6 }
 0x386   : > { %7372 = vmatmul.mubr.bf16.gmra.mrb[28].mxu1 %v6882_v15  ;;  %v6984_v15 = vrot.slane %v6898_v34, 6 }
 0x387   : > { %7604 = vmatpush1.bf16.msra.mxu1 %v18806_v11  ;;  %7607 = vmatprep.mubr.bf16.mxu1 %v7061_v38  ;;  %v6991_v11 = vrot.slane %v6901_v9, 6  ;;  %v6992_v38 = vrot.slane %v20525_v49, 6  ;;  %v6907_v49 = vld [vmem:[#allocation3 + $0x118] sm:$0x3f] }
 0x388   : > { %7605 = vmatprep.subr.bf16.mxu1 %v18811_v51  ;;  %v6985_v51 = vsel %vm6755_vm5, %v6979_v39, %v6984_v15  ;;  %8993 = vmatpush1.bf16.msra.mxu0 %v18856_v8  ;;  %v18859_v9 = vld [vmem:[%s24630_s2 + $0xff0] ss:$8 sps:$4 sm:$0xff]   ;;  %v7021_v39 = vrot.slane %v6913_v0, 6  ;;  %v7022_v15 = vrot.slane %v20617_v20, 6 }
 0x389   : > { %v6993_v2 = vsel %vm6755_vm5, %v6991_v11, %v6992_v38  ;;  %v6997_v25 = vsel %vm6755_vm5, %v6992_v38, %v6996_v4  ;;  %v7066_v30 = vpack.c.bf16 %v6985_v51, %v6980_v19  ;;  %8994 = vmatprep.subr.bf16.mxu0 %v18857_v45  ;;  %v7026_v11 = vrot.slane %v6915_v35, 6  ;;  %v18862_v38 = vld [vmem:[%s24630_s2 + $0x1604] ss:$8 sps:$4 sm:$0xff]   ;;  %v6912_v51 = vld [vmem:[#allocation3 + $0x150] sm:$0xc0] }
 0x38a   : > { %v7069_v54 = vpack.c.bf16 %v6997_v25, %v6993_v2  ;;  %v6914_v2 = vld [vmem:[#allocation3 + $0x170] sm:$0x3f]  ;;  %v7018_v55 = vrot.slane %v6912_v51, 6 }
 0x38b   : > { %7606 = vmatpush1.bf16.msra.mxu1 %v18809_v36  ;;  %v6905_v36 = vld [vmem:[#allocation3 + $0xf8] sm:$0xc0]  ;;  %v7027_v19 = vsel %vm6755_vm5, %v7022_v15, %v7026_v11 }
 0x38c   : > { %v7001_v1 = vrot.slane %v6905_v36, 6  ;;  %8995 = vmatpush1.bf16.msra.mxu0 %v18859_v9  ;;  %v7024_v36 = vrot.slane %v6914_v2, 6 }
 0x38d   : > { %9270 = vmatprep.subr.bf16.mxu0 %v18862_v38 }
 0x38e   : > { %7608 = vmatmul.mubr.bf16.vlgmr.msra.gmra.mrb[32].mxu1 %v7060_v40  ;;  %v7002_v40 = vrot.slane %v20557_v32, 6  ;;  %v7025_v48 = vsel %vm6755_vm5, %v7019_v18, %v7024_v36 }
 0x38f   : > { %7617 = vmatprep.mubr.bf16.mxu1 %v7063_v27  ;;  %v7006_v27 = vrot.slane %v6907_v49, 6  ;;  %v7020_v49 = vsel %vm6755_vm5, %v7018_v55, %v7019_v18  ;;  %v18860_v55 = vld [vmem:[%s24630_s2 + $0x1600] ss:$8 sps:$4 sm:$0xff]  }
 0x390   : > { %v7003_v57 = vsel %vm6755_vm5, %v7001_v1, %v7002_v40 }
 0x391   : > { %v7007_v32 = vsel %vm6755_vm5, %v7002_v40, %v7006_v27 }
 0x392   : > { %v7071_v61 = vpack.c.bf16 %v7007_v32, %v7003_v57 }
 0x396   : > { %7618 = vmatmul.mubr.bf16.gmra.mrb[36].mxu1 %v7062_v44  ;;  %v7004_v44 = vrot.slane %v6906_v21, 6 }
 0x397   : > { %7627 = vmatprep.mubr.bf16.mxu1 %v7065_v13  ;;  %v7011_v13 = vrot.slane %v6909_v3, 6 }
 0x398   : > { %v7005_v10 = vsel %vm6755_vm5, %v6999_v29, %v7004_v44 }
 0x399   : > { %v7013_v33 = vsel %vm6755_vm5, %v7011_v13, %v7012_v16  ;;  %v7070_v34 = vpack.c.bf16 %v7005_v10, %v7000_v42 }
 0x39a   : > { %v7073_v62 = vpack.c.bf16 %v7017_v24, %v7013_v33 }
 0x39e   : > { %7628 = vmatmul.mubr.bf16.gmra.mrb[40].mxu1 %v7064_v12  ;;  %v7008_v12 = vrot.slane %v6908_v22, 6 }
 0x39f   : > { %7637 = vmatprep.mubr.bf16.mxu1 %v7067_v17  ;;  %v7009_v17 = vrot.slane %v20383_v6, 6  ;;  %v7023_v6 = vsel %vm6755_vm5, %v7021_v39, %v7022_v15 }
 0x3a0   : > { %v7075_v25 = vpack.c.bf16 %v7027_v19, %v7023_v6 }
 0x3a1   : > { %v7010_v4 = vsel %vm6755_vm5, %v7008_v12, %v7009_v17  ;;  %v7015_v63 = vsel %vm6755_vm5, %v7009_v17, %v7014_v37 }
 0x3a2   : > { %v7072_v20 = vpack.c.bf16 %v7015_v63, %v7010_v4 }
 0x3a6   : > { %7638 = vmatmul.mubr.bf16.gmra.mrb[44].mxu1 %v7066_v30  ;;  %v7074_v30 = vpack.c.bf16 %v7025_v48, %v7020_v49  ;;  %v18865_v48 = vld [vmem:[%s24630_s2 + $0x1614] ss:$8 sps:$4 sm:$0xff]  }
 0x3a7   : > { %7647 = vmatprep.mubr.bf16.mxu1 %v7069_v54  ;;  %v7755_v54 = vshrl.u32 %v7754_v14, 7 }
 0x3a9   : > { %v22325_v26 = vsub.s32 0, %v7755_v54  ;;  %v22330_v56 = vsub.s32 1, %v7755_v54 }
 0x3ab   : > { %v22333_v43 = vrot.slane %v7752_v23, %v22325_v26  ;;  %v22336_v1 = vrot.slane %v7752_v23, %v22330_v56 }
 0x3ae   : > { %7648 = vmatmul.mubr.bf16.gmra.mrb[48].mxu1 %v7068_v41 }
 0x3af   : > { %7657 = vmatprep.mubr.bf16.mxu1 %v7071_v61 }
 0x3b6   : > { %7658 = vmatmul.mubr.bf16.gmra.mrb[52].mxu1 %v7070_v34 }
 0x3b7   : > { %7667 = vmatprep.mubr.bf16.mxu1 %v7073_v62 }
 0x3be   : > { %7668 = vmatmul.mubr.bf16.gmra.mrb[56].mxu1 %v7072_v20 }
 0x3bf   : > { %7677 = vmatprep.mubr.bf16.mxu1 %v7075_v25 }
 0x3c6   : > { %7678 = vmatmul.mubr.bf16.gmra.mrb[60].mxu1 %v7074_v30 }
 0x421   : > { %v7303_v40 = vpop.f32.mrb[0].mxu1 }
 0x422   : > { %v7764_v27 = vadd.f32 %v22333_v43, %v7303_v40  ;;  %v7305_v58 = vpop.f32.mrb[1].mxu1  ;;  %v18863_v40 = vld [vmem:[%s24630_s2 + $0x1610] ss:$8 sps:$4 sm:$0xff]  }
 0x423   : > { %v7765_v60 = vadd.f32 %v22336_v1, %v7305_v58  ;;  %v7307_v28 = vpop.f32.mrb[2].mxu1 }
 0x424   : > { %v7873_v52 = vrot.slane %v7764_v27, 5  ;;  %v7766_v57 = vadd.f32 %v22333_v43, %v7307_v28  ;;  %v7309_v32 = vpop.f32.mrb[3].mxu1 }
 0x425   : > { %v7874_v5 = vrot.slane %v7765_v60, 5  ;;  %v7767_v21 = vadd.f32 %v22336_v1, %v7309_v32 }
 0x426   : > { %7969 = vst [vmem:[#allocation2] sm:$0xf8] %v7873_v52  ;;  %v7875_v3 = vrot.slane %v7766_v57, 5 }
 0x427   : > { %7970 = vst [vmem:[#allocation2 + $0x8] sm:$0xf8] %v7874_v5  ;;  %v7877_v31 = vrot.slane %v7767_v21, 5 }
 0x428   : > { %v7876_v46 = vsel %vm391_vm0, %v7873_v52, %v7875_v3  ;;  %7973 = vst [vmem:[#allocation2 + $0x20] sm:$0x7] %v7875_v3 }
 0x429   : > { %7971 = vst [vmem:[#allocation2 + $0x10] sm:$0xff] %v7876_v46  ;;  %v7878_v41 = vsel %vm391_vm0, %v7874_v5, %v7877_v31  ;;  %7974 = vst [vmem:[#allocation2 + $0x28] sm:$0x7] %v7877_v31  ;;  %v7313_v59 = vpop.f32.mrb[4].mxu1  ;;  %v8436_v34 = vrot.slane %v7876_v46, 1 }
 0x42a   : > { %7972 = vst [vmem:[#allocation2 + $0x18] sm:$0xff] %v7878_v41  ;;  %v7768_v61 = vadd.f32 %v22333_v43, %v7313_v59  ;;  %v7315_v7 = vpop.f32.mrb[5].mxu1  ;;  %v8439_v17 = vrot.slane %v7878_v41, 1  ;;  %v18868_v46 = vld [vmem:[%s24630_s2 + $0x1624] ss:$8 sps:$4 sm:$0xff]  }
 0x42b   : > { %v7769_v29 = vadd.f32 %v22336_v1, %v7315_v7  ;;  %v7317_v44 = vpop.f32.mrb[6].mxu1 }
 0x42c   : > { %v7879_v13 = vrot.slane %v7768_v61, 5  ;;  %v7770_v16 = vadd.f32 %v22333_v43, %v7317_v44  ;;  %v7319_v50 = vpop.f32.mrb[7].mxu1 }
 0x42d   : > { %v7880_v47 = vrot.slane %v7769_v29, 5  ;;  %v7771_v8 = vadd.f32 %v22336_v1, %v7319_v50  ;;  %v8355_v42 = vld [vmem:[#allocation2] sm:$0xfe] }
 0x42e   : > { %7975 = vst [vmem:[#allocation2 + $0x30] sm:$0xf8] %v7879_v13  ;;  %v7881_v10 = vrot.slane %v7770_v16, 5  ;;  %v8356_v33 = vld [vmem:[#allocation2 + $0x8] sm:$0xfe]  ;;  %v8435_v45 = vrot.slane %v8355_v42, 1 }
 0x42f   : > { %7976 = vst [vmem:[#allocation2 + $0x38] sm:$0xf8] %v7880_v47  ;;  %v7883_v24 = vrot.slane %v7771_v8, 5  ;;  %v8438_v22 = vrot.slane %v8356_v33, 1  ;;  %v8357_v53 = vld [vmem:[#allocation2 + $0x20] sm:$0x1] }
 0x430   : > { %v22349_v0 = vsel %vm391_vm0, %v7879_v13, %v7881_v10  ;;  %7979 = vst [vmem:[#allocation2 + $0x50] sm:$0x7] %v7881_v10  ;;  %v8358_v35 = vld [vmem:[#allocation2 + $0x28] sm:$0x1]  ;;  %v8441_v9 = vrot.slane %v8357_v53, 1  ;;  %v8437_v25 = vsel %vm953_vm1, %v8435_v45, %v8436_v34 }
 0x431   : > { %7977 = vst [vmem:[#allocation2 + $0x40] sm:$0xff] %v22349_v0  ;;  %v7884_v62 = vsel %vm391_vm0, %v7880_v47, %v7883_v24  ;;  %7980 = vst [vmem:[#allocation2 + $0x58] sm:$0x7] %v7883_v24  ;;  %v7323_v12 = vpop.f32.mrb[8].mxu1  ;;  %v8443_v37 = vrot.slane %v8358_v35, 1  ;;  %v8440_v63 = vsel %vm953_vm1, %v8438_v22, %v8439_v17  ;;  %v8446_v57 = vrot.slane %v22349_v0, 1 }
 0x432   : > { %7978 = vst [vmem:[#allocation2 + $0x48] sm:$0xff] %v7884_v62  ;;  %v7772_v39 = vadd.f32 %v22333_v43, %v7323_v12  ;;  %v7325_v15 = vpop.f32.mrb[9].mxu1  ;;  %v8442_v11 = vsel %vm953_vm1, %v8436_v34, %v8441_v9  ;;  %v8449_v3 = vrot.slane %v7884_v62, 1  ;;  %v18866_v10 = vld [vmem:[%s24630_s2 + $0x1620] ss:$8 sps:$4 sm:$0xff]  }
 0x433   : > { %v7773_v38 = vadd.f32 %v22336_v1, %v7325_v15  ;;  %v7327_v4 = vpop.f32.mrb[10].mxu1  ;;  %v8444_v6 = vsel %vm953_vm1, %v8439_v17, %v8443_v37  ;;  %v8547_v49 = vpack.c.bf16 %v8442_v11, %v8437_v25  ;;  %v18871_v53 = vld [vmem:[%s24630_s2 + $0x1634] ss:$8 sps:$4 sm:$0xff]   ;;  %v18869_v9 = vld [vmem:[%s24630_s2 + $0x1630] ss:$8 sps:$4 sm:$0xff]  }
 0x434   : > { %v7885_v19 = vrot.slane %v7772_v39, 5  ;;  %v7774_v51 = vadd.f32 %v22333_v43, %v7327_v4  ;;  %v7329_v2 = vpop.f32.mrb[11].mxu1  ;;  %v8548_v20 = vpack.c.bf16 %v8444_v6, %v8440_v63 }
 0x435   : > { %v7886_v18 = vrot.slane %v7773_v38, 5  ;;  %v7775_v36 = vadd.f32 %v22336_v1, %v7329_v2  ;;  %v8359_v30 = vld [vmem:[#allocation2 + $0x30] sm:$0xfe] }
 0x436   : > { %7981 = vst [vmem:[#allocation2 + $0x60] sm:$0xf8] %v7885_v19  ;;  %v7887_v14 = vrot.slane %v7774_v51, 5  ;;  %8996 = vmatprep.mubr.bf16.mxu0 %v8548_v20  ;;  %v8360_v54 = vld [vmem:[#allocation2 + $0x38] sm:$0xfe]  ;;  %v8445_v52 = vrot.slane %v8359_v30, 1 }
 0x437   : > { %7982 = vst [vmem:[#allocation2 + $0x68] sm:$0xf8] %v7886_v18  ;;  %v7889_v23 = vrot.slane %v7775_v36, 5  ;;  %8997 = vmatmul.mubr.bf16.vlgmr.msra.gmra.mrb[0].mxu0 %v8547_v49  ;;  %v8448_v27 = vrot.slane %v8360_v54, 1  ;;  %v8361_v58 = vld [vmem:[#allocation2 + $0x50] sm:$0x1] }
 0x438   : > { %v22371_v60 = vsel %vm391_vm0, %v7885_v19, %v7887_v14  ;;  %7985 = vst [vmem:[#allocation2 + $0x80] sm:$0x7] %v7887_v14  ;;  %9271 = vmatpush1.bf16.msra.mxu0 %v18860_v55  ;;  %v8362_v28 = vld [vmem:[#allocation2 + $0x58] sm:$0x1]  ;;  %v8451_v32 = vrot.slane %v8361_v58, 1  ;;  %v8447_v42 = vsel %vm953_vm1, %v8445_v52, %v8446_v57 }
 0x439   : > { %7983 = vst [vmem:[#allocation2 + $0x70] sm:$0xff] %v22371_v60  ;;  %v7890_v5 = vsel %vm391_vm0, %v7886_v18, %v7889_v23  ;;  %7986 = vst [vmem:[#allocation2 + $0x88] sm:$0x7] %v7889_v23  ;;  %v7333_v21 = vpop.f32.mrb[12].mxu1  ;;  %9272 = vmatprep.subr.bf16.mxu0 %v18865_v48  ;;  %v8453_v31 = vrot.slane %v8362_v28, 1  ;;  %v8450_v44 = vsel %vm953_vm1, %v8448_v27, %v8449_v3  ;;  %v8456_v15 = vrot.slane %v22371_v60, 1 }
 0x43a   : > { %7984 = vst [vmem:[#allocation2 + $0x78] sm:$0xff] %v7890_v5  ;;  %v7776_v41 = vadd.f32 %v22333_v43, %v7333_v21  ;;  %v7335_v59 = vpop.f32.mrb[13].mxu1  ;;  %v8452_v61 = vsel %vm953_vm1, %v8446_v57, %v8451_v32  ;;  %v8459_v63 = vrot.slane %v7890_v5, 1  ;;  %v18874_v19 = vld [vmem:[%s24630_s2 + $0x1644] ss:$8 sps:$4 sm:$0xff]  }
 0x43b   : > { %v7777_v7 = vadd.f32 %v22336_v1, %v7335_v59  ;;  %v7337_v29 = vpop.f32.mrb[14].mxu1  ;;  %v8454_v13 = vsel %vm953_vm1, %v8449_v3, %v8453_v31  ;;  %v8549_v22 = vpack.c.bf16 %v8452_v61, %v8447_v42  ;;  %v18872_v23 = vld [vmem:[%s24630_s2 + $0x1640] ss:$8 sps:$4 sm:$0xff]   ;;  %v18877_v60 = vld [vmem:[%s24630_s2 + $0x1654] ss:$8 sps:$4 sm:$0xff]  }
 0x43c   : > { %v7891_v16 = vrot.slane %v7776_v41, 5  ;;  %v7778_v50 = vadd.f32 %v22333_v43, %v7337_v29  ;;  %v7339_v47 = vpop.f32.mrb[15].mxu1  ;;  %9273 = vmatpush1.bf16.msra.mxu0 %v18863_v40  ;;  %v8550_v8 = vpack.c.bf16 %v8454_v13, %v8450_v44  ;;  %v18875_v5 = vld [vmem:[%s24630_s2 + $0x1650] ss:$8 sps:$4 sm:$0xff]  }
 0x43d   : > { %v7892_v33 = vrot.slane %v7777_v7, 5  ;;  %v7779_v24 = vadd.f32 %v22336_v1, %v7339_v47  ;;  %9274 = vmatprep.subr.bf16.mxu0 %v18868_v46  ;;  %v8363_v0 = vld [vmem:[#allocation2 + $0x60] sm:$0xfe] }
 0x43e   : > { %7987 = vst [vmem:[#allocation2 + $0x90] sm:$0xf8] %v7891_v16  ;;  %v7893_v35 = vrot.slane %v7778_v50, 5  ;;  %9006 = vmatprep.mubr.bf16.mxu0 %v8550_v8  ;;  %v8364_v45 = vld [vmem:[#allocation2 + $0x68] sm:$0xfe]  ;;  %v8455_v39 = vrot.slane %v8363_v0, 1 }
 0x43f   : > { %7988 = vst [vmem:[#allocation2 + $0x98] sm:$0xf8] %v7892_v33  ;;  %v7895_v34 = vrot.slane %v7779_v24, 5  ;;  %9007 = vmatmul.mubr.bf16.gmra.mrb[4].mxu0 %v8549_v22  ;;  %v8458_v62 = vrot.slane %v8364_v45, 1  ;;  %v8365_v12 = vld [vmem:[#allocation2 + $0x80] sm:$0x1] }
 0x440   : > { %v22397_v17 = vsel %vm391_vm0, %v7891_v16, %v7893_v35  ;;  %7991 = vst [vmem:[#allocation2 + $0xb0] sm:$0x7] %v7893_v35  ;;  %9275 = vmatpush1.bf16.msra.mxu0 %v18866_v10  ;;  %v8366_v37 = vld [vmem:[#allocation2 + $0x88] sm:$0x1]  ;;  %v8461_v11 = vrot.slane %v8365_v12, 1  ;;  %v8457_v54 = vsel %vm953_vm1, %v8455_v39, %v8456_v15 }
 0x441   : > { %7989 = vst [vmem:[#allocation2 + $0xa0] sm:$0xff] %v22397_v17  ;;  %v7896_v38 = vsel %vm391_vm0, %v7892_v33, %v7895_v34  ;;  %7992 = vst [vmem:[#allocation2 + $0xb8] sm:$0x7] %v7895_v34  ;;  %v7343_v4 = vpop.f32.mrb[16].mxu1  ;;  %9276 = vmatprep.subr.bf16.mxu0 %v18871_v53  ;;  %v8463_v6 = vrot.slane %v8366_v37, 1  ;;  %v8460_v18 = vsel %vm953_vm1, %v8458_v62, %v8459_v63  ;;  %v8466_v59 = vrot.slane %v22397_v17, 1 }
 0x442   : > { %7990 = vst [vmem:[#allocation2 + $0xa8] sm:$0xff] %v7896_v38  ;;  %v7780_v51 = vadd.f32 %v22333_v43, %v7343_v4  ;;  %v7345_v2 = vpop.f32.mrb[17].mxu1  ;;  %v8462_v20 = vsel %vm953_vm1, %v8456_v15, %v8461_v11  ;;  %v8469_v44 = vrot.slane %v7896_v38, 1  ;;  %v18880_v16 = vld [vmem:[%s24630_s2 + $0x1664] ss:$8 sps:$4 sm:$0xff]  }
 0x443   : > { %v7781_v25 = vadd.f32 %v22336_v1, %v7345_v2  ;;  %v7347_v55 = vpop.f32.mrb[18].mxu1  ;;  %v8464_v36 = vsel %vm953_vm1, %v8459_v63, %v8463_v6  ;;  %v8551_v58 = vpack.c.bf16 %v8462_v20, %v8457_v54  ;;  %v18878_v34 = vld [vmem:[%s24630_s2 + $0x1660] ss:$8 sps:$4 sm:$0xff]   ;;  %v18883_v17 = vld [vmem:[%s24630_s2 + $0x1674] ss:$8 sps:$4 sm:$0xff]  }
 0x444   : > { %v7897_v49 = vrot.slane %v7780_v51, 5  ;;  %v7782_v48 = vadd.f32 %v22333_v43, %v7347_v55  ;;  %v7349_v30 = vpop.f32.mrb[19].mxu1  ;;  %9277 = vmatpush1.bf16.msra.mxu0 %v18869_v9  ;;  %v8552_v14 = vpack.c.bf16 %v8464_v36, %v8460_v18  ;;  %v18881_v38 = vld [vmem:[%s24630_s2 + $0x1670] ss:$8 sps:$4 sm:$0xff]  }
 0x445   : > { %v7898_v40 = vrot.slane %v7781_v25, 5  ;;  %v7783_v27 = vadd.f32 %v22336_v1, %v7349_v30  ;;  %9278 = vmatprep.subr.bf16.mxu0 %v18874_v19  ;;  %v8367_v28 = vld [vmem:[#allocation2 + $0x90] sm:$0xfe] }
 0x446   : > { %7993 = vst [vmem:[#allocation2 + $0xc0] sm:$0xf8] %v7897_v49  ;;  %v7899_v52 = vrot.slane %v7782_v48, 5  ;;  %9016 = vmatprep.mubr.bf16.mxu0 %v8552_v14  ;;  %v8368_v57 = vld [vmem:[#allocation2 + $0x98] sm:$0xfe]  ;;  %v8465_v41 = vrot.slane %v8367_v28, 1 }
 0x447   : > { %7994 = vst [vmem:[#allocation2 + $0xc8] sm:$0xf8] %v7898_v40  ;;  %v7901_v32 = vrot.slane %v7783_v27, 5  ;;  %9017 = vmatmul.mubr.bf16.gmra.mrb[8].mxu0 %v8551_v58  ;;  %v8468_v21 = vrot.slane %v8368_v57, 1  ;;  %v8369_v3 = vld [vmem:[#allocation2 + $0xb0] sm:$0x1] }
 0x448   : > { %v22423_v31 = vsel %vm391_vm0, %v7897_v49, %v7899_v52  ;;  %7997 = vst [vmem:[#allocation2 + $0xe0] sm:$0x7] %v7899_v52  ;;  %9279 = vmatpush1.bf16.msra.mxu0 %v18872_v23  ;;  %v8370_v46 = vld [vmem:[#allocation2 + $0xb8] sm:$0x1]  ;;  %v8471_v61 = vrot.slane %v8369_v3, 1  ;;  %v8467_v45 = vsel %vm953_vm1, %v8465_v41, %v8466_v59 }
 0x449   : > { %7995 = vst [vmem:[#allocation2 + $0xd0] sm:$0xff] %v22423_v31  ;;  %v7902_v7 = vsel %vm391_vm0, %v7898_v40, %v7901_v32  ;;  %7998 = vst [vmem:[#allocation2 + $0xe8] sm:$0x7] %v7901_v32  ;;  %v7353_v29 = vpop.f32.mrb[20].mxu1  ;;  %9280 = vmatprep.subr.bf16.mxu0 %v18877_v60  ;;  %v8473_v13 = vrot.slane %v8370_v46, 1  ;;  %v8470_v33 = vsel %vm953_vm1, %v8468_v21, %v8469_v44  ;;  %v8476_v2 = vrot.slane %v22423_v31, 1 }
 0x44a   : > { %7996 = vst [vmem:[#allocation2 + $0xd8] sm:$0xff] %v7902_v7  ;;  %v7784_v50 = vadd.f32 %v22333_v43, %v7353_v29  ;;  %v7355_v47 = vpop.f32.mrb[21].mxu1  ;;  %v8472_v8 = vsel %vm953_vm1, %v8466_v59, %v8471_v61  ;;  %v8479_v18 = vrot.slane %v7902_v7, 1  ;;  %v18886_v49 = vld [vmem:[%s24630_s2 + $0x1684] ss:$8 sps:$4 sm:$0xff]  }
 0x44b   : > { %v7785_v42 = vadd.f32 %v22336_v1, %v7355_v47  ;;  %v7357_v10 = vpop.f32.mrb[22].mxu1  ;;  %v8474_v24 = vsel %vm953_vm1, %v8469_v44, %v8473_v13  ;;  %v8553_v12 = vpack.c.bf16 %v8472_v8, %v8467_v45  ;;  %v18884_v32 = vld [vmem:[%s24630_s2 + $0x1680] ss:$8 sps:$4 sm:$0xff]   ;;  %v18889_v31 = vld [vmem:[%s24630_s2 + $0x1694] ss:$8 sps:$4 sm:$0xff]  }
 0x44c   : > { %v7903_v22 = vrot.slane %v7784_v50, 5  ;;  %v7786_v53 = vadd.f32 %v22333_v43, %v7357_v10  ;;  %v7359_v0 = vpop.f32.mrb[23].mxu1  ;;  %9281 = vmatpush1.bf16.msra.mxu0 %v18875_v5  ;;  %v8554_v35 = vpack.c.bf16 %v8474_v24, %v8470_v33  ;;  %v18887_v7 = vld [vmem:[%s24630_s2 + $0x1690] ss:$8 sps:$4 sm:$0xff]  }
 0x44d   : > { %v7904_v9 = vrot.slane %v7785_v42, 5  ;;  %v7787_v62 = vadd.f32 %v22336_v1, %v7359_v0  ;;  %9282 = vmatprep.subr.bf16.mxu0 %v18880_v16  ;;  %v8371_v37 = vld [vmem:[#allocation2 + $0xc0] sm:$0xfe] }
 0x44e   : > { %7999 = vst [vmem:[#allocation2 + $0xf0] sm:$0xf8] %v7903_v22  ;;  %v7905_v39 = vrot.slane %v7786_v53, 5  ;;  %9026 = vmatprep.mubr.bf16.mxu0 %v8554_v35  ;;  %v8372_v15 = vld [vmem:[#allocation2 + $0xc8] sm:$0xfe]  ;;  %v8475_v51 = vrot.slane %v8371_v37, 1 }
 0x44f   : > { %8000 = vst [vmem:[#allocation2 + $0xf8] sm:$0xf8] %v7904_v9  ;;  %v7907_v11 = vrot.slane %v7787_v62, 5  ;;  %9027 = vmatmul.mubr.bf16.gmra.mrb[12].mxu0 %v8553_v12  ;;  %v8478_v4 = vrot.slane %v8372_v15, 1  ;;  %v8373_v63 = vld [vmem:[#allocation2 + $0xe0] sm:$0x1] }
 0x450   : > { %v22449_v6 = vsel %vm391_vm0, %v7903_v22, %v7905_v39  ;;  %8003 = vst [vmem:[#allocation2 + $0x110] sm:$0x7] %v7905_v39  ;;  %9283 = vmatpush1.bf16.msra.mxu0 %v18878_v34  ;;  %v8374_v19 = vld [vmem:[#allocation2 + $0xe8] sm:$0x1]  ;;  %v8481_v20 = vrot.slane %v8373_v63, 1  ;;  %v8477_v57 = vsel %vm953_vm1, %v8475_v51, %v8476_v2 }
 0x451   : > { %8001 = vst [vmem:[#allocation2 + $0x100] sm:$0xff] %v22449_v6  ;;  %v7908_v25 = vsel %vm391_vm0, %v7904_v9, %v7907_v11  ;;  %8004 = vst [vmem:[#allocation2 + $0x118] sm:$0x7] %v7907_v11  ;;  %v7363_v55 = vpop.f32.mrb[24].mxu1  ;;  %9284 = vmatprep.subr.bf16.mxu0 %v18883_v17  ;;  %v8483_v36 = vrot.slane %v8374_v19, 1  ;;  %v8480_v40 = vsel %vm953_vm1, %v8478_v4, %v8479_v18  ;;  %v8486_v47 = vrot.slane %v22449_v6, 1 }
 0x452   : > { %8002 = vst [vmem:[#allocation2 + $0x108] sm:$0xff] %v7908_v25  ;;  %v7788_v48 = vadd.f32 %v22333_v43, %v7363_v55  ;;  %v7365_v30 = vpop.f32.mrb[25].mxu1  ;;  %v8482_v14 = vsel %vm953_vm1, %v8476_v2, %v8481_v20  ;;  %v8489_v33 = vrot.slane %v7908_v25, 1  ;;  %v18892_v22 = vld [vmem:[%s24630_s2 + $0x16a4] ss:$8 sps:$4 sm:$0xff]  }
 0x453   : > { %v7789_v54 = vadd.f32 %v22336_v1, %v7365_v30  ;;  %v7367_v23 = vpop.f32.mrb[26].mxu1  ;;  %v8484_v27 = vsel %vm953_vm1, %v8479_v18, %v8483_v36  ;;  %v8555_v3 = vpack.c.bf16 %v8482_v14, %v8477_v57  ;;  %v16363_v12 = vld [vmem:[%s24631_s3 + $0x2] sm:$0x3]  ;;  %v18895_v19 = vld [vmem:[%s24630_s2 + $0x16b4] ss:$8 sps:$4 sm:$0xff]  }
 0x454   : > { %v7909_v58 = vrot.slane %v7788_v48, 5  ;;  %v7790_v60 = vadd.f32 %v22333_v43, %v7367_v23  ;;  %v7369_v28 = vpop.f32.mrb[27].mxu1  ;;  %9285 = vmatpush1.bf16.msra.mxu0 %v18881_v38  ;;  %v8556_v52 = vpack.c.bf16 %v8484_v27, %v8480_v40  ;;  %v18890_v38 = vld [vmem:[%s24630_s2 + $0x16a0] ss:$8 sps:$4 sm:$0xff]   ;;  %v22504_v2 = vrot.slane %v16363_v12, %v22325_v26 }
 0x455   : > { %v7910_v5 = vrot.slane %v7789_v54, 5  ;;  %v7791_v21 = vadd.f32 %v22336_v1, %v7369_v28  ;;  %9286 = vmatprep.subr.bf16.mxu0 %v18886_v49  ;;  %v8375_v46 = vld [vmem:[#allocation2 + $0xf0] sm:$0xfe]  ;;  %v22507_v55 = vrot.slane %v16363_v12, %v22330_v56 }
 0x456   : > { %8005 = vst [vmem:[#allocation2 + $0x120] sm:$0xf8] %v7909_v58  ;;  %v7911_v41 = vrot.slane %v7790_v60, 5  ;;  %9036 = vmatprep.mubr.bf16.mxu0 %v8556_v52  ;;  %v8376_v59 = vld [vmem:[#allocation2 + $0xf8] sm:$0xfe]  ;;  %v8485_v50 = vrot.slane %v8375_v46, 1 }
 0x457   : > { %8006 = vst [vmem:[#allocation2 + $0x128] sm:$0xf8] %v7910_v5  ;;  %v7913_v61 = vrot.slane %v7791_v21, 5  ;;  %9037 = vmatmul.mubr.bf16.gmra.mrb[16].mxu0 %v8555_v3  ;;  %v8488_v29 = vrot.slane %v8376_v59, 1  ;;  %v8377_v44 = vld [vmem:[#allocation2 + $0x110] sm:$0x1] }
 0x458   : > { %v22475_v13 = vsel %vm391_vm0, %v7909_v58, %v7911_v41  ;;  %8009 = vst [vmem:[#allocation2 + $0x140] sm:$0x7] %v7911_v41  ;;  %9287 = vmatpush1.bf16.msra.mxu0 %v18884_v32  ;;  %v8378_v16 = vld [vmem:[#allocation2 + $0x118] sm:$0x1]  ;;  %v8491_v8 = vrot.slane %v8377_v44, 1  ;;  %v8487_v11 = vsel %vm953_vm1, %v8485_v50, %v8486_v47 }
 0x459   : > { %8007 = vst [vmem:[#allocation2 + $0x130] sm:$0xff] %v22475_v13  ;;  %v22480_v42 = vsel %vm391_vm0, %v7910_v5, %v7913_v61  ;;  %8010 = vst [vmem:[#allocation2 + $0x148] sm:$0x7] %v7913_v61  ;;  %v7373_v10 = vpop.f32.mrb[28].mxu1  ;;  %9288 = vmatprep.subr.bf16.mxu0 %v18889_v31  ;;  %v8493_v24 = vrot.slane %v8378_v16, 1  ;;  %v8490_v9 = vsel %vm953_vm1, %v8488_v29, %v8489_v33  ;;  %v8496_v14 = vrot.slane %v22475_v13, 1 }
 0x45a   : > { %8008 = vst [vmem:[#allocation2 + $0x138] sm:$0xff] %v22480_v42  ;;  %v7792_v53 = vadd.f32 %v22333_v43, %v7373_v10  ;;  %v7375_v0 = vpop.f32.mrb[29].mxu1  ;;  %v8492_v35 = vsel %vm953_vm1, %v8486_v47, %v8491_v8  ;;  %v8499_v27 = vrot.slane %v22480_v42, 1  ;;  %v18898_v60 = vld [vmem:[%s24630_s2 + $0x16c4] ss:$8 sps:$4 sm:$0xff]  }
 0x45b   : > { %v7793_v45 = vadd.f32 %v22336_v1, %v7375_v0  ;;  %v7377_v34 = vpop.f32.mrb[30].mxu1  ;;  %v8494_v62 = vsel %vm953_vm1, %v8489_v33, %v8493_v24  ;;  %v8557_v6 = vpack.c.bf16 %v8492_v35, %v8487_v11  ;;  %v18901_v16 = vld [vmem:[%s24630_s2 + $0x16d4] ss:$8 sps:$4 sm:$0xff]   ;;  %v18899_v10 = vld [vmem:[%s24630_s2 + $0x16d0] ss:$8 sps:$4 sm:$0xff]  }
 0x45c   : > { %v7915_v17 = vrot.slane %v7792_v53, 5  ;;  %v7794_v37 = vadd.f32 %v22333_v43, %v7377_v34  ;;  %v7379_v39 = vpop.f32.mrb[31].mxu1  ;;  %9289 = vmatpush1.bf16.msra.mxu0 %v18887_v7  ;;  %v8558_v15 = vpack.c.bf16 %v8494_v62, %v8490_v9  ;;  %v18896_v7 = vld [vmem:[%s24630_s2 + $0x16c0] ss:$8 sps:$4 sm:$0xff]  }
 0x45d   : > { %v7916_v4 = vrot.slane %v7793_v45, 5  ;;  %v7795_v63 = vadd.f32 %v22336_v1, %v7379_v39  ;;  %9290 = vmatprep.subr.bf16.mxu0 %v18892_v22  ;;  %v8379_v51 = vld [vmem:[#allocation2 + $0x120] sm:$0xfe]  ;;  %v18893_v1 = vld [vmem:[%s24630_s2 + $0x16b0] ss:$8 sps:$4 sm:$0xff]  }
 0x45e   : > { %8011 = vst [vmem:[#allocation2 + $0x150] sm:$0xf8] %v7915_v17  ;;  %v7917_v43 = vrot.slane %v7794_v37, 5  ;;  %9046 = vmatprep.mubr.bf16.mxu0 %v8558_v15  ;;  %v8380_v20 = vld [vmem:[#allocation2 + $0x128] sm:$0xfe]  ;;  %v8495_v30 = vrot.slane %v8379_v51, 1 }
 0x45f   : > { %8012 = vst [vmem:[#allocation2 + $0x158] sm:$0xf8] %v7916_v4  ;;  %v7919_v25 = vrot.slane %v7795_v63, 5  ;;  %9047 = vmatmul.mubr.bf16.gmra.mrb[20].mxu0 %v8557_v6  ;;  %v8498_v18 = vrot.slane %v8380_v20, 1  ;;  %v8381_v36 = vld [vmem:[#allocation2 + $0x140] sm:$0x1] }
 0x460   : > { %v22513_v49 = vsel %vm391_vm0, %v7915_v17, %v7917_v43  ;;  %8015 = vst [vmem:[#allocation2 + $0x170] sm:$0x7] %v7917_v43  ;;  %9291 = vmatpush1.bf16.msra.mxu0 %v18890_v38  ;;  %v8382_v48 = vld [vmem:[#allocation2 + $0x148] sm:$0x1]  ;;  %v8501_v54 = vrot.slane %v8381_v36, 1  ;;  %v8497_v61 = vsel %vm953_vm1, %v8495_v30, %v8496_v14 }
 0x461   : > { %8013 = vst [vmem:[#allocation2 + $0x160] sm:$0xff] %v22513_v49  ;;  %v22518_v23 = vsel %vm391_vm0, %v7916_v4, %v7919_v25  ;;  %8016 = vst [vmem:[#allocation2 + $0x178] sm:$0x7] %v7919_v25  ;;  %v7609_v40 = vpop.f32.mrb[32].mxu1  ;;  %9292 = vmatprep.subr.bf16.mxu0 %v18895_v19  ;;  %v8503_v58 = vrot.slane %v8382_v48, 1  ;;  %v8500_v21 = vsel %vm953_vm1, %v8498_v18, %v8499_v27  ;;  %v8506_v35 = vrot.slane %v22513_v49, 1 }
 0x462   : > { %8014 = vst [vmem:[#allocation2 + $0x168] sm:$0xff] %v22518_v23  ;;  %v7809_v28 = vadd.f32 %v22504_v2, %v7609_v40  ;;  %v7611_v52 = vpop.f32.mrb[33].mxu1  ;;  %v8502_v57 = vsel %vm953_vm1, %v8496_v14, %v8501_v54  ;;  %v8509_v62 = vrot.slane %v22518_v23, 1  ;;  %v18904_v17 = vld [vmem:[%s24630_s2 + $0x16e4] ss:$8 sps:$4 sm:$0xff]  }
 0x463   : > { %v7810_v32 = vadd.f32 %v22507_v55, %v7611_v52  ;;  %v7613_v5 = vpop.f32.mrb[34].mxu1  ;;  %v8504_v3 = vsel %vm953_vm1, %v8499_v27, %v8503_v58  ;;  %v8559_v13 = vpack.c.bf16 %v8502_v57, %v8497_v61  ;;  %v18902_v25 = vld [vmem:[%s24630_s2 + $0x16e0] ss:$8 sps:$4 sm:$0xff]   ;;  %v18907_v49 = vld [vmem:[%s24630_s2 + $0x16f4] ss:$8 sps:$4 sm:$0xff]  }
 0x464   : > { %v8049_v31 = vrot.slane %v7809_v28, 5  ;;  %v7811_v46 = vadd.f32 %v22504_v2, %v7613_v5  ;;  %v7615_v41 = vpop.f32.mrb[35].mxu1  ;;  %9293 = vmatpush1.bf16.msra.mxu0 %v18893_v1  ;;  %v8560_v59 = vpack.c.bf16 %v8504_v3, %v8500_v21  ;;  %v18905_v40 = vld [vmem:[%s24630_s2 + $0x16f0] ss:$8 sps:$4 sm:$0xff]  }
 0x465   : > { %v8050_v29 = vrot.slane %v7810_v32, 5  ;;  %v7812_v44 = vadd.f32 %v22507_v55, %v7615_v41  ;;  %9294 = vmatprep.subr.bf16.mxu0 %v18898_v60  ;;  %v8383_v50 = vld [vmem:[#allocation2 + $0x150] sm:$0xfe] }
 0x466   : > { %8145 = vst [vmem:[#allocation3] sm:$0xf8] %v8049_v31  ;;  %v8051_v47 = vrot.slane %v7811_v46, 5  ;;  %9056 = vmatprep.mubr.bf16.mxu0 %v8560_v59  ;;  %v8384_v8 = vld [vmem:[#allocation2 + $0x158] sm:$0xfe]  ;;  %v8505_v0 = vrot.slane %v8383_v50, 1 }
 0x467   : > { %8146 = vst [vmem:[#allocation3 + $0x8] sm:$0xf8] %v8050_v29  ;;  %v8053_v42 = vrot.slane %v7812_v44, 5  ;;  %9057 = vmatmul.mubr.bf16.gmra.mrb[24].mxu0 %v8559_v13  ;;  %v8508_v33 = vrot.slane %v8384_v8, 1  ;;  %v8385_v24 = vld [vmem:[#allocation2 + $0x170] sm:$0x1] }
 0x468   : > { %v22543_v22 = vsel %vm391_vm0, %v8049_v31, %v8051_v47  ;;  %8149 = vst [vmem:[#allocation3 + $0x20] sm:$0x7] %v8051_v47  ;;  %9295 = vmatpush1.bf16.msra.mxu0 %v18896_v7  ;;  %v8386_v53 = vld [vmem:[#allocation2 + $0x178] sm:$0x1]  ;;  %v8511_v45 = vrot.slane %v8385_v24, 1  ;;  %v8507_v20 = vsel %vm953_vm1, %v8505_v0, %v8506_v35 }
 0x469   : > { %8147 = vst [vmem:[#allocation3 + $0x10] sm:$0xff] %v22543_v22  ;;  %v22548_v34 = vsel %vm391_vm0, %v8050_v29, %v8053_v42  ;;  %8150 = vst [vmem:[#allocation3 + $0x28] sm:$0x7] %v8053_v42  ;;  %v7619_v9 = vpop.f32.mrb[36].mxu1  ;;  %9296 = vmatprep.subr.bf16.mxu0 %v18901_v16  ;;  %v8513_v12 = vrot.slane %v8386_v53, 1  ;;  %v8510_v4 = vsel %vm953_vm1, %v8508_v33, %v8509_v62  ;;  %v8644_v57 = vrot.slane %v22543_v22, 1 }
 0x46a   : > { %8148 = vst [vmem:[#allocation3 + $0x18] sm:$0xff] %v22548_v34  ;;  %v7813_v37 = vadd.f32 %v22504_v2, %v7619_v9  ;;  %v7621_v39 = vpop.f32.mrb[37].mxu1  ;;  %v8512_v15 = vsel %vm953_vm1, %v8506_v35, %v8511_v45  ;;  %v8647_v3 = vrot.slane %v22548_v34, 1  ;;  %v18910_v46 = vld [vmem:[%s24630_s2 + $0xe04] ss:$8 sps:$4 sm:$0xff]  }
 0x46b   : > { %v7814_v11 = vadd.f32 %v22507_v55, %v7621_v39  ;;  %v7623_v38 = vpop.f32.mrb[38].mxu1  ;;  %v8514_v63 = vsel %vm953_vm1, %v8509_v62, %v8513_v12  ;;  %v8561_v36 = vpack.c.bf16 %v8512_v15, %v8507_v20  ;;  %v18913_v0 = vld [vmem:[%s24630_s2 + $0xe14] ss:$8 sps:$4 sm:$0xff]   ;;  %v18911_v12 = vld [vmem:[%s24630_s2 + $0xe10] ss:$8 sps:$4 sm:$0xff]  }
 0x46c   : > { %v8055_v6 = vrot.slane %v7813_v37, 5  ;;  %v7815_v19 = vadd.f32 %v22504_v2, %v7623_v38  ;;  %v7625_v51 = vpop.f32.mrb[39].mxu1  ;;  %9297 = vmatpush1.bf16.msra.mxu0 %v18899_v10  ;;  %v8562_v43 = vpack.c.bf16 %v8514_v63, %v8510_v4  ;;  %v18908_v10 = vld [vmem:[%s24630_s2 + $0xe00] ss:$8 sps:$4 sm:$0xff]  }
 0x46d   : > { %v8056_v1 = vrot.slane %v7814_v11, 5  ;;  %v7816_v18 = vadd.f32 %v22507_v55, %v7625_v51  ;;  %9298 = vmatprep.subr.bf16.mxu0 %v18904_v17  ;;  %v8563_v48 = vld [vmem:[#allocation3] sm:$0xfe] }
 0x46e   : > { %8151 = vst [vmem:[#allocation3 + $0x30] sm:$0xf8] %v8055_v6  ;;  %v8057_v30 = vrot.slane %v7815_v19, 5  ;;  %9066 = vmatprep.mubr.bf16.mxu0 %v8562_v43  ;;  %v8564_v14 = vld [vmem:[#allocation3 + $0x8] sm:$0xfe]  ;;  %v8643_v52 = vrot.slane %v8563_v48, 1 }
 0x46f   : > { %8152 = vst [vmem:[#allocation3 + $0x38] sm:$0xf8] %v8056_v1  ;;  %v8059_v54 = vrot.slane %v7816_v18, 5  ;;  %9067 = vmatmul.mubr.bf16.gmra.mrb[28].mxu0 %v8561_v36  ;;  %v8646_v27 = vrot.slane %v8564_v14, 1  ;;  %v8565_v58 = vld [vmem:[#allocation3 + $0x20] sm:$0x1] }
 0x470   : > { %v22573_v60 = vsel %vm391_vm0, %v8055_v6, %v8057_v30  ;;  %8155 = vst [vmem:[#allocation3 + $0x50] sm:$0x7] %v8057_v30  ;;  %9299 = vmatpush1.bf16.msra.mxu0 %v18902_v25  ;;  %v8566_v28 = vld [vmem:[#allocation3 + $0x28] sm:$0x1]  ;;  %v8649_v32 = vrot.slane %v8565_v58, 1  ;;  %v8645_v42 = vsel %vm953_vm1, %v8643_v52, %v8644_v57 }
 0x471   : > { %8153 = vst [vmem:[#allocation3 + $0x40] sm:$0xff] %v22573_v60  ;;  %v22578_v5 = vsel %vm391_vm0, %v8056_v1, %v8059_v54  ;;  %8156 = vst [vmem:[#allocation3 + $0x58] sm:$0x7] %v8059_v54  ;;  %v7629_v21 = vpop.f32.mrb[40].mxu1  ;;  %9300 = vmatprep.subr.bf16.mxu0 %v18907_v49  ;;  %v8651_v31 = vrot.slane %v8566_v28, 1  ;;  %v8648_v44 = vsel %vm953_vm1, %v8646_v27, %v8647_v3  ;;  %v8654_v38 = vrot.slane %v22573_v60, 1 }
 0x472   : > { %8154 = vst [vmem:[#allocation3 + $0x48] sm:$0xff] %v22578_v5  ;;  %v7817_v41 = vadd.f32 %v22504_v2, %v7629_v21  ;;  %v7631_v59 = vpop.f32.mrb[41].mxu1  ;;  %v8650_v61 = vsel %vm953_vm1, %v8644_v57, %v8649_v32  ;;  %v8657_v19 = vrot.slane %v22578_v5, 1  ;;  %v18916_v43 = vld [vmem:[%s24630_s2 + $0xe24] ss:$8 sps:$4 sm:$0xff]  }
 0x473   : > { %v7818_v7 = vadd.f32 %v22507_v55, %v7631_v59  ;;  %v7633_v29 = vpop.f32.mrb[42].mxu1  ;;  %v8652_v13 = vsel %vm953_vm1, %v8647_v3, %v8651_v31  ;;  %v8755_v53 = vpack.c.bf16 %v8650_v61, %v8645_v42  ;;  %v18914_v58 = vld [vmem:[%s24630_s2 + $0xe20] ss:$8 sps:$4 sm:$0xff]   ;;  %v18919_v32 = vld [vmem:[%s24630_s2 + $0xe34] ss:$8 sps:$4 sm:$0xff]  }
 0x474   : > { %v8061_v16 = vrot.slane %v7817_v41, 5  ;;  %v7819_v50 = vadd.f32 %v22504_v2, %v7633_v29  ;;  %v7635_v47 = vpop.f32.mrb[43].mxu1  ;;  %9301 = vmatpush1.bf16.msra.mxu0 %v18905_v40  ;;  %v8756_v8 = vpack.c.bf16 %v8652_v13, %v8648_v44  ;;  %v18917_v41 = vld [vmem:[%s24630_s2 + $0xe30] ss:$8 sps:$4 sm:$0xff]  }
 0x475   : > { %v8062_v33 = vrot.slane %v7818_v7, 5  ;;  %v7820_v24 = vadd.f32 %v22507_v55, %v7635_v47  ;;  %9543 = vmatprep.subr.bf16.mxu0 %v18910_v46  ;;  %v8567_v35 = vld [vmem:[#allocation3 + $0x30] sm:$0xfe] }
 0x476   : > { %8157 = vst [vmem:[#allocation3 + $0x60] sm:$0xf8] %v8061_v16  ;;  %v8063_v45 = vrot.slane %v7819_v50, 5  ;;  %9302 = vmatprep.mubr.bf16.mxu0 %v8756_v8  ;;  %v8568_v9 = vld [vmem:[#allocation3 + $0x38] sm:$0xfe]  ;;  %v8653_v11 = vrot.slane %v8567_v35, 1 }
 0x477   : > { %8158 = vst [vmem:[#allocation3 + $0x68] sm:$0xf8] %v8062_v33  ;;  %v8065_v62 = vrot.slane %v7820_v24, 5  ;;  %9303 = vmatmul.mubr.bf16.vlgmr.msra.gmra.mrb[0].mxu0 %v8755_v53  ;;  %v8656_v17 = vrot.slane %v8568_v9, 1  ;;  %v8569_v37 = vld [vmem:[#allocation3 + $0x50] sm:$0x1] }
 0x478   : > { %v22603_v39 = vsel %vm391_vm0, %v8061_v16, %v8063_v45  ;;  %8161 = vst [vmem:[#allocation3 + $0x80] sm:$0x7] %v8063_v45  ;;  %9544 = vmatpush1.bf16.msra.mxu0 %v18908_v10  ;;  %v8570_v15 = vld [vmem:[#allocation3 + $0x58] sm:$0x1]  ;;  %v8659_v4 = vrot.slane %v8569_v37, 1  ;;  %v8655_v27 = vsel %vm953_vm1, %v8653_v11, %v8654_v38 }
 0x479   : > { %8159 = vst [vmem:[#allocation3 + $0x70] sm:$0xff] %v22603_v39  ;;  %v22608_v63 = vsel %vm391_vm0, %v8062_v33, %v8065_v62  ;;  %8162 = vst [vmem:[#allocation3 + $0x88] sm:$0x7] %v8065_v62  ;;  %v7639_v6 = vpop.f32.mrb[44].mxu1  ;;  %9545 = vmatprep.subr.bf16.mxu0 %v18913_v0  ;;  %v8661_v51 = vrot.slane %v8570_v15, 1  ;;  %v8658_v49 = vsel %vm953_vm1, %v8656_v17, %v8657_v19  ;;  %v8664_v13 = vrot.slane %v22603_v39, 1 }
 0x47a   : > { %8160 = vst [vmem:[#allocation3 + $0x78] sm:$0xff] %v22608_v63  ;;  %v7821_v20 = vadd.f32 %v22504_v2, %v7639_v6  ;;  %v7641_v25 = vpop.f32.mrb[45].mxu1  ;;  %v8660_v1 = vsel %vm953_vm1, %v8654_v38, %v8659_v4  ;;  %v8667_v8 = vrot.slane %v22608_v63, 1  ;;  %v18922_v10 = vld [vmem:[%s24630_s2 + $0xe44] ss:$8 sps:$4 sm:$0xff]  }
 0x47b   : > { %v7822_v18 = vadd.f32 %v22507_v55, %v7641_v25  ;;  %v7643_v36 = vpop.f32.mrb[46].mxu1  ;;  %v8662_v48 = vsel %vm953_vm1, %v8657_v19, %v8661_v51  ;;  %v8757_v57 = vpack.c.bf16 %v8660_v1, %v8655_v27  ;;  %v18920_v11 = vld [vmem:[%s24630_s2 + $0xe40] ss:$8 sps:$4 sm:$0xff]   ;;  %v18925_v19 = vld [vmem:[%s24630_s2 + $0xe54] ss:$8 sps:$4 sm:$0xff]  }
 0x47c   : > { %v8067_v30 = vrot.slane %v7821_v20, 5  ;;  %v7823_v14 = vadd.f32 %v22504_v2, %v7643_v36  ;;  %v7645_v54 = vpop.f32.mrb[47].mxu1  ;;  %9546 = vmatpush1.bf16.msra.mxu0 %v18911_v12  ;;  %v8758_v40 = vpack.c.bf16 %v8662_v48, %v8658_v49  ;;  %v18923_v1 = vld [vmem:[%s24630_s2 + $0xe50] ss:$8 sps:$4 sm:$0xff]  }
 0x47d   : > { %v8068_v28 = vrot.slane %v7822_v18, 5  ;;  %v7824_v52 = vadd.f32 %v22507_v55, %v7645_v54  ;;  %9547 = vmatprep.subr.bf16.mxu0 %v18916_v43  ;;  %v8571_v21 = vld [vmem:[#allocation3 + $0x60] sm:$0xfe] }
 0x47e   : > { %8163 = vst [vmem:[#allocation3 + $0x90] sm:$0xf8] %v8067_v30  ;;  %v8069_v3 = vrot.slane %v7823_v14, 5  ;;  %9312 = vmatprep.mubr.bf16.mxu0 %v8758_v40  ;;  %v8572_v31 = vld [vmem:[#allocation3 + $0x68] sm:$0xfe]  ;;  %v8663_v44 = vrot.slane %v8571_v21, 1 }
 0x47f   : > { %8164 = vst [vmem:[#allocation3 + $0x98] sm:$0xf8] %v8068_v28  ;;  %v8071_v46 = vrot.slane %v7824_v52, 5  ;;  %9313 = vmatmul.mubr.bf16.gmra.mrb[4].mxu0 %v8757_v57  ;;  %v8666_v59 = vrot.slane %v8572_v31, 1  ;;  %v8573_v61 = vld [vmem:[#allocation3 + $0x80] sm:$0x1] }
 0x480   : > { %v22633_v7 = vsel %vm391_vm0, %v8067_v30, %v8069_v3  ;;  %8167 = vst [vmem:[#allocation3 + $0xb0] sm:$0x7] %v8069_v3  ;;  %9548 = vmatpush1.bf16.msra.mxu0 %v18914_v58  ;;  %v8574_v29 = vld [vmem:[#allocation3 + $0x88] sm:$0x1]  ;;  %v8669_v16 = vrot.slane %v8573_v61, 1  ;;  %v8665_v15 = vsel %vm953_vm1, %v8663_v44, %v8664_v13 }
 0x481   : > { %8165 = vst [vmem:[#allocation3 + $0xa0] sm:$0xff] %v22633_v7  ;;  %v22638_v50 = vsel %vm391_vm0, %v8068_v28, %v8071_v46  ;;  %8168 = vst [vmem:[#allocation3 + $0xb8] sm:$0x7] %v8071_v46  ;;  %v7649_v47 = vpop.f32.mrb[48].mxu1  ;;  %9549 = vmatprep.subr.bf16.mxu0 %v18919_v32  ;;  %v8671_v42 = vrot.slane %v8574_v29, 1  ;;  %v8668_v45 = vsel %vm953_vm1, %v8666_v59, %v8667_v8  ;;  %v8674_v14 = vrot.slane %v22633_v7, 1 }
 0x482   : > { %8166 = vst [vmem:[#allocation3 + $0xa8] sm:$0xff] %v22638_v50  ;;  %v7825_v33 = vadd.f32 %v22504_v2, %v7649_v47  ;;  %v7651_v24 = vpop.f32.mrb[49].mxu1  ;;  %v8670_v53 = vsel %vm953_vm1, %v8664_v13, %v8669_v16  ;;  %v8677_v58 = vrot.slane %v22638_v50, 1  ;;  %v18928_v52 = vld [vmem:[%s24630_s2 + $0xe64] ss:$8 sps:$4 sm:$0xff]  }
 0x483   : > { %v7826_v0 = vadd.f32 %v22507_v55, %v7651_v24  ;;  %v7653_v35 = vpop.f32.mrb[50].mxu1  ;;  %v8672_v9 = vsel %vm953_vm1, %v8667_v8, %v8671_v42  ;;  %v8759_v6 = vpack.c.bf16 %v8670_v53, %v8665_v15  ;;  %v18926_v16 = vld [vmem:[%s24630_s2 + $0xe60] ss:$8 sps:$4 sm:$0xff]  }
 0x484   : > { %v8073_v62 = vrot.slane %v7825_v33, 5  ;;  %v7827_v12 = vadd.f32 %v22504_v2, %v7653_v35  ;;  %v7655_v17 = vpop.f32.mrb[51].mxu1  ;;  %9550 = vmatpush1.bf16.msra.mxu0 %v18917_v41  ;;  %v8760_v37 = vpack.c.bf16 %v8672_v9, %v8668_v45  ;;  %v18929_v35 = vld [vmem:[%s24630_s2 + $0xe70] ss:$8 sps:$4 sm:$0xff]  }
 0x485   : > { %v8074_v38 = vrot.slane %v7826_v0, 5  ;;  %v7828_v4 = vadd.f32 %v22507_v55, %v7655_v17  ;;  %9551 = vmatprep.subr.bf16.mxu0 %v18922_v10  ;;  %v8575_v51 = vld [vmem:[#allocation3 + $0x90] sm:$0xfe] }
 0x486   : > { %8169 = vst [vmem:[#allocation3 + $0xc0] sm:$0xf8] %v8073_v62  ;;  %v8075_v43 = vrot.slane %v7827_v12, 5  ;;  %9322 = vmatprep.mubr.bf16.mxu0 %v8760_v37  ;;  %v8576_v20 = vld [vmem:[#allocation3 + $0x98] sm:$0xfe]  ;;  %v8673_v30 = vrot.slane %v8575_v51, 1 }
 0x487   : > { %8170 = vst [vmem:[#allocation3 + $0xc8] sm:$0xf8] %v8074_v38  ;;  %v8077_v25 = vrot.slane %v7828_v4, 5  ;;  %9323 = vmatmul.mubr.bf16.gmra.mrb[8].mxu0 %v8759_v6  ;;  %v8676_v18 = vrot.slane %v8576_v20, 1  ;;  %v8577_v36 = vld [vmem:[#allocation3 + $0xb0] sm:$0x1] }
 0x488   : > { %v22663_v49 = vsel %vm391_vm0, %v8073_v62, %v8075_v43  ;;  %8173 = vst [vmem:[#allocation3 + $0xe0] sm:$0x7] %v8075_v43  ;;  %9552 = vmatpush1.bf16.msra.mxu0 %v18920_v11  ;;  %v8578_v48 = vld [vmem:[#allocation3 + $0xb8] sm:$0x1]  ;;  %v8679_v54 = vrot.slane %v8577_v36, 1  ;;  %v8675_v13 = vsel %vm953_vm1, %v8673_v30, %v8674_v14 }
 0x489   : > { %8171 = vst [vmem:[#allocation3 + $0xd0] sm:$0xff] %v22663_v49  ;;  %v22668_v40 = vsel %vm391_vm0, %v8074_v38, %v8077_v25  ;;  %8174 = vst [vmem:[#allocation3 + $0xe8] sm:$0x7] %v8077_v25  ;;  %v7659_v27 = vpop.f32.mrb[52].mxu1  ;;  %9553 = vmatprep.subr.bf16.mxu0 %v18925_v19  ;;  %v8681_v28 = vrot.slane %v8578_v48, 1  ;;  %v8678_v46 = vsel %vm953_vm1, %v8676_v18, %v8677_v58  ;;  %v8684_v37 = vrot.slane %v22663_v49, 1 }
 0x48a   : > { %8172 = vst [vmem:[#allocation3 + $0xd8] sm:$0xff] %v22668_v40  ;;  %v7829_v57 = vadd.f32 %v22504_v2, %v7659_v27  ;;  %v7661_v32 = vpop.f32.mrb[53].mxu1  ;;  %v8680_v21 = vsel %vm953_vm1, %v8674_v14, %v8679_v54  ;;  %v18931_v10 = vld [vmem:[%s24630_s2 + $0xe74] ss:$8 sps:$4 sm:$0xff]   ;;  %v8687_v4 = vrot.slane %v22668_v40, 1 }
 0x48b   : > { %v7830_v3 = vadd.f32 %v22507_v55, %v7661_v32  ;;  %v7663_v31 = vpop.f32.mrb[54].mxu1  ;;  %v8682_v41 = vsel %vm953_vm1, %v8677_v58, %v8681_v28  ;;  %v8761_v42 = vpack.c.bf16 %v8680_v21, %v8675_v13  ;;  %v18934_v19 = vld [vmem:[%s24630_s2 + $0xe84] ss:$8 sps:$4 sm:$0xff]   ;;  %v18932_v58 = vld [vmem:[%s24630_s2 + $0xe80] ss:$8 sps:$4 sm:$0xff]  }
 0x48c   : > { %v8079_v59 = vrot.slane %v7829_v57, 5  ;;  %v7831_v61 = vadd.f32 %v22504_v2, %v7663_v31  ;;  %v7665_v29 = vpop.f32.mrb[55].mxu1  ;;  %9554 = vmatpush1.bf16.msra.mxu0 %v18923_v1  ;;  %v8762_v44 = vpack.c.bf16 %v8682_v41, %v8678_v46  ;;  %v18937_v32 = vld [vmem:[%s24630_s2 + $0xe94] ss:$8 sps:$4 sm:$0xff]   ;;  %v18935_v41 = vld [vmem:[%s24630_s2 + $0xe90] ss:$8 sps:$4 sm:$0xff]  }
 0x48d   : > { %v8080_v47 = vrot.slane %v7830_v3, 5  ;;  %v7832_v8 = vadd.f32 %v22507_v55, %v7665_v29  ;;  %9555 = vmatprep.subr.bf16.mxu0 %v18928_v52  ;;  %v8579_v33 = vld [vmem:[#allocation3 + $0xc0] sm:$0xfe] }
 0x48e   : > { %8175 = vst [vmem:[#allocation3 + $0xf0] sm:$0xf8] %v8079_v59  ;;  %v8081_v24 = vrot.slane %v7831_v61, 5  ;;  %9332 = vmatprep.mubr.bf16.mxu0 %v8762_v44  ;;  %v8580_v53 = vld [vmem:[#allocation3 + $0xc8] sm:$0xfe]  ;;  %v8683_v17 = vrot.slane %v8579_v33, 1 }
 0x48f   : > { %8176 = vst [vmem:[#allocation3 + $0xf8] sm:$0xf8] %v8080_v47  ;;  %v8083_v0 = vrot.slane %v7832_v8, 5  ;;  %9333 = vmatmul.mubr.bf16.gmra.mrb[12].mxu0 %v8761_v42  ;;  %v8686_v45 = vrot.slane %v8580_v53, 1  ;;  %v8581_v9 = vld [vmem:[#allocation3 + $0xe0] sm:$0x1] }
 0x490   : > { %v22693_v62 = vsel %vm391_vm0, %v8079_v59, %v8081_v24  ;;  %8179 = vst [vmem:[#allocation3 + $0x110] sm:$0x7] %v8081_v24  ;;  %9556 = vmatpush1.bf16.msra.mxu0 %v18926_v16  ;;  %v8582_v12 = vld [vmem:[#allocation3 + $0xe8] sm:$0x1]  ;;  %v8689_v15 = vrot.slane %v8581_v9, 1  ;;  %v8685_v27 = vsel %vm953_vm1, %v8683_v17, %v8684_v37 }
 0x491   : > { %8177 = vst [vmem:[#allocation3 + $0x100] sm:$0xff] %v22693_v62  ;;  %v22698_v11 = vsel %vm391_vm0, %v8080_v47, %v8083_v0  ;;  %8180 = vst [vmem:[#allocation3 + $0x118] sm:$0x7] %v8083_v0  ;;  %v7669_v38 = vpop.f32.mrb[56].mxu1  ;;  %9557 = vmatprep.subr.bf16.mxu0 %v18931_v10  ;;  %v8691_v6 = vrot.slane %v8582_v12, 1  ;;  %v8688_v18 = vsel %vm953_vm1, %v8686_v45, %v8687_v4  ;;  %v8694_v16 = vrot.slane %v22693_v62, 1 }
 0x492   : > { %8178 = vst [vmem:[#allocation3 + $0x108] sm:$0xff] %v22698_v11  ;;  %v7833_v51 = vadd.f32 %v22504_v2, %v7669_v38  ;;  %v7671_v43 = vpop.f32.mrb[57].mxu1  ;;  %v8690_v20 = vsel %vm953_vm1, %v8684_v37, %v8689_v15  ;;  %v8697_v10 = vrot.slane %v22698_v11, 1  ;;  %v18940_v24 = vld [vmem:[%s24630_s2 + $0xea4] ss:$8 sps:$4 sm:$0xff]  }
 0x493   : > { %v7834_v25 = vadd.f32 %v22507_v55, %v7671_v43  ;;  %v7673_v1 = vpop.f32.mrb[58].mxu1  ;;  %v8692_v36 = vsel %vm953_vm1, %v8687_v4, %v8691_v6  ;;  %v8763_v57 = vpack.c.bf16 %v8690_v20, %v8685_v27 }
 0x494   : > { %v8085_v48 = vrot.slane %v7833_v51, 5  ;;  %v7835_v30 = vadd.f32 %v22504_v2, %v7673_v1  ;;  %v7675_v14 = vpop.f32.mrb[59].mxu1  ;;  %9558 = vmatpush1.bf16.msra.mxu0 %v18929_v35  ;;  %v8764_v54 = vpack.c.bf16 %v8692_v36, %v8688_v18 }
 0x495   : > { %v8086_v28 = vrot.slane %v7834_v25, 5  ;;  %v7836_v52 = vadd.f32 %v22507_v55, %v7675_v14  ;;  %9559 = vmatprep.subr.bf16.mxu0 %v18934_v19  ;;  %v8583_v21 = vld [vmem:[#allocation3 + $0xf0] sm:$0xfe]  ;;  %v18938_v19 = vld [vmem:[%s24630_s2 + $0xea0] ss:$8 sps:$4 sm:$0xff]  }
 0x496   : > { %8181 = vst [vmem:[#allocation3 + $0x120] sm:$0xf8] %v8085_v48  ;;  %v8087_v3 = vrot.slane %v7835_v30, 5  ;;  %9342 = vmatprep.mubr.bf16.mxu0 %v8764_v54  ;;  %v8584_v31 = vld [vmem:[#allocation3 + $0xf8] sm:$0xfe]  ;;  %v8693_v13 = vrot.slane %v8583_v21, 1 }
 0x497   : > { %8182 = vst [vmem:[#allocation3 + $0x128] sm:$0xf8] %v8086_v28  ;;  %v8089_v46 = vrot.slane %v7836_v52, 5  ;;  %9343 = vmatmul.mubr.bf16.gmra.mrb[16].mxu0 %v8763_v57  ;;  %v8696_v59 = vrot.slane %v8584_v31, 1  ;;  %v8585_v61 = vld [vmem:[#allocation3 + $0x110] sm:$0x1] }
 0x498   : > { %v22723_v29 = vsel %vm391_vm0, %v8085_v48, %v8087_v3  ;;  %8185 = vst [vmem:[#allocation3 + $0x140] sm:$0x7] %v8087_v3  ;;  %9560 = vmatpush1.bf16.msra.mxu0 %v18932_v58  ;;  %v8586_v44 = vld [vmem:[#allocation3 + $0x118] sm:$0x1]  ;;  %v8699_v47 = vrot.slane %v8585_v61, 1  ;;  %v8695_v6 = vsel %vm953_vm1, %v8693_v13, %v8694_v16 }
 0x499   : > { %8183 = vst [vmem:[#allocation3 + $0x130] sm:$0xff] %v22723_v29  ;;  %v22728_v8 = vsel %vm391_vm0, %v8086_v28, %v8089_v46  ;;  %8186 = vst [vmem:[#allocation3 + $0x148] sm:$0x7] %v8089_v46  ;;  %v7679_v42 = vpop.f32.mrb[60].mxu1  ;;  %9561 = vmatprep.subr.bf16.mxu0 %v18937_v32  ;;  %v8701_v33 = vrot.slane %v8586_v44, 1  ;;  %v8698_v12 = vsel %vm953_vm1, %v8696_v59, %v8697_v10  ;;  %v8704_v58 = vrot.slane %v22723_v29, 1 }
 0x49a   : > { %8184 = vst [vmem:[#allocation3 + $0x138] sm:$0xff] %v22728_v8  ;;  %v7837_v53 = vadd.f32 %v22504_v2, %v7679_v42  ;;  %v7681_v0 = vpop.f32.mrb[61].mxu1  ;;  %v8700_v35 = vsel %vm953_vm1, %v8694_v16, %v8699_v47  ;;  %v18943_v25 = vld [vmem:[%s24630_s2 + $0xeb4] ss:$8 sps:$4 sm:$0xff]   ;;  %v18941_v48 = vld [vmem:[%s24630_s2 + $0xeb0] ss:$8 sps:$4 sm:$0xff]  }
 0x49b   : > { %v7838_v45 = vadd.f32 %v22507_v55, %v7681_v0  ;;  %v7683_v9 = vpop.f32.mrb[62].mxu1  ;;  %v8702_v17 = vsel %vm953_vm1, %v8697_v10, %v8701_v33  ;;  %v8765_v20 = vpack.c.bf16 %v8700_v35, %v8695_v6  ;;  %v8707_v57 = vrot.slane %v22728_v8, 1  ;;  %v18946_v21 = vld [vmem:[%s24630_s2 + $0xec4] ss:$8 sps:$4 sm:$0xff]   ;;  %v18944_v61 = vld [vmem:[%s24630_s2 + $0xec0] ss:$8 sps:$4 sm:$0xff]  }
 0x49c   : > { %v8091_v37 = vrot.slane %v7837_v53, 5  ;;  %v7839_v15 = vadd.f32 %v22504_v2, %v7683_v9  ;;  %v7685_v38 = vpop.f32.mrb[63].mxu1  ;;  %9562 = vmatpush1.bf16.msra.mxu0 %v18935_v41  ;;  %v8766_v4 = vpack.c.bf16 %v8702_v17, %v8698_v12  ;;  %v18949_v13 = vld [vmem:[%s24630_s2 + $0xed4] ss:$8 sps:$4 sm:$0xff]   ;;  %v18947_v42 = vld [vmem:[%s24630_s2 + $0xed0] ss:$8 sps:$4 sm:$0xff]  }
 0x49d   : > { %v8092_v51 = vrot.slane %v7838_v45, 5  ;;  %v7840_v43 = vadd.f32 %v22507_v55, %v7685_v38  ;;  %9563 = vmatprep.subr.bf16.mxu0 %v18940_v24  ;;  %v8587_v1 = vld [vmem:[#allocation3 + $0x120] sm:$0xfe]  ;;  %v8194_v38 = vld [vmem:[#allocation2 + $0x8] sm:$0xff] }
 0x49e   : > { %8187 = vst [vmem:[#allocation3 + $0x150] sm:$0xf8] %v8091_v37  ;;  %v8093_v2 = vrot.slane %v7839_v15, 5  ;;  %9352 = vmatprep.mubr.bf16.mxu0 %v8766_v4  ;;  %v8588_v18 = vld [vmem:[#allocation3 + $0x128] sm:$0xfe]  ;;  %v8703_v27 = vrot.slane %v8587_v1, 1 }
 0x49f   : > { %8188 = vst [vmem:[#allocation3 + $0x158] sm:$0xf8] %v8092_v51  ;;  %v8095_v36 = vrot.slane %v7840_v43, 5  ;;  %9353 = vmatmul.mubr.bf16.gmra.mrb[20].mxu0 %v8765_v20  ;;  %v8706_v30 = vrot.slane %v8588_v18, 1  ;;  %v8589_v55 = vld [vmem:[#allocation3 + $0x140] sm:$0x1] }
 0x4a0   : > { %v22753_v14 = vsel %vm391_vm0, %v8091_v37, %v8093_v2  ;;  %8191 = vst [vmem:[#allocation3 + $0x170] sm:$0x7] %v8093_v2  ;;  %9564 = vmatpush1.bf16.msra.mxu0 %v18938_v19  ;;  %v8590_v54 = vld [vmem:[#allocation3 + $0x148] sm:$0x1]  ;;  %v8709_v28 = vrot.slane %v8589_v55, 1  ;;  %v8705_v59 = vsel %vm953_vm1, %v8703_v27, %v8704_v58  ;;  %v22793_v20 = vld [vmem:[#allocation2 + $0x18] sm:$0xff] }
 0x4a1   : > { %8189 = vst [vmem:[#allocation3 + $0x160] sm:$0xff] %v22753_v14  ;;  %v22758_v52 = vsel %vm391_vm0, %v8092_v51, %v8095_v36  ;;  %8192 = vst [vmem:[#allocation3 + $0x178] sm:$0x7] %v8095_v36  ;;  %9565 = vmatprep.subr.bf16.mxu0 %v18943_v25  ;;  %v8711_v32 = vrot.slane %v8590_v54, 1  ;;  %v8708_v31 = vsel %vm953_vm1, %v8706_v30, %v8707_v57  ;;  %v8714_v0 = vrot.slane %v22753_v14, 1  ;;  %v8193_v18 = vld [vmem:[#allocation2] sm:$0xff] }
 0x4a2   : > { %8190 = vst [vmem:[#allocation3 + $0x168] sm:$0xff] %v22758_v52  ;;  %v8710_v3 = vsel %vm953_vm1, %v8704_v58, %v8709_v28  ;;  %v8717_v45 = vrot.slane %v22758_v52, 1  ;;  %v18952_v12 = vld [vmem:[%s24630_s2 + $0xee4] ss:$8 sps:$4 sm:$0xff]   ;;  %v18950_v19 = vld [vmem:[%s24630_s2 + $0xee0] ss:$8 sps:$4 sm:$0xff]   ;;  %v8226_v25 = vpack.c.bf16 %v22793_v20, %v8194_v38 }
 0x4a3   : > { %v8712_v46 = vsel %vm953_vm1, %v8707_v57, %v8711_v32  ;;  %v8767_v44 = vpack.c.bf16 %v8710_v3, %v8705_v59  ;;  %v18955_v43 = vld [vmem:[%s24630_s2 + $0xef4] ss:$8 sps:$4 sm:$0xff]   ;;  %v18953_v1 = vld [vmem:[%s24630_s2 + $0xef0] ss:$8 sps:$4 sm:$0xff]   ;;  %v18958_v2 = vld [vmem:[%s24630_s2 + $0x1504] ss:$8 sps:$4 sm:$0xff]  }
 0x4a4   : > { %9566 = vmatpush1.bf16.msra.mxu0 %v18941_v48  ;;  %v8768_v41 = vpack.c.bf16 %v8712_v46, %v8708_v31  ;;  %v8198_v36 = vld [vmem:[#allocation2 + $0x38] sm:$0xff]  ;;  %v18956_v48 = vld [vmem:[%s24630_s2 + $0x1500] ss:$8 sps:$4 sm:$0xff]   ;;  %v22805_v30 = vld [vmem:[#allocation2 + $0x10] sm:$0xff] }
 0x4a5   : > { %9567 = vmatprep.subr.bf16.mxu0 %v18946_v21  ;;  %v8591_v16 = vld [vmem:[#allocation3 + $0x150] sm:$0xfe]  ;;  %v8225_v55 = vpack.c.bf16 %v22805_v30, %v8193_v18  ;;  %v22811_v27 = vld [vmem:[#allocation2 + $0x48] sm:$0xff]  ;;  %v22823_v31 = vld [vmem:[#allocation2 + $0x40] sm:$0xff] }
 0x4a6   : > { %9362 = vmatprep.mubr.bf16.mxu0 %v8768_v41  ;;  %v8592_v47 = vld [vmem:[#allocation3 + $0x158] sm:$0xfe]  ;;  %v8713_v53 = vrot.slane %v8591_v16, 1  ;;  %v8228_v58 = vpack.c.bf16 %v22811_v27, %v8198_v36  ;;  %v18964_v57 = vld [vmem:[%s24630_s2 + $0x1524] ss:$8 sps:$4 sm:$0xff]   ;;  %v8197_v32 = vld [vmem:[#allocation2 + $0x30] sm:$0xff] }
 0x4a7   : > { %9363 = vmatmul.mubr.bf16.gmra.mrb[24].mxu0 %v8767_v44  ;;  %v8716_v10 = vrot.slane %v8592_v47, 1  ;;  %v8593_v33 = vld [vmem:[#allocation3 + $0x170] sm:$0x1]  ;;  %v18961_v54 = vld [vmem:[%s24630_s2 + $0x1514] ss:$8 sps:$4 sm:$0xff]   ;;  %v8202_v21 = vld [vmem:[#allocation2 + $0x68] sm:$0xff]  ;;  %v8227_v46 = vpack.c.bf16 %v22823_v31, %v8197_v32 }
 0x4a8   : > { %9568 = vmatpush1.bf16.msra.mxu0 %v18944_v61  ;;  %v8594_v24 = vld [vmem:[#allocation3 + $0x178] sm:$0x1]  ;;  %v8719_v35 = vrot.slane %v8593_v33, 1  ;;  %v8715_v6 = vsel %vm953_vm1, %v8713_v53, %v8714_v0  ;;  %v18962_v3 = vld [vmem:[%s24630_s2 + $0x1520] ss:$8 sps:$4 sm:$0xff]  }
 0x4a9   : > { %9569 = vmatprep.subr.bf16.mxu0 %v18949_v13  ;;  %v8721_v9 = vrot.slane %v8594_v24, 1  ;;  %v8718_v37 = vsel %vm953_vm1, %v8716_v10, %v8717_v45  ;;  %v18959_v28 = vld [vmem:[%s24630_s2 + $0x1510] ss:$8 sps:$4 sm:$0xff]   ;;  %v18967_v41 = vld [vmem:[%s24630_s2 + $0x1534] ss:$8 sps:$4 sm:$0xff]   ;;  %v8201_v16 = vld [vmem:[#allocation2 + $0x60] sm:$0xff] }
 0x4aa   : > { %v8720_v17 = vsel %vm953_vm1, %v8714_v0, %v8719_v35  ;;  %v22829_v59 = vld [vmem:[#allocation2 + $0x78] sm:$0xff]  ;;  %v18970_v13 = vld [vmem:[%s24630_s2 + $0x1544] ss:$8 sps:$4 sm:$0xff]   ;;  %v22841_v10 = vld [vmem:[#allocation2 + $0x70] sm:$0xff] }
 0x4ab   : > { %v8722_v15 = vsel %vm953_vm1, %v8717_v45, %v8721_v9  ;;  %v8769_v51 = vpack.c.bf16 %v8720_v17, %v8715_v6  ;;  %v8230_v61 = vpack.c.bf16 %v22829_v59, %v8202_v21  ;;  %v18965_v44 = vld [vmem:[%s24630_s2 + $0x1530] ss:$8 sps:$4 sm:$0xff]   ;;  %v8229_v33 = vpack.c.bf16 %v22841_v10, %v8201_v16  ;;  %v18973_v24 = vld [vmem:[%s24630_s2 + $0x1554] ss:$8 sps:$4 sm:$0xff]   ;;  %v22847_v53 = vld [vmem:[#allocation2 + $0xa8] sm:$0xff] }
 0x4ac   : > { %9570 = vmatpush1.bf16.msra.mxu0 %v18947_v42  ;;  %v8770_v4 = vpack.c.bf16 %v8722_v15, %v8718_v37  ;;  %v8206_v47 = vld [vmem:[#allocation2 + $0x98] sm:$0xff]  ;;  %v18968_v42 = vld [vmem:[%s24630_s2 + $0x1540] ss:$8 sps:$4 sm:$0xff]   ;;  %v18976_v45 = vld [vmem:[%s24630_s2 + $0x1564] ss:$8 sps:$4 sm:$0xff]  }
 0x4ad   : > { %9571 = vmatprep.subr.bf16.mxu0 %v18952_v12  ;;  %v8232_v0 = vpack.c.bf16 %v22847_v53, %v8206_v47  ;;  %v18971_v35 = vld [vmem:[%s24630_s2 + $0x1550] ss:$8 sps:$4 sm:$0xff]   ;;  %v8210_v12 = vld [vmem:[#allocation2 + $0xc8] sm:$0xff]  ;;  %v22859_v37 = vld [vmem:[#allocation2 + $0xa0] sm:$0xff] }
 0x4ae   : > { %9372 = vmatprep.mubr.bf16.mxu0 %v8770_v4  ;;  %v8205_v9 = vld [vmem:[#allocation2 + $0x90] sm:$0xff]  ;;  %v18974_v17 = vld [vmem:[%s24630_s2 + $0x1560] ss:$8 sps:$4 sm:$0xff]   ;;  %v22865_v4 = vld [vmem:[#allocation2 + $0xd8] sm:$0xff] }
 0x4af   : > { %9373 = vmatmul.mubr.bf16.gmra.mrb[28].mxu0 %v8769_v51  ;;  %v8231_v15 = vpack.c.bf16 %v22859_v37, %v8205_v9  ;;  %v18979_v38 = vld [vmem:[%s24630_s2 + $0x1574] ss:$8 sps:$4 sm:$0xff]   ;;  %v8234_v6 = vpack.c.bf16 %v22865_v4, %v8210_v12  ;;  %v18982_v51 = vld [vmem:[%s24630_s2 + $0x1584] ss:$8 sps:$4 sm:$0xff]   ;;  %v18986_v32 = vld [vmem:[%s24630_s2 + $0x15a0] ss:$8 sps:$4 sm:$0xff]  }
 0x4b0   : > { %9572 = vmatpush1.bf16.msra.mxu0 %v18950_v19  ;;  %9575 = vmatprep.mubr.bf16.mxu0 %v8226_v25  ;;  %v18977_v19 = vld [vmem:[%s24630_s2 + $0x1570] ss:$8 sps:$4 sm:$0xff]   ;;  %v18985_v36 = vld [vmem:[%s24630_s2 + $0x1594] ss:$8 sps:$4 sm:$0xff]   ;;  %v22895_v21 = vld [vmem:[#allocation2 + $0x100] sm:$0xff] }
 0x4b1   : > { %9573 = vmatprep.subr.bf16.mxu0 %v18955_v43  ;;  %v8209_v43 = vld [vmem:[#allocation2 + $0xc0] sm:$0xff]  ;;  %v8214_v25 = vld [vmem:[#allocation2 + $0xf8] sm:$0xff]  ;;  %v8221_v12 = vld [vmem:[#allocation2 + $0x150] sm:$0xff] }
 0x4b2   : > { %v8217_v16 = vld [vmem:[#allocation2 + $0x120] sm:$0xff]  ;;  %v8222_v47 = vld [vmem:[#allocation2 + $0x158] sm:$0xff] }
 0x4b3   : > { %v19000_v9 = vld [vmem:[%s24630_s2 + $0x15e4] ss:$8 sps:$4 sm:$0xff]  }
 0x4b4   : > { %9574 = vmatpush1.bf16.msra.mxu0 %v18953_v1  ;;  %v18980_v1 = vld [vmem:[%s24630_s2 + $0x1580] ss:$8 sps:$4 sm:$0xff]  }
 0x4b5   : > { %9816 = vmatprep.subr.bf16.mxu0 %v18958_v2  ;;  %v22877_v2 = vld [vmem:[#allocation2 + $0xd0] sm:$0xff] }
 0x4b6   : > { %v8233_v18 = vpack.c.bf16 %v22877_v2, %v8209_v43  ;;  %v19006_v43 = vld [vmem:[%s24630_s2 + $0x1004] ss:$8 sps:$4 sm:$0xff]  }
 0x4b7   : > { %9576 = vmatmul.mubr.bf16.vlgmr.msra.gmra.mrb[0].mxu0 %v8225_v55 }
 0x4b8   : > { %9585 = vmatprep.mubr.bf16.mxu0 %v8228_v58  ;;  %9817 = vmatpush1.bf16.msra.mxu0 %v18956_v48  ;;  %v22883_v48 = vld [vmem:[#allocation2 + $0x108] sm:$0xff] }
 0x4b9   : > { %9818 = vmatprep.subr.bf16.mxu0 %v18961_v54  ;;  %v8236_v55 = vpack.c.bf16 %v22883_v48, %v8214_v25  ;;  %v18983_v54 = vld [vmem:[%s24630_s2 + $0x1590] ss:$8 sps:$4 sm:$0xff]   ;;  %v18988_v58 = vld [vmem:[%s24630_s2 + $0x15a4] ss:$8 sps:$4 sm:$0xff]  }
 0x4ba   : > { %v8241_v25 = vld [vmem:[#allocation3] sm:$0xff] }
 0x4bc   : > { %9819 = vmatpush1.bf16.msra.mxu0 %v18959_v28  ;;  %v8213_v28 = vld [vmem:[#allocation2 + $0xf0] sm:$0xff] }
 0x4bd   : > { %9820 = vmatprep.subr.bf16.mxu0 %v18964_v57  ;;  %v8218_v57 = vld [vmem:[#allocation2 + $0x128] sm:$0xff] }
 0x4bf   : > { %9586 = vmatmul.mubr.bf16.gmra.mrb[4].mxu0 %v8227_v46  ;;  %v18991_v46 = vld [vmem:[%s24630_s2 + $0x15b4] ss:$8 sps:$4 sm:$0xff]  }
 0x4c0   : > { %9595 = vmatprep.mubr.bf16.mxu0 %v8230_v61  ;;  %9821 = vmatpush1.bf16.msra.mxu0 %v18962_v3  ;;  %v8235_v3 = vpack.c.bf16 %v22895_v21, %v8213_v28  ;;  %v8250_v28 = vld [vmem:[#allocation3 + $0x68] sm:$0xff] }
 0x4c1   : > { %9822 = vmatprep.subr.bf16.mxu0 %v18967_v41  ;;  %v22901_v41 = vld [vmem:[#allocation2 + $0x138] sm:$0xff] }
 0x4c2   : > { %v8238_v61 = vpack.c.bf16 %v22901_v41, %v8218_v57  ;;  %v19010_v57 = vld [vmem:[%s24630_s2 + $0x1020] ss:$8 sps:$4 sm:$0xff]  }
 0x4c4   : > { %9823 = vmatpush1.bf16.msra.mxu0 %v18965_v44  ;;  %v18989_v44 = vld [vmem:[%s24630_s2 + $0x15b0] ss:$8 sps:$4 sm:$0xff]  }
 0x4c5   : > { %9824 = vmatprep.subr.bf16.mxu0 %v18970_v13  ;;  %v18994_v13 = vld [vmem:[%s24630_s2 + $0x15c4] ss:$8 sps:$4 sm:$0xff]  }
 0x4c7   : > { %9596 = vmatmul.mubr.bf16.gmra.mrb[8].mxu0 %v8229_v33  ;;  %v22913_v33 = vld [vmem:[#allocation2 + $0x130] sm:$0xff] }
 0x4c8   : > { %9605 = vmatprep.mubr.bf16.mxu0 %v8232_v0  ;;  %9825 = vmatpush1.bf16.msra.mxu0 %v18968_v42  ;;  %v18992_v42 = vld [vmem:[%s24630_s2 + $0x15c0] ss:$8 sps:$4 sm:$0xff]   ;;  %v18997_v0 = vld [vmem:[%s24630_s2 + $0x15d4] ss:$8 sps:$4 sm:$0xff]  }
 0x4c9   : > { %9826 = vmatprep.subr.bf16.mxu0 %v18973_v24  ;;  %v8237_v24 = vpack.c.bf16 %v22913_v33, %v8217_v16  ;;  %v19021_v16 = vld [vmem:[%s24630_s2 + $0x1054] ss:$8 sps:$4 sm:$0xff]  }
 0x4cc   : > { %9827 = vmatpush1.bf16.msra.mxu0 %v18971_v35  ;;  %v8240_v35 = vpack.c.bf16 %v22518_v23, %v8222_v47  ;;  %v22929_v23 = vld [vmem:[#allocation2 + $0x160] sm:$0xff] }
 0x4cd   : > { %9828 = vmatprep.subr.bf16.mxu0 %v18976_v45  ;;  %v18995_v45 = vld [vmem:[%s24630_s2 + $0x15d0] ss:$8 sps:$4 sm:$0xff]  }
 0x4cf   : > { %9606 = vmatmul.mubr.bf16.gmra.mrb[12].mxu0 %v8231_v15  ;;  %v18998_v15 = vld [vmem:[%s24630_s2 + $0x15e0] ss:$8 sps:$4 sm:$0xff]  }
 0x4d0   : > { %9615 = vmatprep.mubr.bf16.mxu0 %v8234_v6  ;;  %9829 = vmatpush1.bf16.msra.mxu0 %v18974_v17  ;;  %v8242_v17 = vld [vmem:[#allocation3 + $0x8] sm:$0xff]  ;;  %v19003_v6 = vld [vmem:[%s24630_s2 + $0x15f4] ss:$8 sps:$4 sm:$0xff]  }
 0x4d1   : > { %9830 = vmatprep.subr.bf16.mxu0 %v18979_v38  ;;  %v8239_v38 = vpack.c.bf16 %v22929_v23, %v8221_v12  ;;  %v19025_v12 = vld [vmem:[%s24630_s2 + $0x1070] ss:$8 sps:$4 sm:$0xff]  }
 0x4d4   : > { %9831 = vmatpush1.bf16.msra.mxu0 %v18977_v19  ;;  %v8274_v19 = vpack.c.bf16 %v22548_v34, %v8242_v17  ;;  %v8273_v34 = vpack.c.bf16 %v22543_v22, %v8241_v25  ;;  %v8245_v22 = vld [vmem:[#allocation3 + $0x30] sm:$0xff]  ;;  %v19030_v17 = vld [vmem:[%s24630_s2 + $0x1084] ss:$8 sps:$4 sm:$0xff]  }
 0x4d5   : > { %9832 = vmatprep.subr.bf16.mxu0 %v18982_v51  ;;  %v19001_v51 = vld [vmem:[%s24630_s2 + $0x15f0] ss:$8 sps:$4 sm:$0xff]   ;;  %v8266_v25 = vld [vmem:[#allocation3 + $0x128] sm:$0xff] }
 0x4d7   : > { %9616 = vmatmul.mubr.bf16.gmra.mrb[16].mxu0 %v8233_v18  ;;  %v19004_v18 = vld [vmem:[%s24630_s2 + $0x1000] ss:$8 sps:$4 sm:$0xff]  }
 0x4d8   : > { %9625 = vmatprep.mubr.bf16.mxu0 %v8236_v55  ;;  %9833 = vmatpush1.bf16.msra.mxu0 %v18980_v1  ;;  %v8246_v1 = vld [vmem:[#allocation3 + $0x38] sm:$0xff] }
 0x4d9   : > { %9834 = vmatprep.subr.bf16.mxu0 %v18985_v36  ;;  %v19009_v36 = vld [vmem:[%s24630_s2 + $0x1014] ss:$8 sps:$4 sm:$0xff]   ;;  %v8276_v55 = vpack.c.bf16 %v22578_v5, %v8246_v1  ;;  %v8275_v5 = vpack.c.bf16 %v22573_v60, %v8245_v22  ;;  %v8249_v60 = vld [vmem:[#allocation3 + $0x60] sm:$0xff] }
 0x4da   : > { %v19034_v1 = vld [vmem:[%s24630_s2 + $0x10a0] ss:$8 sps:$4 sm:$0xff]  }
 0x4dc   : > { %9835 = vmatpush1.bf16.msra.mxu0 %v18983_v54  ;;  %v19007_v54 = vld [vmem:[%s24630_s2 + $0x1010] ss:$8 sps:$4 sm:$0xff]  }
 0x4dd   : > { %9836 = vmatprep.subr.bf16.mxu0 %v18988_v58  ;;  %v19012_v58 = vld [vmem:[%s24630_s2 + $0x1024] ss:$8 sps:$4 sm:$0xff]  }
 0x4df   : > { %9626 = vmatmul.mubr.bf16.gmra.mrb[20].mxu0 %v8235_v3  ;;  %v8278_v3 = vpack.c.bf16 %v22608_v63, %v8250_v28  ;;  %v8277_v63 = vpack.c.bf16 %v22603_v39, %v8249_v60  ;;  %v8253_v39 = vld [vmem:[#allocation3 + $0x90] sm:$0xff] }
 0x4e0   : > { %9635 = vmatprep.mubr.bf16.mxu0 %v8238_v61  ;;  %9837 = vmatpush1.bf16.msra.mxu0 %v18986_v32  ;;  %v19015_v32 = vld [vmem:[%s24630_s2 + $0x1034] ss:$8 sps:$4 sm:$0xff]   ;;  %v19018_v61 = vld [vmem:[%s24630_s2 + $0x1044] ss:$8 sps:$4 sm:$0xff]  }
 0x4e1   : > { %9838 = vmatprep.subr.bf16.mxu0 %v18991_v46  ;;  %v19013_v46 = vld [vmem:[%s24630_s2 + $0x1030] ss:$8 sps:$4 sm:$0xff]   ;;  %v19045_v28 = vld [vmem:[%s24630_s2 + $0x10d4] ss:$8 sps:$4 sm:$0xff]  }
 0x4e2   : > { %v8269_v60 = vld [vmem:[#allocation3 + $0x150] sm:$0xff] }
 0x4e4   : > { %9839 = vmatpush1.bf16.msra.mxu0 %v18989_v44  ;;  %v8254_v44 = vld [vmem:[#allocation3 + $0x98] sm:$0xff] }
 0x4e5   : > { %9840 = vmatprep.subr.bf16.mxu0 %v18994_v13  ;;  %v19016_v13 = vld [vmem:[%s24630_s2 + $0x1040] ss:$8 sps:$4 sm:$0xff]   ;;  %v8280_v47 = vpack.c.bf16 %v22638_v50, %v8254_v44  ;;  %v8279_v50 = vpack.c.bf16 %v22633_v7, %v8253_v39 }
 0x4e6   : > { %v8257_v7 = vld [vmem:[#allocation3 + $0xc0] sm:$0xff] }
 0x4e7   : > { %9636 = vmatmul.mubr.bf16.gmra.mrb[24].mxu0 %v8237_v24  ;;  %v19024_v24 = vld [vmem:[%s24630_s2 + $0x1064] ss:$8 sps:$4 sm:$0xff]   ;;  %v9931_v44 = vld [vmem:[#allocation2 + $0x20] sm:$0x3] }
 0x4e8   : > { %9645 = vmatprep.mubr.bf16.mxu0 %v8240_v35  ;;  %9841 = vmatpush1.bf16.msra.mxu0 %v18992_v42  ;;  %v19019_v42 = vld [vmem:[%s24630_s2 + $0x1050] ss:$8 sps:$4 sm:$0xff]   ;;  %v19022_v35 = vld [vmem:[%s24630_s2 + $0x1060] ss:$8 sps:$4 sm:$0xff]   ;;  %v9999_v39 = vrot.slane %v9931_v44, 2 }
 0x4e9   : > { %9842 = vmatprep.subr.bf16.mxu0 %v18997_v0  ;;  %v8258_v0 = vld [vmem:[#allocation3 + $0xc8] sm:$0xff] }
 0x4ec   : > { %9843 = vmatpush1.bf16.msra.mxu0 %v18995_v45  ;;  %v19027_v45 = vld [vmem:[%s24630_s2 + $0x1074] ss:$8 sps:$4 sm:$0xff]  }
 0x4ed   : > { %9844 = vmatprep.subr.bf16.mxu0 %v19000_v9  ;;  %v8282_v9 = vpack.c.bf16 %v22668_v40, %v8258_v0  ;;  %v8281_v40 = vpack.c.bf16 %v22663_v49, %v8257_v7  ;;  %v8261_v49 = vld [vmem:[#allocation3 + $0xf0] sm:$0xff]  ;;  %v9934_v0 = vld [vmem:[#allocation2 + $0x38] sm:$0xfc] }
 0x4ef   : > { %9646 = vmatmul.mubr.bf16.gmra.mrb[28].mxu0 %v8239_v38  ;;  %v19028_v38 = vld [vmem:[%s24630_s2 + $0x1080] ss:$8 sps:$4 sm:$0xff]  }
 0x4f0   : > { %9845 = vmatpush1.bf16.msra.mxu0 %v18998_v15  ;;  %9848 = vmatprep.mubr.bf16.mxu0 %v8274_v19  ;;  %v8262_v15 = vld [vmem:[#allocation3 + $0xf8] sm:$0xff] }
 0x4f1   : > { %9846 = vmatprep.subr.bf16.mxu0 %v19003_v6  ;;  %v19033_v6 = vld [vmem:[%s24630_s2 + $0x1094] ss:$8 sps:$4 sm:$0xff]   ;;  %v8284_v19 = vpack.c.bf16 %v22698_v11, %v8262_v15  ;;  %v8283_v11 = vpack.c.bf16 %v22693_v62, %v8261_v49  ;;  %v8265_v62 = vld [vmem:[#allocation3 + $0x120] sm:$0xff] }
 0x4f2   : > { %v8285_v22 = vpack.c.bf16 %v22723_v29, %v8265_v62  ;;  %v19048_v29 = vld [vmem:[%s24630_s2 + $0x10e4] ss:$8 sps:$4 sm:$0xff]  }
 0x4f4   : > { %9847 = vmatpush1.bf16.msra.mxu0 %v19001_v51  ;;  %v19031_v51 = vld [vmem:[%s24630_s2 + $0x1090] ss:$8 sps:$4 sm:$0xff]  }
 0x4f5   : > { %10506 = vmatprep.subr.bf16.mxu0 %v19006_v43  ;;  %v19036_v43 = vld [vmem:[%s24630_s2 + $0x10a4] ss:$8 sps:$4 sm:$0xff]  }
 0x4f7   : > { %9849 = vmatmul.mubr.bf16.vlgmr.msra.gmra.mrb[0].mxu0 %v8273_v34  ;;  %v8286_v34 = vpack.c.bf16 %v22728_v8, %v8266_v25  ;;  %v9932_v8 = vld [vmem:[#allocation2 + $0x28] sm:$0x3] }
 0x4f8   : > { %9858 = vmatprep.mubr.bf16.mxu0 %v8276_v55  ;;  %10507 = vmatpush1.bf16.msra.mxu0 %v19004_v18  ;;  %v19039_v18 = vld [vmem:[%s24630_s2 + $0x10b4] ss:$8 sps:$4 sm:$0xff]   ;;  %v19042_v55 = vld [vmem:[%s24630_s2 + $0x10c4] ss:$8 sps:$4 sm:$0xff]  }
 0x4f9   : > { %10508 = vmatprep.subr.bf16.mxu0 %v19009_v36  ;;  %v19037_v36 = vld [vmem:[%s24630_s2 + $0x10b0] ss:$8 sps:$4 sm:$0xff]  }
 0x4fc   : > { %10509 = vmatpush1.bf16.msra.mxu0 %v19007_v54  ;;  %v8270_v54 = vld [vmem:[#allocation3 + $0x158] sm:$0xff] }
 0x4fd   : > { %10510 = vmatprep.subr.bf16.mxu0 %v19012_v58  ;;  %v19040_v58 = vld [vmem:[%s24630_s2 + $0x10c0] ss:$8 sps:$4 sm:$0xff]  }
 0x4ff   : > { %9859 = vmatmul.mubr.bf16.gmra.mrb[4].mxu0 %v8275_v5  ;;  %v9930_v5 = vld [vmem:[#allocation2 + $0x8] sm:$0xfc] }
 0x500   : > { %9868 = vmatprep.mubr.bf16.mxu0 %v8278_v3  ;;  %10511 = vmatpush1.bf16.msra.mxu0 %v19010_v57  ;;  %v8288_v57 = vpack.c.bf16 %v22758_v52, %v8270_v54  ;;  %v19043_v3 = vld [vmem:[%s24630_s2 + $0x10d0] ss:$8 sps:$4 sm:$0xff]   ;;  %v10017_v54 = vrot.slane %v22829_v59, 2  ;;  %v19063_v59 = vld [vmem:[%s24630_s2 + $0x1734] ss:$8 sps:$4 sm:$0xff]  }
 0x501   : > { %10512 = vmatprep.subr.bf16.mxu0 %v19015_v32  ;;  %v10001_v32 = vrot.slane %v9932_v8, 2 }
 0x504   : > { %10513 = vmatpush1.bf16.msra.mxu0 %v19013_v46  ;;  %v9996_v46 = vrot.slane %v9930_v5, 2 }
 0x505   : > { %10514 = vmatprep.subr.bf16.mxu0 %v19018_v61  ;;  %v9997_v61 = vrot.slane %v22793_v20, 2  ;;  %v9929_v20 = vld [vmem:[#allocation2] sm:$0xfc] }
 0x507   : > { %9869 = vmatmul.mubr.bf16.gmra.mrb[8].mxu0 %v8277_v63  ;;  %v10002_v52 = vsel %vm2512_vm2, %v9997_v61, %v10001_v32  ;;  %v9936_v63 = vld [vmem:[#allocation2 + $0x58] sm:$0x3] }
 0x508   : > { %9878 = vmatprep.mubr.bf16.mxu0 %v8280_v47  ;;  %10515 = vmatpush1.bf16.msra.mxu0 %v19016_v13  ;;  %v19046_v13 = vld [vmem:[%s24630_s2 + $0x10e0] ss:$8 sps:$4 sm:$0xff]   ;;  %v9998_v47 = vsel %vm2512_vm2, %v9996_v46, %v9997_v61  ;;  %v9942_v61 = vld [vmem:[#allocation2 + $0x98] sm:$0xfc] }
 0x509   : > { %10516 = vmatprep.subr.bf16.mxu0 %v19021_v16  ;;  %v8287_v16 = vpack.c.bf16 %v22753_v14, %v8269_v60  ;;  %v9993_v14 = vrot.slane %v9929_v20, 2 }
 0x50c   : > { %10517 = vmatpush1.bf16.msra.mxu0 %v19019_v42  ;;  %v19051_v42 = vld [vmem:[%s24630_s2 + $0x10f4] ss:$8 sps:$4 sm:$0xff]  }
 0x50d   : > { %10518 = vmatprep.subr.bf16.mxu0 %v19024_v24  ;;  %v10106_v24 = vpack.c.bf16 %v10002_v52, %v9998_v47  ;;  %v19061_v52 = vld [vmem:[%s24630_s2 + $0x1730] ss:$8 sps:$4 sm:$0xff]   ;;  %v10027_v47 = vrot.slane %v22847_v53, 2  ;;  %v19069_v53 = vld [vmem:[%s24630_s2 + $0x1754] ss:$8 sps:$4 sm:$0xff]  }
 0x50f   : > { %9879 = vmatmul.mubr.bf16.gmra.mrb[12].mxu0 %v8279_v50  ;;  %v19049_v50 = vld [vmem:[%s24630_s2 + $0x10f0] ss:$8 sps:$4 sm:$0xff]  }
 0x510   : > { %9888 = vmatprep.mubr.bf16.mxu0 %v8282_v9  ;;  %10519 = vmatpush1.bf16.msra.mxu0 %v19022_v35  ;;  %v10011_v35 = vrot.slane %v9936_v63, 2  ;;  %v19054_v9 = vld [vmem:[%s24630_s2 + $0x1704] ss:$8 sps:$4 sm:$0xff]  }
 0x511   : > { %10520 = vmatprep.subr.bf16.mxu0 %v19027_v45  ;;  %v9994_v45 = vrot.slane %v22805_v30, 2  ;;  %v19052_v30 = vld [vmem:[%s24630_s2 + $0x1700] ss:$8 sps:$4 sm:$0xff]   ;;  %v19066_v63 = vld [vmem:[%s24630_s2 + $0x1744] ss:$8 sps:$4 sm:$0xff]  }
 0x513   : > { %v10000_v7 = vsel %vm2512_vm2, %v9994_v45, %v9999_v39 }
 0x514   : > { %10521 = vmatpush1.bf16.msra.mxu0 %v19025_v12  ;;  %v10006_v12 = vrot.slane %v9934_v0, 2  ;;  %v9948_v0 = vld [vmem:[#allocation2 + $0xe8] sm:$0x3] }
 0x515   : > { %10522 = vmatprep.subr.bf16.mxu0 %v19030_v17  ;;  %v10007_v17 = vrot.slane %v22811_v27, 2  ;;  %v19057_v27 = vld [vmem:[%s24630_s2 + $0x1714] ss:$8 sps:$4 sm:$0xff]  }
 0x517   : > { %9889 = vmatmul.mubr.bf16.gmra.mrb[16].mxu0 %v8281_v40  ;;  %v10012_v15 = vsel %vm2512_vm2, %v10007_v17, %v10011_v35  ;;  %v9995_v40 = vsel %vm2512_vm2, %v9993_v14, %v9994_v45  ;;  %v9941_v14 = vld [vmem:[#allocation2 + $0x90] sm:$0xfc] }
 0x518   : > { %9898 = vmatprep.mubr.bf16.mxu0 %v8284_v19  ;;  %10523 = vmatpush1.bf16.msra.mxu0 %v19028_v38  ;;  %v9935_v38 = vld [vmem:[#allocation2 + $0x50] sm:$0x3]  ;;  %v10105_v19 = vpack.c.bf16 %v10000_v7, %v9995_v40  ;;  %v19072_v40 = vld [vmem:[%s24630_s2 + $0x1764] ss:$8 sps:$4 sm:$0xff]  }
 0x519   : > { %10524 = vmatprep.subr.bf16.mxu0 %v19033_v6  ;;  %v9940_v6 = vld [vmem:[#allocation2 + $0x88] sm:$0x3]  ;;  %v10009_v25 = vrot.slane %v9935_v38, 2  ;;  %v19067_v7 = vld [vmem:[%s24630_s2 + $0x1750] ss:$8 sps:$4 sm:$0xff]   ;;  %v10024_v38 = vrot.slane %v22859_v37, 2 }
 0x51a   : > { %v19070_v37 = vld [vmem:[%s24630_s2 + $0x1760] ss:$8 sps:$4 sm:$0xff]  }
 0x51c   : > { %10525 = vmatpush1.bf16.msra.mxu0 %v19031_v51  ;;  %v10008_v51 = vsel %vm2512_vm2, %v10006_v12, %v10007_v17  ;;  %v9946_v12 = vld [vmem:[#allocation2 + $0xc8] sm:$0xfc]  ;;  %v10041_v17 = vrot.slane %v9948_v0, 2 }
 0x51d   : > { %10526 = vmatprep.subr.bf16.mxu0 %v19036_v43  ;;  %v9933_v43 = vld [vmem:[#allocation2 + $0x30] sm:$0xfc]  ;;  %v10108_v49 = vpack.c.bf16 %v10012_v15, %v10008_v51  ;;  %v10023_v15 = vrot.slane %v9941_v14, 2  ;;  %v9953_v14 = vld [vmem:[#allocation2 + $0x120] sm:$0xfc] }
 0x51f   : > { %9899 = vmatmul.mubr.bf16.gmra.mrb[20].mxu0 %v8283_v11  ;;  %v10021_v11 = vrot.slane %v9940_v6, 2  ;;  %v10037_v6 = vrot.slane %v22865_v4, 2  ;;  %v19075_v4 = vld [vmem:[%s24630_s2 + $0x1774] ss:$8 sps:$4 sm:$0xff]  }
 0x520   : > { %9908 = vmatprep.mubr.bf16.mxu0 %v8286_v34  ;;  %10527 = vmatpush1.bf16.msra.mxu0 %v19034_v1  ;;  %v9938_v1 = vld [vmem:[#allocation2 + $0x68] sm:$0xfc]  ;;  %v10003_v34 = vrot.slane %v9933_v43, 2  ;;  %v10025_v43 = vsel %vm2512_vm2, %v10023_v15, %v10024_v38  ;;  %v10053_v15 = vrot.slane %v9953_v14, 2 }
 0x521   : > { %10528 = vmatprep.subr.bf16.mxu0 %v19039_v18  ;;  %v19055_v18 = vld [vmem:[%s24630_s2 + $0x1710] ss:$8 sps:$4 sm:$0xff]   ;;  %v10016_v62 = vrot.slane %v9938_v1, 2  ;;  %v10022_v8 = vsel %vm2512_vm2, %v10017_v54, %v10021_v11  ;;  %v10042_v51 = vsel %vm2512_vm2, %v10037_v6, %v10041_v17  ;;  %v9945_v11 = vld [vmem:[#allocation2 + $0xc0] sm:$0xfc] }
 0x523   : > { %v10018_v32 = vsel %vm2512_vm2, %v10016_v62, %v10017_v54  ;;  %v19073_v62 = vld [vmem:[%s24630_s2 + $0x1770] ss:$8 sps:$4 sm:$0xff]   ;;  %v10033_v54 = vrot.slane %v9945_v11, 2 }
 0x524   : > { %10529 = vmatpush1.bf16.msra.mxu0 %v19037_v36  ;;  %v10004_v36 = vrot.slane %v22823_v31, 2  ;;  %v19058_v31 = vld [vmem:[%s24630_s2 + $0x1720] ss:$8 sps:$4 sm:$0xff]   ;;  %v9957_v11 = vld [vmem:[#allocation2 + $0x150] sm:$0xfc] }
 0x525   : > { %10530 = vmatprep.subr.bf16.mxu0 %v19042_v55  ;;  %v19060_v55 = vld [vmem:[%s24630_s2 + $0x1724] ss:$8 sps:$4 sm:$0xff]  }
 0x527   : > { %9909 = vmatmul.mubr.bf16.gmra.mrb[24].mxu0 %v8285_v22  ;;  %v9939_v22 = vld [vmem:[#allocation2 + $0x80] sm:$0x3] }
 0x528   : > { %9918 = vmatprep.mubr.bf16.mxu0 %v8288_v57  ;;  %10531 = vmatpush1.bf16.msra.mxu0 %v19040_v58  ;;  %v10010_v58 = vsel %vm2512_vm2, %v10004_v36, %v10009_v25  ;;  %v9944_v57 = vld [vmem:[#allocation2 + $0xb8] sm:$0x3]  ;;  %v10019_v46 = vrot.slane %v9939_v22, 2 }
 0x529   : > { %10532 = vmatprep.subr.bf16.mxu0 %v19045_v28  ;;  %v10005_v28 = vsel %vm2512_vm2, %v10003_v34, %v10004_v36  ;;  %v10031_v60 = vrot.slane %v9944_v57, 2  ;;  %v9950_v36 = vld [vmem:[#allocation2 + $0xf8] sm:$0xfc] }
 0x52a   : > { %v10107_v5 = vpack.c.bf16 %v10010_v58, %v10005_v28  ;;  %v10034_v58 = vrot.slane %v22877_v2, 2  ;;  %v10046_v22 = vrot.slane %v9950_v36, 2  ;;  %v10047_v28 = vrot.slane %v22883_v48, 2  ;;  %v19076_v2 = vld [vmem:[%s24630_s2 + $0x1780] ss:$8 sps:$4 sm:$0xff]  }
 0x52b   : > { %v10032_v20 = vsel %vm2512_vm2, %v10027_v47, %v10031_v60  ;;  %v19081_v48 = vld [vmem:[%s24630_s2 + $0x1794] ss:$8 sps:$4 sm:$0xff]   ;;  %v10122_v36 = vld [vmem:[#allocation3 + $0x8] sm:$0xfc] }
 0x52c   : > { %10533 = vmatpush1.bf16.msra.mxu0 %v19043_v3  ;;  %v9937_v3 = vld [vmem:[#allocation2 + $0x60] sm:$0xfc] }
 0x52d   : > { %10534 = vmatprep.subr.bf16.mxu0 %v19048_v29  ;;  %v10110_v29 = vpack.c.bf16 %v10022_v8, %v10018_v32  ;;  %v10013_v44 = vrot.slane %v9937_v3, 2  ;;  %v19078_v8 = vld [vmem:[%s24630_s2 + $0x1784] ss:$8 sps:$4 sm:$0xff]   ;;  %v10035_v32 = vsel %vm2512_vm2, %v10033_v54, %v10034_v58  ;;  %v10063_v54 = vrot.slane %v9957_v11, 2  ;;  %v10136_v11 = vld [vmem:[#allocation3 + $0xb8] sm:$0x3] }
 0x52f   : > { %9919 = vmatmul.mubr.bf16.gmra.mrb[28].mxu0 %v8287_v16  ;;  %v10026_v16 = vrot.slane %v9942_v61, 2 }
 0x530   : > { %10535 = vmatpush1.bf16.msra.mxu0 %v19046_v13  ;;  %10538 = vmatprep.mubr.bf16.mxu0 %v10106_v24  ;;  %v10014_v13 = vrot.slane %v22841_v10, 2  ;;  %v9943_v24 = vld [vmem:[#allocation2 + $0xb0] sm:$0x3]  ;;  %v19064_v10 = vld [vmem:[%s24630_s2 + $0x1740] ss:$8 sps:$4 sm:$0xff]  }
 0x531   : > { %10536 = vmatprep.subr.bf16.mxu0 %v19051_v42 }
 0x532   : > { %v10020_v42 = vsel %vm2512_vm2, %v10014_v13, %v10019_v46  ;;  %v10015_v39 = vsel %vm2512_vm2, %v10013_v44, %v10014_v13  ;;  %v9949_v46 = vld [vmem:[#allocation2 + $0xf0] sm:$0xfc] }
 0x533   : > { %v10109_v35 = vpack.c.bf16 %v10020_v42, %v10015_v39  ;;  %v19079_v13 = vld [vmem:[%s24630_s2 + $0x1790] ss:$8 sps:$4 sm:$0xff]  }
 0x534   : > { %10537 = vmatpush1.bf16.msra.mxu0 %v19049_v50  ;;  %v10028_v50 = vsel %vm2512_vm2, %v10026_v16, %v10027_v47  ;;  %v10044_v16 = vrot.slane %v22895_v21, 2  ;;  %v19084_v47 = vld [vmem:[%s24630_s2 + $0x17a4] ss:$8 sps:$4 sm:$0xff]   ;;  %v19082_v21 = vld [vmem:[%s24630_s2 + $0x17a0] ss:$8 sps:$4 sm:$0xff]  }
 0x535   : > { %10812 = vmatprep.subr.bf16.mxu0 %v19054_v9  ;;  %v10112_v45 = vpack.c.bf16 %v10032_v20, %v10028_v50  ;;  %v10029_v9 = vrot.slane %v9943_v24, 2  ;;  %v10057_v20 = vrot.slane %v22901_v41, 2  ;;  %v19087_v41 = vld [vmem:[%s24630_s2 + $0x17b4] ss:$8 sps:$4 sm:$0xff]  }
 0x537   : > { %10539 = vmatmul.mubr.bf16.vlgmr.msra.gmra.mrb[0].mxu0 %v10105_v19  ;;  %v10030_v19 = vsel %vm2512_vm2, %v10024_v38, %v10029_v9  ;;  %v10054_v38 = vrot.slane %v22913_v33, 2  ;;  %v19088_v33 = vld [vmem:[%s24630_s2 + $0x17c0] ss:$8 sps:$4 sm:$0xff]  }
 0x538   : > { %10548 = vmatprep.mubr.bf16.mxu0 %v10108_v49  ;;  %10813 = vmatpush1.bf16.msra.mxu0 %v19052_v30  ;;  %v10036_v30 = vrot.slane %v9946_v12, 2  ;;  %v9952_v49 = vld [vmem:[#allocation2 + $0x118] sm:$0x3]  ;;  %v10111_v25 = vpack.c.bf16 %v10030_v19, %v10025_v43  ;;  %v9958_v12 = vld [vmem:[#allocation2 + $0x158] sm:$0xfc] }
 0x539   : > { %10814 = vmatprep.subr.bf16.mxu0 %v19057_v27  ;;  %v9947_v27 = vld [vmem:[#allocation2 + $0xe0] sm:$0x3]  ;;  %v9959_v43 = vld [vmem:[#allocation2 + $0x170] sm:$0x3] }
 0x53a   : > { %v10038_v1 = vsel %vm2512_vm2, %v10036_v30, %v10037_v6  ;;  %v10039_v34 = vrot.slane %v9947_v27, 2  ;;  %v10066_v30 = vrot.slane %v9958_v12, 2  ;;  %v23165_v6 = vld [vmem:[#allocation2 + $0x168] sm:$0xff] }
 0x53b   : > { %v10067_v19 = vrot.slane %v23165_v6, 2 }
 0x53c   : > { %10815 = vmatpush1.bf16.msra.mxu0 %v19055_v18  ;;  %v10114_v18 = vpack.c.bf16 %v10042_v51, %v10038_v1 }
 0x53d   : > { %10816 = vmatprep.subr.bf16.mxu0 %v19060_v55  ;;  %v10051_v55 = vrot.slane %v9952_v49, 2  ;;  %v10124_v49 = vld [vmem:[#allocation3 + $0x28] sm:$0x3]  ;;  %v10068_v1 = vsel %vm2512_vm2, %v10066_v30, %v10067_v19  ;;  %v23223_v30 = vld [vmem:[#allocation3 + $0x40] sm:$0xff] }
 0x53f   : > { %10549 = vmatmul.mubr.bf16.gmra.mrb[4].mxu0 %v10107_v5  ;;  %v10052_v57 = vsel %vm2512_vm2, %v10047_v28, %v10051_v55  ;;  %v9951_v5 = vld [vmem:[#allocation2 + $0x110] sm:$0x3]  ;;  %v10193_v55 = vrot.slane %v10124_v49, 2 }
 0x540   : > { %10558 = vmatprep.mubr.bf16.mxu0 %v10110_v29  ;;  %10817 = vmatpush1.bf16.msra.mxu0 %v19058_v31  ;;  %v10040_v31 = vsel %vm2512_vm2, %v10034_v58, %v10039_v34  ;;  %v10048_v29 = vsel %vm2512_vm2, %v10046_v22, %v10047_v28  ;;  %v10049_v60 = vrot.slane %v9951_v5, 2  ;;  %v10069_v34 = vrot.slane %v9959_v43, 2  ;;  %v23185_v28 = vld [vmem:[#allocation3 + $0x18] sm:$0xff] }
 0x541   : > { %10818 = vmatprep.subr.bf16.mxu0 %v19063_v59  ;;  %v9956_v59 = vld [vmem:[#allocation2 + $0x148] sm:$0x3]  ;;  %v10113_v3 = vpack.c.bf16 %v10040_v31, %v10035_v32  ;;  %v10116_v61 = vpack.c.bf16 %v10052_v57, %v10048_v29  ;;  %v10064_v58 = vrot.slane %v22929_v23, 2  ;;  %v10188_v22 = vrot.slane %v10122_v36, 2  ;;  %v10123_v32 = vld [vmem:[#allocation3 + $0x20] sm:$0x3] }
 0x542   : > { %v10061_v44 = vrot.slane %v9956_v59, 2  ;;  %v10050_v24 = vsel %vm2512_vm2, %v10044_v16, %v10049_v60  ;;  %v10189_v31 = vrot.slane %v23185_v28, 2  ;;  %v19094_v23 = vld [vmem:[%s24630_s2 + $0x17e0] ss:$8 sps:$4 sm:$0xff]   ;;  %v10128_v59 = vld [vmem:[#allocation3 + $0x58] sm:$0x3] }
 0x543   : > { %v10070_v57 = vsel %vm2512_vm2, %v10064_v58, %v10069_v34  ;;  %v10191_v60 = vrot.slane %v10123_v32, 2  ;;  %v23229_v43 = vld [vmem:[#allocation3 + $0x78] sm:$0xff]  ;;  %v19114_v32 = vld [vmem:[%s24630_s2 + $0x1144] ss:$8 sps:$4 sm:$0xff]  }
 0x544   : > { %10819 = vmatpush1.bf16.msra.mxu0 %v19061_v52  ;;  %v9954_v52 = vld [vmem:[#allocation2 + $0x128] sm:$0xfc]  ;;  %v10062_v39 = vsel %vm2512_vm2, %v10057_v20, %v10061_v44  ;;  %v10194_v5 = vsel %vm2512_vm2, %v10189_v31, %v10193_v55  ;;  %v10190_v29 = vsel %vm2512_vm2, %v10188_v22, %v10189_v31  ;;  %v10203_v44 = vrot.slane %v10128_v59, 2  ;;  %v19111_v36 = vld [vmem:[%s24630_s2 + $0x1134] ss:$8 sps:$4 sm:$0xff]  }
 0x545   : > { %10820 = vmatprep.subr.bf16.mxu0 %v19066_v63  ;;  %v10043_v63 = vrot.slane %v9949_v46, 2  ;;  %v10056_v42 = vrot.slane %v9954_v52, 2  ;;  %v10121_v46 = vld [vmem:[#allocation3] sm:$0xfc]  ;;  %v10126_v52 = vld [vmem:[#allocation3 + $0x38] sm:$0xfc] }
 0x546   : > { %v10129_v55 = vld [vmem:[#allocation3 + $0x60] sm:$0xfc]  ;;  %v19109_v22 = vld [vmem:[%s24630_s2 + $0x1130] ss:$8 sps:$4 sm:$0xff]  }
 0x547   : > { %10559 = vmatmul.mubr.bf16.gmra.mrb[8].mxu0 %v10109_v35  ;;  %v10045_v0 = vsel %vm2512_vm2, %v10043_v63, %v10044_v16  ;;  %v9960_v35 = vld [vmem:[#allocation2 + $0x178] sm:$0x3]  ;;  %v10185_v63 = vrot.slane %v10121_v46, 2  ;;  %v23201_v16 = vld [vmem:[#allocation3 + $0x10] sm:$0xff]  ;;  %v10205_v31 = vrot.slane %v10129_v55, 2 }
 0x548   : > { %10568 = vmatprep.mubr.bf16.mxu0 %v10112_v45  ;;  %10821 = vmatpush1.bf16.msra.mxu0 %v19064_v10  ;;  %v9955_v10 = vld [vmem:[#allocation2 + $0x140] sm:$0x3]  ;;  %v10115_v50 = vpack.c.bf16 %v10050_v24, %v10045_v0  ;;  %v10071_v17 = vrot.slane %v9960_v35, 2  ;;  %v23207_v24 = vld [vmem:[#allocation3 + $0x48] sm:$0xff] }
 0x549   : > { %10822 = vmatprep.subr.bf16.mxu0 %v19069_v53  ;;  %v10058_v53 = vsel %vm2512_vm2, %v10056_v42, %v10057_v20  ;;  %v10059_v9 = vrot.slane %v9955_v10, 2  ;;  %v19102_v42 = vld [vmem:[%s24630_s2 + $0x1104] ss:$8 sps:$4 sm:$0xff]   ;;  %v10198_v20 = vrot.slane %v10126_v52, 2 }
 0x54a   : > { %v10118_v45 = vpack.c.bf16 %v10062_v39, %v10058_v53  ;;  %v10072_v27 = vsel %vm2512_vm2, %v10067_v19, %v10071_v17  ;;  %v10199_v39 = vrot.slane %v23207_v24, 2  ;;  %v10132_v53 = vld [vmem:[#allocation3 + $0x88] sm:$0x3]  ;;  %v10196_v19 = vrot.slane %v23223_v30, 2 }
 0x54b   : > { %v10060_v51 = vsel %vm2512_vm2, %v10054_v38, %v10059_v9  ;;  %v10125_v9 = vld [vmem:[#allocation3 + $0x30] sm:$0xfc] }
 0x54c   : > { %10823 = vmatpush1.bf16.msra.mxu0 %v19067_v7  ;;  %v19085_v7 = vld [vmem:[%s24630_s2 + $0x17b0] ss:$8 sps:$4 sm:$0xff]   ;;  %v10204_v0 = vsel %vm2512_vm2, %v10199_v39, %v10203_v44  ;;  %v10200_v14 = vsel %vm2512_vm2, %v10198_v20, %v10199_v39  ;;  %v10138_v20 = vld [vmem:[#allocation3 + $0xc8] sm:$0xfc] }
 0x54d   : > { %10824 = vmatprep.subr.bf16.mxu0 %v19072_v40  ;;  %v19090_v40 = vld [vmem:[%s24630_s2 + $0x17c4] ss:$8 sps:$4 sm:$0xff]   ;;  %v10300_v12 = vpack.c.bf16 %v10204_v0, %v10200_v14 }
 0x54f   : > { %10569 = vmatmul.mubr.bf16.gmra.mrb[12].mxu0 %v10111_v25 }
 0x550   : > { %10578 = vmatprep.mubr.bf16.mxu0 %v10114_v18  ;;  %10825 = vmatpush1.bf16.msra.mxu0 %v19070_v37  ;;  %v10055_v37 = vsel %vm2512_vm2, %v10053_v15, %v10054_v38  ;;  %v10120_v18 = vpack.c.bf16 %v10072_v27, %v10068_v1  ;;  %v10213_v15 = vrot.slane %v10132_v53, 2  ;;  %v19103_v38 = vld [vmem:[%s24630_s2 + $0x1110] ss:$8 sps:$4 sm:$0xff]   ;;  %v10228_v53 = vrot.slane %v10138_v20, 2 }
 0x551   : > { %10826 = vmatprep.subr.bf16.mxu0 %v19075_v4  ;;  %v10117_v25 = vpack.c.bf16 %v10060_v51, %v10055_v37  ;;  %v19093_v4 = vld [vmem:[%s24630_s2 + $0x17d4] ss:$8 sps:$4 sm:$0xff]   ;;  %v19108_v51 = vld [vmem:[%s24630_s2 + $0x1124] ss:$8 sps:$4 sm:$0xff]   ;;  %v10209_v37 = vrot.slane %v23229_v43, 2 }
 0x553   : > { %v10214_v49 = vsel %vm2512_vm2, %v10209_v37, %v10213_v15  ;;  %v10144_v15 = vld [vmem:[#allocation3 + $0x118] sm:$0x3] }
 0x554   : > { %10827 = vmatpush1.bf16.msra.mxu0 %v19073_v62  ;;  %v19091_v62 = vld [vmem:[%s24630_s2 + $0x17d0] ss:$8 sps:$4 sm:$0xff]  }
 0x555   : > { %10828 = vmatprep.subr.bf16.mxu0 %v19078_v8  ;;  %v19096_v8 = vld [vmem:[%s24630_s2 + $0x17e4] ss:$8 sps:$4 sm:$0xff]  }
 0x557   : > { %10579 = vmatmul.mubr.bf16.gmra.mrb[16].mxu0 %v10113_v3 }
 0x558   : > { %10588 = vmatprep.mubr.bf16.mxu0 %v10116_v61  ;;  %10829 = vmatpush1.bf16.msra.mxu0 %v19076_v2  ;;  %v10065_v2 = vsel %vm2512_vm2, %v10063_v54, %v10064_v58  ;;  %v10298_v61 = vpack.c.bf16 %v10194_v5, %v10190_v29  ;;  %v10134_v58 = vld [vmem:[#allocation3 + $0x98] sm:$0xfc] }
 0x559   : > { %10830 = vmatprep.subr.bf16.mxu0 %v19081_v48  ;;  %v10119_v3 = vpack.c.bf16 %v10070_v57, %v10065_v2  ;;  %v19099_v48 = vld [vmem:[%s24630_s2 + $0x17f4] ss:$8 sps:$4 sm:$0xff]   ;;  %v10218_v2 = vrot.slane %v10134_v58, 2  ;;  %v10143_v58 = vld [vmem:[#allocation3 + $0x110] sm:$0x3] }
 0x55a   : > { %v23245_v57 = vld [vmem:[#allocation3 + $0x70] sm:$0xff] }
 0x55b   : > { %v10206_v5 = vrot.slane %v23245_v57, 2 }
 0x55c   : > { %10831 = vmatpush1.bf16.msra.mxu0 %v19079_v13  ;;  %v19097_v13 = vld [vmem:[%s24630_s2 + $0x17f0] ss:$8 sps:$4 sm:$0xff]  }
 0x55d   : > { %10832 = vmatprep.subr.bf16.mxu0 %v19084_v47  ;;  %v10186_v47 = vrot.slane %v23201_v16, 2  ;;  %v10207_v46 = vsel %vm2512_vm2, %v10205_v31, %v10206_v5  ;;  %v10148_v31 = vld [vmem:[#allocation3 + $0x148] sm:$0x3] }
 0x55f   : > { %10589 = vmatmul.mubr.bf16.gmra.mrb[20].mxu0 %v10115_v50  ;;  %v10192_v10 = vsel %vm2512_vm2, %v10186_v47, %v10191_v60  ;;  %v10187_v35 = vsel %vm2512_vm2, %v10185_v63, %v10186_v47  ;;  %v19100_v50 = vld [vmem:[%s24630_s2 + $0x1100] ss:$8 sps:$4 sm:$0xff]   ;;  %v10133_v63 = vld [vmem:[#allocation3 + $0x90] sm:$0xfc] }
 0x560   : > { %10598 = vmatprep.mubr.bf16.mxu0 %v10118_v45  ;;  %10833 = vmatpush1.bf16.msra.mxu0 %v19082_v21  ;;  %v10127_v21 = vld [vmem:[#allocation3 + $0x50] sm:$0x3]  ;;  %v19105_v45 = vld [vmem:[%s24630_s2 + $0x1114] ss:$8 sps:$4 sm:$0xff]   ;;  %v10140_v60 = vld [vmem:[#allocation3 + $0xe8] sm:$0x3] }
 0x561   : > { %10834 = vmatprep.subr.bf16.mxu0 %v19087_v41  ;;  %v10297_v41 = vpack.c.bf16 %v10192_v10, %v10187_v35  ;;  %v10201_v17 = vrot.slane %v10127_v21, 2  ;;  %v10233_v39 = vrot.slane %v10140_v60, 2  ;;  %v19115_v10 = vld [vmem:[%s24630_s2 + $0x1150] ss:$8 sps:$4 sm:$0xff]   ;;  %v10215_v0 = vrot.slane %v10133_v63, 2  ;;  %v23267_v21 = vld [vmem:[#allocation3 + $0xa0] sm:$0xff] }
 0x562   : > { %v10216_v35 = vrot.slane %v23267_v21, 2 }
 0x564   : > { %10835 = vmatpush1.bf16.msra.mxu0 %v19085_v7  ;;  %v10130_v7 = vld [vmem:[#allocation3 + $0x68] sm:$0xfc] }
 0x565   : > { %10836 = vmatprep.subr.bf16.mxu0 %v19090_v40  ;;  %v10195_v40 = vrot.slane %v10125_v9, 2  ;;  %v10208_v27 = vrot.slane %v10130_v7, 2  ;;  %v19118_v7 = vld [vmem:[%s24630_s2 + $0x1160] ss:$8 sps:$4 sm:$0xff]  }
 0x567   : > { %10599 = vmatmul.mubr.bf16.gmra.mrb[24].mxu0 %v10117_v25  ;;  %v10131_v25 = vld [vmem:[#allocation3 + $0x80] sm:$0x3]  ;;  %v10197_v1 = vsel %vm2512_vm2, %v10195_v40, %v10196_v19  ;;  %v10210_v34 = vsel %vm2512_vm2, %v10208_v27, %v10209_v37 }
 0x568   : > { %10608 = vmatprep.mubr.bf16.mxu0 %v10120_v18  ;;  %10837 = vmatpush1.bf16.msra.mxu0 %v19088_v33  ;;  %v10202_v33 = vsel %vm2512_vm2, %v10196_v19, %v10201_v17  ;;  %v10211_v54 = vrot.slane %v10131_v25, 2  ;;  %v10217_v17 = vsel %vm2512_vm2, %v10215_v0, %v10216_v35  ;;  %v19123_v19 = vld [vmem:[%s24630_s2 + $0x1174] ss:$8 sps:$4 sm:$0xff]   ;;  %v19121_v25 = vld [vmem:[%s24630_s2 + $0x1170] ss:$8 sps:$4 sm:$0xff]  }
 0x569   : > { %10838 = vmatprep.subr.bf16.mxu0 %v19093_v4  ;;  %v19106_v4 = vld [vmem:[%s24630_s2 + $0x1120] ss:$8 sps:$4 sm:$0xff]   ;;  %v10299_v18 = vpack.c.bf16 %v10202_v33, %v10197_v1  ;;  %v10142_v33 = vld [vmem:[#allocation3 + $0xf8] sm:$0xfc] }
 0x56c   : > { %10839 = vmatpush1.bf16.msra.mxu0 %v19091_v62  ;;  %v10302_v62 = vpack.c.bf16 %v10214_v49, %v10210_v34  ;;  %v10243_v49 = vrot.slane %v10144_v15, 2  ;;  %v10238_v34 = vrot.slane %v10142_v33, 2  ;;  %v23339_v33 = vld [vmem:[#allocation3 + $0x168] sm:$0xff] }
 0x56d   : > { %10840 = vmatprep.subr.bf16.mxu0 %v19096_v8  ;;  %v10223_v8 = vrot.slane %v10136_v11, 2 }
 0x56f   : > { %10609 = vmatmul.mubr.bf16.gmra.mrb[28].mxu0 %v10119_v3  ;;  %v10212_v3 = vsel %vm2512_vm2, %v10206_v5, %v10211_v54 }
 0x570   : > { %10841 = vmatpush1.bf16.msra.mxu0 %v19094_v23  ;;  %10844 = vmatprep.mubr.bf16.mxu0 %v10298_v61  ;;  %v23251_v23 = vld [vmem:[#allocation3 + $0xa8] sm:$0xff]  ;;  %v10301_v52 = vpack.c.bf16 %v10212_v3, %v10207_v46  ;;  %v10253_v46 = vrot.slane %v10148_v31, 2 }
 0x571   : > { %10842 = vmatprep.subr.bf16.mxu0 %v19099_v48  ;;  %v10219_v59 = vrot.slane %v23251_v23, 2  ;;  %v10135_v48 = vld [vmem:[#allocation3 + $0xb0] sm:$0x3]  ;;  %v19112_v61 = vld [vmem:[%s24630_s2 + $0x1140] ss:$8 sps:$4 sm:$0xff]  }
 0x573   : > { %v10224_v29 = vsel %vm2512_vm2, %v10219_v59, %v10223_v8  ;;  %v10220_v44 = vsel %vm2512_vm2, %v10218_v2, %v10219_v59  ;;  %v19129_v2 = vld [vmem:[%s24630_s2 + $0x1194] ss:$8 sps:$4 sm:$0xff]  }
 0x574   : > { %10843 = vmatpush1.bf16.msra.mxu0 %v19097_v13  ;;  %v19117_v13 = vld [vmem:[%s24630_s2 + $0x1154] ss:$8 sps:$4 sm:$0xff]   ;;  %v10304_v47 = vpack.c.bf16 %v10224_v29, %v10220_v44  ;;  %v10241_v29 = vrot.slane %v10143_v58, 2 }
 0x575   : > { %11566 = vmatprep.subr.bf16.mxu0 %v19102_v42  ;;  %v10221_v42 = vrot.slane %v10135_v48, 2  ;;  %v10141_v59 = vld [vmem:[#allocation3 + $0xf0] sm:$0xfc]  ;;  %v10146_v48 = vld [vmem:[#allocation3 + $0x128] sm:$0xfc] }
 0x576   : > { %v10235_v60 = vrot.slane %v10141_v59, 2  ;;  %v10248_v63 = vrot.slane %v10146_v48, 2  ;;  %v19141_v58 = vld [vmem:[%s24630_s2 + $0x11d4] ss:$8 sps:$4 sm:$0xff]   ;;  %v19144_v48 = vld [vmem:[%s24630_s2 + $0x11e4] ss:$8 sps:$4 sm:$0xff]  }
 0x577   : > { %10845 = vmatmul.mubr.bf16.vlgmr.msra.gmra.mrb[0].mxu0 %v10297_v41  ;;  %v23273_v41 = vld [vmem:[#allocation3 + $0xd8] sm:$0xff] }
 0x578   : > { %10854 = vmatprep.mubr.bf16.mxu0 %v10300_v12  ;;  %11567 = vmatpush1.bf16.msra.mxu0 %v19100_v50  ;;  %v19120_v50 = vld [vmem:[%s24630_s2 + $0x1164] ss:$8 sps:$4 sm:$0xff]   ;;  %v10229_v14 = vrot.slane %v23273_v41, 2  ;;  %v10139_v12 = vld [vmem:[#allocation3 + $0xe0] sm:$0x3] }
 0x579   : > { %11568 = vmatprep.subr.bf16.mxu0 %v19105_v45  ;;  %v10222_v45 = vsel %vm2512_vm2, %v10216_v35, %v10221_v42  ;;  %v10231_v37 = vrot.slane %v10139_v12, 2  ;;  %v19130_v35 = vld [vmem:[%s24630_s2 + $0x11a0] ss:$8 sps:$4 sm:$0xff]  }
 0x57a   : > { %v10234_v9 = vsel %vm2512_vm2, %v10229_v14, %v10233_v39  ;;  %v10230_v40 = vsel %vm2512_vm2, %v10228_v53, %v10229_v14 }
 0x57b   : > { %v10306_v27 = vpack.c.bf16 %v10234_v9, %v10230_v40  ;;  %v10145_v9 = vld [vmem:[#allocation3 + $0x120] sm:$0xfc] }
 0x57c   : > { %11569 = vmatpush1.bf16.msra.mxu0 %v19103_v38  ;;  %v10303_v38 = vpack.c.bf16 %v10222_v45, %v10217_v17  ;;  %v19135_v45 = vld [vmem:[%s24630_s2 + $0x11b4] ss:$8 sps:$4 sm:$0xff]   ;;  %v10245_v40 = vrot.slane %v10145_v9, 2 }
 0x57d   : > { %11570 = vmatprep.subr.bf16.mxu0 %v19108_v51  ;;  %v10137_v51 = vld [vmem:[#allocation3 + $0xc0] sm:$0xfc] }
 0x57e   : > { %v10225_v1 = vrot.slane %v10137_v51, 2 }
 0x57f   : > { %10855 = vmatmul.mubr.bf16.gmra.mrb[4].mxu0 %v10299_v18  ;;  %v19126_v18 = vld [vmem:[%s24630_s2 + $0x1184] ss:$8 sps:$4 sm:$0xff]  }
 0x580   : > { %10864 = vmatprep.mubr.bf16.mxu0 %v10302_v62  ;;  %11571 = vmatpush1.bf16.msra.mxu0 %v19106_v4  ;;  %v23289_v4 = vld [vmem:[#allocation3 + $0xd0] sm:$0xff] }
 0x581   : > { %11572 = vmatprep.subr.bf16.mxu0 %v19111_v36  ;;  %v10226_v11 = vrot.slane %v23289_v4, 2  ;;  %v23295_v36 = vld [vmem:[#allocation3 + $0x108] sm:$0xff] }
 0x582   : > { %v10239_v55 = vrot.slane %v23295_v36, 2 }
 0x583   : > { %v10232_v62 = vsel %vm2512_vm2, %v10226_v11, %v10231_v37  ;;  %v10227_v8 = vsel %vm2512_vm2, %v10225_v1, %v10226_v11  ;;  %v10151_v11 = vld [vmem:[#allocation3 + $0x170] sm:$0x3] }
 0x584   : > { %11573 = vmatpush1.bf16.msra.mxu0 %v19109_v22  ;;  %v10244_v54 = vsel %vm2512_vm2, %v10239_v55, %v10243_v49  ;;  %v19124_v22 = vld [vmem:[%s24630_s2 + $0x1180] ss:$8 sps:$4 sm:$0xff]   ;;  %v10305_v5 = vpack.c.bf16 %v10232_v62, %v10227_v8  ;;  %v10259_v49 = vrot.slane %v23339_v33, 2  ;;  %v10149_v8 = vld [vmem:[#allocation3 + $0x150] sm:$0xfc]  ;;  %v10261_v31 = vrot.slane %v10151_v11, 2 }
 0x585   : > { %11574 = vmatprep.subr.bf16.mxu0 %v19114_v32  ;;  %v10240_v32 = vsel %vm2512_vm2, %v10238_v34, %v10239_v55  ;;  %v19136_v34 = vld [vmem:[%s24630_s2 + $0x11c0] ss:$8 sps:$4 sm:$0xff]   ;;  %v10255_v59 = vrot.slane %v10149_v8, 2 }
 0x586   : > { %v10308_v3 = vpack.c.bf16 %v10244_v54, %v10240_v32  ;;  %v10992_v55 = vld [vmem:[#allocation2 + $0x28] sm:$0x7] }
 0x587   : > { %10865 = vmatmul.mubr.bf16.gmra.mrb[8].mxu0 %v10301_v52  ;;  %v23311_v52 = vld [vmem:[#allocation3 + $0x100] sm:$0xff]  ;;  %v11061_v32 = vrot.slane %v10992_v55, 3 }
 0x588   : > { %10874 = vmatprep.mubr.bf16.mxu0 %v10304_v47  ;;  %11575 = vmatpush1.bf16.msra.mxu0 %v19112_v61  ;;  %v19127_v61 = vld [vmem:[%s24630_s2 + $0x1190] ss:$8 sps:$4 sm:$0xff]   ;;  %v10236_v44 = vrot.slane %v23311_v52, 2  ;;  %v19148_v11 = vld [vmem:[%s24630_s2 + $0x1800] ss:$8 sps:$4 sm:$0xff]  }
 0x589   : > { %11576 = vmatprep.subr.bf16.mxu0 %v19117_v13  ;;  %v19132_v13 = vld [vmem:[%s24630_s2 + $0x11a4] ss:$8 sps:$4 sm:$0xff]   ;;  %v23317_v47 = vld [vmem:[#allocation3 + $0x138] sm:$0xff] }
 0x58a   : > { %v10249_v42 = vrot.slane %v23317_v47, 2  ;;  %v10242_v20 = vsel %vm2512_vm2, %v10236_v44, %v10241_v29  ;;  %v10237_v0 = vsel %vm2512_vm2, %v10235_v60, %v10236_v44 }
 0x58b   : > { %v10307_v53 = vpack.c.bf16 %v10242_v20, %v10237_v0  ;;  %v19142_v20 = vld [vmem:[%s24630_s2 + $0x11e0] ss:$8 sps:$4 sm:$0xff]  }
 0x58c   : > { %11577 = vmatpush1.bf16.msra.mxu0 %v19115_v10  ;;  %v10254_v39 = vsel %vm2512_vm2, %v10249_v42, %v10253_v46  ;;  %v10147_v10 = vld [vmem:[#allocation3 + $0x140] sm:$0x3]  ;;  %v10250_v14 = vsel %vm2512_vm2, %v10248_v63, %v10249_v42 }
 0x58d   : > { %11578 = vmatprep.subr.bf16.mxu0 %v19120_v50  ;;  %v10152_v50 = vld [vmem:[#allocation3 + $0x178] sm:$0x3]  ;;  %v10310_v12 = vpack.c.bf16 %v10254_v39, %v10250_v14  ;;  %v10251_v17 = vrot.slane %v10147_v10, 2  ;;  %v10991_v63 = vld [vmem:[#allocation2 + $0x20] sm:$0x7] }
 0x58e   : > { %v10263_v15 = vrot.slane %v10152_v50, 2  ;;  %v10996_v39 = vld [vmem:[#allocation2 + $0x58] sm:$0x7]  ;;  %v10989_v50 = vld [vmem:[#allocation2] sm:$0xf8]  ;;  %v11059_v14 = vrot.slane %v10991_v63, 3 }
 0x58f   : > { %10875 = vmatmul.mubr.bf16.gmra.mrb[12].mxu0 %v10303_v38  ;;  %v19133_v38 = vld [vmem:[%s24630_s2 + $0x11b0] ss:$8 sps:$4 sm:$0xff]   ;;  %v11071_v9 = vrot.slane %v10996_v39, 3  ;;  %v10999_v63 = vld [vmem:[#allocation2 + $0x80] sm:$0x7] }
 0x590   : > { %10884 = vmatprep.mubr.bf16.mxu0 %v10306_v27  ;;  %11579 = vmatpush1.bf16.msra.mxu0 %v19118_v7  ;;  %v10150_v7 = vld [vmem:[#allocation3 + $0x158] sm:$0xfc]  ;;  %v19138_v27 = vld [vmem:[%s24630_s2 + $0x11c4] ss:$8 sps:$4 sm:$0xff]   ;;  %v10264_v1 = vsel %vm2512_vm2, %v10259_v49, %v10263_v15 }
 0x591   : > { %11580 = vmatprep.subr.bf16.mxu0 %v19123_v19  ;;  %v23333_v19 = vld [vmem:[#allocation3 + $0x130] sm:$0xff]  ;;  %v10258_v37 = vrot.slane %v10150_v7, 2  ;;  %v11004_v39 = vld [vmem:[#allocation2 + $0xb8] sm:$0x7] }
 0x592   : > { %v10246_v51 = vrot.slane %v23333_v19, 2  ;;  %v23377_v7 = vld [vmem:[#allocation2 + $0x10] sm:$0xff] }
 0x593   : > { %v10260_v54 = vsel %vm2512_vm2, %v10258_v37, %v10259_v49  ;;  %v11054_v15 = vrot.slane %v23377_v7, 3 }
 0x594   : > { %11581 = vmatpush1.bf16.msra.mxu0 %v19121_v25  ;;  %v10252_v25 = vsel %vm2512_vm2, %v10246_v51, %v10251_v17  ;;  %v11053_v17 = vrot.slane %v10989_v50, 3  ;;  %v10997_v50 = vld [vmem:[#allocation2 + $0x60] sm:$0xf8] }
 0x595   : > { %11582 = vmatprep.subr.bf16.mxu0 %v19126_v18  ;;  %v10247_v18 = vsel %vm2512_vm2, %v10245_v40, %v10246_v51  ;;  %v23383_v51 = vld [vmem:[#allocation2 + $0x48] sm:$0xff]  ;;  %v11060_v37 = vsel %vm3573_vm3, %v11054_v15, %v11059_v14  ;;  %v11079_v14 = vrot.slane %v10999_v63, 3  ;;  %v23449_v63 = vld [vmem:[#allocation2 + $0xd8] sm:$0xff] }
 0x596   : > { %v10309_v62 = vpack.c.bf16 %v10252_v25, %v10247_v18  ;;  %v10995_v25 = vld [vmem:[#allocation2 + $0x50] sm:$0x7]  ;;  %v11000_v18 = vld [vmem:[#allocation2 + $0x88] sm:$0x7] }
 0x597   : > { %10885 = vmatmul.mubr.bf16.gmra.mrb[16].mxu0 %v10305_v5  ;;  %v10990_v5 = vld [vmem:[#allocation2 + $0x8] sm:$0xf8]  ;;  %v11069_v8 = vrot.slane %v10995_v25, 3 }
 0x598   : > { %10894 = vmatprep.mubr.bf16.mxu0 %v10308_v3  ;;  %11583 = vmatpush1.bf16.msra.mxu0 %v19124_v22  ;;  %v10312_v22 = vpack.c.bf16 %v10264_v1, %v10260_v54  ;;  %v23355_v3 = vld [vmem:[#allocation3 + $0x160] sm:$0xff]  ;;  %v11056_v46 = vrot.slane %v10990_v5, 3  ;;  %v11055_v1 = vsel %vm3573_vm3, %v11053_v17, %v11054_v15  ;;  %v10993_v54 = vld [vmem:[#allocation2 + $0x30] sm:$0xf8]  ;;  %v11073_v17 = vrot.slane %v10997_v50, 3 }
 0x599   : > { %11584 = vmatprep.subr.bf16.mxu0 %v19129_v2  ;;  %v19139_v2 = vld [vmem:[%s24630_s2 + $0x11d0] ss:$8 sps:$4 sm:$0xff]   ;;  %v10256_v29 = vrot.slane %v23355_v3, 2 }
 0x59a   : > { %v19151_v5 = vld [vmem:[%s24630_s2 + $0x1810] ss:$8 sps:$4 sm:$0xff]  }
 0x59b   : > { %v10262_v44 = vsel %vm2512_vm2, %v10256_v29, %v10261_v31  ;;  %v10257_v42 = vsel %vm2512_vm2, %v10255_v59, %v10256_v29  ;;  %v11081_v31 = vrot.slane %v11000_v18, 3  ;;  %v19156_v29 = vld [vmem:[%s24630_s2 + $0x1824] ss:$8 sps:$4 sm:$0xff]   ;;  %v23421_v15 = vld [vmem:[#allocation2 + $0x70] sm:$0xff]  ;;  %v11012_v50 = vld [vmem:[#allocation2 + $0x118] sm:$0x7] }
 0x59c   : > { %11585 = vmatpush1.bf16.msra.mxu0 %v19127_v61  ;;  %v23361_v61 = vld [vmem:[#allocation2 + $0x18] sm:$0xff]  ;;  %v10311_v10 = vpack.c.bf16 %v10262_v44, %v10257_v42 }
 0x59d   : > { %11586 = vmatprep.subr.bf16.mxu0 %v19132_v13  ;;  %v11057_v60 = vrot.slane %v23361_v61, 3 }
 0x59f   : > { %10895 = vmatmul.mubr.bf16.gmra.mrb[20].mxu0 %v10307_v53  ;;  %v11062_v13 = vsel %vm3573_vm3, %v11057_v60, %v11061_v32  ;;  %v11058_v0 = vsel %vm3573_vm3, %v11056_v46, %v11057_v60  ;;  %v11063_v32 = vrot.slane %v10993_v54, 3  ;;  %v23405_v46 = vld [vmem:[#allocation2 + $0x78] sm:$0xff] }
 0x5a0   : > { %10904 = vmatprep.mubr.bf16.mxu0 %v10310_v12  ;;  %11587 = vmatpush1.bf16.msra.mxu0 %v19130_v35  ;;  %v19147_v35 = vld [vmem:[%s24630_s2 + $0x11f4] ss:$8 sps:$4 sm:$0xff]   ;;  %v11166_v53 = vpack.c.bf16 %v11062_v13, %v11058_v0  ;;  %v19145_v12 = vld [vmem:[%s24630_s2 + $0x11f0] ss:$8 sps:$4 sm:$0xff]   ;;  %v11077_v60 = vrot.slane %v23405_v46, 3 }
 0x5a1   : > { %11588 = vmatprep.subr.bf16.mxu0 %v19135_v45  ;;  %v10994_v45 = vld [vmem:[#allocation2 + $0x38] sm:$0xf8] }
 0x5a2   : > { %v11066_v40 = vrot.slane %v10994_v45, 3  ;;  %v11082_v13 = vsel %vm3573_vm3, %v11077_v60, %v11081_v31  ;;  %v11002_v45 = vld [vmem:[#allocation2 + $0x98] sm:$0xf8] }
 0x5a4   : > { %11589 = vmatpush1.bf16.msra.mxu0 %v19133_v38  ;;  %v19150_v38 = vld [vmem:[%s24630_s2 + $0x1804] ss:$8 sps:$4 sm:$0xff]  }
 0x5a5   : > { %11590 = vmatprep.subr.bf16.mxu0 %v19138_v27  ;;  %v11067_v27 = vrot.slane %v23383_v51, 3 }
 0x5a7   : > { %10905 = vmatmul.mubr.bf16.gmra.mrb[24].mxu0 %v10309_v62  ;;  %v11072_v49 = vsel %vm3573_vm3, %v11067_v27, %v11071_v9  ;;  %v11068_v55 = vsel %vm3573_vm3, %v11066_v40, %v11067_v27  ;;  %v19153_v62 = vld [vmem:[%s24630_s2 + $0x1814] ss:$8 sps:$4 sm:$0xff]   ;;  %v11091_v9 = vrot.slane %v11004_v39, 3  ;;  %v19162_v40 = vld [vmem:[%s24630_s2 + $0x1844] ss:$8 sps:$4 sm:$0xff]   ;;  %v11086_v27 = vrot.slane %v11002_v45, 3 }
 0x5a8   : > { %10914 = vmatprep.mubr.bf16.mxu0 %v10312_v22  ;;  %11591 = vmatpush1.bf16.msra.mxu0 %v19136_v34  ;;  %v11165_v34 = vpack.c.bf16 %v11060_v37, %v11055_v1  ;;  %v10998_v22 = vld [vmem:[#allocation2 + $0x68] sm:$0xf8]  ;;  %v19171_v45 = vld [vmem:[%s24630_s2 + $0x1874] ss:$8 sps:$4 sm:$0xff]  }
 0x5a9   : > { %11592 = vmatprep.subr.bf16.mxu0 %v19141_v58  ;;  %v11168_v58 = vpack.c.bf16 %v11072_v49, %v11068_v55  ;;  %v23427_v37 = vld [vmem:[#allocation2 + $0xa8] sm:$0xff] }
 0x5aa   : > { %v11087_v49 = vrot.slane %v23427_v37, 3  ;;  %v11008_v55 = vld [vmem:[#allocation2 + $0xe8] sm:$0x7] }
 0x5ac   : > { %11593 = vmatpush1.bf16.msra.mxu0 %v19139_v2  ;;  %v23399_v2 = vld [vmem:[#allocation2 + $0x40] sm:$0xff]  ;;  %v11092_v1 = vsel %vm3573_vm3, %v11087_v49, %v11091_v9  ;;  %v11088_v54 = vsel %vm3573_vm3, %v11086_v27, %v11087_v49  ;;  %v19169_v27 = vld [vmem:[%s24630_s2 + $0x1870] ss:$8 sps:$4 sm:$0xff]  }
 0x5ad   : > { %11594 = vmatprep.subr.bf16.mxu0 %v19144_v48  ;;  %v11064_v59 = vrot.slane %v23399_v2, 3  ;;  %v11076_v48 = vrot.slane %v10998_v22, 3  ;;  %v11172_v22 = vpack.c.bf16 %v11092_v1, %v11088_v54  ;;  %v11005_v9 = vld [vmem:[#allocation2 + $0xc0] sm:$0xf8] }
 0x5ae   : > { %v11093_v49 = vrot.slane %v11005_v9, 3 }
 0x5af   : > { %10915 = vmatmul.mubr.bf16.gmra.mrb[28].mxu0 %v10311_v10  ;;  %v11070_v44 = vsel %vm3573_vm3, %v11064_v59, %v11069_v8  ;;  %v11065_v42 = vsel %vm3573_vm3, %v11063_v32, %v11064_v59  ;;  %v11078_v0 = vsel %vm3573_vm3, %v11076_v48, %v11077_v60  ;;  %v11001_v8 = vld [vmem:[#allocation2 + $0x90] sm:$0xf8]  ;;  %v11101_v32 = vrot.slane %v11008_v55, 3  ;;  %v23443_v48 = vld [vmem:[#allocation2 + $0xa0] sm:$0xff] }
 0x5b0   : > { %11595 = vmatpush1.bf16.msra.mxu0 %v19142_v20  ;;  %11598 = vmatprep.mubr.bf16.mxu0 %v11166_v53  ;;  %v19154_v20 = vld [vmem:[%s24630_s2 + $0x1820] ss:$8 sps:$4 sm:$0xff]   ;;  %v11167_v10 = vpack.c.bf16 %v11070_v44, %v11065_v42  ;;  %v11170_v53 = vpack.c.bf16 %v11082_v13, %v11078_v0  ;;  %v19163_v59 = vld [vmem:[%s24630_s2 + $0x1850] ss:$8 sps:$4 sm:$0xff]   ;;  %v11084_v60 = vrot.slane %v23443_v48, 3  ;;  %v11097_v42 = vrot.slane %v23449_v63, 3 }
 0x5b1   : > { %11596 = vmatprep.subr.bf16.mxu0 %v19147_v35  ;;  %v19159_v35 = vld [vmem:[%s24630_s2 + $0x1834] ss:$8 sps:$4 sm:$0xff]   ;;  %v19168_v44 = vld [vmem:[%s24630_s2 + $0x1864] ss:$8 sps:$4 sm:$0xff]  }
 0x5b2   : > { %v11102_v39 = vsel %vm3573_vm3, %v11097_v42, %v11101_v32 }
 0x5b4   : > { %11597 = vmatpush1.bf16.msra.mxu0 %v19145_v12  ;;  %v19157_v12 = vld [vmem:[%s24630_s2 + $0x1830] ss:$8 sps:$4 sm:$0xff]  }
 0x5b5   : > { %11872 = vmatprep.subr.bf16.mxu0 %v19150_v38  ;;  %v11074_v38 = vrot.slane %v23421_v15, 3 }
 0x5b7   : > { %11599 = vmatmul.mubr.bf16.vlgmr.msra.gmra.mrb[0].mxu0 %v11165_v34  ;;  %v11080_v25 = vsel %vm3573_vm3, %v11074_v38, %v11079_v14  ;;  %v11075_v18 = vsel %vm3573_vm3, %v11073_v17, %v11074_v38  ;;  %v19160_v34 = vld [vmem:[%s24630_s2 + $0x1840] ss:$8 sps:$4 sm:$0xff]   ;;  %v11010_v38 = vld [vmem:[#allocation2 + $0xf8] sm:$0xf8] }
 0x5b8   : > { %11608 = vmatprep.mubr.bf16.mxu0 %v11168_v58  ;;  %11873 = vmatpush1.bf16.msra.mxu0 %v19148_v11  ;;  %v11003_v11 = vld [vmem:[#allocation2 + $0xb0] sm:$0x7]  ;;  %v19165_v58 = vld [vmem:[%s24630_s2 + $0x1854] ss:$8 sps:$4 sm:$0xff]  }
 0x5b9   : > { %11874 = vmatprep.subr.bf16.mxu0 %v19153_v62  ;;  %v11169_v62 = vpack.c.bf16 %v11080_v25, %v11075_v18  ;;  %v11089_v31 = vrot.slane %v11003_v11, 3  ;;  %v23465_v25 = vld [vmem:[#allocation2 + $0xd0] sm:$0xff]  ;;  %v19174_v11 = vld [vmem:[%s24630_s2 + $0x1884] ss:$8 sps:$4 sm:$0xff]   ;;  %v11106_v18 = vrot.slane %v11010_v38, 3 }
 0x5ba   : > { %v11094_v1 = vrot.slane %v23465_v25, 3  ;;  %v19178_v38 = vld [vmem:[%s24630_s2 + $0x18a0] ss:$8 sps:$4 sm:$0xff]  }
 0x5bc   : > { %11875 = vmatpush1.bf16.msra.mxu0 %v19151_v5  ;;  %v11006_v5 = vld [vmem:[#allocation2 + $0xc8] sm:$0xf8] }
 0x5bd   : > { %11876 = vmatprep.subr.bf16.mxu0 %v19156_v29  ;;  %v11083_v29 = vrot.slane %v11001_v8, 3  ;;  %v11096_v13 = vrot.slane %v11006_v5, 3  ;;  %v11095_v8 = vsel %vm3573_vm3, %v11093_v49, %v11094_v1 }
 0x5bf   : > { %11609 = vmatmul.mubr.bf16.gmra.mrb[4].mxu0 %v11167_v10  ;;  %v11007_v10 = vld [vmem:[#allocation2 + $0xe0] sm:$0x7]  ;;  %v11085_v0 = vsel %vm3573_vm3, %v11083_v29, %v11084_v60  ;;  %v11098_v14 = vsel %vm3573_vm3, %v11096_v13, %v11097_v42  ;;  %v11009_v29 = vld [vmem:[#allocation2 + $0xf0] sm:$0xf8]  ;;  %v11014_v13 = vld [vmem:[#allocation2 + $0x128] sm:$0xf8] }
 0x5c0   : > { %11618 = vmatprep.mubr.bf16.mxu0 %v11170_v53  ;;  %11877 = vmatpush1.bf16.msra.mxu0 %v19154_v20  ;;  %v11090_v20 = vsel %vm3573_vm3, %v11084_v60, %v11089_v31  ;;  %v11099_v17 = vrot.slane %v11007_v10, 3  ;;  %v11016_v31 = vld [vmem:[#allocation2 + $0x148] sm:$0x7]  ;;  %v23487_v10 = vld [vmem:[#allocation2 + $0x100] sm:$0xff] }
 0x5c1   : > { %11878 = vmatprep.subr.bf16.mxu0 %v19159_v35  ;;  %v19166_v35 = vld [vmem:[%s24630_s2 + $0x1860] ss:$8 sps:$4 sm:$0xff]   ;;  %v11171_v53 = vpack.c.bf16 %v11090_v20, %v11085_v0  ;;  %v11121_v42 = vrot.slane %v11016_v31, 3  ;;  %v19175_v20 = vld [vmem:[%s24630_s2 + $0x1890] ss:$8 sps:$4 sm:$0xff]   ;;  %v11104_v0 = vrot.slane %v23487_v10, 3 }
 0x5c4   : > { %11879 = vmatpush1.bf16.msra.mxu0 %v19157_v12  ;;  %v11174_v12 = vpack.c.bf16 %v11102_v39, %v11098_v14  ;;  %v11103_v39 = vrot.slane %v11009_v29, 3 }
 0x5c5   : > { %11880 = vmatprep.subr.bf16.mxu0 %v19162_v40  ;;  %v11111_v40 = vrot.slane %v11012_v50, 3  ;;  %v11116_v50 = vrot.slane %v11014_v13, 3 }
 0x5c7   : > { %11619 = vmatmul.mubr.bf16.gmra.mrb[8].mxu0 %v11169_v62  ;;  %v11100_v62 = vsel %vm3573_vm3, %v11094_v1, %v11099_v17  ;;  %v11105_v17 = vsel %vm3573_vm3, %v11103_v39, %v11104_v0  ;;  %v19183_v1 = vld [vmem:[%s24630_s2 + $0x18b4] ss:$8 sps:$4 sm:$0xff]  }
 0x5c8   : > { %11628 = vmatprep.mubr.bf16.mxu0 %v11172_v22  ;;  %11881 = vmatpush1.bf16.msra.mxu0 %v19160_v34  ;;  %v23471_v34 = vld [vmem:[#allocation2 + $0x108] sm:$0xff]  ;;  %v11173_v5 = vpack.c.bf16 %v11100_v62, %v11095_v8  ;;  %v11018_v62 = vld [vmem:[#allocation2 + $0x158] sm:$0xf8] }
 0x5c9   : > { %11882 = vmatprep.subr.bf16.mxu0 %v19165_v58  ;;  %v11107_v55 = vrot.slane %v23471_v34, 3  ;;  %v11011_v58 = vld [vmem:[#allocation2 + $0x110] sm:$0x7]  ;;  %v19172_v22 = vld [vmem:[%s24630_s2 + $0x1880] ss:$8 sps:$4 sm:$0xff]  }
 0x5cb   : > { %v11112_v54 = vsel %vm3573_vm3, %v11107_v55, %v11111_v40  ;;  %v11108_v32 = vsel %vm3573_vm3, %v11106_v18, %v11107_v55  ;;  %v11020_v40 = vld [vmem:[#allocation2 + $0x178] sm:$0x7] }
 0x5cc   : > { %11883 = vmatpush1.bf16.msra.mxu0 %v19163_v59  ;;  %v19177_v59 = vld [vmem:[%s24630_s2 + $0x1894] ss:$8 sps:$4 sm:$0xff]   ;;  %v11176_v60 = vpack.c.bf16 %v11112_v54, %v11108_v32  ;;  %v11131_v54 = vrot.slane %v11020_v40, 3  ;;  %v11126_v32 = vrot.slane %v11018_v62, 3 }
 0x5cd   : > { %11884 = vmatprep.subr.bf16.mxu0 %v19168_v44  ;;  %v11109_v44 = vrot.slane %v11011_v58, 3  ;;  %v19181_v58 = vld [vmem:[%s24630_s2 + $0x18b0] ss:$8 sps:$4 sm:$0xff]  }
 0x5cf   : > { %11629 = vmatmul.mubr.bf16.gmra.mrb[12].mxu0 %v11171_v53  ;;  %v23493_v53 = vld [vmem:[#allocation2 + $0x138] sm:$0xff] }
 0x5d0   : > { %11638 = vmatprep.mubr.bf16.mxu0 %v11174_v12  ;;  %11885 = vmatpush1.bf16.msra.mxu0 %v19166_v35  ;;  %v19180_v35 = vld [vmem:[%s24630_s2 + $0x18a4] ss:$8 sps:$4 sm:$0xff]   ;;  %v11117_v14 = vrot.slane %v23493_v53, 3  ;;  %v11015_v12 = vld [vmem:[#allocation2 + $0x140] sm:$0x7] }
 0x5d1   : > { %11886 = vmatprep.subr.bf16.mxu0 %v19171_v45  ;;  %v11110_v45 = vsel %vm3573_vm3, %v11104_v0, %v11109_v44  ;;  %v11119_v55 = vrot.slane %v11015_v12, 3  ;;  %v11019_v44 = vld [vmem:[#allocation2 + $0x170] sm:$0x7] }
 0x5d2   : > { %v11122_v9 = vsel %vm3573_vm3, %v11117_v14, %v11121_v42  ;;  %v11118_v49 = vsel %vm3573_vm3, %v11116_v50, %v11117_v14  ;;  %v19184_v42 = vld [vmem:[%s24630_s2 + $0x18c0] ss:$8 sps:$4 sm:$0xff]   ;;  %v11129_v14 = vrot.slane %v11019_v44, 3  ;;  %v19187_v12 = vld [vmem:[%s24630_s2 + $0x18d0] ss:$8 sps:$4 sm:$0xff]  }
 0x5d3   : > { %v11178_v18 = vpack.c.bf16 %v11122_v9, %v11118_v49  ;;  %v19193_v44 = vld [vmem:[%s24630_s2 + $0x18f0] ss:$8 sps:$4 sm:$0xff]  }
 0x5d4   : > { %11887 = vmatpush1.bf16.msra.mxu0 %v19169_v27  ;;  %v11175_v27 = vpack.c.bf16 %v11110_v45, %v11105_v17  ;;  %v11182_v45 = vld [vmem:[#allocation3 + $0x8] sm:$0xf8] }
 0x5d5   : > { %11888 = vmatprep.subr.bf16.mxu0 %v19174_v11  ;;  %v11013_v11 = vld [vmem:[#allocation2 + $0x120] sm:$0xf8]  ;;  %v11248_v49 = vrot.slane %v11182_v45, 3  ;;  %v11192_v45 = vld [vmem:[#allocation3 + $0x88] sm:$0x7] }
 0x5d6   : > { %v11113_v8 = vrot.slane %v11013_v11, 3 }
 0x5d7   : > { %11639 = vmatmul.mubr.bf16.gmra.mrb[16].mxu0 %v11173_v5  ;;  %v19186_v5 = vld [vmem:[%s24630_s2 + $0x18c4] ss:$8 sps:$4 sm:$0xff]  }
 0x5d8   : > { %11648 = vmatprep.mubr.bf16.mxu0 %v11176_v60  ;;  %11889 = vmatpush1.bf16.msra.mxu0 %v19172_v22  ;;  %v23509_v22 = vld [vmem:[#allocation2 + $0x130] sm:$0xff] }
 0x5d9   : > { %11890 = vmatprep.subr.bf16.mxu0 %v19177_v59  ;;  %v11114_v31 = vrot.slane %v23509_v22, 3  ;;  %v11127_v59 = vrot.slane %v23165_v6, 3  ;;  %v19189_v6 = vld [vmem:[%s24630_s2 + $0x18d4] ss:$8 sps:$4 sm:$0xff]  }
 0x5db   : > { %v11120_v29 = vsel %vm3573_vm3, %v11114_v31, %v11119_v55  ;;  %v11132_v60 = vsel %vm3573_vm3, %v11127_v59, %v11131_v54  ;;  %v11115_v13 = vsel %vm3573_vm3, %v11113_v8, %v11114_v31  ;;  %v11128_v0 = vsel %vm3573_vm3, %v11126_v32, %v11127_v59  ;;  %v11183_v55 = vld [vmem:[#allocation3 + $0x20] sm:$0x7] }
 0x5dc   : > { %11891 = vmatpush1.bf16.msra.mxu0 %v19175_v20  ;;  %v11184_v20 = vld [vmem:[#allocation3 + $0x28] sm:$0x7]  ;;  %v11177_v39 = vpack.c.bf16 %v11120_v29, %v11115_v13  ;;  %v11180_v50 = vpack.c.bf16 %v11132_v60, %v11128_v0  ;;  %v11251_v59 = vrot.slane %v11183_v55, 3  ;;  %v11186_v29 = vld [vmem:[#allocation3 + $0x38] sm:$0xf8]  ;;  %v11259_v0 = vrot.slane %v23207_v24, 3 }
 0x5dd   : > { %11892 = vmatprep.subr.bf16.mxu0 %v19180_v35  ;;  %v11017_v35 = vld [vmem:[#allocation2 + $0x150] sm:$0xf8]  ;;  %v11253_v9 = vrot.slane %v11184_v20, 3  ;;  %v19190_v54 = vld [vmem:[%s24630_s2 + $0x18e0] ss:$8 sps:$4 sm:$0xff]   ;;  %v11256_v55 = vrot.slane %v23223_v30, 3 }
 0x5de   : > { %v11123_v17 = vrot.slane %v11017_v35, 3  ;;  %v19198_v20 = vld [vmem:[%s24630_s2 + $0x1204] ss:$8 sps:$4 sm:$0xff]   ;;  %v19201_v24 = vld [vmem:[%s24630_s2 + $0x1214] ss:$8 sps:$4 sm:$0xff]  }
 0x5df   : > { %11649 = vmatmul.mubr.bf16.gmra.mrb[20].mxu0 %v11175_v27  ;;  %v19192_v27 = vld [vmem:[%s24630_s2 + $0x18e4] ss:$8 sps:$4 sm:$0xff]   ;;  %v19202_v30 = vld [vmem:[%s24630_s2 + $0x1220] ss:$8 sps:$4 sm:$0xff]  }
 0x5e0   : > { %11658 = vmatprep.mubr.bf16.mxu0 %v11178_v18  ;;  %11893 = vmatpush1.bf16.msra.mxu0 %v19178_v38  ;;  %v23529_v38 = vld [vmem:[#allocation2 + $0x160] sm:$0xff] }
 0x5e1   : > { %11894 = vmatprep.subr.bf16.mxu0 %v19183_v1  ;;  %v11124_v40 = vrot.slane %v23529_v38, 3  ;;  %v11249_v1 = vrot.slane %v23185_v28, 3  ;;  %v19195_v28 = vld [vmem:[%s24630_s2 + $0x18f4] ss:$8 sps:$4 sm:$0xff]  }
 0x5e3   : > { %v11130_v11 = vsel %vm3573_vm3, %v11124_v40, %v11129_v14  ;;  %v11254_v18 = vsel %vm3573_vm3, %v11249_v1, %v11253_v9  ;;  %v11125_v62 = vsel %vm3573_vm3, %v11123_v17, %v11124_v40  ;;  %v11250_v31 = vsel %vm3573_vm3, %v11248_v49, %v11249_v1  ;;  %v11185_v17 = vld [vmem:[#allocation3 + $0x30] sm:$0xf8]  ;;  %v11190_v49 = vld [vmem:[#allocation3 + $0x68] sm:$0xf8] }
 0x5e4   : > { %11895 = vmatpush1.bf16.msra.mxu0 %v19181_v58  ;;  %v11188_v58 = vld [vmem:[#allocation3 + $0x58] sm:$0x7]  ;;  %v11179_v8 = vpack.c.bf16 %v11130_v11, %v11125_v62  ;;  %v11358_v32 = vpack.c.bf16 %v11254_v18, %v11250_v31  ;;  %v11273_v1 = vrot.slane %v11192_v45, 3  ;;  %v11255_v18 = vrot.slane %v11185_v17, 3  ;;  %v19204_v62 = vld [vmem:[%s24630_s2 + $0x1224] ss:$8 sps:$4 sm:$0xff]  }
 0x5e5   : > { %11896 = vmatprep.subr.bf16.mxu0 %v19186_v5  ;;  %v11181_v5 = vld [vmem:[#allocation3] sm:$0xf8]  ;;  %v11263_v60 = vrot.slane %v11188_v58, 3  ;;  %v19199_v11 = vld [vmem:[%s24630_s2 + $0x1210] ss:$8 sps:$4 sm:$0xff]   ;;  %v11269_v58 = vrot.slane %v23229_v43, 3 }
 0x5e6   : > { %v11245_v13 = vrot.slane %v11181_v5, 3  ;;  %v11257_v5 = vsel %vm3573_vm3, %v11255_v18, %v11256_v55  ;;  %v19207_v43 = vld [vmem:[%s24630_s2 + $0x1234] ss:$8 sps:$4 sm:$0xff]  }
 0x5e7   : > { %11659 = vmatmul.mubr.bf16.gmra.mrb[24].mxu0 %v11177_v39  ;;  %v11258_v39 = vrot.slane %v11186_v29, 3  ;;  %v11264_v35 = vsel %vm3573_vm3, %v11259_v0, %v11263_v60  ;;  %v11274_v31 = vsel %vm3573_vm3, %v11269_v58, %v11273_v1  ;;  %v11189_v60 = vld [vmem:[#allocation3 + $0x60] sm:$0xf8] }
 0x5e8   : > { %11668 = vmatprep.mubr.bf16.mxu0 %v11180_v50  ;;  %11897 = vmatpush1.bf16.msra.mxu0 %v19184_v42  ;;  %v11246_v42 = vrot.slane %v23201_v16, 3  ;;  %v11187_v50 = vld [vmem:[#allocation3 + $0x50] sm:$0x7]  ;;  %v19196_v16 = vld [vmem:[%s24630_s2 + $0x1200] ss:$8 sps:$4 sm:$0xff]  }
 0x5e9   : > { %11898 = vmatprep.subr.bf16.mxu0 %v19189_v6 }
 0x5ea   : > { %v11252_v6 = vsel %vm3573_vm3, %v11246_v42, %v11251_v59  ;;  %v11247_v14 = vsel %vm3573_vm3, %v11245_v13, %v11246_v42  ;;  %v11194_v42 = vld [vmem:[#allocation3 + $0x98] sm:$0xf8] }
 0x5eb   : > { %v11357_v9 = vpack.c.bf16 %v11252_v6, %v11247_v14  ;;  %v11266_v6 = vrot.slane %v23245_v57, 3  ;;  %v11279_v14 = vrot.slane %v23251_v23, 3  ;;  %v19208_v57 = vld [vmem:[%s24630_s2 + $0x1240] ss:$8 sps:$4 sm:$0xff]   ;;  %v19213_v23 = vld [vmem:[%s24630_s2 + $0x1254] ss:$8 sps:$4 sm:$0xff]  }
 0x5ec   : > { %11899 = vmatpush1.bf16.msra.mxu0 %v19187_v12  ;;  %v11260_v12 = vsel %vm3573_vm3, %v11258_v39, %v11259_v0  ;;  %v19205_v39 = vld [vmem:[%s24630_s2 + $0x1230] ss:$8 sps:$4 sm:$0xff]   ;;  %v11265_v0 = vrot.slane %v11189_v60, 3  ;;  %v11197_v60 = vld [vmem:[#allocation3 + $0xc0] sm:$0xf8] }
 0x5ed   : > { %11900 = vmatprep.subr.bf16.mxu0 %v19192_v27  ;;  %v11360_v40 = vpack.c.bf16 %v11264_v35, %v11260_v12  ;;  %v11261_v27 = vrot.slane %v11187_v50, 3  ;;  %v19210_v35 = vld [vmem:[%s24630_s2 + $0x1244] ss:$8 sps:$4 sm:$0xff]   ;;  %v11278_v50 = vrot.slane %v11194_v42, 3  ;;  %v11202_v42 = vld [vmem:[#allocation3 + $0xf8] sm:$0xf8] }
 0x5ee   : > { %v11267_v12 = vsel %vm3573_vm3, %v11265_v0, %v11266_v6  ;;  %v11285_v0 = vrot.slane %v11197_v60, 3 }
 0x5ef   : > { %11669 = vmatmul.mubr.bf16.gmra.mrb[28].mxu0 %v11179_v8  ;;  %v11262_v8 = vsel %vm3573_vm3, %v11256_v55, %v11261_v27  ;;  %v11193_v27 = vld [vmem:[#allocation3 + $0x90] sm:$0xf8] }
 0x5f0   : > { %11901 = vmatpush1.bf16.msra.mxu0 %v19190_v54  ;;  %11904 = vmatprep.mubr.bf16.mxu0 %v11358_v32  ;;  %v11268_v54 = vrot.slane %v11190_v49, 3  ;;  %v11196_v32 = vld [vmem:[#allocation3 + $0xb8] sm:$0x7]  ;;  %v11359_v59 = vpack.c.bf16 %v11262_v8, %v11257_v5 }
 0x5f1   : > { %11902 = vmatprep.subr.bf16.mxu0 %v19195_v28  ;;  %v11191_v28 = vld [vmem:[#allocation3 + $0x80] sm:$0x7]  ;;  %v19211_v55 = vld [vmem:[%s24630_s2 + $0x1250] ss:$8 sps:$4 sm:$0xff]  }
 0x5f2   : > { %v11270_v29 = vsel %vm3573_vm3, %v11268_v54, %v11269_v58  ;;  %v11271_v13 = vrot.slane %v11191_v28, 3  ;;  %v11276_v54 = vrot.slane %v23267_v21, 3  ;;  %v19216_v58 = vld [vmem:[%s24630_s2 + $0x1264] ss:$8 sps:$4 sm:$0xff]   ;;  %v19214_v21 = vld [vmem:[%s24630_s2 + $0x1260] ss:$8 sps:$4 sm:$0xff]  }
 0x5f4   : > { %11903 = vmatpush1.bf16.msra.mxu0 %v19193_v44  ;;  %v11362_v44 = vpack.c.bf16 %v11274_v31, %v11270_v29  ;;  %v11289_v31 = vrot.slane %v23273_v41, 3  ;;  %v19219_v41 = vld [vmem:[%s24630_s2 + $0x1274] ss:$8 sps:$4 sm:$0xff]  }
 0x5f5   : > { %12626 = vmatprep.subr.bf16.mxu0 %v19198_v20  ;;  %v11283_v20 = vrot.slane %v11196_v32, 3 }
 0x5f7   : > { %11905 = vmatmul.mubr.bf16.vlgmr.msra.gmra.mrb[0].mxu0 %v11357_v9  ;;  %v11284_v45 = vsel %vm3573_vm3, %v11279_v14, %v11283_v20  ;;  %v11195_v9 = vld [vmem:[#allocation3 + $0xb0] sm:$0x7] }
 0x5f8   : > { %11914 = vmatprep.mubr.bf16.mxu0 %v11360_v40  ;;  %12627 = vmatpush1.bf16.msra.mxu0 %v19196_v16  ;;  %v11272_v16 = vsel %vm3573_vm3, %v11266_v6, %v11271_v13  ;;  %v11280_v40 = vsel %vm3573_vm3, %v11278_v50, %v11279_v14  ;;  %v11281_v1 = vrot.slane %v11195_v9, 3  ;;  %v11286_v6 = vrot.slane %v23289_v4, 3  ;;  %v11203_v9 = vld [vmem:[#allocation3 + $0x110] sm:$0x7]  ;;  %v19220_v4 = vld [vmem:[%s24630_s2 + $0x1280] ss:$8 sps:$4 sm:$0xff]  }
 0x5f9   : > { %12628 = vmatprep.subr.bf16.mxu0 %v19201_v24  ;;  %v11200_v24 = vld [vmem:[#allocation3 + $0xe8] sm:$0x7]  ;;  %v11361_v17 = vpack.c.bf16 %v11272_v16, %v11267_v12  ;;  %v11364_v49 = vpack.c.bf16 %v11284_v45, %v11280_v40  ;;  %v11298_v50 = vrot.slane %v11202_v42, 3  ;;  %v11299_v14 = vrot.slane %v23295_v36, 3  ;;  %v19225_v36 = vld [vmem:[%s24630_s2 + $0x1294] ss:$8 sps:$4 sm:$0xff]  }
 0x5fa   : > { %v11293_v18 = vrot.slane %v11200_v24, 3  ;;  %v11282_v28 = vsel %vm3573_vm3, %v11276_v54, %v11281_v1  ;;  %v11287_v12 = vsel %vm3573_vm3, %v11285_v0, %v11286_v6  ;;  %v11201_v40 = vld [vmem:[#allocation3 + $0xf0] sm:$0xf8]  ;;  %v11306_v42 = vrot.slane %v23333_v19, 3  ;;  %v19232_v19 = vld [vmem:[%s24630_s2 + $0x12c0] ss:$8 sps:$4 sm:$0xff]  }
 0x5fb   : > { %v11319_v0 = vrot.slane %v23339_v33, 3  ;;  %v19237_v33 = vld [vmem:[%s24630_s2 + $0x12d4] ss:$8 sps:$4 sm:$0xff]  }
 0x5fc   : > { %12629 = vmatpush1.bf16.msra.mxu0 %v19199_v11  ;;  %v11198_v11 = vld [vmem:[#allocation3 + $0xc8] sm:$0xf8]  ;;  %v11294_v5 = vsel %vm3573_vm3, %v11289_v31, %v11293_v18  ;;  %v11295_v18 = vrot.slane %v11201_v40, 3 }
 0x5fd   : > { %12630 = vmatprep.subr.bf16.mxu0 %v19204_v62  ;;  %v11275_v62 = vrot.slane %v11193_v27, 3  ;;  %v11288_v8 = vrot.slane %v11198_v11, 3  ;;  %v11301_v27 = vrot.slane %v11203_v9, 3  ;;  %v19223_v11 = vld [vmem:[%s24630_s2 + $0x1290] ss:$8 sps:$4 sm:$0xff]  }
 0x5ff   : > { %11915 = vmatmul.mubr.bf16.gmra.mrb[4].mxu0 %v11359_v59  ;;  %v11277_v32 = vsel %vm3573_vm3, %v11275_v62, %v11276_v54  ;;  %v11204_v59 = vld [vmem:[#allocation3 + $0x118] sm:$0x7]  ;;  %v19228_v62 = vld [vmem:[%s24630_s2 + $0x12a4] ss:$8 sps:$4 sm:$0xff]  }
 0x600   : > { %11924 = vmatprep.mubr.bf16.mxu0 %v11362_v44  ;;  %12631 = vmatpush1.bf16.msra.mxu0 %v19202_v30  ;;  %v11199_v30 = vld [vmem:[#allocation3 + $0xe0] sm:$0x7]  ;;  %v11363_v29 = vpack.c.bf16 %v11282_v28, %v11277_v32  ;;  %v11303_v20 = vrot.slane %v11204_v59, 3  ;;  %v11205_v59 = vld [vmem:[#allocation3 + $0x120] sm:$0xf8] }
 0x601   : > { %12632 = vmatprep.subr.bf16.mxu0 %v19207_v43  ;;  %v11290_v43 = vsel %vm3573_vm3, %v11288_v8, %v11289_v31  ;;  %v11291_v13 = vrot.slane %v11199_v30, 3  ;;  %v11207_v28 = vld [vmem:[#allocation3 + $0x140] sm:$0x7]  ;;  %v11212_v30 = vld [vmem:[#allocation3 + $0x178] sm:$0x7] }
 0x602   : > { %v11366_v44 = vpack.c.bf16 %v11294_v5, %v11290_v43  ;;  %v11304_v45 = vsel %vm3573_vm3, %v11299_v14, %v11303_v20  ;;  %v11311_v43 = vrot.slane %v11207_v28, 3  ;;  %v11323_v60 = vrot.slane %v11212_v30, 3  ;;  %v19234_v20 = vld [vmem:[%s24630_s2 + $0x12c4] ss:$8 sps:$4 sm:$0xff]  }
 0x603   : > { %v11292_v16 = vsel %vm3573_vm3, %v11286_v6, %v11291_v13  ;;  %v11305_v13 = vrot.slane %v11205_v59, 3  ;;  %v19246_v59 = vld [vmem:[%s24630_s2 + $0x1904] ss:$8 sps:$4 sm:$0xff]  }
 0x604   : > { %12633 = vmatpush1.bf16.msra.mxu0 %v19205_v39  ;;  %v19217_v39 = vld [vmem:[%s24630_s2 + $0x1270] ss:$8 sps:$4 sm:$0xff]   ;;  %v11365_v24 = vpack.c.bf16 %v11292_v16, %v11287_v12  ;;  %v11312_v6 = vsel %vm3573_vm3, %v11306_v42, %v11311_v43  ;;  %v12052_v16 = vld [vmem:[#allocation2 + $0x28] sm:$0xf]  ;;  %v12127_v43 = vrot.slane %v23383_v51, 4 }
 0x605   : > { %12634 = vmatprep.subr.bf16.mxu0 %v19210_v35  ;;  %v19222_v35 = vld [vmem:[%s24630_s2 + $0x1284] ss:$8 sps:$4 sm:$0xff]   ;;  %v11209_v12 = vld [vmem:[#allocation3 + $0x150] sm:$0xf8] }
 0x606   : > { %v11315_v40 = vrot.slane %v11209_v12, 3  ;;  %v19249_v51 = vld [vmem:[%s24630_s2 + $0x1914] ss:$8 sps:$4 sm:$0xff]   ;;  %v12137_v12 = vrot.slane %v23405_v46, 4 }
 0x607   : > { %11925 = vmatmul.mubr.bf16.gmra.mrb[8].mxu0 %v11361_v17  ;;  %v11300_v17 = vsel %vm3573_vm3, %v11298_v50, %v11299_v14  ;;  %v11211_v50 = vld [vmem:[#allocation3 + $0x170] sm:$0x7]  ;;  %v11307_v14 = vsel %vm3573_vm3, %v11305_v13, %v11306_v42  ;;  %v12060_v42 = vld [vmem:[#allocation2 + $0x88] sm:$0xf]  ;;  %v19255_v46 = vld [vmem:[%s24630_s2 + $0x1934] ss:$8 sps:$4 sm:$0xff]  }
 0x608   : > { %11934 = vmatprep.mubr.bf16.mxu0 %v11364_v49  ;;  %12635 = vmatpush1.bf16.msra.mxu0 %v19208_v57  ;;  %v11208_v57 = vld [vmem:[#allocation3 + $0x148] sm:$0x7]  ;;  %v11206_v49 = vld [vmem:[#allocation3 + $0x128] sm:$0xf8] }
 0x609   : > { %12636 = vmatprep.subr.bf16.mxu0 %v19213_v23  ;;  %v11368_v23 = vpack.c.bf16 %v11304_v45, %v11300_v17  ;;  %v11313_v1 = vrot.slane %v11208_v57, 3  ;;  %v11308_v54 = vrot.slane %v11206_v49, 3  ;;  %v11369_v45 = vpack.c.bf16 %v11312_v6, %v11307_v14 }
 0x60a   : > { %v11321_v57 = vrot.slane %v11211_v50, 3  ;;  %v12121_v17 = vrot.slane %v12052_v16, 4  ;;  %v12058_v50 = vld [vmem:[#allocation2 + $0x68] sm:$0xf0]  ;;  %v12141_v14 = vrot.slane %v12060_v42, 4  ;;  %v12157_v42 = vrot.slane %v23449_v63, 4 }
 0x60b   : > { %v19267_v63 = vld [vmem:[%s24630_s2 + $0x1974] ss:$8 sps:$4 sm:$0xff]  }
 0x60c   : > { %12637 = vmatpush1.bf16.msra.mxu0 %v19211_v55  ;;  %v11296_v55 = vrot.slane %v23311_v52, 3  ;;  %v19226_v52 = vld [vmem:[%s24630_s2 + $0x12a0] ss:$8 sps:$4 sm:$0xff]  }
 0x60d   : > { %12638 = vmatprep.subr.bf16.mxu0 %v19216_v58  ;;  %v11309_v58 = vrot.slane %v23317_v47, 3  ;;  %v19231_v47 = vld [vmem:[%s24630_s2 + $0x12b4] ss:$8 sps:$4 sm:$0xff]  }
 0x60e   : > { %v11302_v8 = vsel %vm3573_vm3, %v11296_v55, %v11301_v27  ;;  %v11297_v5 = vsel %vm3573_vm3, %v11295_v18, %v11296_v55  ;;  %v19240_v27 = vld [vmem:[%s24630_s2 + $0x12e4] ss:$8 sps:$4 sm:$0xff]   ;;  %v12051_v55 = vld [vmem:[#allocation2 + $0x20] sm:$0xf] }
 0x60f   : > { %11935 = vmatmul.mubr.bf16.gmra.mrb[12].mxu0 %v11363_v29  ;;  %v11314_v31 = vsel %vm3573_vm3, %v11309_v58, %v11313_v1  ;;  %v11367_v32 = vpack.c.bf16 %v11302_v8, %v11297_v5  ;;  %v12117_v1 = vrot.slane %v23361_v61, 4  ;;  %v19243_v61 = vld [vmem:[%s24630_s2 + $0x12f4] ss:$8 sps:$4 sm:$0xff]   ;;  %v12119_v5 = vrot.slane %v12051_v55, 4  ;;  %v19253_v55 = vld [vmem:[%s24630_s2 + $0x1930] ss:$8 sps:$4 sm:$0xff]  }
 0x610   : > { %11944 = vmatprep.mubr.bf16.mxu0 %v11366_v44  ;;  %12639 = vmatpush1.bf16.msra.mxu0 %v19214_v21  ;;  %v11310_v21 = vsel %vm3573_vm3, %v11308_v54, %v11309_v58  ;;  %v19229_v44 = vld [vmem:[%s24630_s2 + $0x12b0] ss:$8 sps:$4 sm:$0xff]  }
 0x611   : > { %12640 = vmatprep.subr.bf16.mxu0 %v19219_v41  ;;  %v11370_v29 = vpack.c.bf16 %v11314_v31, %v11310_v21  ;;  %v11210_v41 = vld [vmem:[#allocation3 + $0x158] sm:$0xf8]  ;;  %v12122_v18 = vsel %vm4634_vm4, %v12117_v1, %v12121_v17  ;;  %v12049_v31 = vld [vmem:[#allocation2] sm:$0xf0] }
 0x612   : > { %v12056_v54 = vld [vmem:[#allocation2 + $0x58] sm:$0xf]  ;;  %v12113_v21 = vrot.slane %v12049_v31, 4 }
 0x613   : > { %v12131_v30 = vrot.slane %v12056_v54, 4  ;;  %v19258_v54 = vld [vmem:[%s24630_s2 + $0x1944] ss:$8 sps:$4 sm:$0xff]  }
 0x614   : > { %12641 = vmatpush1.bf16.msra.mxu0 %v19217_v39  ;;  %v11318_v39 = vrot.slane %v11210_v41, 3 }
 0x615   : > { %12642 = vmatprep.subr.bf16.mxu0 %v19222_v35  ;;  %v11324_v35 = vsel %vm3573_vm3, %v11319_v0, %v11323_v60  ;;  %v12132_v60 = vsel %vm4634_vm4, %v12127_v43, %v12131_v30 }
 0x616   : > { %v11320_v9 = vsel %vm3573_vm3, %v11318_v39, %v11319_v0  ;;  %v12053_v0 = vld [vmem:[#allocation2 + $0x30] sm:$0xf0] }
 0x617   : > { %11945 = vmatmul.mubr.bf16.gmra.mrb[16].mxu0 %v11365_v24  ;;  %v12050_v24 = vld [vmem:[#allocation2 + $0x8] sm:$0xf0]  ;;  %v12123_v16 = vrot.slane %v12053_v0, 4 }
 0x618   : > { %11954 = vmatprep.mubr.bf16.mxu0 %v11368_v23  ;;  %12643 = vmatpush1.bf16.msra.mxu0 %v19220_v4  ;;  %v11372_v4 = vpack.c.bf16 %v11324_v35, %v11320_v9  ;;  %v11316_v23 = vrot.slane %v23355_v3, 3  ;;  %v12116_v49 = vrot.slane %v12050_v24, 4  ;;  %v19238_v3 = vld [vmem:[%s24630_s2 + $0x12e0] ss:$8 sps:$4 sm:$0xff]   ;;  %v19252_v9 = vld [vmem:[%s24630_s2 + $0x1924] ss:$8 sps:$4 sm:$0xff]  }
 0x619   : > { %12644 = vmatprep.subr.bf16.mxu0 %v19225_v36  ;;  %v19235_v36 = vld [vmem:[%s24630_s2 + $0x12d0] ss:$8 sps:$4 sm:$0xff]   ;;  %v12059_v24 = vld [vmem:[#allocation2 + $0x80] sm:$0xf] }
 0x61a   : > { %v12118_v8 = vsel %vm4634_vm4, %v12116_v49, %v12117_v1  ;;  %v12139_v1 = vrot.slane %v12059_v24, 4 }
 0x61b   : > { %v12226_v28 = vpack.c.bf16 %v12122_v18, %v12118_v8  ;;  %v12147_v8 = vrot.slane %v23427_v37, 4  ;;  %v19261_v37 = vld [vmem:[%s24630_s2 + $0x1954] ss:$8 sps:$4 sm:$0xff]  }
 0x61c   : > { %12645 = vmatpush1.bf16.msra.mxu0 %v19223_v11  ;;  %v11322_v11 = vsel %vm3573_vm3, %v11316_v23, %v11321_v57  ;;  %v12142_v57 = vsel %vm4634_vm4, %v12137_v12, %v12141_v14  ;;  %v12065_v14 = vld [vmem:[#allocation2 + $0xc0] sm:$0xf0] }
 0x61d   : > { %12646 = vmatprep.subr.bf16.mxu0 %v19228_v62  ;;  %v11317_v62 = vsel %vm3573_vm3, %v11315_v40, %v11316_v23 }
 0x61e   : > { %v11371_v58 = vpack.c.bf16 %v11322_v11, %v11317_v62  ;;  %v12062_v11 = vld [vmem:[#allocation2 + $0x98] sm:$0xf0] }
 0x61f   : > { %11955 = vmatmul.mubr.bf16.gmra.mrb[20].mxu0 %v11367_v32  ;;  %v19241_v32 = vld [vmem:[%s24630_s2 + $0x12f0] ss:$8 sps:$4 sm:$0xff]  }
 0x620   : > { %11964 = vmatprep.mubr.bf16.mxu0 %v11370_v29  ;;  %12647 = vmatpush1.bf16.msra.mxu0 %v19226_v52  ;;  %v12054_v52 = vld [vmem:[#allocation2 + $0x38] sm:$0xf0] }
 0x621   : > { %12648 = vmatprep.subr.bf16.mxu0 %v19231_v47  ;;  %v12114_v47 = vrot.slane %v23377_v7, 4  ;;  %v12126_v29 = vrot.slane %v12054_v52, 4  ;;  %v19244_v7 = vld [vmem:[%s24630_s2 + $0x1900] ss:$8 sps:$4 sm:$0xff]  }
 0x622   : > { %v12068_v52 = vld [vmem:[#allocation2 + $0xe8] sm:$0xf] }
 0x623   : > { %v12120_v41 = vsel %vm4634_vm4, %v12114_v47, %v12119_v5  ;;  %v12115_v13 = vsel %vm4634_vm4, %v12113_v21, %v12114_v47  ;;  %v12128_v39 = vsel %vm4634_vm4, %v12126_v29, %v12127_v43  ;;  %v12061_v21 = vld [vmem:[#allocation2 + $0x90] sm:$0xf0]  ;;  %v12066_v29 = vld [vmem:[#allocation2 + $0xc8] sm:$0xf0]  ;;  %v12161_v43 = vrot.slane %v12068_v52, 4 }
 0x624   : > { %12649 = vmatpush1.bf16.msra.mxu0 %v19229_v44  ;;  %v12055_v44 = vld [vmem:[#allocation2 + $0x50] sm:$0xf]  ;;  %v12228_v6 = vpack.c.bf16 %v12132_v60, %v12128_v39  ;;  %v12143_v60 = vrot.slane %v12061_v21, 4  ;;  %v12073_v21 = vld [vmem:[#allocation2 + $0x120] sm:$0xf0] }
 0x625   : > { %12650 = vmatprep.subr.bf16.mxu0 %v19234_v20  ;;  %v12225_v20 = vpack.c.bf16 %v12120_v41, %v12115_v13  ;;  %v12129_v35 = vrot.slane %v12055_v44, 4  ;;  %v19259_v41 = vld [vmem:[%s24630_s2 + $0x1950] ss:$8 sps:$4 sm:$0xff]   ;;  %v12144_v44 = vrot.slane %v23443_v48, 4  ;;  %v19264_v13 = vld [vmem:[%s24630_s2 + $0x1964] ss:$8 sps:$4 sm:$0xff]   ;;  %v12162_v39 = vsel %vm4634_vm4, %v12157_v42, %v12161_v43 }
 0x626   : > { %v19262_v48 = vld [vmem:[%s24630_s2 + $0x1960] ss:$8 sps:$4 sm:$0xff]  }
 0x627   : > { %11965 = vmatmul.mubr.bf16.gmra.mrb[24].mxu0 %v11369_v45  ;;  %v12124_v45 = vrot.slane %v23399_v2, 4  ;;  %v19250_v2 = vld [vmem:[%s24630_s2 + $0x1920] ss:$8 sps:$4 sm:$0xff]   ;;  %v12145_v0 = vsel %vm4634_vm4, %v12143_v60, %v12144_v44  ;;  %v12173_v60 = vrot.slane %v12073_v21, 4 }
 0x628   : > { %11974 = vmatprep.mubr.bf16.mxu0 %v11372_v4  ;;  %12651 = vmatpush1.bf16.msra.mxu0 %v19232_v19  ;;  %v19247_v19 = vld [vmem:[%s24630_s2 + $0x1910] ss:$8 sps:$4 sm:$0xff]  }
 0x629   : > { %12652 = vmatprep.subr.bf16.mxu0 %v19237_v33  ;;  %v12136_v33 = vrot.slane %v12058_v50, 4  ;;  %v12130_v4 = vsel %vm4634_vm4, %v12124_v45, %v12129_v35  ;;  %v12125_v17 = vsel %vm4634_vm4, %v12123_v16, %v12124_v45  ;;  %v12070_v45 = vld [vmem:[#allocation2 + $0xf8] sm:$0xf0] }
 0x62a   : > { %v12227_v40 = vpack.c.bf16 %v12130_v4, %v12125_v17  ;;  %v12154_v4 = vrot.slane %v23465_v25, 4  ;;  %v12166_v24 = vrot.slane %v12070_v45, 4  ;;  %v12167_v17 = vrot.slane %v23471_v34, 4  ;;  %v19268_v25 = vld [vmem:[%s24630_s2 + $0x1980] ss:$8 sps:$4 sm:$0xff]  }
 0x62b   : > { %v12138_v23 = vsel %vm4634_vm4, %v12136_v33, %v12137_v12  ;;  %v19265_v33 = vld [vmem:[%s24630_s2 + $0x1970] ss:$8 sps:$4 sm:$0xff]   ;;  %v12153_v12 = vrot.slane %v12065_v14, 4  ;;  %v19273_v34 = vld [vmem:[%s24630_s2 + $0x1994] ss:$8 sps:$4 sm:$0xff]  }
 0x62c   : > { %12653 = vmatpush1.bf16.msra.mxu0 %v19235_v36  ;;  %v12064_v36 = vld [vmem:[#allocation2 + $0xb8] sm:$0xf]  ;;  %v12230_v49 = vpack.c.bf16 %v12142_v57, %v12138_v23  ;;  %v19270_v57 = vld [vmem:[%s24630_s2 + $0x1984] ss:$8 sps:$4 sm:$0xff]   ;;  %v12077_v14 = vld [vmem:[#allocation2 + $0x150] sm:$0xf0] }
 0x62d   : > { %12654 = vmatprep.subr.bf16.mxu0 %v19240_v27  ;;  %v12057_v27 = vld [vmem:[#allocation2 + $0x60] sm:$0xf0]  ;;  %v12151_v18 = vrot.slane %v12064_v36, 4  ;;  %v12155_v23 = vsel %vm4634_vm4, %v12153_v12, %v12154_v4  ;;  %v12242_v45 = vld [vmem:[#allocation3 + $0x8] sm:$0xf0]  ;;  %v12183_v12 = vrot.slane %v12077_v14, 4 }
 0x62e   : > { %v12133_v62 = vrot.slane %v12057_v27, 4  ;;  %v12256_v14 = vld [vmem:[#allocation3 + $0xb8] sm:$0xf] }
 0x62f   : > { %11975 = vmatmul.mubr.bf16.gmra.mrb[28].mxu0 %v11371_v58  ;;  %v12146_v58 = vrot.slane %v12062_v11, 4  ;;  %v12152_v31 = vsel %vm4634_vm4, %v12147_v8, %v12151_v18 }
 0x630   : > { %12655 = vmatpush1.bf16.msra.mxu0 %v19238_v3  ;;  %12658 = vmatprep.mubr.bf16.mxu0 %v12226_v28  ;;  %v12134_v3 = vrot.slane %v23421_v15, 4  ;;  %v12063_v28 = vld [vmem:[#allocation2 + $0xb0] sm:$0xf]  ;;  %v19256_v15 = vld [vmem:[%s24630_s2 + $0x1940] ss:$8 sps:$4 sm:$0xff]  }
 0x631   : > { %12656 = vmatprep.subr.bf16.mxu0 %v19243_v61 }
 0x632   : > { %v12140_v61 = vsel %vm4634_vm4, %v12134_v3, %v12139_v1  ;;  %v12135_v5 = vsel %vm4634_vm4, %v12133_v62, %v12134_v3  ;;  %v12069_v1 = vld [vmem:[#allocation2 + $0xf0] sm:$0xf0]  ;;  %v19271_v3 = vld [vmem:[%s24630_s2 + $0x1990] ss:$8 sps:$4 sm:$0xff]  }
 0x633   : > { %v12229_v30 = vpack.c.bf16 %v12140_v61, %v12135_v5 }
 0x634   : > { %12657 = vmatpush1.bf16.msra.mxu0 %v19241_v32  ;;  %v12148_v32 = vsel %vm4634_vm4, %v12146_v58, %v12147_v8  ;;  %v12164_v58 = vrot.slane %v23487_v10, 4  ;;  %v19276_v8 = vld [vmem:[%s24630_s2 + $0x19a4] ss:$8 sps:$4 sm:$0xff]   ;;  %v19274_v10 = vld [vmem:[%s24630_s2 + $0x19a0] ss:$8 sps:$4 sm:$0xff]  }
 0x635   : > { %12932 = vmatprep.subr.bf16.mxu0 %v19246_v59  ;;  %v12232_v47 = vpack.c.bf16 %v12152_v31, %v12148_v32  ;;  %v12149_v59 = vrot.slane %v12063_v28, 4  ;;  %v12177_v31 = vrot.slane %v23493_v53, 4  ;;  %v19279_v53 = vld [vmem:[%s24630_s2 + $0x19b4] ss:$8 sps:$4 sm:$0xff]  }
 0x637   : > { %12659 = vmatmul.mubr.bf16.vlgmr.msra.gmra.mrb[0].mxu0 %v12225_v20  ;;  %v12150_v20 = vsel %vm4634_vm4, %v12144_v44, %v12149_v59  ;;  %v12174_v44 = vrot.slane %v23509_v22, 4  ;;  %v19280_v22 = vld [vmem:[%s24630_s2 + $0x19c0] ss:$8 sps:$4 sm:$0xff]  }
 0x638   : > { %12668 = vmatprep.mubr.bf16.mxu0 %v12228_v6  ;;  %12933 = vmatpush1.bf16.msra.mxu0 %v19244_v7  ;;  %v12156_v7 = vrot.slane %v12066_v29, 4  ;;  %v12072_v6 = vld [vmem:[#allocation2 + $0x118] sm:$0xf]  ;;  %v12231_v35 = vpack.c.bf16 %v12150_v20, %v12145_v0  ;;  %v12078_v29 = vld [vmem:[#allocation2 + $0x158] sm:$0xf0] }
 0x639   : > { %12934 = vmatprep.subr.bf16.mxu0 %v19249_v51  ;;  %v12067_v51 = vld [vmem:[#allocation2 + $0xe0] sm:$0xf]  ;;  %v12079_v0 = vld [vmem:[#allocation2 + $0x170] sm:$0xf] }
 0x63a   : > { %v12158_v50 = vsel %vm4634_vm4, %v12156_v7, %v12157_v42  ;;  %v12159_v16 = vrot.slane %v12067_v51, 4  ;;  %v12186_v7 = vrot.slane %v12078_v29, 4  ;;  %v23805_v42 = vld [vmem:[#allocation2 + $0x168] sm:$0xff] }
 0x63b   : > { %v12187_v20 = vrot.slane %v23805_v42, 4 }
 0x63c   : > { %12935 = vmatpush1.bf16.msra.mxu0 %v19247_v19  ;;  %v12234_v19 = vpack.c.bf16 %v12162_v39, %v12158_v50 }
 0x63d   : > { %12936 = vmatprep.subr.bf16.mxu0 %v19252_v9  ;;  %v12171_v9 = vrot.slane %v12072_v6, 4  ;;  %v12244_v6 = vld [vmem:[#allocation3 + $0x28] sm:$0xf]  ;;  %v12188_v50 = vsel %vm4634_vm4, %v12186_v7, %v12187_v20  ;;  %v23863_v7 = vld [vmem:[#allocation3 + $0x40] sm:$0xff] }
 0x63f   : > { %12669 = vmatmul.mubr.bf16.gmra.mrb[4].mxu0 %v12227_v40  ;;  %v12172_v36 = vsel %vm4634_vm4, %v12167_v17, %v12171_v9  ;;  %v12071_v40 = vld [vmem:[#allocation2 + $0x110] sm:$0xf]  ;;  %v12313_v9 = vrot.slane %v12244_v6, 4 }
 0x640   : > { %12678 = vmatprep.mubr.bf16.mxu0 %v12230_v49  ;;  %12937 = vmatpush1.bf16.msra.mxu0 %v19250_v2  ;;  %v12160_v2 = vsel %vm4634_vm4, %v12154_v4, %v12159_v16  ;;  %v12168_v49 = vsel %vm4634_vm4, %v12166_v24, %v12167_v17  ;;  %v12169_v18 = vrot.slane %v12071_v40, 4  ;;  %v12189_v16 = vrot.slane %v12079_v0, 4  ;;  %v23825_v17 = vld [vmem:[#allocation3 + $0x18] sm:$0xff] }
 0x641   : > { %12938 = vmatprep.subr.bf16.mxu0 %v19255_v46  ;;  %v12076_v46 = vld [vmem:[#allocation2 + $0x148] sm:$0xf]  ;;  %v12233_v27 = vpack.c.bf16 %v12160_v2, %v12155_v23  ;;  %v12236_v11 = vpack.c.bf16 %v12172_v36, %v12168_v49  ;;  %v12184_v4 = vrot.slane %v23529_v38, 4  ;;  %v12308_v24 = vrot.slane %v12242_v45, 4  ;;  %v12243_v23 = vld [vmem:[#allocation3 + $0x20] sm:$0xf] }
 0x642   : > { %v12181_v62 = vrot.slane %v12076_v46, 4  ;;  %v12170_v28 = vsel %vm4634_vm4, %v12164_v58, %v12169_v18  ;;  %v12309_v2 = vrot.slane %v23825_v17, 4  ;;  %v19286_v38 = vld [vmem:[%s24630_s2 + $0x19e0] ss:$8 sps:$4 sm:$0xff]   ;;  %v12248_v46 = vld [vmem:[#allocation3 + $0x58] sm:$0xf] }
 0x643   : > { %v12190_v36 = vsel %vm4634_vm4, %v12184_v4, %v12189_v16  ;;  %v12311_v18 = vrot.slane %v12243_v23, 4  ;;  %v23869_v0 = vld [vmem:[#allocation3 + $0x78] sm:$0xff]  ;;  %v19306_v23 = vld [vmem:[%s24630_s2 + $0x1344] ss:$8 sps:$4 sm:$0xff]  }
 0x644   : > { %12939 = vmatpush1.bf16.msra.mxu0 %v19253_v55  ;;  %v12074_v55 = vld [vmem:[#allocation2 + $0x128] sm:$0xf0]  ;;  %v12182_v5 = vsel %vm4634_vm4, %v12177_v31, %v12181_v62  ;;  %v12314_v40 = vsel %vm4634_vm4, %v12309_v2, %v12313_v9  ;;  %v12310_v49 = vsel %vm4634_vm4, %v12308_v24, %v12309_v2  ;;  %v12323_v62 = vrot.slane %v12248_v46, 4  ;;  %v19303_v45 = vld [vmem:[%s24630_s2 + $0x1334] ss:$8 sps:$4 sm:$0xff]  }
 0x645   : > { %12940 = vmatprep.subr.bf16.mxu0 %v19258_v54  ;;  %v12163_v54 = vrot.slane %v12069_v1, 4  ;;  %v12176_v61 = vrot.slane %v12074_v55, 4  ;;  %v12241_v1 = vld [vmem:[#allocation3] sm:$0xf0]  ;;  %v12246_v55 = vld [vmem:[#allocation3 + $0x38] sm:$0xf0] }
 0x646   : > { %v12249_v9 = vld [vmem:[#allocation3 + $0x60] sm:$0xf0]  ;;  %v19301_v24 = vld [vmem:[%s24630_s2 + $0x1330] ss:$8 sps:$4 sm:$0xff]  }
 0x647   : > { %12679 = vmatmul.mubr.bf16.gmra.mrb[8].mxu0 %v12229_v30  ;;  %v12165_v52 = vsel %vm4634_vm4, %v12163_v54, %v12164_v58  ;;  %v12080_v30 = vld [vmem:[#allocation2 + $0x178] sm:$0xf]  ;;  %v12305_v54 = vrot.slane %v12241_v1, 4  ;;  %v23841_v58 = vld [vmem:[#allocation3 + $0x10] sm:$0xff]  ;;  %v12325_v2 = vrot.slane %v12249_v9, 4 }
 0x648   : > { %12688 = vmatprep.mubr.bf16.mxu0 %v12232_v47  ;;  %12941 = vmatpush1.bf16.msra.mxu0 %v19256_v15  ;;  %v12075_v15 = vld [vmem:[#allocation2 + $0x140] sm:$0xf]  ;;  %v12235_v32 = vpack.c.bf16 %v12170_v28, %v12165_v52  ;;  %v12191_v43 = vrot.slane %v12080_v30, 4  ;;  %v23847_v28 = vld [vmem:[#allocation3 + $0x48] sm:$0xff] }
 0x649   : > { %12942 = vmatprep.subr.bf16.mxu0 %v19261_v37  ;;  %v12178_v37 = vsel %vm4634_vm4, %v12176_v61, %v12177_v31  ;;  %v12179_v59 = vrot.slane %v12075_v15, 4  ;;  %v19294_v61 = vld [vmem:[%s24630_s2 + $0x1304] ss:$8 sps:$4 sm:$0xff]   ;;  %v12318_v31 = vrot.slane %v12246_v55, 4 }
 0x64a   : > { %v12238_v47 = vpack.c.bf16 %v12182_v5, %v12178_v37  ;;  %v12192_v51 = vsel %vm4634_vm4, %v12187_v20, %v12191_v43  ;;  %v12319_v5 = vrot.slane %v23847_v28, 4  ;;  %v12252_v37 = vld [vmem:[#allocation3 + $0x88] sm:$0xf]  ;;  %v12316_v20 = vrot.slane %v23863_v7, 4 }
 0x64b   : > { %v12180_v39 = vsel %vm4634_vm4, %v12174_v44, %v12179_v59  ;;  %v12245_v59 = vld [vmem:[#allocation3 + $0x30] sm:$0xf0] }
 0x64c   : > { %12943 = vmatpush1.bf16.msra.mxu0 %v19259_v41  ;;  %v19277_v41 = vld [vmem:[%s24630_s2 + $0x19b0] ss:$8 sps:$4 sm:$0xff]   ;;  %v12324_v52 = vsel %vm4634_vm4, %v12319_v5, %v12323_v62  ;;  %v12320_v21 = vsel %vm4634_vm4, %v12318_v31, %v12319_v5  ;;  %v12258_v31 = vld [vmem:[#allocation3 + $0xc8] sm:$0xf0] }
 0x64d   : > { %12944 = vmatprep.subr.bf16.mxu0 %v19264_v13  ;;  %v19282_v13 = vld [vmem:[%s24630_s2 + $0x19c4] ss:$8 sps:$4 sm:$0xff]   ;;  %v12420_v29 = vpack.c.bf16 %v12324_v52, %v12320_v21 }
 0x64f   : > { %12689 = vmatmul.mubr.bf16.gmra.mrb[12].mxu0 %v12231_v35 }
 0x650   : > { %12698 = vmatprep.mubr.bf16.mxu0 %v12234_v19  ;;  %12945 = vmatpush1.bf16.msra.mxu0 %v19262_v48  ;;  %v12175_v48 = vsel %vm4634_vm4, %v12173_v60, %v12174_v44  ;;  %v12240_v19 = vpack.c.bf16 %v12192_v51, %v12188_v50  ;;  %v12333_v60 = vrot.slane %v12252_v37, 4  ;;  %v19295_v44 = vld [vmem:[%s24630_s2 + $0x1310] ss:$8 sps:$4 sm:$0xff]   ;;  %v12348_v37 = vrot.slane %v12258_v31, 4 }
 0x651   : > { %12946 = vmatprep.subr.bf16.mxu0 %v19267_v63  ;;  %v12237_v35 = vpack.c.bf16 %v12180_v39, %v12175_v48  ;;  %v19285_v63 = vld [vmem:[%s24630_s2 + $0x19d4] ss:$8 sps:$4 sm:$0xff]   ;;  %v19300_v39 = vld [vmem:[%s24630_s2 + $0x1324] ss:$8 sps:$4 sm:$0xff]   ;;  %v12329_v48 = vrot.slane %v23869_v0, 4 }
 0x653   : > { %v12334_v6 = vsel %vm4634_vm4, %v12329_v48, %v12333_v60  ;;  %v12264_v60 = vld [vmem:[#allocation3 + $0x118] sm:$0xf] }
 0x654   : > { %12947 = vmatpush1.bf16.msra.mxu0 %v19265_v33  ;;  %v19283_v33 = vld [vmem:[%s24630_s2 + $0x19d0] ss:$8 sps:$4 sm:$0xff]  }
 0x655   : > { %12948 = vmatprep.subr.bf16.mxu0 %v19270_v57  ;;  %v19288_v57 = vld [vmem:[%s24630_s2 + $0x19e4] ss:$8 sps:$4 sm:$0xff]  }
 0x657   : > { %12699 = vmatmul.mubr.bf16.gmra.mrb[16].mxu0 %v12233_v27 }
 0x658   : > { %12708 = vmatprep.mubr.bf16.mxu0 %v12236_v11  ;;  %12949 = vmatpush1.bf16.msra.mxu0 %v19268_v25  ;;  %v12185_v25 = vsel %vm4634_vm4, %v12183_v12, %v12184_v4  ;;  %v12418_v11 = vpack.c.bf16 %v12314_v40, %v12310_v49  ;;  %v12254_v4 = vld [vmem:[#allocation3 + $0x98] sm:$0xf0] }
 0x659   : > { %12950 = vmatprep.subr.bf16.mxu0 %v19273_v34  ;;  %v12239_v27 = vpack.c.bf16 %v12190_v36, %v12185_v25  ;;  %v19291_v34 = vld [vmem:[%s24630_s2 + $0x19f4] ss:$8 sps:$4 sm:$0xff]   ;;  %v12338_v25 = vrot.slane %v12254_v4, 4  ;;  %v12263_v4 = vld [vmem:[#allocation3 + $0x110] sm:$0xf] }
 0x65a   : > { %v23885_v36 = vld [vmem:[#allocation3 + $0x70] sm:$0xff] }
 0x65b   : > { %v12326_v40 = vrot.slane %v23885_v36, 4 }
 0x65c   : > { %12951 = vmatpush1.bf16.msra.mxu0 %v19271_v3  ;;  %v19289_v3 = vld [vmem:[%s24630_s2 + $0x19f0] ss:$8 sps:$4 sm:$0xff]  }
 0x65d   : > { %12952 = vmatprep.subr.bf16.mxu0 %v19276_v8  ;;  %v12306_v8 = vrot.slane %v23841_v58, 4  ;;  %v12327_v1 = vsel %vm4634_vm4, %v12325_v2, %v12326_v40  ;;  %v12268_v2 = vld [vmem:[#allocation3 + $0x148] sm:$0xf] }
 0x65f   : > { %12709 = vmatmul.mubr.bf16.gmra.mrb[20].mxu0 %v12235_v32  ;;  %v12312_v15 = vsel %vm4634_vm4, %v12306_v8, %v12311_v18  ;;  %v12307_v30 = vsel %vm4634_vm4, %v12305_v54, %v12306_v8  ;;  %v19292_v32 = vld [vmem:[%s24630_s2 + $0x1300] ss:$8 sps:$4 sm:$0xff]   ;;  %v12253_v54 = vld [vmem:[#allocation3 + $0x90] sm:$0xf0] }
 0x660   : > { %12718 = vmatprep.mubr.bf16.mxu0 %v12238_v47  ;;  %12953 = vmatpush1.bf16.msra.mxu0 %v19274_v10  ;;  %v12247_v10 = vld [vmem:[#allocation3 + $0x50] sm:$0xf]  ;;  %v19297_v47 = vld [vmem:[%s24630_s2 + $0x1314] ss:$8 sps:$4 sm:$0xff]   ;;  %v12260_v18 = vld [vmem:[#allocation3 + $0xe8] sm:$0xf] }
 0x661   : > { %12954 = vmatprep.subr.bf16.mxu0 %v19279_v53  ;;  %v12417_v53 = vpack.c.bf16 %v12312_v15, %v12307_v30  ;;  %v12321_v43 = vrot.slane %v12247_v10, 4  ;;  %v12353_v5 = vrot.slane %v12260_v18, 4  ;;  %v19307_v15 = vld [vmem:[%s24630_s2 + $0x1350] ss:$8 sps:$4 sm:$0xff]   ;;  %v12335_v52 = vrot.slane %v12253_v54, 4  ;;  %v23907_v10 = vld [vmem:[#allocation3 + $0xa0] sm:$0xff] }
 0x662   : > { %v12336_v30 = vrot.slane %v23907_v10, 4 }
 0x664   : > { %12955 = vmatpush1.bf16.msra.mxu0 %v19277_v41  ;;  %v12250_v41 = vld [vmem:[#allocation3 + $0x68] sm:$0xf0] }
 0x665   : > { %12956 = vmatprep.subr.bf16.mxu0 %v19282_v13  ;;  %v12315_v13 = vrot.slane %v12245_v59, 4  ;;  %v12328_v51 = vrot.slane %v12250_v41, 4  ;;  %v19310_v41 = vld [vmem:[%s24630_s2 + $0x1360] ss:$8 sps:$4 sm:$0xff]  }
 0x667   : > { %12719 = vmatmul.mubr.bf16.gmra.mrb[24].mxu0 %v12237_v35  ;;  %v12251_v35 = vld [vmem:[#allocation3 + $0x80] sm:$0xf]  ;;  %v12317_v50 = vsel %vm4634_vm4, %v12315_v13, %v12316_v20  ;;  %v12330_v16 = vsel %vm4634_vm4, %v12328_v51, %v12329_v48 }
 0x668   : > { %12728 = vmatprep.mubr.bf16.mxu0 %v12240_v19  ;;  %12957 = vmatpush1.bf16.msra.mxu0 %v19280_v22  ;;  %v12322_v22 = vsel %vm4634_vm4, %v12316_v20, %v12321_v43  ;;  %v12331_v12 = vrot.slane %v12251_v35, 4  ;;  %v12337_v43 = vsel %vm4634_vm4, %v12335_v52, %v12336_v30  ;;  %v19315_v20 = vld [vmem:[%s24630_s2 + $0x1374] ss:$8 sps:$4 sm:$0xff]   ;;  %v19313_v35 = vld [vmem:[%s24630_s2 + $0x1370] ss:$8 sps:$4 sm:$0xff]  }
 0x669   : > { %12958 = vmatprep.subr.bf16.mxu0 %v19285_v63  ;;  %v19298_v63 = vld [vmem:[%s24630_s2 + $0x1320] ss:$8 sps:$4 sm:$0xff]   ;;  %v12419_v19 = vpack.c.bf16 %v12322_v22, %v12317_v50  ;;  %v12262_v22 = vld [vmem:[#allocation3 + $0xf8] sm:$0xf0] }
 0x66c   : > { %12959 = vmatpush1.bf16.msra.mxu0 %v19283_v33  ;;  %v12422_v33 = vpack.c.bf16 %v12334_v6, %v12330_v16  ;;  %v12363_v6 = vrot.slane %v12264_v60, 4  ;;  %v12358_v16 = vrot.slane %v12262_v22, 4  ;;  %v23979_v22 = vld [vmem:[#allocation3 + $0x168] sm:$0xff] }
 0x66d   : > { %12960 = vmatprep.subr.bf16.mxu0 %v19288_v57  ;;  %v12343_v57 = vrot.slane %v12256_v14, 4 }
 0x66f   : > { %12729 = vmatmul.mubr.bf16.gmra.mrb[28].mxu0 %v12239_v27  ;;  %v12332_v27 = vsel %vm4634_vm4, %v12326_v40, %v12331_v12 }
 0x670   : > { %12961 = vmatpush1.bf16.msra.mxu0 %v19286_v38  ;;  %12964 = vmatprep.mubr.bf16.mxu0 %v12418_v11  ;;  %v23891_v38 = vld [vmem:[#allocation3 + $0xa8] sm:$0xff]  ;;  %v12421_v55 = vpack.c.bf16 %v12332_v27, %v12327_v1  ;;  %v12373_v1 = vrot.slane %v12268_v2, 4 }
 0x671   : > { %12962 = vmatprep.subr.bf16.mxu0 %v19291_v34  ;;  %v12339_v46 = vrot.slane %v23891_v38, 4  ;;  %v12255_v34 = vld [vmem:[#allocation3 + $0xb0] sm:$0xf]  ;;  %v19304_v11 = vld [vmem:[%s24630_s2 + $0x1340] ss:$8 sps:$4 sm:$0xff]  }
 0x673   : > { %v12344_v49 = vsel %vm4634_vm4, %v12339_v46, %v12343_v57  ;;  %v12340_v62 = vsel %vm4634_vm4, %v12338_v25, %v12339_v46  ;;  %v19321_v25 = vld [vmem:[%s24630_s2 + $0x1394] ss:$8 sps:$4 sm:$0xff]  }
 0x674   : > { %12963 = vmatpush1.bf16.msra.mxu0 %v19289_v3  ;;  %v19309_v3 = vld [vmem:[%s24630_s2 + $0x1354] ss:$8 sps:$4 sm:$0xff]   ;;  %v12424_v8 = vpack.c.bf16 %v12344_v49, %v12340_v62  ;;  %v12361_v49 = vrot.slane %v12263_v4, 4 }
 0x675   : > { %13686 = vmatprep.subr.bf16.mxu0 %v19294_v61  ;;  %v12341_v61 = vrot.slane %v12255_v34, 4  ;;  %v12261_v46 = vld [vmem:[#allocation3 + $0xf0] sm:$0xf0]  ;;  %v12266_v34 = vld [vmem:[#allocation3 + $0x128] sm:$0xf0] }
 0x676   : > { %v12355_v18 = vrot.slane %v12261_v46, 4  ;;  %v12368_v54 = vrot.slane %v12266_v34, 4  ;;  %v19333_v4 = vld [vmem:[%s24630_s2 + $0x13d4] ss:$8 sps:$4 sm:$0xff]   ;;  %v19336_v34 = vld [vmem:[%s24630_s2 + $0x13e4] ss:$8 sps:$4 sm:$0xff]  }
 0x677   : > { %12965 = vmatmul.mubr.bf16.vlgmr.msra.gmra.mrb[0].mxu0 %v12417_v53  ;;  %v23913_v53 = vld [vmem:[#allocation3 + $0xd8] sm:$0xff] }
 0x678   : > { %12974 = vmatprep.mubr.bf16.mxu0 %v12420_v29  ;;  %13687 = vmatpush1.bf16.msra.mxu0 %v19292_v32  ;;  %v19312_v32 = vld [vmem:[%s24630_s2 + $0x1364] ss:$8 sps:$4 sm:$0xff]   ;;  %v12349_v21 = vrot.slane %v23913_v53, 4  ;;  %v12259_v29 = vld [vmem:[#allocation3 + $0xe0] sm:$0xf] }
 0x679   : > { %13688 = vmatprep.subr.bf16.mxu0 %v19297_v47  ;;  %v12342_v47 = vsel %vm4634_vm4, %v12336_v30, %v12341_v61  ;;  %v12351_v48 = vrot.slane %v12259_v29, 4  ;;  %v19322_v30 = vld [vmem:[%s24630_s2 + $0x13a0] ss:$8 sps:$4 sm:$0xff]  }
 0x67a   : > { %v12354_v59 = vsel %vm4634_vm4, %v12349_v21, %v12353_v5  ;;  %v12350_v13 = vsel %vm4634_vm4, %v12348_v37, %v12349_v21 }
 0x67b   : > { %v12426_v51 = vpack.c.bf16 %v12354_v59, %v12350_v13  ;;  %v12265_v59 = vld [vmem:[#allocation3 + $0x120] sm:$0xf0] }
 0x67c   : > { %13689 = vmatpush1.bf16.msra.mxu0 %v19295_v44  ;;  %v12423_v44 = vpack.c.bf16 %v12342_v47, %v12337_v43  ;;  %v19327_v47 = vld [vmem:[%s24630_s2 + $0x13b4] ss:$8 sps:$4 sm:$0xff]   ;;  %v12365_v13 = vrot.slane %v12265_v59, 4 }
 0x67d   : > { %13690 = vmatprep.subr.bf16.mxu0 %v19300_v39  ;;  %v12257_v39 = vld [vmem:[#allocation3 + $0xc0] sm:$0xf0] }
 0x67e   : > { %v12345_v50 = vrot.slane %v12257_v39, 4 }
 0x67f   : > { %12975 = vmatmul.mubr.bf16.gmra.mrb[4].mxu0 %v12419_v19  ;;  %v19318_v19 = vld [vmem:[%s24630_s2 + $0x1384] ss:$8 sps:$4 sm:$0xff]  }
 0x680   : > { %12984 = vmatprep.mubr.bf16.mxu0 %v12422_v33  ;;  %13691 = vmatpush1.bf16.msra.mxu0 %v19298_v63  ;;  %v23929_v63 = vld [vmem:[#allocation3 + $0xd0] sm:$0xff] }
 0x681   : > { %13692 = vmatprep.subr.bf16.mxu0 %v19303_v45  ;;  %v12346_v14 = vrot.slane %v23929_v63, 4  ;;  %v23935_v45 = vld [vmem:[#allocation3 + $0x108] sm:$0xff] }
 0x682   : > { %v12359_v9 = vrot.slane %v23935_v45, 4 }
 0x683   : > { %v12352_v33 = vsel %vm4634_vm4, %v12346_v14, %v12351_v48  ;;  %v12347_v57 = vsel %vm4634_vm4, %v12345_v50, %v12346_v14  ;;  %v12271_v14 = vld [vmem:[#allocation3 + $0x170] sm:$0xf] }
 0x684   : > { %13693 = vmatpush1.bf16.msra.mxu0 %v19301_v24  ;;  %v12364_v12 = vsel %vm4634_vm4, %v12359_v9, %v12363_v6  ;;  %v19316_v24 = vld [vmem:[%s24630_s2 + $0x1380] ss:$8 sps:$4 sm:$0xff]   ;;  %v12425_v40 = vpack.c.bf16 %v12352_v33, %v12347_v57  ;;  %v12379_v6 = vrot.slane %v23979_v22, 4  ;;  %v12269_v57 = vld [vmem:[#allocation3 + $0x150] sm:$0xf0]  ;;  %v12381_v2 = vrot.slane %v12271_v14, 4 }
 0x685   : > { %13694 = vmatprep.subr.bf16.mxu0 %v19306_v23  ;;  %v12360_v23 = vsel %vm4634_vm4, %v12358_v16, %v12359_v9  ;;  %v19328_v16 = vld [vmem:[%s24630_s2 + $0x13c0] ss:$8 sps:$4 sm:$0xff]   ;;  %v12375_v46 = vrot.slane %v12269_v57, 4 }
 0x686   : > { %v12428_v27 = vpack.c.bf16 %v12364_v12, %v12360_v23  ;;  %v13112_v9 = vld [vmem:[#allocation2 + $0x28] sm:$0x1f] }
 0x687   : > { %12985 = vmatmul.mubr.bf16.gmra.mrb[8].mxu0 %v12421_v55  ;;  %v23951_v55 = vld [vmem:[#allocation3 + $0x100] sm:$0xff]  ;;  %v13181_v23 = vrot.slane %v13112_v9, 5 }
 0x688   : > { %12994 = vmatprep.mubr.bf16.mxu0 %v12424_v8  ;;  %13695 = vmatpush1.bf16.msra.mxu0 %v19304_v11  ;;  %v19319_v11 = vld [vmem:[%s24630_s2 + $0x1390] ss:$8 sps:$4 sm:$0xff]   ;;  %v12356_v62 = vrot.slane %v23951_v55, 4  ;;  %v19340_v14 = vld [vmem:[%s24630_s2 + $0x1a00] ss:$8 sps:$4 sm:$0xff]  }
 0x689   : > { %13696 = vmatprep.subr.bf16.mxu0 %v19309_v3  ;;  %v19324_v3 = vld [vmem:[%s24630_s2 + $0x13a4] ss:$8 sps:$4 sm:$0xff]   ;;  %v23957_v8 = vld [vmem:[#allocation3 + $0x138] sm:$0xff] }
 0x68a   : > { %v12369_v61 = vrot.slane %v23957_v8, 4  ;;  %v12362_v31 = vsel %vm4634_vm4, %v12356_v62, %v12361_v49  ;;  %v12357_v52 = vsel %vm4634_vm4, %v12355_v18, %v12356_v62 }
 0x68b   : > { %v12427_v37 = vpack.c.bf16 %v12362_v31, %v12357_v52  ;;  %v19334_v31 = vld [vmem:[%s24630_s2 + $0x13e0] ss:$8 sps:$4 sm:$0xff]  }
 0x68c   : > { %13697 = vmatpush1.bf16.msra.mxu0 %v19307_v15  ;;  %v12374_v5 = vsel %vm4634_vm4, %v12369_v61, %v12373_v1  ;;  %v12267_v15 = vld [vmem:[#allocation3 + $0x140] sm:$0xf]  ;;  %v12370_v21 = vsel %vm4634_vm4, %v12368_v54, %v12369_v61 }
 0x68d   : > { %13698 = vmatprep.subr.bf16.mxu0 %v19312_v32  ;;  %v12272_v32 = vld [vmem:[#allocation3 + $0x178] sm:$0xf]  ;;  %v12430_v29 = vpack.c.bf16 %v12374_v5, %v12370_v21  ;;  %v12371_v43 = vrot.slane %v12267_v15, 4  ;;  %v13111_v54 = vld [vmem:[#allocation2 + $0x20] sm:$0x1f] }
 0x68e   : > { %v12383_v60 = vrot.slane %v12272_v32, 4  ;;  %v13116_v5 = vld [vmem:[#allocation2 + $0x58] sm:$0x1f]  ;;  %v13109_v32 = vld [vmem:[#allocation2] sm:$0xe0]  ;;  %v13179_v21 = vrot.slane %v13111_v54, 5 }
 0x68f   : > { %12995 = vmatmul.mubr.bf16.gmra.mrb[12].mxu0 %v12423_v44  ;;  %v19325_v44 = vld [vmem:[%s24630_s2 + $0x13b0] ss:$8 sps:$4 sm:$0xff]   ;;  %v13191_v59 = vrot.slane %v13116_v5, 5  ;;  %v13119_v54 = vld [vmem:[#allocation2 + $0x80] sm:$0x1f] }
 0x690   : > { %13004 = vmatprep.mubr.bf16.mxu0 %v12426_v51  ;;  %13699 = vmatpush1.bf16.msra.mxu0 %v19310_v41  ;;  %v12270_v41 = vld [vmem:[#allocation3 + $0x158] sm:$0xf0]  ;;  %v19330_v51 = vld [vmem:[%s24630_s2 + $0x13c4] ss:$8 sps:$4 sm:$0xff]   ;;  %v12384_v50 = vsel %vm4634_vm4, %v12379_v6, %v12383_v60 }
 0x691   : > { %13700 = vmatprep.subr.bf16.mxu0 %v19315_v20  ;;  %v23973_v20 = vld [vmem:[#allocation3 + $0x130] sm:$0xff]  ;;  %v12378_v48 = vrot.slane %v12270_v41, 4  ;;  %v13124_v5 = vld [vmem:[#allocation2 + $0xb8] sm:$0x1f] }
 0x692   : > { %v12366_v39 = vrot.slane %v23973_v20, 4  ;;  %v24017_v41 = vld [vmem:[#allocation2 + $0x10] sm:$0xff] }
 0x693   : > { %v12380_v12 = vsel %vm4634_vm4, %v12378_v48, %v12379_v6  ;;  %v13174_v60 = vrot.slane %v24017_v41, 5 }
 0x694   : > { %13701 = vmatpush1.bf16.msra.mxu0 %v19313_v35  ;;  %v12372_v35 = vsel %vm4634_vm4, %v12366_v39, %v12371_v43  ;;  %v13173_v43 = vrot.slane %v13109_v32, 5  ;;  %v13117_v32 = vld [vmem:[#allocation2 + $0x60] sm:$0xe0] }
 0x695   : > { %13702 = vmatprep.subr.bf16.mxu0 %v19318_v19  ;;  %v12367_v19 = vsel %vm4634_vm4, %v12365_v13, %v12366_v39  ;;  %v24023_v39 = vld [vmem:[#allocation2 + $0x48] sm:$0xff]  ;;  %v13180_v48 = vsel %vm391_vm0, %v13174_v60, %v13179_v21  ;;  %v13199_v21 = vrot.slane %v13119_v54, 5  ;;  %v24089_v54 = vld [vmem:[#allocation2 + $0xd8] sm:$0xff] }
 0x696   : > { %v12429_v33 = vpack.c.bf16 %v12372_v35, %v12367_v19  ;;  %v13115_v35 = vld [vmem:[#allocation2 + $0x50] sm:$0x1f]  ;;  %v13120_v19 = vld [vmem:[#allocation2 + $0x88] sm:$0x1f] }
 0x697   : > { %13005 = vmatmul.mubr.bf16.gmra.mrb[16].mxu0 %v12425_v40  ;;  %v13110_v40 = vld [vmem:[#allocation2 + $0x8] sm:$0xe0]  ;;  %v13189_v57 = vrot.slane %v13115_v35, 5 }
 0x698   : > { %13014 = vmatprep.mubr.bf16.mxu0 %v12428_v27  ;;  %13703 = vmatpush1.bf16.msra.mxu0 %v19316_v24  ;;  %v12432_v24 = vpack.c.bf16 %v12384_v50, %v12380_v12  ;;  %v23995_v27 = vld [vmem:[#allocation3 + $0x160] sm:$0xff]  ;;  %v13176_v1 = vrot.slane %v13110_v40, 5  ;;  %v13175_v50 = vsel %vm391_vm0, %v13173_v43, %v13174_v60  ;;  %v13113_v12 = vld [vmem:[#allocation2 + $0x30] sm:$0xe0]  ;;  %v19343_v40 = vld [vmem:[%s24630_s2 + $0x1a10] ss:$8 sps:$4 sm:$0xff]  }
 0x699   : > { %13704 = vmatprep.subr.bf16.mxu0 %v19321_v25  ;;  %v19331_v25 = vld [vmem:[%s24630_s2 + $0x13d0] ss:$8 sps:$4 sm:$0xff]   ;;  %v12376_v49 = vrot.slane %v23995_v27, 4  ;;  %v13193_v43 = vrot.slane %v13117_v32, 5 }
 0x69a   : > { %v24061_v60 = vld [vmem:[#allocation2 + $0x70] sm:$0xff]  ;;  %v13132_v32 = vld [vmem:[#allocation2 + $0x118] sm:$0x1f] }
 0x69b   : > { %v12382_v62 = vsel %vm4634_vm4, %v12376_v49, %v12381_v2  ;;  %v12377_v61 = vsel %vm4634_vm4, %v12375_v46, %v12376_v49  ;;  %v13201_v2 = vrot.slane %v13120_v19, 5  ;;  %v19348_v49 = vld [vmem:[%s24630_s2 + $0x1a24] ss:$8 sps:$4 sm:$0xff]  }
 0x69c   : > { %13705 = vmatpush1.bf16.msra.mxu0 %v19319_v11  ;;  %v24001_v11 = vld [vmem:[#allocation2 + $0x18] sm:$0xff]  ;;  %v12431_v15 = vpack.c.bf16 %v12382_v62, %v12377_v61 }
 0x69d   : > { %13706 = vmatprep.subr.bf16.mxu0 %v19324_v3  ;;  %v13177_v18 = vrot.slane %v24001_v11, 5 }
 0x69f   : > { %13015 = vmatmul.mubr.bf16.gmra.mrb[20].mxu0 %v12427_v37  ;;  %v13182_v3 = vsel %vm391_vm0, %v13177_v18, %v13181_v23  ;;  %v13178_v52 = vsel %vm391_vm0, %v13176_v1, %v13177_v18  ;;  %v13183_v23 = vrot.slane %v13113_v12, 5  ;;  %v24045_v1 = vld [vmem:[#allocation2 + $0x78] sm:$0xff] }
 0x6a0   : > { %13024 = vmatprep.mubr.bf16.mxu0 %v12430_v29  ;;  %13707 = vmatpush1.bf16.msra.mxu0 %v19322_v30  ;;  %v19339_v30 = vld [vmem:[%s24630_s2 + $0x13f4] ss:$8 sps:$4 sm:$0xff]   ;;  %v13286_v37 = vpack.c.bf16 %v13182_v3, %v13178_v52  ;;  %v19337_v29 = vld [vmem:[%s24630_s2 + $0x13f0] ss:$8 sps:$4 sm:$0xff]   ;;  %v13197_v18 = vrot.slane %v24045_v1, 5 }
 0x6a1   : > { %13708 = vmatprep.subr.bf16.mxu0 %v19327_v47  ;;  %v13114_v47 = vld [vmem:[#allocation2 + $0x38] sm:$0xe0] }
 0x6a2   : > { %v13186_v13 = vrot.slane %v13114_v47, 5  ;;  %v13202_v3 = vsel %vm391_vm0, %v13197_v18, %v13201_v2  ;;  %v13122_v47 = vld [vmem:[#allocation2 + $0x98] sm:$0xe0] }
 0x6a4   : > { %13709 = vmatpush1.bf16.msra.mxu0 %v19325_v44  ;;  %v19342_v44 = vld [vmem:[%s24630_s2 + $0x1a04] ss:$8 sps:$4 sm:$0xff]  }
 0x6a5   : > { %13710 = vmatprep.subr.bf16.mxu0 %v19330_v51  ;;  %v13187_v51 = vrot.slane %v24023_v39, 5 }
 0x6a7   : > { %13025 = vmatmul.mubr.bf16.gmra.mrb[24].mxu0 %v12429_v33  ;;  %v13192_v6 = vsel %vm391_vm0, %v13187_v51, %v13191_v59  ;;  %v13188_v9 = vsel %vm391_vm0, %v13186_v13, %v13187_v51  ;;  %v19345_v33 = vld [vmem:[%s24630_s2 + $0x1a14] ss:$8 sps:$4 sm:$0xff]   ;;  %v13211_v59 = vrot.slane %v13124_v5, 5  ;;  %v19354_v13 = vld [vmem:[%s24630_s2 + $0x1a44] ss:$8 sps:$4 sm:$0xff]   ;;  %v13206_v51 = vrot.slane %v13122_v47, 5 }
 0x6a8   : > { %13034 = vmatprep.mubr.bf16.mxu0 %v12432_v24  ;;  %13711 = vmatpush1.bf16.msra.mxu0 %v19328_v16  ;;  %v13285_v16 = vpack.c.bf16 %v13180_v48, %v13175_v50  ;;  %v13118_v24 = vld [vmem:[#allocation2 + $0x68] sm:$0xe0]  ;;  %v19363_v47 = vld [vmem:[%s24630_s2 + $0x1a74] ss:$8 sps:$4 sm:$0xff]  }
 0x6a9   : > { %13712 = vmatprep.subr.bf16.mxu0 %v19333_v4  ;;  %v13288_v4 = vpack.c.bf16 %v13192_v6, %v13188_v9  ;;  %v24067_v48 = vld [vmem:[#allocation2 + $0xa8] sm:$0xff] }
 0x6aa   : > { %v13207_v6 = vrot.slane %v24067_v48, 5  ;;  %v13128_v9 = vld [vmem:[#allocation2 + $0xe8] sm:$0x1f] }
 0x6ac   : > { %13713 = vmatpush1.bf16.msra.mxu0 %v19331_v25  ;;  %v24039_v25 = vld [vmem:[#allocation2 + $0x40] sm:$0xff]  ;;  %v13212_v50 = vsel %vm391_vm0, %v13207_v6, %v13211_v59  ;;  %v13208_v12 = vsel %vm391_vm0, %v13206_v51, %v13207_v6  ;;  %v19361_v51 = vld [vmem:[%s24630_s2 + $0x1a70] ss:$8 sps:$4 sm:$0xff]  }
 0x6ad   : > { %13714 = vmatprep.subr.bf16.mxu0 %v19336_v34  ;;  %v13184_v46 = vrot.slane %v24039_v25, 5  ;;  %v13196_v34 = vrot.slane %v13118_v24, 5  ;;  %v13292_v24 = vpack.c.bf16 %v13212_v50, %v13208_v12  ;;  %v13125_v59 = vld [vmem:[#allocation2 + $0xc0] sm:$0xe0] }
 0x6ae   : > { %v13213_v6 = vrot.slane %v13125_v59, 5 }
 0x6af   : > { %13035 = vmatmul.mubr.bf16.gmra.mrb[28].mxu0 %v12431_v15  ;;  %v13190_v62 = vsel %vm391_vm0, %v13184_v46, %v13189_v57  ;;  %v13185_v61 = vsel %vm391_vm0, %v13183_v23, %v13184_v46  ;;  %v13198_v52 = vsel %vm391_vm0, %v13196_v34, %v13197_v18  ;;  %v13121_v57 = vld [vmem:[#allocation2 + $0x90] sm:$0xe0]  ;;  %v13221_v23 = vrot.slane %v13128_v9, 5  ;;  %v19355_v46 = vld [vmem:[%s24630_s2 + $0x1a50] ss:$8 sps:$4 sm:$0xff]   ;;  %v24083_v34 = vld [vmem:[#allocation2 + $0xa0] sm:$0xff] }
 0x6b0   : > { %13715 = vmatpush1.bf16.msra.mxu0 %v19334_v31  ;;  %13718 = vmatprep.mubr.bf16.mxu0 %v13286_v37  ;;  %v19346_v31 = vld [vmem:[%s24630_s2 + $0x1a20] ss:$8 sps:$4 sm:$0xff]   ;;  %v13287_v15 = vpack.c.bf16 %v13190_v62, %v13185_v61  ;;  %v13290_v37 = vpack.c.bf16 %v13202_v3, %v13198_v52  ;;  %v13204_v18 = vrot.slane %v24083_v34, 5  ;;  %v19360_v62 = vld [vmem:[%s24630_s2 + $0x1a64] ss:$8 sps:$4 sm:$0xff]   ;;  %v13217_v61 = vrot.slane %v24089_v54, 5 }
 0x6b1   : > { %13716 = vmatprep.subr.bf16.mxu0 %v19339_v30  ;;  %v19351_v30 = vld [vmem:[%s24630_s2 + $0x1a34] ss:$8 sps:$4 sm:$0xff]  }
 0x6b2   : > { %v13222_v5 = vsel %vm391_vm0, %v13217_v61, %v13221_v23 }
 0x6b4   : > { %13717 = vmatpush1.bf16.msra.mxu0 %v19337_v29  ;;  %v19349_v29 = vld [vmem:[%s24630_s2 + $0x1a30] ss:$8 sps:$4 sm:$0xff]  }
 0x6b5   : > { %13992 = vmatprep.subr.bf16.mxu0 %v19342_v44  ;;  %v13194_v44 = vrot.slane %v24061_v60, 5 }
 0x6b7   : > { %13719 = vmatmul.mubr.bf16.vlgmr.msra.gmra.mrb[0].mxu0 %v13285_v16  ;;  %v13200_v35 = vsel %vm391_vm0, %v13194_v44, %v13199_v21  ;;  %v13195_v19 = vsel %vm391_vm0, %v13193_v43, %v13194_v44  ;;  %v19352_v16 = vld [vmem:[%s24630_s2 + $0x1a40] ss:$8 sps:$4 sm:$0xff]   ;;  %v13130_v44 = vld [vmem:[#allocation2 + $0xf8] sm:$0xe0] }
 0x6b8   : > { %13728 = vmatprep.mubr.bf16.mxu0 %v13288_v4  ;;  %13993 = vmatpush1.bf16.msra.mxu0 %v19340_v14  ;;  %v13123_v14 = vld [vmem:[#allocation2 + $0xb0] sm:$0x1f] }
 0x6b9   : > { %13994 = vmatprep.subr.bf16.mxu0 %v19345_v33  ;;  %v13289_v33 = vpack.c.bf16 %v13200_v35, %v13195_v19  ;;  %v19357_v4 = vld [vmem:[%s24630_s2 + $0x1a54] ss:$8 sps:$4 sm:$0xff]   ;;  %v13209_v2 = vrot.slane %v13123_v14, 5  ;;  %v19366_v14 = vld [vmem:[%s24630_s2 + $0x1a84] ss:$8 sps:$4 sm:$0xff]   ;;  %v13226_v19 = vrot.slane %v13130_v44, 5 }
 0x6ba   : > { %v24105_v35 = vld [vmem:[#allocation2 + $0xd0] sm:$0xff]  ;;  %v19370_v44 = vld [vmem:[%s24630_s2 + $0x1aa0] ss:$8 sps:$4 sm:$0xff]  }
 0x6bb   : > { %v13214_v50 = vrot.slane %v24105_v35, 5 }
 0x6bc   : > { %13995 = vmatpush1.bf16.msra.mxu0 %v19343_v40  ;;  %v13126_v40 = vld [vmem:[#allocation2 + $0xc8] sm:$0xe0] }
 0x6bd   : > { %13996 = vmatprep.subr.bf16.mxu0 %v19348_v49  ;;  %v13203_v49 = vrot.slane %v13121_v57, 5  ;;  %v13216_v3 = vrot.slane %v13126_v40, 5  ;;  %v13215_v57 = vsel %vm391_vm0, %v13213_v6, %v13214_v50 }
 0x6bf   : > { %13729 = vmatmul.mubr.bf16.gmra.mrb[4].mxu0 %v13287_v15  ;;  %v13127_v15 = vld [vmem:[#allocation2 + $0xe0] sm:$0x1f]  ;;  %v13205_v52 = vsel %vm391_vm0, %v13203_v49, %v13204_v18  ;;  %v13218_v21 = vsel %vm391_vm0, %v13216_v3, %v13217_v61  ;;  %v13129_v49 = vld [vmem:[#allocation2 + $0xf0] sm:$0xe0]  ;;  %v13134_v3 = vld [vmem:[#allocation2 + $0x128] sm:$0xe0] }
 0x6c0   : > { %13738 = vmatprep.mubr.bf16.mxu0 %v13290_v37  ;;  %13997 = vmatpush1.bf16.msra.mxu0 %v19346_v31  ;;  %v13210_v31 = vsel %vm391_vm0, %v13204_v18, %v13209_v2  ;;  %v13219_v43 = vrot.slane %v13127_v15, 5  ;;  %v13136_v2 = vld [vmem:[#allocation2 + $0x148] sm:$0x1f]  ;;  %v24127_v15 = vld [vmem:[#allocation2 + $0x100] sm:$0xff] }
 0x6c1   : > { %13998 = vmatprep.subr.bf16.mxu0 %v19351_v30  ;;  %v19358_v30 = vld [vmem:[%s24630_s2 + $0x1a60] ss:$8 sps:$4 sm:$0xff]   ;;  %v13291_v37 = vpack.c.bf16 %v13210_v31, %v13205_v52  ;;  %v13241_v61 = vrot.slane %v13136_v2, 5  ;;  %v19367_v31 = vld [vmem:[%s24630_s2 + $0x1a90] ss:$8 sps:$4 sm:$0xff]   ;;  %v13224_v52 = vrot.slane %v24127_v15, 5 }
 0x6c4   : > { %13999 = vmatpush1.bf16.msra.mxu0 %v19349_v29  ;;  %v13294_v29 = vpack.c.bf16 %v13222_v5, %v13218_v21  ;;  %v13223_v5 = vrot.slane %v13129_v49, 5 }
 0x6c5   : > { %14000 = vmatprep.subr.bf16.mxu0 %v19354_v13  ;;  %v13231_v13 = vrot.slane %v13132_v32, 5  ;;  %v13236_v32 = vrot.slane %v13134_v3, 5 }
 0x6c7   : > { %13739 = vmatmul.mubr.bf16.gmra.mrb[8].mxu0 %v13289_v33  ;;  %v13220_v33 = vsel %vm391_vm0, %v13214_v50, %v13219_v43  ;;  %v13225_v43 = vsel %vm391_vm0, %v13223_v5, %v13224_v52  ;;  %v19375_v50 = vld [vmem:[%s24630_s2 + $0x1ab4] ss:$8 sps:$4 sm:$0xff]  }
 0x6c8   : > { %13748 = vmatprep.mubr.bf16.mxu0 %v13292_v24  ;;  %14001 = vmatpush1.bf16.msra.mxu0 %v19352_v16  ;;  %v24111_v16 = vld [vmem:[#allocation2 + $0x108] sm:$0xff]  ;;  %v13293_v40 = vpack.c.bf16 %v13220_v33, %v13215_v57  ;;  %v13138_v33 = vld [vmem:[#allocation2 + $0x158] sm:$0xe0] }
 0x6c9   : > { %14002 = vmatprep.subr.bf16.mxu0 %v19357_v4  ;;  %v13227_v9 = vrot.slane %v24111_v16, 5  ;;  %v13131_v4 = vld [vmem:[#allocation2 + $0x110] sm:$0x1f]  ;;  %v19364_v24 = vld [vmem:[%s24630_s2 + $0x1a80] ss:$8 sps:$4 sm:$0xff]  }
 0x6cb   : > { %v13232_v12 = vsel %vm391_vm0, %v13227_v9, %v13231_v13  ;;  %v13228_v23 = vsel %vm391_vm0, %v13226_v19, %v13227_v9  ;;  %v13140_v13 = vld [vmem:[#allocation2 + $0x178] sm:$0x1f] }
 0x6cc   : > { %14003 = vmatpush1.bf16.msra.mxu0 %v19355_v46  ;;  %v19369_v46 = vld [vmem:[%s24630_s2 + $0x1a94] ss:$8 sps:$4 sm:$0xff]   ;;  %v13296_v18 = vpack.c.bf16 %v13232_v12, %v13228_v23  ;;  %v13251_v12 = vrot.slane %v13140_v13, 5  ;;  %v13246_v23 = vrot.slane %v13138_v33, 5 }
 0x6cd   : > { %14004 = vmatprep.subr.bf16.mxu0 %v19360_v62  ;;  %v13229_v62 = vrot.slane %v13131_v4, 5  ;;  %v19373_v4 = vld [vmem:[%s24630_s2 + $0x1ab0] ss:$8 sps:$4 sm:$0xff]  }
 0x6cf   : > { %13749 = vmatmul.mubr.bf16.gmra.mrb[12].mxu0 %v13291_v37  ;;  %v24133_v37 = vld [vmem:[#allocation2 + $0x138] sm:$0xff] }
 0x6d0   : > { %13758 = vmatprep.mubr.bf16.mxu0 %v13294_v29  ;;  %14005 = vmatpush1.bf16.msra.mxu0 %v19358_v30  ;;  %v19372_v30 = vld [vmem:[%s24630_s2 + $0x1aa4] ss:$8 sps:$4 sm:$0xff]   ;;  %v13237_v21 = vrot.slane %v24133_v37, 5 }
 0x6d1   : > { %14006 = vmatprep.subr.bf16.mxu0 %v19363_v47  ;;  %v13230_v47 = vsel %vm391_vm0, %v13224_v52, %v13229_v62  ;;  %v13135_v29 = vld [vmem:[#allocation2 + $0x140] sm:$0x1f]  ;;  %v13139_v62 = vld [vmem:[#allocation2 + $0x170] sm:$0x1f] }
 0x6d2   : > { %v13242_v59 = vsel %vm391_vm0, %v13237_v21, %v13241_v61  ;;  %v13238_v6 = vsel %vm391_vm0, %v13236_v32, %v13237_v21  ;;  %v13239_v9 = vrot.slane %v13135_v29, 5  ;;  %v19376_v61 = vld [vmem:[%s24630_s2 + $0x1ac0] ss:$8 sps:$4 sm:$0xff]   ;;  %v13249_v21 = vrot.slane %v13139_v62, 5  ;;  %v19379_v29 = vld [vmem:[%s24630_s2 + $0x1ad0] ss:$8 sps:$4 sm:$0xff]  }
 0x6d3   : > { %v13298_v19 = vpack.c.bf16 %v13242_v59, %v13238_v6  ;;  %v19385_v62 = vld [vmem:[%s24630_s2 + $0x1af0] ss:$8 sps:$4 sm:$0xff]  }
 0x6d4   : > { %14007 = vmatpush1.bf16.msra.mxu0 %v19361_v51  ;;  %v13295_v51 = vpack.c.bf16 %v13230_v47, %v13225_v43  ;;  %v13302_v47 = vld [vmem:[#allocation3 + $0x8] sm:$0xe0] }
 0x6d5   : > { %14008 = vmatprep.subr.bf16.mxu0 %v19366_v14  ;;  %v13133_v14 = vld [vmem:[#allocation2 + $0x120] sm:$0xe0]  ;;  %v13368_v6 = vrot.slane %v13302_v47, 5  ;;  %v13312_v47 = vld [vmem:[#allocation3 + $0x88] sm:$0x1f] }
 0x6d6   : > { %v13233_v57 = vrot.slane %v13133_v14, 5 }
 0x6d7   : > { %13759 = vmatmul.mubr.bf16.gmra.mrb[16].mxu0 %v13293_v40  ;;  %v19378_v40 = vld [vmem:[%s24630_s2 + $0x1ac4] ss:$8 sps:$4 sm:$0xff]  }
 0x6d8   : > { %13768 = vmatprep.mubr.bf16.mxu0 %v13296_v18  ;;  %14009 = vmatpush1.bf16.msra.mxu0 %v19364_v24  ;;  %v24149_v24 = vld [vmem:[#allocation2 + $0x130] sm:$0xff] }
 0x6d9   : > { %14010 = vmatprep.subr.bf16.mxu0 %v19369_v46  ;;  %v13234_v2 = vrot.slane %v24149_v24, 5  ;;  %v13247_v46 = vrot.slane %v23805_v42, 5  ;;  %v19381_v42 = vld [vmem:[%s24630_s2 + $0x1ad4] ss:$8 sps:$4 sm:$0xff]  }
 0x6db   : > { %v13240_v49 = vsel %vm391_vm0, %v13234_v2, %v13239_v9  ;;  %v13252_v18 = vsel %vm391_vm0, %v13247_v46, %v13251_v12  ;;  %v13235_v3 = vsel %vm391_vm0, %v13233_v57, %v13234_v2  ;;  %v13248_v52 = vsel %vm391_vm0, %v13246_v23, %v13247_v46  ;;  %v13303_v9 = vld [vmem:[#allocation3 + $0x20] sm:$0x1f] }
 0x6dc   : > { %14011 = vmatpush1.bf16.msra.mxu0 %v19367_v31  ;;  %v13304_v31 = vld [vmem:[#allocation3 + $0x28] sm:$0x1f]  ;;  %v13297_v5 = vpack.c.bf16 %v13240_v49, %v13235_v3  ;;  %v13300_v32 = vpack.c.bf16 %v13252_v18, %v13248_v52  ;;  %v13371_v46 = vrot.slane %v13303_v9, 5  ;;  %v13306_v49 = vld [vmem:[#allocation3 + $0x38] sm:$0xe0]  ;;  %v13379_v52 = vrot.slane %v23847_v28, 5 }
 0x6dd   : > { %14012 = vmatprep.subr.bf16.mxu0 %v19372_v30  ;;  %v13137_v30 = vld [vmem:[#allocation2 + $0x150] sm:$0xe0]  ;;  %v13373_v59 = vrot.slane %v13304_v31, 5  ;;  %v19382_v12 = vld [vmem:[%s24630_s2 + $0x1ae0] ss:$8 sps:$4 sm:$0xff]   ;;  %v13376_v9 = vrot.slane %v23863_v7, 5 }
 0x6de   : > { %v13243_v43 = vrot.slane %v13137_v30, 5  ;;  %v19390_v31 = vld [vmem:[%s24630_s2 + $0x1404] ss:$8 sps:$4 sm:$0xff]   ;;  %v19393_v28 = vld [vmem:[%s24630_s2 + $0x1414] ss:$8 sps:$4 sm:$0xff]  }
 0x6df   : > { %13769 = vmatmul.mubr.bf16.gmra.mrb[20].mxu0 %v13295_v51  ;;  %v19384_v51 = vld [vmem:[%s24630_s2 + $0x1ae4] ss:$8 sps:$4 sm:$0xff]   ;;  %v19394_v7 = vld [vmem:[%s24630_s2 + $0x1420] ss:$8 sps:$4 sm:$0xff]  }
 0x6e0   : > { %13778 = vmatprep.mubr.bf16.mxu0 %v13298_v19  ;;  %14013 = vmatpush1.bf16.msra.mxu0 %v19370_v44  ;;  %v24169_v44 = vld [vmem:[#allocation2 + $0x160] sm:$0xff] }
 0x6e1   : > { %14014 = vmatprep.subr.bf16.mxu0 %v19375_v50  ;;  %v13244_v13 = vrot.slane %v24169_v44, 5  ;;  %v13369_v50 = vrot.slane %v23825_v17, 5  ;;  %v19387_v17 = vld [vmem:[%s24630_s2 + $0x1af4] ss:$8 sps:$4 sm:$0xff]  }
 0x6e3   : > { %v13250_v14 = vsel %vm391_vm0, %v13244_v13, %v13249_v21  ;;  %v13374_v19 = vsel %vm391_vm0, %v13369_v50, %v13373_v59  ;;  %v13245_v33 = vsel %vm391_vm0, %v13243_v43, %v13244_v13  ;;  %v13370_v2 = vsel %vm391_vm0, %v13368_v6, %v13369_v50  ;;  %v13305_v43 = vld [vmem:[#allocation3 + $0x30] sm:$0xe0]  ;;  %v13310_v6 = vld [vmem:[#allocation3 + $0x68] sm:$0xe0] }
 0x6e4   : > { %14015 = vmatpush1.bf16.msra.mxu0 %v19373_v4  ;;  %v13308_v4 = vld [vmem:[#allocation3 + $0x58] sm:$0x1f]  ;;  %v13299_v57 = vpack.c.bf16 %v13250_v14, %v13245_v33  ;;  %v13478_v23 = vpack.c.bf16 %v13374_v19, %v13370_v2  ;;  %v13393_v50 = vrot.slane %v13312_v47, 5  ;;  %v13375_v19 = vrot.slane %v13305_v43, 5  ;;  %v19396_v33 = vld [vmem:[%s24630_s2 + $0x1424] ss:$8 sps:$4 sm:$0xff]  }
 0x6e5   : > { %14016 = vmatprep.subr.bf16.mxu0 %v19378_v40  ;;  %v13301_v40 = vld [vmem:[#allocation3] sm:$0xe0]  ;;  %v13383_v18 = vrot.slane %v13308_v4, 5  ;;  %v19391_v14 = vld [vmem:[%s24630_s2 + $0x1410] ss:$8 sps:$4 sm:$0xff]   ;;  %v13389_v4 = vrot.slane %v23869_v0, 5 }
 0x6e6   : > { %v13365_v3 = vrot.slane %v13301_v40, 5  ;;  %v13377_v40 = vsel %vm391_vm0, %v13375_v19, %v13376_v9  ;;  %v19399_v0 = vld [vmem:[%s24630_s2 + $0x1434] ss:$8 sps:$4 sm:$0xff]  }
 0x6e7   : > { %13779 = vmatmul.mubr.bf16.gmra.mrb[24].mxu0 %v13297_v5  ;;  %v13378_v5 = vrot.slane %v13306_v49, 5  ;;  %v13384_v30 = vsel %vm391_vm0, %v13379_v52, %v13383_v18  ;;  %v13394_v2 = vsel %vm391_vm0, %v13389_v4, %v13393_v50  ;;  %v13309_v18 = vld [vmem:[#allocation3 + $0x60] sm:$0xe0] }
 0x6e8   : > { %13788 = vmatprep.mubr.bf16.mxu0 %v13300_v32  ;;  %14017 = vmatpush1.bf16.msra.mxu0 %v19376_v61  ;;  %v13366_v61 = vrot.slane %v23841_v58, 5  ;;  %v13307_v32 = vld [vmem:[#allocation3 + $0x50] sm:$0x1f]  ;;  %v19388_v58 = vld [vmem:[%s24630_s2 + $0x1400] ss:$8 sps:$4 sm:$0xff]  }
 0x6e9   : > { %14018 = vmatprep.subr.bf16.mxu0 %v19381_v42 }
 0x6ea   : > { %v13372_v42 = vsel %vm391_vm0, %v13366_v61, %v13371_v46  ;;  %v13367_v21 = vsel %vm391_vm0, %v13365_v3, %v13366_v61  ;;  %v13314_v61 = vld [vmem:[#allocation3 + $0x98] sm:$0xe0] }
 0x6eb   : > { %v13477_v59 = vpack.c.bf16 %v13372_v42, %v13367_v21  ;;  %v13386_v42 = vrot.slane %v23885_v36, 5  ;;  %v13399_v21 = vrot.slane %v23891_v38, 5  ;;  %v19400_v36 = vld [vmem:[%s24630_s2 + $0x1440] ss:$8 sps:$4 sm:$0xff]   ;;  %v19405_v38 = vld [vmem:[%s24630_s2 + $0x1454] ss:$8 sps:$4 sm:$0xff]  }
 0x6ec   : > { %14019 = vmatpush1.bf16.msra.mxu0 %v19379_v29  ;;  %v13380_v29 = vsel %vm391_vm0, %v13378_v5, %v13379_v52  ;;  %v19397_v5 = vld [vmem:[%s24630_s2 + $0x1430] ss:$8 sps:$4 sm:$0xff]   ;;  %v13385_v52 = vrot.slane %v13309_v18, 5  ;;  %v13317_v18 = vld [vmem:[#allocation3 + $0xc0] sm:$0xe0] }
 0x6ed   : > { %14020 = vmatprep.subr.bf16.mxu0 %v19384_v51  ;;  %v13480_v13 = vpack.c.bf16 %v13384_v30, %v13380_v29  ;;  %v13381_v51 = vrot.slane %v13307_v32, 5  ;;  %v19402_v30 = vld [vmem:[%s24630_s2 + $0x1444] ss:$8 sps:$4 sm:$0xff]   ;;  %v13398_v32 = vrot.slane %v13314_v61, 5  ;;  %v13322_v61 = vld [vmem:[#allocation3 + $0xf8] sm:$0xe0] }
 0x6ee   : > { %v13387_v29 = vsel %vm391_vm0, %v13385_v52, %v13386_v42  ;;  %v13405_v52 = vrot.slane %v13317_v18, 5 }
 0x6ef   : > { %13789 = vmatmul.mubr.bf16.gmra.mrb[28].mxu0 %v13299_v57  ;;  %v13382_v57 = vsel %vm391_vm0, %v13376_v9, %v13381_v51  ;;  %v13313_v51 = vld [vmem:[#allocation3 + $0x90] sm:$0xe0]  ;;  %v19403_v9 = vld [vmem:[%s24630_s2 + $0x1450] ss:$8 sps:$4 sm:$0xff]  }
 0x6f0   : > { %14021 = vmatpush1.bf16.msra.mxu0 %v19382_v12  ;;  %14024 = vmatprep.mubr.bf16.mxu0 %v13478_v23  ;;  %v13388_v12 = vrot.slane %v13310_v6, 5  ;;  %v13316_v23 = vld [vmem:[#allocation3 + $0xb8] sm:$0x1f]  ;;  %v13479_v46 = vpack.c.bf16 %v13382_v57, %v13377_v40 }
 0x6f1   : > { %14022 = vmatprep.subr.bf16.mxu0 %v19387_v17  ;;  %v13311_v17 = vld [vmem:[#allocation3 + $0x80] sm:$0x1f] }
 0x6f2   : > { %v13390_v49 = vsel %vm391_vm0, %v13388_v12, %v13389_v4  ;;  %v13391_v3 = vrot.slane %v13311_v17, 5  ;;  %v13396_v12 = vrot.slane %v23907_v10, 5  ;;  %v19408_v4 = vld [vmem:[%s24630_s2 + $0x1464] ss:$8 sps:$4 sm:$0xff]   ;;  %v19406_v10 = vld [vmem:[%s24630_s2 + $0x1460] ss:$8 sps:$4 sm:$0xff]  }
 0x6f4   : > { %14023 = vmatpush1.bf16.msra.mxu0 %v19385_v62  ;;  %v13482_v62 = vpack.c.bf16 %v13394_v2, %v13390_v49  ;;  %v13409_v2 = vrot.slane %v23913_v53, 5  ;;  %v19411_v53 = vld [vmem:[%s24630_s2 + $0x1474] ss:$8 sps:$4 sm:$0xff]  }
 0x6f5   : > { %14746 = vmatprep.subr.bf16.mxu0 %v19390_v31  ;;  %v13403_v31 = vrot.slane %v13316_v23, 5 }
 0x6f7   : > { %14025 = vmatmul.mubr.bf16.vlgmr.msra.gmra.mrb[0].mxu0 %v13477_v59  ;;  %v13404_v47 = vsel %vm391_vm0, %v13399_v21, %v13403_v31  ;;  %v13315_v59 = vld [vmem:[#allocation3 + $0xb0] sm:$0x1f] }
 0x6f8   : > { %14034 = vmatprep.mubr.bf16.mxu0 %v13480_v13  ;;  %14747 = vmatpush1.bf16.msra.mxu0 %v19388_v58  ;;  %v13392_v58 = vsel %vm391_vm0, %v13386_v42, %v13391_v3  ;;  %v13400_v13 = vsel %vm391_vm0, %v13398_v32, %v13399_v21  ;;  %v13401_v50 = vrot.slane %v13315_v59, 5  ;;  %v13406_v42 = vrot.slane %v23929_v63, 5  ;;  %v13323_v59 = vld [vmem:[#allocation3 + $0x110] sm:$0x1f]  ;;  %v19412_v63 = vld [vmem:[%s24630_s2 + $0x1480] ss:$8 sps:$4 sm:$0xff]  }
 0x6f9   : > { %14748 = vmatprep.subr.bf16.mxu0 %v19393_v28  ;;  %v13320_v28 = vld [vmem:[#allocation3 + $0xe8] sm:$0x1f]  ;;  %v13481_v43 = vpack.c.bf16 %v13392_v58, %v13387_v29  ;;  %v13484_v6 = vpack.c.bf16 %v13404_v47, %v13400_v13  ;;  %v13418_v32 = vrot.slane %v13322_v61, 5  ;;  %v13419_v21 = vrot.slane %v23935_v45, 5  ;;  %v19417_v45 = vld [vmem:[%s24630_s2 + $0x1494] ss:$8 sps:$4 sm:$0xff]  }
 0x6fa   : > { %v13413_v19 = vrot.slane %v13320_v28, 5  ;;  %v13402_v17 = vsel %vm391_vm0, %v13396_v12, %v13401_v50  ;;  %v13407_v29 = vsel %vm391_vm0, %v13405_v52, %v13406_v42  ;;  %v13321_v13 = vld [vmem:[#allocation3 + $0xf0] sm:$0xe0]  ;;  %v13426_v61 = vrot.slane %v23973_v20, 5  ;;  %v19424_v20 = vld [vmem:[%s24630_s2 + $0x14c0] ss:$8 sps:$4 sm:$0xff]  }
 0x6fb   : > { %v13439_v52 = vrot.slane %v23979_v22, 5  ;;  %v19429_v22 = vld [vmem:[%s24630_s2 + $0x14d4] ss:$8 sps:$4 sm:$0xff]  }
 0x6fc   : > { %14749 = vmatpush1.bf16.msra.mxu0 %v19391_v14  ;;  %v13318_v14 = vld [vmem:[#allocation3 + $0xc8] sm:$0xe0]  ;;  %v13414_v40 = vsel %vm391_vm0, %v13409_v2, %v13413_v19  ;;  %v13415_v19 = vrot.slane %v13321_v13, 5 }
 0x6fd   : > { %14750 = vmatprep.subr.bf16.mxu0 %v19396_v33  ;;  %v13395_v33 = vrot.slane %v13313_v51, 5  ;;  %v13408_v57 = vrot.slane %v13318_v14, 5  ;;  %v13421_v51 = vrot.slane %v13323_v59, 5  ;;  %v19415_v14 = vld [vmem:[%s24630_s2 + $0x1490] ss:$8 sps:$4 sm:$0xff]  }
 0x6ff   : > { %14035 = vmatmul.mubr.bf16.gmra.mrb[4].mxu0 %v13479_v46  ;;  %v13397_v23 = vsel %vm391_vm0, %v13395_v33, %v13396_v12  ;;  %v13324_v46 = vld [vmem:[#allocation3 + $0x118] sm:$0x1f]  ;;  %v19420_v33 = vld [vmem:[%s24630_s2 + $0x14a4] ss:$8 sps:$4 sm:$0xff]  }
 0x700   : > { %14044 = vmatprep.mubr.bf16.mxu0 %v13482_v62  ;;  %14751 = vmatpush1.bf16.msra.mxu0 %v19394_v7  ;;  %v13319_v7 = vld [vmem:[#allocation3 + $0xe0] sm:$0x1f]  ;;  %v13483_v49 = vpack.c.bf16 %v13402_v17, %v13397_v23  ;;  %v13423_v31 = vrot.slane %v13324_v46, 5  ;;  %v13325_v46 = vld [vmem:[#allocation3 + $0x120] sm:$0xe0] }
 0x701   : > { %14752 = vmatprep.subr.bf16.mxu0 %v19399_v0  ;;  %v13410_v0 = vsel %vm391_vm0, %v13408_v57, %v13409_v2  ;;  %v13411_v3 = vrot.slane %v13319_v7, 5  ;;  %v13327_v17 = vld [vmem:[#allocation3 + $0x140] sm:$0x1f]  ;;  %v13332_v7 = vld [vmem:[#allocation3 + $0x178] sm:$0x1f] }
 0x702   : > { %v13486_v62 = vpack.c.bf16 %v13414_v40, %v13410_v0  ;;  %v13424_v47 = vsel %vm391_vm0, %v13419_v21, %v13423_v31  ;;  %v13431_v0 = vrot.slane %v13327_v17, 5  ;;  %v13443_v18 = vrot.slane %v13332_v7, 5  ;;  %v19426_v31 = vld [vmem:[%s24630_s2 + $0x14c4] ss:$8 sps:$4 sm:$0xff]  }
 0x703   : > { %v13412_v58 = vsel %vm391_vm0, %v13406_v42, %v13411_v3  ;;  %v13425_v3 = vrot.slane %v13325_v46, 5  ;;  %v19438_v46 = vld [vmem:[%s24630_s2 + $0x1b04] ss:$8 sps:$4 sm:$0xff]  }
 0x704   : > { %14753 = vmatpush1.bf16.msra.mxu0 %v19397_v5  ;;  %v19409_v5 = vld [vmem:[%s24630_s2 + $0x1470] ss:$8 sps:$4 sm:$0xff]   ;;  %v13485_v28 = vpack.c.bf16 %v13412_v58, %v13407_v29  ;;  %v13432_v42 = vsel %vm391_vm0, %v13426_v61, %v13431_v0  ;;  %v14172_v58 = vld [vmem:[#allocation2 + $0x28] sm:$0x3f]  ;;  %v13329_v29 = vld [vmem:[#allocation3 + $0x150] sm:$0xe0] }
 0x705   : > { %14754 = vmatprep.subr.bf16.mxu0 %v19402_v30  ;;  %v19414_v30 = vld [vmem:[%s24630_s2 + $0x1484] ss:$8 sps:$4 sm:$0xff]   ;;  %v13435_v13 = vrot.slane %v13329_v29, 5  ;;  %v14247_v0 = vrot.slane %v24023_v39, 6  ;;  %v19441_v39 = vld [vmem:[%s24630_s2 + $0x1b14] ss:$8 sps:$4 sm:$0xff]  }
 0x706   : > { %v14257_v29 = vrot.slane %v24045_v1, 6  ;;  %v19447_v1 = vld [vmem:[%s24630_s2 + $0x1b34] ss:$8 sps:$4 sm:$0xff]  }
 0x707   : > { %14045 = vmatmul.mubr.bf16.gmra.mrb[8].mxu0 %v13481_v43  ;;  %v13420_v43 = vsel %vm391_vm0, %v13418_v32, %v13419_v21  ;;  %v13331_v32 = vld [vmem:[#allocation3 + $0x170] sm:$0x1f]  ;;  %v13427_v21 = vsel %vm391_vm0, %v13425_v3, %v13426_v61  ;;  %v14180_v61 = vld [vmem:[#allocation2 + $0x88] sm:$0x3f] }
 0x708   : > { %14054 = vmatprep.mubr.bf16.mxu0 %v13484_v6  ;;  %14755 = vmatpush1.bf16.msra.mxu0 %v19400_v36  ;;  %v13328_v36 = vld [vmem:[#allocation3 + $0x148] sm:$0x1f]  ;;  %v13326_v6 = vld [vmem:[#allocation3 + $0x128] sm:$0xe0] }
 0x709   : > { %14756 = vmatprep.subr.bf16.mxu0 %v19405_v38  ;;  %v13488_v38 = vpack.c.bf16 %v13424_v47, %v13420_v43  ;;  %v13433_v50 = vrot.slane %v13328_v36, 5  ;;  %v13428_v12 = vrot.slane %v13326_v6, 5  ;;  %v13489_v47 = vpack.c.bf16 %v13432_v42, %v13427_v21 }
 0x70a   : > { %v13441_v36 = vrot.slane %v13331_v32, 5  ;;  %v14241_v43 = vrot.slane %v14172_v58, 6  ;;  %v14178_v32 = vld [vmem:[#allocation2 + $0x68] sm:$0xc0]  ;;  %v14261_v21 = vrot.slane %v14180_v61, 6  ;;  %v14277_v61 = vrot.slane %v24089_v54, 6 }
 0x70b   : > { %v19459_v54 = vld [vmem:[%s24630_s2 + $0x1b74] ss:$8 sps:$4 sm:$0xff]  }
 0x70c   : > { %14757 = vmatpush1.bf16.msra.mxu0 %v19403_v9  ;;  %v13416_v9 = vrot.slane %v23951_v55, 5  ;;  %v19418_v55 = vld [vmem:[%s24630_s2 + $0x14a0] ss:$8 sps:$4 sm:$0xff]  }
 0x70d   : > { %14758 = vmatprep.subr.bf16.mxu0 %v19408_v4  ;;  %v13429_v4 = vrot.slane %v23957_v8, 5  ;;  %v19423_v8 = vld [vmem:[%s24630_s2 + $0x14b4] ss:$8 sps:$4 sm:$0xff]  }
 0x70e   : > { %v13422_v57 = vsel %vm391_vm0, %v13416_v9, %v13421_v51  ;;  %v13417_v40 = vsel %vm391_vm0, %v13415_v19, %v13416_v9  ;;  %v19432_v51 = vld [vmem:[%s24630_s2 + $0x14e4] ss:$8 sps:$4 sm:$0xff]  }
 0x70f   : > { %14055 = vmatmul.mubr.bf16.gmra.mrb[12].mxu0 %v13483_v49  ;;  %v13434_v2 = vsel %vm391_vm0, %v13429_v4, %v13433_v50  ;;  %v13487_v23 = vpack.c.bf16 %v13422_v57, %v13417_v40  ;;  %v14237_v50 = vrot.slane %v24001_v11, 6  ;;  %v14171_v9 = vld [vmem:[#allocation2 + $0x20] sm:$0x3f]  ;;  %v19435_v11 = vld [vmem:[%s24630_s2 + $0x14f4] ss:$8 sps:$4 sm:$0xff]  }
 0x710   : > { %14064 = vmatprep.mubr.bf16.mxu0 %v13486_v62  ;;  %14759 = vmatpush1.bf16.msra.mxu0 %v19406_v10  ;;  %v13430_v10 = vsel %vm391_vm0, %v13428_v12, %v13429_v4  ;;  %v19421_v62 = vld [vmem:[%s24630_s2 + $0x14b0] ss:$8 sps:$4 sm:$0xff]   ;;  %v14239_v40 = vrot.slane %v14171_v9, 6 }
 0x711   : > { %14760 = vmatprep.subr.bf16.mxu0 %v19411_v53  ;;  %v13490_v49 = vpack.c.bf16 %v13434_v2, %v13430_v10  ;;  %v13330_v53 = vld [vmem:[#allocation3 + $0x158] sm:$0xe0]  ;;  %v14242_v19 = vsel %vm6755_vm5, %v14237_v50, %v14241_v43  ;;  %v14169_v2 = vld [vmem:[#allocation2] sm:$0xc0]  ;;  %v19445_v9 = vld [vmem:[%s24630_s2 + $0x1b30] ss:$8 sps:$4 sm:$0xff]  }
 0x712   : > { %v14176_v12 = vld [vmem:[#allocation2 + $0x58] sm:$0x3f]  ;;  %v14233_v10 = vrot.slane %v14169_v2, 6 }
 0x713   : > { %v14251_v7 = vrot.slane %v14176_v12, 6  ;;  %v19450_v12 = vld [vmem:[%s24630_s2 + $0x1b44] ss:$8 sps:$4 sm:$0xff]  }
 0x714   : > { %14761 = vmatpush1.bf16.msra.mxu0 %v19409_v5  ;;  %v13438_v5 = vrot.slane %v13330_v53, 5 }
 0x715   : > { %14762 = vmatprep.subr.bf16.mxu0 %v19414_v30  ;;  %v13444_v30 = vsel %vm391_vm0, %v13439_v52, %v13443_v18  ;;  %v14252_v18 = vsel %vm6755_vm5, %v14247_v0, %v14251_v7 }
 0x716   : > { %v13440_v59 = vsel %vm391_vm0, %v13438_v5, %v13439_v52  ;;  %v14173_v52 = vld [vmem:[#allocation2 + $0x30] sm:$0xc0] }
 0x717   : > { %14065 = vmatmul.mubr.bf16.gmra.mrb[16].mxu0 %v13485_v28  ;;  %v14170_v28 = vld [vmem:[#allocation2 + $0x8] sm:$0xc0]  ;;  %v14243_v58 = vrot.slane %v14173_v52, 6 }
 0x718   : > { %14074 = vmatprep.mubr.bf16.mxu0 %v13488_v38  ;;  %14763 = vmatpush1.bf16.msra.mxu0 %v19412_v63  ;;  %v13492_v63 = vpack.c.bf16 %v13444_v30, %v13440_v59  ;;  %v13436_v38 = vrot.slane %v23995_v27, 5  ;;  %v14236_v6 = vrot.slane %v14170_v28, 6  ;;  %v19430_v27 = vld [vmem:[%s24630_s2 + $0x14e0] ss:$8 sps:$4 sm:$0xff]   ;;  %v19444_v59 = vld [vmem:[%s24630_s2 + $0x1b24] ss:$8 sps:$4 sm:$0xff]  }
 0x719   : > { %14764 = vmatprep.subr.bf16.mxu0 %v19417_v45  ;;  %v19427_v45 = vld [vmem:[%s24630_s2 + $0x14d0] ss:$8 sps:$4 sm:$0xff]   ;;  %v14179_v28 = vld [vmem:[#allocation2 + $0x80] sm:$0x3f] }
 0x71a   : > { %v14238_v57 = vsel %vm6755_vm5, %v14236_v6, %v14237_v50  ;;  %v14259_v50 = vrot.slane %v14179_v28, 6 }
 0x71b   : > { %v14346_v17 = vpack.c.bf16 %v14242_v19, %v14238_v57  ;;  %v14267_v57 = vrot.slane %v24067_v48, 6  ;;  %v19453_v48 = vld [vmem:[%s24630_s2 + $0x1b54] ss:$8 sps:$4 sm:$0xff]  }
 0x71c   : > { %14765 = vmatpush1.bf16.msra.mxu0 %v19415_v14  ;;  %v13442_v14 = vsel %vm391_vm0, %v13436_v38, %v13441_v36  ;;  %v14262_v36 = vsel %vm6755_vm5, %v14257_v29, %v14261_v21  ;;  %v14185_v21 = vld [vmem:[#allocation2 + $0xc0] sm:$0xc0] }
 0x71d   : > { %14766 = vmatprep.subr.bf16.mxu0 %v19420_v33  ;;  %v13437_v33 = vsel %vm391_vm0, %v13435_v13, %v13436_v38 }
 0x71e   : > { %v13491_v4 = vpack.c.bf16 %v13442_v14, %v13437_v33  ;;  %v14182_v14 = vld [vmem:[#allocation2 + $0x98] sm:$0xc0] }
 0x71f   : > { %14075 = vmatmul.mubr.bf16.gmra.mrb[20].mxu0 %v13487_v23  ;;  %v19433_v23 = vld [vmem:[%s24630_s2 + $0x14f0] ss:$8 sps:$4 sm:$0xff]  }
 0x720   : > { %14084 = vmatprep.mubr.bf16.mxu0 %v13490_v49  ;;  %14767 = vmatpush1.bf16.msra.mxu0 %v19418_v55  ;;  %v14174_v55 = vld [vmem:[#allocation2 + $0x38] sm:$0xc0] }
 0x721   : > { %14768 = vmatprep.subr.bf16.mxu0 %v19423_v8  ;;  %v14234_v8 = vrot.slane %v24017_v41, 6  ;;  %v14246_v49 = vrot.slane %v14174_v55, 6  ;;  %v19436_v41 = vld [vmem:[%s24630_s2 + $0x1b00] ss:$8 sps:$4 sm:$0xff]  }
 0x722   : > { %v14188_v55 = vld [vmem:[#allocation2 + $0xe8] sm:$0x3f] }
 0x723   : > { %v14240_v53 = vsel %vm6755_vm5, %v14234_v8, %v14239_v40  ;;  %v14235_v3 = vsel %vm6755_vm5, %v14233_v10, %v14234_v8  ;;  %v14248_v5 = vsel %vm6755_vm5, %v14246_v49, %v14247_v0  ;;  %v14181_v10 = vld [vmem:[#allocation2 + $0x90] sm:$0xc0]  ;;  %v14186_v49 = vld [vmem:[#allocation2 + $0xc8] sm:$0xc0]  ;;  %v14281_v0 = vrot.slane %v14188_v55, 6 }
 0x724   : > { %14769 = vmatpush1.bf16.msra.mxu0 %v19421_v62  ;;  %v14175_v62 = vld [vmem:[#allocation2 + $0x50] sm:$0x3f]  ;;  %v14348_v42 = vpack.c.bf16 %v14252_v18, %v14248_v5  ;;  %v14263_v18 = vrot.slane %v14181_v10, 6  ;;  %v14193_v10 = vld [vmem:[#allocation2 + $0x120] sm:$0xc0] }
 0x725   : > { %14770 = vmatprep.subr.bf16.mxu0 %v19426_v31  ;;  %v14345_v31 = vpack.c.bf16 %v14240_v53, %v14235_v3  ;;  %v14249_v30 = vrot.slane %v14175_v62, 6  ;;  %v19451_v53 = vld [vmem:[%s24630_s2 + $0x1b50] ss:$8 sps:$4 sm:$0xff]   ;;  %v14264_v62 = vrot.slane %v24083_v34, 6  ;;  %v19456_v3 = vld [vmem:[%s24630_s2 + $0x1b64] ss:$8 sps:$4 sm:$0xff]   ;;  %v14282_v5 = vsel %vm6755_vm5, %v14277_v61, %v14281_v0 }
 0x726   : > { %v19454_v34 = vld [vmem:[%s24630_s2 + $0x1b60] ss:$8 sps:$4 sm:$0xff]  }
 0x727   : > { %14085 = vmatmul.mubr.bf16.gmra.mrb[24].mxu0 %v13489_v47  ;;  %v14244_v47 = vrot.slane %v24039_v25, 6  ;;  %v19442_v25 = vld [vmem:[%s24630_s2 + $0x1b20] ss:$8 sps:$4 sm:$0xff]   ;;  %v14265_v52 = vsel %vm6755_vm5, %v14263_v18, %v14264_v62  ;;  %v14293_v18 = vrot.slane %v14193_v10, 6 }
 0x728   : > { %14094 = vmatprep.mubr.bf16.mxu0 %v13492_v63  ;;  %14771 = vmatpush1.bf16.msra.mxu0 %v19424_v20  ;;  %v19439_v20 = vld [vmem:[%s24630_s2 + $0x1b10] ss:$8 sps:$4 sm:$0xff]  }
 0x729   : > { %14772 = vmatprep.subr.bf16.mxu0 %v19429_v22  ;;  %v14256_v22 = vrot.slane %v14178_v32, 6  ;;  %v14250_v63 = vsel %vm6755_vm5, %v14244_v47, %v14249_v30  ;;  %v14245_v43 = vsel %vm6755_vm5, %v14243_v58, %v14244_v47  ;;  %v14190_v47 = vld [vmem:[#allocation2 + $0xf8] sm:$0xc0] }
 0x72a   : > { %v14347_v13 = vpack.c.bf16 %v14250_v63, %v14245_v43  ;;  %v14274_v63 = vrot.slane %v24105_v35, 6  ;;  %v14286_v28 = vrot.slane %v14190_v47, 6  ;;  %v14287_v43 = vrot.slane %v24111_v16, 6  ;;  %v19460_v35 = vld [vmem:[%s24630_s2 + $0x1b80] ss:$8 sps:$4 sm:$0xff]  }
 0x72b   : > { %v14258_v38 = vsel %vm6755_vm5, %v14256_v22, %v14257_v29  ;;  %v19457_v22 = vld [vmem:[%s24630_s2 + $0x1b70] ss:$8 sps:$4 sm:$0xff]   ;;  %v14273_v29 = vrot.slane %v14185_v21, 6  ;;  %v19465_v16 = vld [vmem:[%s24630_s2 + $0x1b94] ss:$8 sps:$4 sm:$0xff]  }
 0x72c   : > { %14773 = vmatpush1.bf16.msra.mxu0 %v19427_v45  ;;  %v14184_v45 = vld [vmem:[#allocation2 + $0xb8] sm:$0x3f]  ;;  %v14350_v6 = vpack.c.bf16 %v14262_v36, %v14258_v38  ;;  %v19462_v36 = vld [vmem:[%s24630_s2 + $0x1b84] ss:$8 sps:$4 sm:$0xff]   ;;  %v14197_v21 = vld [vmem:[#allocation2 + $0x150] sm:$0xc0] }
 0x72d   : > { %14774 = vmatprep.subr.bf16.mxu0 %v19432_v51  ;;  %v14177_v51 = vld [vmem:[#allocation2 + $0x60] sm:$0xc0]  ;;  %v14271_v19 = vrot.slane %v14184_v45, 6  ;;  %v14275_v38 = vsel %vm6755_vm5, %v14273_v29, %v14274_v63  ;;  %v14362_v47 = vld [vmem:[#allocation3 + $0x8] sm:$0xc0]  ;;  %v14303_v29 = vrot.slane %v14197_v21, 6 }
 0x72e   : > { %v14253_v33 = vrot.slane %v14177_v51, 6 }
 0x72f   : > { %14095 = vmatmul.mubr.bf16.gmra.mrb[28].mxu0 %v13491_v4  ;;  %v14266_v4 = vrot.slane %v14182_v14, 6  ;;  %v14272_v2 = vsel %vm6755_vm5, %v14267_v57, %v14271_v19 }
 0x730   : > { %14775 = vmatpush1.bf16.msra.mxu0 %v19430_v27  ;;  %14778 = vmatprep.mubr.bf16.mxu0 %v14346_v17  ;;  %v14254_v27 = vrot.slane %v24061_v60, 6  ;;  %v14183_v17 = vld [vmem:[#allocation2 + $0xb0] sm:$0x3f]  ;;  %v19448_v60 = vld [vmem:[%s24630_s2 + $0x1b40] ss:$8 sps:$4 sm:$0xff]  }
 0x731   : > { %14776 = vmatprep.subr.bf16.mxu0 %v19435_v11 }
 0x732   : > { %v14260_v11 = vsel %vm6755_vm5, %v14254_v27, %v14259_v50  ;;  %v14255_v40 = vsel %vm6755_vm5, %v14253_v33, %v14254_v27  ;;  %v14189_v50 = vld [vmem:[#allocation2 + $0xf0] sm:$0xc0]  ;;  %v19463_v27 = vld [vmem:[%s24630_s2 + $0x1b90] ss:$8 sps:$4 sm:$0xff]  }
 0x733   : > { %v14349_v7 = vpack.c.bf16 %v14260_v11, %v14255_v40 }
 0x734   : > { %14777 = vmatpush1.bf16.msra.mxu0 %v19433_v23  ;;  %v14268_v23 = vsel %vm6755_vm5, %v14266_v4, %v14267_v57  ;;  %v14284_v4 = vrot.slane %v24127_v15, 6  ;;  %v19468_v57 = vld [vmem:[%s24630_s2 + $0x1ba4] ss:$8 sps:$4 sm:$0xff]   ;;  %v19466_v15 = vld [vmem:[%s24630_s2 + $0x1ba0] ss:$8 sps:$4 sm:$0xff]  }
 0x735   : > { %15052 = vmatprep.subr.bf16.mxu0 %v19438_v46  ;;  %v14352_v8 = vpack.c.bf16 %v14272_v2, %v14268_v23  ;;  %v14269_v46 = vrot.slane %v14183_v17, 6  ;;  %v14297_v2 = vrot.slane %v24133_v37, 6  ;;  %v19471_v37 = vld [vmem:[%s24630_s2 + $0x1bb4] ss:$8 sps:$4 sm:$0xff]  }
 0x737   : > { %14779 = vmatmul.mubr.bf16.vlgmr.msra.gmra.mrb[0].mxu0 %v14345_v31  ;;  %v14270_v31 = vsel %vm6755_vm5, %v14264_v62, %v14269_v46  ;;  %v14294_v62 = vrot.slane %v24149_v24, 6  ;;  %v19472_v24 = vld [vmem:[%s24630_s2 + $0x1bc0] ss:$8 sps:$4 sm:$0xff]  }
 0x738   : > { %14788 = vmatprep.mubr.bf16.mxu0 %v14348_v42  ;;  %15053 = vmatpush1.bf16.msra.mxu0 %v19436_v41  ;;  %v14276_v41 = vrot.slane %v14186_v49, 6  ;;  %v14192_v42 = vld [vmem:[#allocation2 + $0x118] sm:$0x3f]  ;;  %v14351_v30 = vpack.c.bf16 %v14270_v31, %v14265_v52  ;;  %v14198_v49 = vld [vmem:[#allocation2 + $0x158] sm:$0xc0] }
 0x739   : > { %15054 = vmatprep.subr.bf16.mxu0 %v19441_v39  ;;  %v14187_v39 = vld [vmem:[#allocation2 + $0xe0] sm:$0x3f]  ;;  %v14199_v52 = vld [vmem:[#allocation2 + $0x170] sm:$0x3f] }
 0x73a   : > { %v14278_v32 = vsel %vm6755_vm5, %v14276_v41, %v14277_v61  ;;  %v14279_v58 = vrot.slane %v14187_v39, 6  ;;  %v14306_v41 = vrot.slane %v14198_v49, 6  ;;  %v19563_v61 = vld [vmem:[#allocation2 + $0x168] sm:$0xff] }
 0x73b   : > { %v14307_v31 = vrot.slane %v19563_v61, 6 }
 0x73c   : > { %15055 = vmatpush1.bf16.msra.mxu0 %v19439_v20  ;;  %v14354_v20 = vpack.c.bf16 %v14282_v5, %v14278_v32 }
 0x73d   : > { %15056 = vmatprep.subr.bf16.mxu0 %v19444_v59  ;;  %v14291_v59 = vrot.slane %v14192_v42, 6  ;;  %v14364_v42 = vld [vmem:[#allocation3 + $0x28] sm:$0x3f]  ;;  %v14308_v32 = vsel %vm6755_vm5, %v14306_v41, %v14307_v31 }
 0x73f   : > { %14789 = vmatmul.mubr.bf16.gmra.mrb[4].mxu0 %v14347_v13  ;;  %v14292_v45 = vsel %vm6755_vm5, %v14287_v43, %v14291_v59  ;;  %v14191_v13 = vld [vmem:[#allocation2 + $0x110] sm:$0x3f]  ;;  %v14433_v59 = vrot.slane %v14364_v42, 6  ;;  %v14369_v42 = vld [vmem:[#allocation3 + $0x60] sm:$0xc0] }
 0x740   : > { %14798 = vmatprep.mubr.bf16.mxu0 %v14350_v6  ;;  %15057 = vmatpush1.bf16.msra.mxu0 %v19442_v25  ;;  %v14280_v25 = vsel %vm6755_vm5, %v14274_v63, %v14279_v58  ;;  %v14288_v6 = vsel %vm6755_vm5, %v14286_v28, %v14287_v43  ;;  %v14289_v19 = vrot.slane %v14191_v13, 6  ;;  %v14309_v58 = vrot.slane %v14199_v52, 6  ;;  %v19564_v43 = vld [vmem:[#allocation3 + $0x18] sm:$0xff] }
 0x741   : > { %15058 = vmatprep.subr.bf16.mxu0 %v19447_v1  ;;  %v14196_v1 = vld [vmem:[#allocation2 + $0x148] sm:$0x3f]  ;;  %v14353_v51 = vpack.c.bf16 %v14280_v25, %v14275_v38  ;;  %v14356_v14 = vpack.c.bf16 %v14292_v45, %v14288_v6  ;;  %v14304_v63 = vrot.slane %v24169_v44, 6  ;;  %v14428_v28 = vrot.slane %v14362_v47, 6  ;;  %v14363_v38 = vld [vmem:[#allocation3 + $0x20] sm:$0x3f] }
 0x742   : > { %v14301_v33 = vrot.slane %v14196_v1, 6  ;;  %v14290_v17 = vsel %vm6755_vm5, %v14284_v4, %v14289_v19  ;;  %v14429_v25 = vrot.slane %v19564_v43, 6  ;;  %v19478_v44 = vld [vmem:[%s24630_s2 + $0x1be0] ss:$8 sps:$4 sm:$0xff]   ;;  %v14368_v1 = vld [vmem:[#allocation3 + $0x58] sm:$0x3f] }
 0x743   : > { %v14310_v45 = vsel %vm6755_vm5, %v14304_v63, %v14309_v58  ;;  %v14431_v19 = vrot.slane %v14363_v38, 6  ;;  %v14376_v52 = vld [vmem:[#allocation3 + $0xb8] sm:$0x3f]  ;;  %v19569_v58 = vld [vmem:[#allocation3 + $0x70] sm:$0xff] }
 0x744   : > { %15059 = vmatpush1.bf16.msra.mxu0 %v19445_v9  ;;  %v14194_v9 = vld [vmem:[#allocation2 + $0x128] sm:$0xc0]  ;;  %v14302_v40 = vsel %vm6755_vm5, %v14297_v2, %v14301_v33  ;;  %v14434_v13 = vsel %vm6755_vm5, %v14429_v25, %v14433_v59  ;;  %v14430_v6 = vsel %vm6755_vm5, %v14428_v28, %v14429_v25  ;;  %v14443_v33 = vrot.slane %v14368_v1, 6  ;;  %v14375_v28 = vld [vmem:[#allocation3 + $0xb0] sm:$0x3f] }
 0x745   : > { %15060 = vmatprep.subr.bf16.mxu0 %v19450_v12  ;;  %v14283_v12 = vrot.slane %v14189_v50, 6  ;;  %v14296_v11 = vrot.slane %v14194_v9, 6  ;;  %v14361_v50 = vld [vmem:[#allocation3] sm:$0xc0]  ;;  %v14366_v9 = vld [vmem:[#allocation3 + $0x38] sm:$0xc0] }
 0x746   : > { %v14463_v21 = vrot.slane %v14376_v52, 6  ;;  %v14446_v47 = vrot.slane %v19569_v58, 6  ;;  %v14380_v25 = vld [vmem:[#allocation3 + $0xe8] sm:$0x3f]  ;;  %v14373_v38 = vld [vmem:[#allocation3 + $0x90] sm:$0xc0] }
 0x747   : > { %14799 = vmatmul.mubr.bf16.gmra.mrb[8].mxu0 %v14349_v7  ;;  %v14285_v55 = vsel %vm6755_vm5, %v14283_v12, %v14284_v4  ;;  %v14200_v7 = vld [vmem:[#allocation2 + $0x178] sm:$0x3f]  ;;  %v14425_v12 = vrot.slane %v14361_v50, 6  ;;  %v19565_v4 = vld [vmem:[#allocation3 + $0x10] sm:$0xff]  ;;  %v14378_v1 = vld [vmem:[#allocation3 + $0xc8] sm:$0xc0] }
 0x748   : > { %14808 = vmatprep.mubr.bf16.mxu0 %v14352_v8  ;;  %15061 = vmatpush1.bf16.msra.mxu0 %v19448_v60  ;;  %v14195_v60 = vld [vmem:[#allocation2 + $0x140] sm:$0x3f]  ;;  %v14355_v23 = vpack.c.bf16 %v14290_v17, %v14285_v55  ;;  %v14311_v0 = vrot.slane %v14200_v7, 6  ;;  %v14367_v55 = vld [vmem:[#allocation3 + $0x50] sm:$0x3f] }
 0x749   : > { %15062 = vmatprep.subr.bf16.mxu0 %v19453_v48  ;;  %v14298_v48 = vsel %vm6755_vm5, %v14296_v11, %v14297_v2  ;;  %v14299_v46 = vrot.slane %v14195_v60, 6  ;;  %v14438_v11 = vrot.slane %v14366_v9, 6  ;;  %v19566_v2 = vld [vmem:[#allocation3 + $0x48] sm:$0xff] }
 0x74a   : > { %v14358_v8 = vpack.c.bf16 %v14302_v40, %v14298_v48  ;;  %v14312_v39 = vsel %vm6755_vm5, %v14307_v31, %v14311_v0  ;;  %v14439_v17 = vrot.slane %v19566_v2, 6  ;;  %v14372_v7 = vld [vmem:[#allocation3 + $0x88] sm:$0x3f] }
 0x74b   : > { %v14300_v5 = vsel %vm6755_vm5, %v14294_v62, %v14299_v46  ;;  %v14370_v46 = vld [vmem:[#allocation3 + $0x68] sm:$0xc0]  ;;  %v14453_v49 = vrot.slane %v14372_v7, 6 }
 0x74c   : > { %15063 = vmatpush1.bf16.msra.mxu0 %v19451_v53  ;;  %v19469_v53 = vld [vmem:[%s24630_s2 + $0x1bb0] ss:$8 sps:$4 sm:$0xff]   ;;  %v14444_v60 = vsel %vm6755_vm5, %v14439_v17, %v14443_v33  ;;  %v14440_v48 = vsel %vm6755_vm5, %v14438_v11, %v14439_v17  ;;  %v14377_v17 = vld [vmem:[#allocation3 + $0xc0] sm:$0xc0] }
 0x74d   : > { %15064 = vmatprep.subr.bf16.mxu0 %v19456_v3  ;;  %v19474_v3 = vld [vmem:[%s24630_s2 + $0x1bc4] ss:$8 sps:$4 sm:$0xff]   ;;  %v14540_v10 = vpack.c.bf16 %v14444_v60, %v14440_v48  ;;  %v14465_v7 = vrot.slane %v14377_v17, 6 }
 0x74e   : > { %v17260_v17 = vld [vmem:[%s24631_s3 + $0x4] sm:$0x3] }
 0x74f   : > { %14809 = vmatmul.mubr.bf16.gmra.mrb[12].mxu0 %v14351_v30 }
 0x750   : > { %14818 = vmatprep.mubr.bf16.mxu0 %v14354_v20  ;;  %15065 = vmatpush1.bf16.msra.mxu0 %v19454_v34  ;;  %v14295_v34 = vsel %vm6755_vm5, %v14293_v18, %v14294_v62  ;;  %v14360_v20 = vpack.c.bf16 %v14312_v39, %v14308_v32  ;;  %v14448_v62 = vrot.slane %v14370_v46, 6 }
 0x751   : > { %15066 = vmatprep.subr.bf16.mxu0 %v19459_v54  ;;  %v14357_v30 = vpack.c.bf16 %v14300_v5, %v14295_v34  ;;  %v19477_v54 = vld [vmem:[%s24630_s2 + $0x1bd4] ss:$8 sps:$4 sm:$0xff]   ;;  %v14371_v5 = vld [vmem:[#allocation3 + $0x80] sm:$0x3f] }
 0x752   : > { %v14451_v32 = vrot.slane %v14371_v5, 6  ;;  %v14386_v5 = vld [vmem:[#allocation3 + $0x128] sm:$0xc0] }
 0x754   : > { %15067 = vmatpush1.bf16.msra.mxu0 %v19457_v22  ;;  %v19475_v22 = vld [vmem:[%s24630_s2 + $0x1bd0] ss:$8 sps:$4 sm:$0xff]  }
 0x755   : > { %15068 = vmatprep.subr.bf16.mxu0 %v19462_v36  ;;  %v19480_v36 = vld [vmem:[%s24630_s2 + $0x1be4] ss:$8 sps:$4 sm:$0xff]  }
 0x757   : > { %14819 = vmatmul.mubr.bf16.gmra.mrb[16].mxu0 %v14353_v51 }
 0x758   : > { %14828 = vmatprep.mubr.bf16.mxu0 %v14356_v14  ;;  %15069 = vmatpush1.bf16.msra.mxu0 %v19460_v35  ;;  %v14305_v35 = vsel %vm6755_vm5, %v14303_v29, %v14304_v63  ;;  %v14538_v14 = vpack.c.bf16 %v14434_v13, %v14430_v6  ;;  %v14452_v63 = vsel %vm6755_vm5, %v14446_v47, %v14451_v32  ;;  %v14455_v6 = vrot.slane %v14373_v38, 6 }
 0x759   : > { %15070 = vmatprep.subr.bf16.mxu0 %v19465_v16  ;;  %v14359_v51 = vpack.c.bf16 %v14310_v45, %v14305_v35  ;;  %v19483_v16 = vld [vmem:[%s24630_s2 + $0x1bf4] ss:$8 sps:$4 sm:$0xff]  }
 0x75c   : > { %15071 = vmatpush1.bf16.msra.mxu0 %v19463_v27  ;;  %v19481_v27 = vld [vmem:[%s24630_s2 + $0x1bf0] ss:$8 sps:$4 sm:$0xff]  }
 0x75d   : > { %15072 = vmatprep.subr.bf16.mxu0 %v19468_v57  ;;  %v14426_v57 = vrot.slane %v19565_v4, 6 }
 0x75f   : > { %14829 = vmatmul.mubr.bf16.gmra.mrb[20].mxu0 %v14355_v23  ;;  %v14432_v40 = vsel %vm6755_vm5, %v14426_v57, %v14431_v19  ;;  %v19572_v19 = vld [vmem:[#allocation3 + $0xd8] sm:$0xff] }
 0x760   : > { %14838 = vmatprep.mubr.bf16.mxu0 %v14358_v8  ;;  %15073 = vmatpush1.bf16.msra.mxu0 %v19466_v15  ;;  %v14427_v15 = vsel %vm6755_vm5, %v14425_v12, %v14426_v57  ;;  %v14441_v8 = vrot.slane %v14367_v55, 6  ;;  %v14469_v9 = vrot.slane %v19572_v19, 6  ;;  %v14379_v12 = vld [vmem:[#allocation3 + $0xe0] sm:$0x3f]  ;;  %v14384_v57 = vld [vmem:[#allocation3 + $0x118] sm:$0x3f] }
 0x761   : > { %15074 = vmatprep.subr.bf16.mxu0 %v19471_v37  ;;  %v14537_v23 = vpack.c.bf16 %v14432_v40, %v14427_v15  ;;  %v14365_v37 = vld [vmem:[#allocation3 + $0x30] sm:$0xc0]  ;;  %v14471_v60 = vrot.slane %v14379_v12, 6  ;;  %v14382_v55 = vld [vmem:[#allocation3 + $0xf8] sm:$0xc0]  ;;  %v14483_v15 = vrot.slane %v14384_v57, 6 }
 0x762   : > { %v14435_v0 = vrot.slane %v14365_v37, 6  ;;  %v14478_v37 = vrot.slane %v14382_v55, 6  ;;  %v14389_v19 = vld [vmem:[#allocation3 + $0x150] sm:$0xc0]  ;;  %v19579_v12 = vld [vmem:[#allocation3 + $0x160] sm:$0xff]  ;;  %v24515_v55 = vrot.slane %v17260_v17, %v22330_v56 }
 0x764   : > { %15075 = vmatpush1.bf16.msra.mxu0 %v19469_v53  ;;  %v19567_v53 = vld [vmem:[#allocation3 + $0x40] sm:$0xff] }
 0x765   : > { %15076 = vmatprep.subr.bf16.mxu0 %v19474_v3  ;;  %v14436_v18 = vrot.slane %v19567_v53, 6  ;;  %v19568_v3 = vld [vmem:[#allocation3 + $0x78] sm:$0xff] }
 0x766   : > { %v14449_v41 = vrot.slane %v19568_v3, 6 }
 0x767   : > { %14839 = vmatmul.mubr.bf16.gmra.mrb[24].mxu0 %v14357_v30  ;;  %v14442_v61 = vsel %vm6755_vm5, %v14436_v18, %v14441_v8  ;;  %v14437_v39 = vsel %vm6755_vm5, %v14435_v0, %v14436_v18  ;;  %v14383_v0 = vld [vmem:[#allocation3 + $0x110] sm:$0x3f]  ;;  %v14388_v18 = vld [vmem:[#allocation3 + $0x148] sm:$0x3f] }
 0x768   : > { %14848 = vmatprep.mubr.bf16.mxu0 %v14360_v20  ;;  %15077 = vmatpush1.bf16.msra.mxu0 %v19472_v24  ;;  %v14454_v31 = vsel %vm6755_vm5, %v14449_v41, %v14453_v49  ;;  %v14539_v34 = vpack.c.bf16 %v14442_v61, %v14437_v39  ;;  %v14450_v24 = vsel %vm6755_vm5, %v14448_v62, %v14449_v41  ;;  %v14445_v20 = vrot.slane %v14369_v42, 6  ;;  %v14381_v41 = vld [vmem:[#allocation3 + $0xf0] sm:$0xc0] }
 0x769   : > { %15078 = vmatprep.subr.bf16.mxu0 %v19477_v54  ;;  %v14542_v30 = vpack.c.bf16 %v14454_v31, %v14450_v24  ;;  %v14374_v54 = vld [vmem:[#allocation3 + $0x98] sm:$0xc0]  ;;  %v14481_v31 = vrot.slane %v14383_v0, 6  ;;  %v14493_v39 = vrot.slane %v14388_v18, 6  ;;  %v14475_v52 = vrot.slane %v14381_v41, 6 }
 0x76a   : > { %v14458_v59 = vrot.slane %v14374_v54, 6  ;;  %v14447_v43 = vsel %vm6755_vm5, %v14445_v20, %v14446_v47  ;;  %v14488_v42 = vrot.slane %v14386_v5, 6  ;;  %v14387_v20 = vld [vmem:[#allocation3 + $0x140] sm:$0x3f]  ;;  %v14392_v47 = vld [vmem:[#allocation3 + $0x178] sm:$0x3f] }
 0x76b   : > { %v14541_v45 = vpack.c.bf16 %v14452_v63, %v14447_v43  ;;  %v14503_v43 = vrot.slane %v14392_v47, 6 }
 0x76c   : > { %15079 = vmatpush1.bf16.msra.mxu0 %v19475_v22  ;;  %v19570_v22 = vld [vmem:[#allocation3 + $0xa8] sm:$0xff] }
 0x76d   : > { %15080 = vmatprep.subr.bf16.mxu0 %v19480_v36  ;;  %v14459_v29 = vrot.slane %v19570_v22, 6 }
 0x76f   : > { %14849 = vmatmul.mubr.bf16.gmra.mrb[28].mxu0 %v14359_v51  ;;  %v14464_v36 = vsel %vm6755_vm5, %v14459_v29, %v14463_v21  ;;  %v14460_v13 = vsel %vm6755_vm5, %v14458_v59, %v14459_v29  ;;  %v14473_v51 = vrot.slane %v14380_v25, 6  ;;  %v14385_v29 = vld [vmem:[#allocation3 + $0x120] sm:$0xc0] }
 0x770   : > { %15081 = vmatpush1.bf16.msra.mxu0 %v19478_v44  ;;  %15084 = vmatprep.mubr.bf16.mxu0 %v14538_v14  ;;  %v14544_v35 = vpack.c.bf16 %v14464_v36, %v14460_v13  ;;  %v14461_v44 = vrot.slane %v14375_v28, 6  ;;  %v14468_v14 = vrot.slane %v14378_v1, 6  ;;  %v14491_v36 = vrot.slane %v14387_v20, 6  ;;  %v14390_v28 = vld [vmem:[#allocation3 + $0x158] sm:$0xc0] }
 0x771   : > { %15082 = vmatprep.subr.bf16.mxu0 %v19483_v16  ;;  %v19571_v16 = vld [vmem:[#allocation3 + $0xa0] sm:$0xff]  ;;  %v14485_v25 = vrot.slane %v14385_v29, 6  ;;  %v14498_v38 = vrot.slane %v14390_v28, 6 }
 0x772   : > { %v14456_v50 = vrot.slane %v19571_v16, 6  ;;  %v14470_v2 = vsel %vm6755_vm5, %v14468_v14, %v14469_v9 }
 0x774   : > { %15083 = vmatpush1.bf16.msra.mxu0 %v19481_v27  ;;  %v14462_v33 = vsel %vm6755_vm5, %v14456_v50, %v14461_v44  ;;  %v14474_v27 = vsel %vm6755_vm5, %v14469_v9, %v14473_v51  ;;  %v14457_v4 = vsel %vm6755_vm5, %v14455_v6, %v14456_v50  ;;  %v14391_v6 = vld [vmem:[#allocation3 + $0x170] sm:$0x3f] }
 0x775   : > { %v14543_v11 = vpack.c.bf16 %v14462_v33, %v14457_v4  ;;  %v14546_v40 = vpack.c.bf16 %v14474_v27, %v14470_v2  ;;  %v14501_v33 = vrot.slane %v14391_v6, 6  ;;  %v14495_v27 = vrot.slane %v14389_v19, 6 }
 0x776   : > { %v14496_v4 = vrot.slane %v19579_v12, 6 }
 0x777   : > { %15085 = vmatmul.mubr.bf16.vlgmr.msra.gmra.mrb[0].mxu0 %v14537_v23  ;;  %v19573_v23 = vld [vmem:[#allocation3 + $0xd0] sm:$0xff] }
 0x778   : > { %15094 = vmatprep.mubr.bf16.mxu0 %v14540_v10  ;;  %v14466_v48 = vrot.slane %v19573_v23, 6  ;;  %v19574_v10 = vld [vmem:[#allocation3 + $0x108] sm:$0xff]  ;;  %v14502_v57 = vsel %vm6755_vm5, %v14496_v4, %v14501_v33 }
 0x779   : > { %v14479_v8 = vrot.slane %v19574_v10, 6 }
 0x77a   : > { %v14472_v46 = vsel %vm6755_vm5, %v14466_v48, %v14471_v60  ;;  %v14467_v53 = vsel %vm6755_vm5, %v14465_v7, %v14466_v48  ;;  %v24512_v60 = vrot.slane %v17260_v17, %v22325_v26 }
 0x77b   : > { %v14484_v49 = vsel %vm6755_vm5, %v14479_v8, %v14483_v15  ;;  %v14545_v62 = vpack.c.bf16 %v14472_v46, %v14467_v53  ;;  %v14480_v3 = vsel %vm6755_vm5, %v14478_v37, %v14479_v8 }
 0x77c   : > { %v14548_v61 = vpack.c.bf16 %v14484_v49, %v14480_v3 }
 0x77f   : > { %15095 = vmatmul.mubr.bf16.gmra.mrb[4].mxu0 %v14539_v34  ;;  %v19575_v34 = vld [vmem:[#allocation3 + $0x100] sm:$0xff] }
 0x780   : > { %15104 = vmatprep.mubr.bf16.mxu0 %v14542_v30  ;;  %v14476_v24 = vrot.slane %v19575_v34, 6  ;;  %v19576_v30 = vld [vmem:[#allocation3 + $0x138] sm:$0xff] }
 0x781   : > { %v14489_v32 = vrot.slane %v19576_v30, 6 }
 0x782   : > { %v14482_v54 = vsel %vm6755_vm5, %v14476_v24, %v14481_v31  ;;  %v14477_v58 = vsel %vm6755_vm5, %v14475_v52, %v14476_v24 }
 0x783   : > { %v14494_v21 = vsel %vm6755_vm5, %v14489_v32, %v14493_v39  ;;  %v14547_v59 = vpack.c.bf16 %v14482_v54, %v14477_v58  ;;  %v14490_v22 = vsel %vm6755_vm5, %v14488_v42, %v14489_v32 }
 0x784   : > { %v14550_v63 = vpack.c.bf16 %v14494_v21, %v14490_v22 }
 0x787   : > { %15105 = vmatmul.mubr.bf16.gmra.mrb[8].mxu0 %v14541_v45  ;;  %v19577_v45 = vld [vmem:[#allocation3 + $0x130] sm:$0xff] }
 0x788   : > { %15114 = vmatprep.mubr.bf16.mxu0 %v14544_v35  ;;  %v14486_v13 = vrot.slane %v19577_v45, 6  ;;  %v19578_v35 = vld [vmem:[#allocation3 + $0x168] sm:$0xff] }
 0x789   : > { %v14499_v44 = vrot.slane %v19578_v35, 6 }
 0x78a   : > { %v14492_v1 = vsel %vm6755_vm5, %v14486_v13, %v14491_v36  ;;  %v14487_v16 = vsel %vm6755_vm5, %v14485_v25, %v14486_v13 }
 0x78b   : > { %v14504_v51 = vsel %vm6755_vm5, %v14499_v44, %v14503_v43  ;;  %v14549_v50 = vpack.c.bf16 %v14492_v1, %v14487_v16  ;;  %v14500_v14 = vsel %vm6755_vm5, %v14498_v38, %v14499_v44 }
 0x78c   : > { %v14552_v9 = vpack.c.bf16 %v14504_v51, %v14500_v14 }
 0x78f   : > { %15115 = vmatmul.mubr.bf16.gmra.mrb[12].mxu0 %v14543_v11  ;;  %v14497_v11 = vsel %vm6755_vm5, %v14495_v27, %v14496_v4 }
 0x790   : > { %15124 = vmatprep.mubr.bf16.mxu0 %v14546_v40  ;;  %v14551_v2 = vpack.c.bf16 %v14502_v57, %v14497_v11  ;;  %v17261_v40 = vld [vmem:[%s24631_s3 + $0x6] sm:$0x3] }
 0x791   : > { %v24518_v15 = vrot.slane %v17261_v40, %v22325_v26  ;;  %v24521_v23 = vrot.slane %v17261_v40, %v22330_v56 }
 0x797   : > { %15125 = vmatmul.mubr.bf16.gmra.mrb[16].mxu0 %v14545_v62 }
 0x798   : > { %15134 = vmatprep.mubr.bf16.mxu0 %v14548_v61 }
 0x79f   : > { %15135 = vmatmul.mubr.bf16.gmra.mrb[20].mxu0 %v14547_v59 }
 0x7a0   : > { %15144 = vmatprep.mubr.bf16.mxu0 %v14550_v63 }
 0x7a7   : > { %15145 = vmatmul.mubr.bf16.gmra.mrb[24].mxu0 %v14549_v50 }
 0x7a8   : > { %15154 = vmatprep.mubr.bf16.mxu0 %v14552_v9 }
 0x7af   : > { %15155 = vmatmul.mubr.bf16.gmra.mrb[28].mxu0 %v14551_v2 }
 0x84a   : > { %v15086_v7 = vpop.f32.mrb[0].mxu0 }
 0x84b   : > { %v17267_v48 = vadd.f32 %v24512_v60, %v15086_v7  ;;  %v15088_v37 = vpop.f32.mrb[1].mxu0 }
 0x84c   : > { %v17269_v10 = vadd.f32 %v24515_v55, %v15088_v37  ;;  %v15090_v8 = vpop.f32.mrb[2].mxu0 }
 0x84d   : > { %v17268_v46 = vadd.f32 %v17267_v48, %v24518_v15  ;;  %v17271_v49 = vadd.f32 %v24512_v60, %v15090_v8  ;;  %v15092_v0 = vpop.f32.mrb[3].mxu0 }
 0x84e   : > { %v17270_v26 = vadd.f32 %v17269_v10, %v24521_v23  ;;  %v17273_v56 = vadd.f32 %v24515_v55, %v15092_v0 }
 0x84f   : > { %v15351_v53 = vmax.f32 %v17268_v46, 0.0  ;;  %v17272_v18 = vadd.f32 %v17271_v49, %v24518_v15 }
 0x850   : > { %v15352_v62 = vmax.f32 %v17270_v26, 0.0  ;;  %v17274_v3 = vadd.f32 %v17273_v56, %v24521_v23 }
 0x851   : > { %15383 = vst [vmem:[%s24531_s28] sm:$0xff] %v15351_v53  ;;  %v15353_v41 = vmax.f32 %v17272_v18, 0.0 }
 0x852   : > { %15384 = vst [vmem:[%s24531_s28 + $0x8] sm:$0xff] %v15352_v62  ;;  %v15354_v61 = vmax.f32 %v17274_v3, 0.0  ;;  %v15096_v31 = vpop.f32.mrb[4].mxu0 }
 0x853   : > { %15385 = vst [vmem:[%s24531_s28 + $0x10] sm:$0xff] %v15353_v41  ;;  %v17275_v5 = vadd.f32 %v24512_v60, %v15096_v31  ;;  %v15098_v39 = vpop.f32.mrb[5].mxu0 }
 0x854   : > { %15386 = vst [vmem:[%s24531_s28 + $0x18] sm:$0xff] %v15354_v61  ;;  %v17277_v52 = vadd.f32 %v24515_v55, %v15098_v39  ;;  %v15100_v34 = vpop.f32.mrb[6].mxu0 }
 0x855   : > { %v17276_v24 = vadd.f32 %v17275_v5, %v24518_v15  ;;  %v17279_v42 = vadd.f32 %v24512_v60, %v15100_v34  ;;  %v15102_v30 = vpop.f32.mrb[7].mxu0 }
 0x856   : > { %v17278_v32 = vadd.f32 %v17277_v52, %v24521_v23  ;;  %v17281_v54 = vadd.f32 %v24515_v55, %v15102_v30 }
 0x857   : > { %v15355_v21 = vmax.f32 %v17276_v24, 0.0  ;;  %v17280_v20 = vadd.f32 %v17279_v42, %v24518_v15 }
 0x858   : > { %v15356_v58 = vmax.f32 %v17278_v32, 0.0  ;;  %v17282_v47 = vadd.f32 %v17281_v54, %v24521_v23 }
 0x859   : > { %15387 = vst [vmem:[%s24531_s28 + $0x20] sm:$0xff] %v15355_v21  ;;  %v15357_v59 = vmax.f32 %v17280_v20, 0.0 }
 0x85a   : > { %15388 = vst [vmem:[%s24531_s28 + $0x28] sm:$0xff] %v15356_v58  ;;  %v15358_v22 = vmax.f32 %v17282_v47, 0.0  ;;  %v15106_v29 = vpop.f32.mrb[8].mxu0 }
 0x85b   : > { %15389 = vst [vmem:[%s24531_s28 + $0x30] sm:$0xff] %v15357_v59  ;;  %v17283_v63 = vadd.f32 %v24512_v60, %v15106_v29  ;;  %v15108_v36 = vpop.f32.mrb[9].mxu0 }
 0x85c   : > { %15390 = vst [vmem:[%s24531_s28 + $0x38] sm:$0xff] %v15358_v22  ;;  %v17285_v28 = vadd.f32 %v24515_v55, %v15108_v36  ;;  %v15110_v43 = vpop.f32.mrb[10].mxu0 }
 0x85d   : > { %v17284_v25 = vadd.f32 %v17283_v63, %v24518_v15  ;;  %v17287_v45 = vadd.f32 %v24512_v60, %v15110_v43  ;;  %v15112_v13 = vpop.f32.mrb[11].mxu0 }
 0x85e   : > { %v17286_v38 = vadd.f32 %v17285_v28, %v24521_v23  ;;  %v17289_v35 = vadd.f32 %v24515_v55, %v15112_v13 }
 0x85f   : > { %v15359_v44 = vmax.f32 %v17284_v25, 0.0  ;;  %v17288_v1 = vadd.f32 %v17287_v45, %v24518_v15 }
 0x860   : > { %v15360_v51 = vmax.f32 %v17286_v38, 0.0  ;;  %v17290_v6 = vadd.f32 %v17289_v35, %v24521_v23 }
 0x861   : > { %15391 = vst [vmem:[%s24531_s28 + $0x40] sm:$0xff] %v15359_v44  ;;  %v15361_v16 = vmax.f32 %v17288_v1, 0.0 }
 0x862   : > { %15392 = vst [vmem:[%s24531_s28 + $0x48] sm:$0xff] %v15360_v51  ;;  %v15362_v50 = vmax.f32 %v17290_v6, 0.0  ;;  %v15116_v14 = vpop.f32.mrb[12].mxu0 }
 0x863   : > { %15393 = vst [vmem:[%s24531_s28 + $0x50] sm:$0xff] %v15361_v16  ;;  %v17291_v19 = vadd.f32 %v24512_v60, %v15116_v14  ;;  %v15118_v9 = vpop.f32.mrb[13].mxu0 }
 0x864   : > { %15394 = vst [vmem:[%s24531_s28 + $0x58] sm:$0xff] %v15362_v50  ;;  %v17293_v33 = vadd.f32 %v24515_v55, %v15118_v9  ;;  %v15120_v27 = vpop.f32.mrb[14].mxu0 }
 0x865   : > { %v17292_v12 = vadd.f32 %v17291_v19, %v24518_v15  ;;  %v17295_v4 = vadd.f32 %v24512_v60, %v15120_v27  ;;  %v15122_v57 = vpop.f32.mrb[15].mxu0 }
 0x866   : > { %v17294_v11 = vadd.f32 %v17293_v33, %v24521_v23  ;;  %v17297_v2 = vadd.f32 %v24515_v55, %v15122_v57 }
 0x867   : > { %v15363_v17 = vmax.f32 %v17292_v12, 0.0  ;;  %v17296_v40 = vadd.f32 %v17295_v4, %v24518_v15 }
 0x868   : > { %v15364_v7 = vmax.f32 %v17294_v11, 0.0  ;;  %v17298_v48 = vadd.f32 %v17297_v2, %v24521_v23 }
 0x869   : > { %15395 = vst [vmem:[%s24531_s28 + $0x60] sm:$0xff] %v15363_v17  ;;  %v15365_v37 = vmax.f32 %v17296_v40, 0.0 }
 0x86a   : > { %15396 = vst [vmem:[%s24531_s28 + $0x68] sm:$0xff] %v15364_v7  ;;  %v15366_v10 = vmax.f32 %v17298_v48, 0.0  ;;  %v15126_v8 = vpop.f32.mrb[16].mxu0 }
 0x86b   : > { %15397 = vst [vmem:[%s24531_s28 + $0x70] sm:$0xff] %v15365_v37  ;;  %v17299_v46 = vadd.f32 %v24512_v60, %v15126_v8  ;;  %v15128_v49 = vpop.f32.mrb[17].mxu0 }
 0x86c   : > { %15398 = vst [vmem:[%s24531_s28 + $0x78] sm:$0xff] %v15366_v10  ;;  %v17301_v0 = vadd.f32 %v24515_v55, %v15128_v49  ;;  %v15130_v26 = vpop.f32.mrb[18].mxu0 }
 0x86d   : > { %v17300_v56 = vadd.f32 %v17299_v46, %v24518_v15  ;;  %v17303_v53 = vadd.f32 %v24512_v60, %v15130_v26  ;;  %v15132_v18 = vpop.f32.mrb[19].mxu0 }
 0x86e   : > { %v17302_v62 = vadd.f32 %v17301_v0, %v24521_v23  ;;  %v17305_v3 = vadd.f32 %v24515_v55, %v15132_v18 }
 0x86f   : > { %v15367_v41 = vmax.f32 %v17300_v56, 0.0  ;;  %v17304_v61 = vadd.f32 %v17303_v53, %v24518_v15 }
 0x870   : > { %v15368_v31 = vmax.f32 %v17302_v62, 0.0  ;;  %v17306_v5 = vadd.f32 %v17305_v3, %v24521_v23 }
 0x871   : > { %15399 = vst [vmem:[%s24531_s28 + $0x80] sm:$0xff] %v15367_v41  ;;  %v15369_v39 = vmax.f32 %v17304_v61, 0.0 }
 0x872   : > { %15400 = vst [vmem:[%s24531_s28 + $0x88] sm:$0xff] %v15368_v31  ;;  %v15370_v52 = vmax.f32 %v17306_v5, 0.0  ;;  %v15136_v34 = vpop.f32.mrb[20].mxu0 }
 0x873   : > { %15401 = vst [vmem:[%s24531_s28 + $0x90] sm:$0xff] %v15369_v39  ;;  %v17307_v24 = vadd.f32 %v24512_v60, %v15136_v34  ;;  %v15138_v42 = vpop.f32.mrb[21].mxu0 }
 0x874   : > { %15402 = vst [vmem:[%s24531_s28 + $0x98] sm:$0xff] %v15370_v52  ;;  %v17309_v30 = vadd.f32 %v24515_v55, %v15138_v42  ;;  %v15140_v32 = vpop.f32.mrb[22].mxu0 }
 0x875   : > { %v17308_v54 = vadd.f32 %v17307_v24, %v24518_v15  ;;  %v17311_v21 = vadd.f32 %v24512_v60, %v15140_v32  ;;  %v15142_v20 = vpop.f32.mrb[23].mxu0 }
 0x876   : > { %v17310_v58 = vadd.f32 %v17309_v30, %v24521_v23  ;;  %v17313_v47 = vadd.f32 %v24515_v55, %v15142_v20 }
 0x877   : > { %v15371_v59 = vmax.f32 %v17308_v54, 0.0  ;;  %v17312_v22 = vadd.f32 %v17311_v21, %v24518_v15 }
 0x878   : > { %v15372_v29 = vmax.f32 %v17310_v58, 0.0  ;;  %v17314_v63 = vadd.f32 %v17313_v47, %v24521_v23 }
 0x879   : > { %15403 = vst [vmem:[%s24531_s28 + $0xa0] sm:$0xff] %v15371_v59  ;;  %v15373_v36 = vmax.f32 %v17312_v22, 0.0 }
 0x87a   : > { %15404 = vst [vmem:[%s24531_s28 + $0xa8] sm:$0xff] %v15372_v29  ;;  %v15374_v28 = vmax.f32 %v17314_v63, 0.0  ;;  %v15146_v43 = vpop.f32.mrb[24].mxu0 }
 0x87b   : > { %15405 = vst [vmem:[%s24531_s28 + $0xb0] sm:$0xff] %v15373_v36  ;;  %v17315_v25 = vadd.f32 %v24512_v60, %v15146_v43  ;;  %v15148_v45 = vpop.f32.mrb[25].mxu0 }
 0x87c   : > { %15406 = vst [vmem:[%s24531_s28 + $0xb8] sm:$0xff] %v15374_v28  ;;  %v17317_v13 = vadd.f32 %v24515_v55, %v15148_v45  ;;  %v15150_v38 = vpop.f32.mrb[26].mxu0 }
 0x87d   : > { %v17316_v35 = vadd.f32 %v17315_v25, %v24518_v15  ;;  %v17319_v44 = vadd.f32 %v24512_v60, %v15150_v38  ;;  %v15152_v1 = vpop.f32.mrb[27].mxu0 }
 0x87e   : > { %v17318_v51 = vadd.f32 %v17317_v13, %v24521_v23  ;;  %v17321_v6 = vadd.f32 %v24515_v55, %v15152_v1 }
 0x87f   : > { %v15375_v16 = vmax.f32 %v17316_v35, 0.0  ;;  %v17320_v50 = vadd.f32 %v17319_v44, %v24518_v15 }
 0x880   : > { %v15376_v14 = vmax.f32 %v17318_v51, 0.0  ;;  %v17322_v19 = vadd.f32 %v17321_v6, %v24521_v23 }
 0x881   : > { %15407 = vst [vmem:[%s24531_s28 + $0xc0] sm:$0xff] %v15375_v16  ;;  %v15377_v9 = vmax.f32 %v17320_v50, 0.0 }
 0x882   : > { %15408 = vst [vmem:[%s24531_s28 + $0xc8] sm:$0xff] %v15376_v14  ;;  %v15378_v33 = vmax.f32 %v17322_v19, 0.0  ;;  %v15156_v27 = vpop.f32.mrb[28].mxu0 }
 0x883   : > { %15409 = vst [vmem:[%s24531_s28 + $0xd0] sm:$0xff] %v15377_v9  ;;  %v17323_v12 = vadd.f32 %v24512_v60, %v15156_v27  ;;  %v15158_v4 = vpop.f32.mrb[29].mxu0 }
 0x884   : > { %15410 = vst [vmem:[%s24531_s28 + $0xd8] sm:$0xff] %v15378_v33  ;;  %v17325_v57 = vadd.f32 %v24515_v55, %v15158_v4  ;;  %v15160_v11 = vpop.f32.mrb[30].mxu0 }
 0x885   : > { %v17324_v2 = vadd.f32 %v17323_v12, %v24518_v15  ;;  %v17327_v17 = vadd.f32 %v24512_v60, %v15160_v11  ;;  %v15162_v40 = vpop.f32.mrb[31].mxu0 }
 0x886   : > { %v17326_v7 = vadd.f32 %v17325_v57, %v24521_v23  ;;  %v17329_v48 = vadd.f32 %v24515_v55, %v15162_v40 }
 0x887   : > { %v15379_v37 = vmax.f32 %v17324_v2, 0.0  ;;  %v17328_v10 = vadd.f32 %v17327_v17, %v24518_v15 }
 0x888   : > { %v15380_v8 = vmax.f32 %v17326_v7, 0.0  ;;  %v17330_v46 = vadd.f32 %v17329_v48, %v24521_v23 }
 0x889   : > { %15411 = vst [vmem:[%s24531_s28 + $0xe0] sm:$0xff] %v15379_v37  ;;  %v15381_v49 = vmax.f32 %v17328_v10, 0.0 }
 0x88a   : > { %15412 = vst [vmem:[%s24531_s28 + $0xe8] sm:$0xff] %v15380_v8  ;;  %v15382_v0 = vmax.f32 %v17330_v46, 0.0 }
 0x88b   : > { %15413 = vst [vmem:[%s24531_s28 + $0xf0] sm:$0xff] %v15381_v49 }
 0x88c   : > { %15414 = vst [vmem:[%s24531_s28 + $0xf8] sm:$0xff] %v15382_v0 }
 0x88d PF: > { %s14_s15 = sadd.s32 1, %s19586_s15  }
 0x88e   : > { %p11_p4 = scmp.ge.s32.totalorder %s14_s15, 4  }
 0x890   :  { %13 = sbr.rel (!%p11_p4) target bundleno = 1 (0x1), region = 99 }

</bundles_post_ra>
